<compile_context>
chip_gen: v6e
topology: v6e:2x2x1
jax: 0.10.0
libtpu: 0.0.40
codegen_flags: <defaults>
</compile_context>

<pallas_src>
import jax
import jax.numpy as jnp
from jax.experimental import pallas as pl
from jax.experimental.pallas import tpu as pltpu

C_OUT, KH, KW = 6, 3, 3
H_IN = W_IN = 32
H_CONV = W_CONV = H_IN - KH + 1        # 30
H_POOL = W_POOL = H_CONV // 2          # 15
FC_IN = C_OUT * H_POOL * W_POOL        # 1350
FC_OUT = 10

# Flat lane-frame widths (image flattened row-major onto 1024 lanes, 32/row).
IMG = H_IN * W_IN                      # 1024
CH_W = 1024                            # per-channel slot width in the FC slab
SLAB_W = C_OUT * CH_W                  # 6144 = fused FC contraction width
CV_W = 1280                            # conv frame width   (10 vregs)
M1_W = 1152                            # col-pooled width   (9 vregs)
M2_W = 1024                            # row-pooled width   (8 vregs)
MAX_SHIFT = W_IN * (KH - 1) + (KW - 1) # 66
X_W = 1408                             # input block width: >= CV_W + MAX_SHIFT, mult of 128


def net_kernel(x_ref, cw_ref, cb_ref, fcw_ref, fcb_ref, out_ref, slab_ref):
    x = x_ref[...]                                       # (Bt, X_W) f32; lanes >= 1024 are zero

    # Hoisted (ki, kj) shifted frames: one 1280-wide (whole-vreg) lane-shifted
    # view per conv tap, computed once per grid step and shared by all channels.
    frames = [x[:, W_IN * ki + kj: W_IN * ki + kj + CV_W]
              for ki in range(KH) for kj in range(KW)]   # 9 x (Bt, CV_W)

    for oc in range(C_OUT):
        # ---- conv1 (1 in-channel, 3x3, VALID) = 9 scalar*vector FMAs ---------
        # conv[:, 32*i + j] is the valid conv value for (i, j); lanes with
        # j in {30, 31} or i >= 30 hold finite garbage that never reaches the
        # FC because the scattered FC weight is exactly zero there.
        acc = cw_ref[oc * 9] * frames[0]
        for t in range(1, KH * KW):
            acc = acc + cw_ref[oc * 9 + t] * frames[t]
        conv = jnp.maximum(acc + cb_ref[oc], 0.0)        # bias + relu, (Bt, CV_W)

        # ---- 2x2 / stride-2 max pool in the flat lane frame ------------------
        # All widths are multiples of 128; the pooled value for (p, q) lands at
        # lane 64*p + 2*q.  (The reference model's second relu is a no-op.)
        m1 = jnp.maximum(conv[:, :M1_W], conv[:, 1:1 + M1_W])      # (Bt, M1_W)
        m2 = jnp.maximum(m1[:, :M2_W], m1[:, W_IN:W_IN + M2_W])    # (Bt, M2_W)

        # Stash this channel's pooled frame (bf16) into the fused-FC slab at a
        # 128-aligned lane offset; the store also ends this channel's live range.
        slab_ref[:, oc * CH_W:(oc + 1) * CH_W] = m2.astype(jnp.bfloat16)

    # ---- fc1: one bf16 MXU matmul per grid step, f32 accumulation ------------
    logits = jax.lax.dot_general(
        slab_ref[...], fcw_ref[...],
        dimension_numbers=(((1,), (1,)), ((), ())),
        preferred_element_type=jnp.float32)              # (Bt, FC_OUT)
    out_ref[...] = logits + fcb_ref[...]


def _fc_weight_slab(fc_w):
    """(10, 1350) torch-ordered fc weight -> (10, 6144) bf16 lane-scattered slab.

    The weight for pooled position (oc, p, q) (torch flat index oc*225+15p+q)
    goes to lane oc*1024 + 64*p + 2*q, matching where the in-kernel flat-frame
    pooling leaves that value in the slab.  All other lanes are exactly zero.
    """
    p = jnp.arange(H_POOL)
    q = jnp.arange(W_POOL)
    lane_pq = (2 * W_IN * p[:, None] + 2 * q[None, :]).reshape(-1)             # (225,)
    lane = (jnp.arange(C_OUT)[:, None] * CH_W + lane_pq[None, :]).reshape(-1)  # (1350,)
    slab = jnp.zeros((FC_OUT, SLAB_W), jnp.float32).at[:, lane].set(
        fc_w.astype(jnp.float32))
    return slab.astype(jnp.bfloat16)


def _choose_block(n):
    # Large batch tiles amortize the per-step overhead and fill the MXU M dim;
    # keep >= 2 grid steps when possible so both v7x TensorCores get work.
    if n >= 256:
        return 128
    bt = ((max(n // 2, 1) + 7) // 8) * 8
    return max(8, min(bt, 128))


def net_forward(x, conv_w, conv_b, fc_w, fc_b):
    """x: (N, 1, 32, 32) NCHW float32 -> (N, 10)."""
    n = x.shape[0]
    bt = _choose_block(n)
    n_pad = ((n + bt - 1) // bt) * bt

    # Flatten each 32x32 plane onto 1024 lanes; zero-pad lanes to X_W so every
    # hoisted shifted frame stays in bounds and finite; pad batch to n_pad.
    x_flat = x[:, 0, :, :].astype(jnp.float32).reshape(n, IMG)
    x_pad = jnp.zeros((n_pad, X_W), jnp.float32).at[:n, :IMG].set(x_flat)

    cw = conv_w.reshape(-1).astype(jnp.float32)          # (54,)  oc*9 + ki*3 + kj
    cb = conv_b.astype(jnp.float32)                      # (6,)
    fcw = _fc_weight_slab(fc_w)                          # (10, 6144) bf16
    fcb = fc_b.reshape(1, FC_OUT).astype(jnp.float32)    # (1, 10)

    grid = (n_pad // bt,)
    out = pl.pallas_call(
        net_kernel,
        out_shape=jax.ShapeDtypeStruct((n_pad, FC_OUT), jnp.float32),
        grid_spec=pltpu.PrefetchScalarGridSpec(
            num_scalar_prefetch=0,
            grid=grid,
            in_specs=[
                pl.BlockSpec((bt, X_W), lambda i: (i, 0)),                # x
                pl.BlockSpec(memory_space=pltpu.MemorySpace.SMEM),        # conv w
                pl.BlockSpec(memory_space=pltpu.MemorySpace.SMEM),        # conv b
                pl.BlockSpec((FC_OUT, SLAB_W), lambda i: (0, 0)),         # fc w slab
                pl.BlockSpec((1, FC_OUT), lambda i: (0, 0)),              # fc b
            ],
            out_specs=pl.BlockSpec((bt, FC_OUT), lambda i: (i, 0)),
            scratch_shapes=[pltpu.VMEM((bt, SLAB_W), jnp.bfloat16)],
        ),
        compiler_params=pltpu.CompilerParams(
            dimension_semantics=("parallel",),
            vmem_limit_bytes=32 * 1024 * 1024),
    )(x_pad, cw, cb, fcw, fcb)
    return out[:n]


def net_forward_reference(x, conv_w, conv_b, fc_w, fc_b):
    """Pure-JAX f32 reference matching the PyTorch forward."""
    y = jax.lax.conv_general_dilated(
        x, conv_w, window_strides=(1, 1), padding="VALID",
        dimension_numbers=("NCHW", "OIHW", "NCHW"),
        precision=jax.lax.Precision.HIGHEST)
    y = y + conv_b.reshape(1, C_OUT, 1, 1)
    y = jnp.maximum(y, 0.0)
    y = jax.lax.reduce_window(y, -jnp.inf, jax.lax.max,
                              (1, 1, 2, 2), (1, 1, 2, 2), "VALID")
    y = jnp.maximum(y, 0.0)
    y = y.reshape(y.shape[0], -1)
    return jnp.dot(y, fc_w.T, precision=jax.lax.Precision.HIGHEST) + fc_b


if __name__ == "__main__":
    key = jax.random.PRNGKey(0)
    k_x, k_cw, k_cb, k_fw, k_fb = jax.random.split(key, 5)

    N = 10   # exercises a multi-step grid (Bt=8 -> 2 steps) and batch padding
    x = jax.random.normal(k_x, (N, 1, H_IN, W_IN), dtype=jnp.float32)

    # deterministic parameter init (PyTorch-like uniform(-1/sqrt(fan_in), ...))
    kc = 1.0 / jnp.sqrt(1.0 * KH * KW)
    conv_w = jax.random.uniform(k_cw, (C_OUT, 1, KH, KW), jnp.float32, -kc, kc)
    conv_b = jax.random.uniform(k_cb, (C_OUT,), jnp.float32, -kc, kc)
    kf = 1.0 / jnp.sqrt(1.0 * FC_IN)
    fc_w = jax.random.uniform(k_fw, (FC_OUT, FC_IN), jnp.float32, -kf, kf)
    fc_b = jax.random.uniform(k_fb, (FC_OUT,), jnp.float32, -kf, kf)

    out = jax.block_until_ready(net_forward(x, conv_w, conv_b, fc_w, fc_b))
    ref = net_forward_reference(x, conv_w, conv_b, fc_w, fc_b)

    assert out.shape == (N, FC_OUT)
    # Tolerance accounts for the bf16 FC matmul (f32 accumulation); conv/pool
    # are computed in f32 and the zero weight lanes are exact in bf16.
    assert jnp.allclose(out, ref, atol=1e-2, rtol=1e-2), (out, ref)
    print("KERNEL_OK")
</pallas_src>

<mosaic_0001>
module attributes {stable_mosaic.version = 11 : i64} {
  func.func @net_kernel(%arg0: i32, %arg1: memref<8x1408xf32, #tpu.memory_space<vmem>>, %arg2: memref<54xf32, #tpu.memory_space<smem>>, %arg3: memref<6xf32, #tpu.memory_space<smem>>, %arg4: memref<10x6144xbf16, #tpu.memory_space<vmem>>, %arg5: memref<1x10xf32, #tpu.memory_space<vmem>>, %arg6: memref<8x10xf32, #tpu.memory_space<vmem>>, %arg7: memref<8x6144xbf16, #tpu.memory_space<vmem>>) attributes {dimension_semantics = [#tpu.dimension_semantics<parallel>], iteration_bounds = array<i64: 2>, scalar_prefetch = 0 : i64, scratch_operands = 1 : i64, tpu.core_type = #tpu.core_type<tc>, window_params = [{transform_indices = @transform_0, window_bounds = array<i64: 8, 1408>}, {transform_indices = @transform_1, window_bounds = array<i64: 54>}, {transform_indices = @transform_2, window_bounds = array<i64: 6>}, {pipeline_mode = #tpu.pipeline_mode<synchronous>, transform_indices = @transform_3, window_bounds = array<i64: 10, 6144>}, {pipeline_mode = #tpu.pipeline_mode<synchronous>, transform_indices = @transform_4, window_bounds = array<i64: 1, 10>}, {transform_indices = @transform_5, window_bounds = array<i64: 8, 10>}]} {
    %c0 = arith.constant 0 : index
    %c0_0 = arith.constant 0 : index
    %0 = vector.load %arg1[%c0, %c0_0] : memref<8x1408xf32, #tpu.memory_space<vmem>>, vector<8x1408xf32>
    %1 = vector.extract_strided_slice %0 {offsets = [0, 0], sizes = [8, 1280], strides = [1, 1]} : vector<8x1408xf32> to vector<8x1280xf32>
    %2 = vector.extract_strided_slice %0 {offsets = [0, 1], sizes = [8, 1280], strides = [1, 1]} : vector<8x1408xf32> to vector<8x1280xf32>
    %3 = vector.extract_strided_slice %0 {offsets = [0, 2], sizes = [8, 1280], strides = [1, 1]} : vector<8x1408xf32> to vector<8x1280xf32>
    %4 = vector.extract_strided_slice %0 {offsets = [0, 32], sizes = [8, 1280], strides = [1, 1]} : vector<8x1408xf32> to vector<8x1280xf32>
    %5 = vector.extract_strided_slice %0 {offsets = [0, 33], sizes = [8, 1280], strides = [1, 1]} : vector<8x1408xf32> to vector<8x1280xf32>
    %6 = vector.extract_strided_slice %0 {offsets = [0, 34], sizes = [8, 1280], strides = [1, 1]} : vector<8x1408xf32> to vector<8x1280xf32>
    %7 = vector.extract_strided_slice %0 {offsets = [0, 64], sizes = [8, 1280], strides = [1, 1]} : vector<8x1408xf32> to vector<8x1280xf32>
    %8 = vector.extract_strided_slice %0 {offsets = [0, 65], sizes = [8, 1280], strides = [1, 1]} : vector<8x1408xf32> to vector<8x1280xf32>
    %9 = vector.extract_strided_slice %0 {offsets = [0, 66], sizes = [8, 1280], strides = [1, 1]} : vector<8x1408xf32> to vector<8x1280xf32>
    %c0_1 = arith.constant 0 : index
    %10 = memref.load %arg2[%c0_1] : memref<54xf32, #tpu.memory_space<smem>>
    %11 = vector.broadcast %10 : f32 to vector<8x1280xf32>
    %12 = arith.mulf %11, %1 : vector<8x1280xf32>
    %c1 = arith.constant 1 : index
    %13 = memref.load %arg2[%c1] : memref<54xf32, #tpu.memory_space<smem>>
    %14 = vector.broadcast %13 : f32 to vector<8x1280xf32>
    %15 = arith.mulf %14, %2 : vector<8x1280xf32>
    %16 = arith.addf %12, %15 : vector<8x1280xf32>
    %c2 = arith.constant 2 : index
    %17 = memref.load %arg2[%c2] : memref<54xf32, #tpu.memory_space<smem>>
    %18 = vector.broadcast %17 : f32 to vector<8x1280xf32>
    %19 = arith.mulf %18, %3 : vector<8x1280xf32>
    %20 = arith.addf %16, %19 : vector<8x1280xf32>
    %c3 = arith.constant 3 : index
    %21 = memref.load %arg2[%c3] : memref<54xf32, #tpu.memory_space<smem>>
    %22 = vector.broadcast %21 : f32 to vector<8x1280xf32>
    %23 = arith.mulf %22, %4 : vector<8x1280xf32>
    %24 = arith.addf %20, %23 : vector<8x1280xf32>
    %c4 = arith.constant 4 : index
    %25 = memref.load %arg2[%c4] : memref<54xf32, #tpu.memory_space<smem>>
    %26 = vector.broadcast %25 : f32 to vector<8x1280xf32>
    %27 = arith.mulf %26, %5 : vector<8x1280xf32>
    %28 = arith.addf %24, %27 : vector<8x1280xf32>
    %c5 = arith.constant 5 : index
    %29 = memref.load %arg2[%c5] : memref<54xf32, #tpu.memory_space<smem>>
    %30 = vector.broadcast %29 : f32 to vector<8x1280xf32>
    %31 = arith.mulf %30, %6 : vector<8x1280xf32>
    %32 = arith.addf %28, %31 : vector<8x1280xf32>
    %c6 = arith.constant 6 : index
    %33 = memref.load %arg2[%c6] : memref<54xf32, #tpu.memory_space<smem>>
    %34 = vector.broadcast %33 : f32 to vector<8x1280xf32>
    %35 = arith.mulf %34, %7 : vector<8x1280xf32>
    %36 = arith.addf %32, %35 : vector<8x1280xf32>
    %c7 = arith.constant 7 : index
    %37 = memref.load %arg2[%c7] : memref<54xf32, #tpu.memory_space<smem>>
    %38 = vector.broadcast %37 : f32 to vector<8x1280xf32>
    %39 = arith.mulf %38, %8 : vector<8x1280xf32>
    %40 = arith.addf %36, %39 : vector<8x1280xf32>
    %c8 = arith.constant 8 : index
    %41 = memref.load %arg2[%c8] : memref<54xf32, #tpu.memory_space<smem>>
    %42 = vector.broadcast %41 : f32 to vector<8x1280xf32>
    %43 = arith.mulf %42, %9 : vector<8x1280xf32>
    %44 = arith.addf %40, %43 : vector<8x1280xf32>
    %c0_2 = arith.constant 0 : index
    %45 = memref.load %arg3[%c0_2] : memref<6xf32, #tpu.memory_space<smem>>
    %46 = vector.broadcast %45 : f32 to vector<8x1280xf32>
    %47 = arith.addf %44, %46 : vector<8x1280xf32>
    %cst = arith.constant 0.000000e+00 : f32
    %48 = vector.broadcast %cst : f32 to vector<8x1280xf32>
    %49 = arith.maximumf %47, %48 : vector<8x1280xf32>
    %50 = vector.extract_strided_slice %49 {offsets = [0, 0], sizes = [8, 1152], strides = [1, 1]} : vector<8x1280xf32> to vector<8x1152xf32>
    %51 = vector.extract_strided_slice %49 {offsets = [0, 1], sizes = [8, 1152], strides = [1, 1]} : vector<8x1280xf32> to vector<8x1152xf32>
    %52 = arith.maximumf %50, %51 : vector<8x1152xf32>
    %53 = vector.extract_strided_slice %52 {offsets = [0, 0], sizes = [8, 1024], strides = [1, 1]} : vector<8x1152xf32> to vector<8x1024xf32>
    %54 = vector.extract_strided_slice %52 {offsets = [0, 32], sizes = [8, 1024], strides = [1, 1]} : vector<8x1152xf32> to vector<8x1024xf32>
    %55 = arith.maximumf %53, %54 : vector<8x1024xf32>
    %56 = arith.truncf %55 : vector<8x1024xf32> to vector<8x1024xbf16>
    %c0_3 = arith.constant 0 : index
    %c0_4 = arith.constant 0 : index
    %57 = vector.load %arg7[%c0_3, %c0_4] : memref<8x6144xbf16, #tpu.memory_space<vmem>>, vector<8x1024xbf16>
    tpu.vector_store %arg7[%c0_3, %c0_4], %56 {strides = array<i32>} : memref<8x6144xbf16, #tpu.memory_space<vmem>>, vector<8x1024xbf16>,
    %c9 = arith.constant 9 : index
    %58 = memref.load %arg2[%c9] : memref<54xf32, #tpu.memory_space<smem>>
    %59 = vector.broadcast %58 : f32 to vector<8x1280xf32>
    %60 = arith.mulf %59, %1 : vector<8x1280xf32>
    %c10 = arith.constant 10 : index
    %61 = memref.load %arg2[%c10] : memref<54xf32, #tpu.memory_space<smem>>
    %62 = vector.broadcast %61 : f32 to vector<8x1280xf32>
    %63 = arith.mulf %62, %2 : vector<8x1280xf32>
    %64 = arith.addf %60, %63 : vector<8x1280xf32>
    %c11 = arith.constant 11 : index
    %65 = memref.load %arg2[%c11] : memref<54xf32, #tpu.memory_space<smem>>
    %66 = vector.broadcast %65 : f32 to vector<8x1280xf32>
    %67 = arith.mulf %66, %3 : vector<8x1280xf32>
    %68 = arith.addf %64, %67 : vector<8x1280xf32>
    %c12 = arith.constant 12 : index
    %69 = memref.load %arg2[%c12] : memref<54xf32, #tpu.memory_space<smem>>
    %70 = vector.broadcast %69 : f32 to vector<8x1280xf32>
    %71 = arith.mulf %70, %4 : vector<8x1280xf32>
    %72 = arith.addf %68, %71 : vector<8x1280xf32>
    %c13 = arith.constant 13 : index
    %73 = memref.load %arg2[%c13] : memref<54xf32, #tpu.memory_space<smem>>
    %74 = vector.broadcast %73 : f32 to vector<8x1280xf32>
    %75 = arith.mulf %74, %5 : vector<8x1280xf32>
    %76 = arith.addf %72, %75 : vector<8x1280xf32>
    %c14 = arith.constant 14 : index
    %77 = memref.load %arg2[%c14] : memref<54xf32, #tpu.memory_space<smem>>
    %78 = vector.broadcast %77 : f32 to vector<8x1280xf32>
    %79 = arith.mulf %78, %6 : vector<8x1280xf32>
    %80 = arith.addf %76, %79 : vector<8x1280xf32>
    %c15 = arith.constant 15 : index
    %81 = memref.load %arg2[%c15] : memref<54xf32, #tpu.memory_space<smem>>
    %82 = vector.broadcast %81 : f32 to vector<8x1280xf32>
    %83 = arith.mulf %82, %7 : vector<8x1280xf32>
    %84 = arith.addf %80, %83 : vector<8x1280xf32>
    %c16 = arith.constant 16 : index
    %85 = memref.load %arg2[%c16] : memref<54xf32, #tpu.memory_space<smem>>
    %86 = vector.broadcast %85 : f32 to vector<8x1280xf32>
    %87 = arith.mulf %86, %8 : vector<8x1280xf32>
    %88 = arith.addf %84, %87 : vector<8x1280xf32>
    %c17 = arith.constant 17 : index
    %89 = memref.load %arg2[%c17] : memref<54xf32, #tpu.memory_space<smem>>
    %90 = vector.broadcast %89 : f32 to vector<8x1280xf32>
    %91 = arith.mulf %90, %9 : vector<8x1280xf32>
    %92 = arith.addf %88, %91 : vector<8x1280xf32>
    %c1_5 = arith.constant 1 : index
    %93 = memref.load %arg3[%c1_5] : memref<6xf32, #tpu.memory_space<smem>>
    %94 = vector.broadcast %93 : f32 to vector<8x1280xf32>
    %95 = arith.addf %92, %94 : vector<8x1280xf32>
    %cst_6 = arith.constant 0.000000e+00 : f32
    %96 = vector.broadcast %cst_6 : f32 to vector<8x1280xf32>
    %97 = arith.maximumf %95, %96 : vector<8x1280xf32>
    %98 = vector.extract_strided_slice %97 {offsets = [0, 0], sizes = [8, 1152], strides = [1, 1]} : vector<8x1280xf32> to vector<8x1152xf32>
    %99 = vector.extract_strided_slice %97 {offsets = [0, 1], sizes = [8, 1152], strides = [1, 1]} : vector<8x1280xf32> to vector<8x1152xf32>
    %100 = arith.maximumf %98, %99 : vector<8x1152xf32>
    %101 = vector.extract_strided_slice %100 {offsets = [0, 0], sizes = [8, 1024], strides = [1, 1]} : vector<8x1152xf32> to vector<8x1024xf32>
    %102 = vector.extract_strided_slice %100 {offsets = [0, 32], sizes = [8, 1024], strides = [1, 1]} : vector<8x1152xf32> to vector<8x1024xf32>
    %103 = arith.maximumf %101, %102 : vector<8x1024xf32>
    %104 = arith.truncf %103 : vector<8x1024xf32> to vector<8x1024xbf16>
    %c0_7 = arith.constant 0 : index
    %c1024 = arith.constant 1024 : index
    %105 = vector.load %arg7[%c0_7, %c1024] : memref<8x6144xbf16, #tpu.memory_space<vmem>>, vector<8x1024xbf16>
    tpu.vector_store %arg7[%c0_7, %c1024], %104 {strides = array<i32>} : memref<8x6144xbf16, #tpu.memory_space<vmem>>, vector<8x1024xbf16>,
    %c18 = arith.constant 18 : index
    %106 = memref.load %arg2[%c18] : memref<54xf32, #tpu.memory_space<smem>>
    %107 = vector.broadcast %106 : f32 to vector<8x1280xf32>
    %108 = arith.mulf %107, %1 : vector<8x1280xf32>
    %c19 = arith.constant 19 : index
    %109 = memref.load %arg2[%c19] : memref<54xf32, #tpu.memory_space<smem>>
    %110 = vector.broadcast %109 : f32 to vector<8x1280xf32>
    %111 = arith.mulf %110, %2 : vector<8x1280xf32>
    %112 = arith.addf %108, %111 : vector<8x1280xf32>
    %c20 = arith.constant 20 : index
    %113 = memref.load %arg2[%c20] : memref<54xf32, #tpu.memory_space<smem>>
    %114 = vector.broadcast %113 : f32 to vector<8x1280xf32>
    %115 = arith.mulf %114, %3 : vector<8x1280xf32>
    %116 = arith.addf %112, %115 : vector<8x1280xf32>
    %c21 = arith.constant 21 : index
    %117 = memref.load %arg2[%c21] : memref<54xf32, #tpu.memory_space<smem>>
    %118 = vector.broadcast %117 : f32 to vector<8x1280xf32>
    %119 = arith.mulf %118, %4 : vector<8x1280xf32>
    %120 = arith.addf %116, %119 : vector<8x1280xf32>
    %c22 = arith.constant 22 : index
    %121 = memref.load %arg2[%c22] : memref<54xf32, #tpu.memory_space<smem>>
    %122 = vector.broadcast %121 : f32 to vector<8x1280xf32>
    %123 = arith.mulf %122, %5 : vector<8x1280xf32>
    %124 = arith.addf %120, %123 : vector<8x1280xf32>
    %c23 = arith.constant 23 : index
    %125 = memref.load %arg2[%c23] : memref<54xf32, #tpu.memory_space<smem>>
    %126 = vector.broadcast %125 : f32 to vector<8x1280xf32>
    %127 = arith.mulf %126, %6 : vector<8x1280xf32>
    %128 = arith.addf %124, %127 : vector<8x1280xf32>
    %c24 = arith.constant 24 : index
    %129 = memref.load %arg2[%c24] : memref<54xf32, #tpu.memory_space<smem>>
    %130 = vector.broadcast %129 : f32 to vector<8x1280xf32>
    %131 = arith.mulf %130, %7 : vector<8x1280xf32>
    %132 = arith.addf %128, %131 : vector<8x1280xf32>
    %c25 = arith.constant 25 : index
    %133 = memref.load %arg2[%c25] : memref<54xf32, #tpu.memory_space<smem>>
    %134 = vector.broadcast %133 : f32 to vector<8x1280xf32>
    %135 = arith.mulf %134, %8 : vector<8x1280xf32>
    %136 = arith.addf %132, %135 : vector<8x1280xf32>
    %c26 = arith.constant 26 : index
    %137 = memref.load %arg2[%c26] : memref<54xf32, #tpu.memory_space<smem>>
    %138 = vector.broadcast %137 : f32 to vector<8x1280xf32>
    %139 = arith.mulf %138, %9 : vector<8x1280xf32>
    %140 = arith.addf %136, %139 : vector<8x1280xf32>
    %c2_8 = arith.constant 2 : index
    %141 = memref.load %arg3[%c2_8] : memref<6xf32, #tpu.memory_space<smem>>
    %142 = vector.broadcast %141 : f32 to vector<8x1280xf32>
    %143 = arith.addf %140, %142 : vector<8x1280xf32>
    %cst_9 = arith.constant 0.000000e+00 : f32
    %144 = vector.broadcast %cst_9 : f32 to vector<8x1280xf32>
    %145 = arith.maximumf %143, %144 : vector<8x1280xf32>
    %146 = vector.extract_strided_slice %145 {offsets = [0, 0], sizes = [8, 1152], strides = [1, 1]} : vector<8x1280xf32> to vector<8x1152xf32>
    %147 = vector.extract_strided_slice %145 {offsets = [0, 1], sizes = [8, 1152], strides = [1, 1]} : vector<8x1280xf32> to vector<8x1152xf32>
    %148 = arith.maximumf %146, %147 : vector<8x1152xf32>
    %149 = vector.extract_strided_slice %148 {offsets = [0, 0], sizes = [8, 1024], strides = [1, 1]} : vector<8x1152xf32> to vector<8x1024xf32>
    %150 = vector.extract_strided_slice %148 {offsets = [0, 32], sizes = [8, 1024], strides = [1, 1]} : vector<8x1152xf32> to vector<8x1024xf32>
    %151 = arith.maximumf %149, %150 : vector<8x1024xf32>
    %152 = arith.truncf %151 : vector<8x1024xf32> to vector<8x1024xbf16>
    %c0_10 = arith.constant 0 : index
    %c2048 = arith.constant 2048 : index
    %153 = vector.load %arg7[%c0_10, %c2048] : memref<8x6144xbf16, #tpu.memory_space<vmem>>, vector<8x1024xbf16>
    tpu.vector_store %arg7[%c0_10, %c2048], %152 {strides = array<i32>} : memref<8x6144xbf16, #tpu.memory_space<vmem>>, vector<8x1024xbf16>,
    %c27 = arith.constant 27 : index
    %154 = memref.load %arg2[%c27] : memref<54xf32, #tpu.memory_space<smem>>
    %155 = vector.broadcast %154 : f32 to vector<8x1280xf32>
    %156 = arith.mulf %155, %1 : vector<8x1280xf32>
    %c28 = arith.constant 28 : index
    %157 = memref.load %arg2[%c28] : memref<54xf32, #tpu.memory_space<smem>>
    %158 = vector.broadcast %157 : f32 to vector<8x1280xf32>
    %159 = arith.mulf %158, %2 : vector<8x1280xf32>
    %160 = arith.addf %156, %159 : vector<8x1280xf32>
    %c29 = arith.constant 29 : index
    %161 = memref.load %arg2[%c29] : memref<54xf32, #tpu.memory_space<smem>>
    %162 = vector.broadcast %161 : f32 to vector<8x1280xf32>
    %163 = arith.mulf %162, %3 : vector<8x1280xf32>
    %164 = arith.addf %160, %163 : vector<8x1280xf32>
    %c30 = arith.constant 30 : index
    %165 = memref.load %arg2[%c30] : memref<54xf32, #tpu.memory_space<smem>>
    %166 = vector.broadcast %165 : f32 to vector<8x1280xf32>
    %167 = arith.mulf %166, %4 : vector<8x1280xf32>
    %168 = arith.addf %164, %167 : vector<8x1280xf32>
    %c31 = arith.constant 31 : index
    %169 = memref.load %arg2[%c31] : memref<54xf32, #tpu.memory_space<smem>>
    %170 = vector.broadcast %169 : f32 to vector<8x1280xf32>
    %171 = arith.mulf %170, %5 : vector<8x1280xf32>
    %172 = arith.addf %168, %171 : vector<8x1280xf32>
    %c32 = arith.constant 32 : index
    %173 = memref.load %arg2[%c32] : memref<54xf32, #tpu.memory_space<smem>>
    %174 = vector.broadcast %173 : f32 to vector<8x1280xf32>
    %175 = arith.mulf %174, %6 : vector<8x1280xf32>
    %176 = arith.addf %172, %175 : vector<8x1280xf32>
    %c33 = arith.constant 33 : index
    %177 = memref.load %arg2[%c33] : memref<54xf32, #tpu.memory_space<smem>>
    %178 = vector.broadcast %177 : f32 to vector<8x1280xf32>
    %179 = arith.mulf %178, %7 : vector<8x1280xf32>
    %180 = arith.addf %176, %179 : vector<8x1280xf32>
    %c34 = arith.constant 34 : index
    %181 = memref.load %arg2[%c34] : memref<54xf32, #tpu.memory_space<smem>>
    %182 = vector.broadcast %181 : f32 to vector<8x1280xf32>
    %183 = arith.mulf %182, %8 : vector<8x1280xf32>
    %184 = arith.addf %180, %183 : vector<8x1280xf32>
    %c35 = arith.constant 35 : index
    %185 = memref.load %arg2[%c35] : memref<54xf32, #tpu.memory_space<smem>>
    %186 = vector.broadcast %185 : f32 to vector<8x1280xf32>
    %187 = arith.mulf %186, %9 : vector<8x1280xf32>
    %188 = arith.addf %184, %187 : vector<8x1280xf32>
    %c3_11 = arith.constant 3 : index
    %189 = memref.load %arg3[%c3_11] : memref<6xf32, #tpu.memory_space<smem>>
    %190 = vector.broadcast %189 : f32 to vector<8x1280xf32>
    %191 = arith.addf %188, %190 : vector<8x1280xf32>
    %cst_12 = arith.constant 0.000000e+00 : f32
    %192 = vector.broadcast %cst_12 : f32 to vector<8x1280xf32>
    %193 = arith.maximumf %191, %192 : vector<8x1280xf32>
    %194 = vector.extract_strided_slice %193 {offsets = [0, 0], sizes = [8, 1152], strides = [1, 1]} : vector<8x1280xf32> to vector<8x1152xf32>
    %195 = vector.extract_strided_slice %193 {offsets = [0, 1], sizes = [8, 1152], strides = [1, 1]} : vector<8x1280xf32> to vector<8x1152xf32>
    %196 = arith.maximumf %194, %195 : vector<8x1152xf32>
    %197 = vector.extract_strided_slice %196 {offsets = [0, 0], sizes = [8, 1024], strides = [1, 1]} : vector<8x1152xf32> to vector<8x1024xf32>
    %198 = vector.extract_strided_slice %196 {offsets = [0, 32], sizes = [8, 1024], strides = [1, 1]} : vector<8x1152xf32> to vector<8x1024xf32>
    %199 = arith.maximumf %197, %198 : vector<8x1024xf32>
    %200 = arith.truncf %199 : vector<8x1024xf32> to vector<8x1024xbf16>
    %c0_13 = arith.constant 0 : index
    %c3072 = arith.constant 3072 : index
    %201 = vector.load %arg7[%c0_13, %c3072] : memref<8x6144xbf16, #tpu.memory_space<vmem>>, vector<8x1024xbf16>
    tpu.vector_store %arg7[%c0_13, %c3072], %200 {strides = array<i32>} : memref<8x6144xbf16, #tpu.memory_space<vmem>>, vector<8x1024xbf16>,
    %c36 = arith.constant 36 : index
    %202 = memref.load %arg2[%c36] : memref<54xf32, #tpu.memory_space<smem>>
    %203 = vector.broadcast %202 : f32 to vector<8x1280xf32>
    %204 = arith.mulf %203, %1 : vector<8x1280xf32>
    %c37 = arith.constant 37 : index
    %205 = memref.load %arg2[%c37] : memref<54xf32, #tpu.memory_space<smem>>
    %206 = vector.broadcast %205 : f32 to vector<8x1280xf32>
    %207 = arith.mulf %206, %2 : vector<8x1280xf32>
    %208 = arith.addf %204, %207 : vector<8x1280xf32>
    %c38 = arith.constant 38 : index
    %209 = memref.load %arg2[%c38] : memref<54xf32, #tpu.memory_space<smem>>
    %210 = vector.broadcast %209 : f32 to vector<8x1280xf32>
    %211 = arith.mulf %210, %3 : vector<8x1280xf32>
    %212 = arith.addf %208, %211 : vector<8x1280xf32>
    %c39 = arith.constant 39 : index
    %213 = memref.load %arg2[%c39] : memref<54xf32, #tpu.memory_space<smem>>
    %214 = vector.broadcast %213 : f32 to vector<8x1280xf32>
    %215 = arith.mulf %214, %4 : vector<8x1280xf32>
    %216 = arith.addf %212, %215 : vector<8x1280xf32>
    %c40 = arith.constant 40 : index
    %217 = memref.load %arg2[%c40] : memref<54xf32, #tpu.memory_space<smem>>
    %218 = vector.broadcast %217 : f32 to vector<8x1280xf32>
    %219 = arith.mulf %218, %5 : vector<8x1280xf32>
    %220 = arith.addf %216, %219 : vector<8x1280xf32>
    %c41 = arith.constant 41 : index
    %221 = memref.load %arg2[%c41] : memref<54xf32, #tpu.memory_space<smem>>
    %222 = vector.broadcast %221 : f32 to vector<8x1280xf32>
    %223 = arith.mulf %222, %6 : vector<8x1280xf32>
    %224 = arith.addf %220, %223 : vector<8x1280xf32>
    %c42 = arith.constant 42 : index
    %225 = memref.load %arg2[%c42] : memref<54xf32, #tpu.memory_space<smem>>
    %226 = vector.broadcast %225 : f32 to vector<8x1280xf32>
    %227 = arith.mulf %226, %7 : vector<8x1280xf32>
    %228 = arith.addf %224, %227 : vector<8x1280xf32>
    %c43 = arith.constant 43 : index
    %229 = memref.load %arg2[%c43] : memref<54xf32, #tpu.memory_space<smem>>
    %230 = vector.broadcast %229 : f32 to vector<8x1280xf32>
    %231 = arith.mulf %230, %8 : vector<8x1280xf32>
    %232 = arith.addf %228, %231 : vector<8x1280xf32>
    %c44 = arith.constant 44 : index
    %233 = memref.load %arg2[%c44] : memref<54xf32, #tpu.memory_space<smem>>
    %234 = vector.broadcast %233 : f32 to vector<8x1280xf32>
    %235 = arith.mulf %234, %9 : vector<8x1280xf32>
    %236 = arith.addf %232, %235 : vector<8x1280xf32>
    %c4_14 = arith.constant 4 : index
    %237 = memref.load %arg3[%c4_14] : memref<6xf32, #tpu.memory_space<smem>>
    %238 = vector.broadcast %237 : f32 to vector<8x1280xf32>
    %239 = arith.addf %236, %238 : vector<8x1280xf32>
    %cst_15 = arith.constant 0.000000e+00 : f32
    %240 = vector.broadcast %cst_15 : f32 to vector<8x1280xf32>
    %241 = arith.maximumf %239, %240 : vector<8x1280xf32>
    %242 = vector.extract_strided_slice %241 {offsets = [0, 0], sizes = [8, 1152], strides = [1, 1]} : vector<8x1280xf32> to vector<8x1152xf32>
    %243 = vector.extract_strided_slice %241 {offsets = [0, 1], sizes = [8, 1152], strides = [1, 1]} : vector<8x1280xf32> to vector<8x1152xf32>
    %244 = arith.maximumf %242, %243 : vector<8x1152xf32>
    %245 = vector.extract_strided_slice %244 {offsets = [0, 0], sizes = [8, 1024], strides = [1, 1]} : vector<8x1152xf32> to vector<8x1024xf32>
    %246 = vector.extract_strided_slice %244 {offsets = [0, 32], sizes = [8, 1024], strides = [1, 1]} : vector<8x1152xf32> to vector<8x1024xf32>
    %247 = arith.maximumf %245, %246 : vector<8x1024xf32>
    %248 = arith.truncf %247 : vector<8x1024xf32> to vector<8x1024xbf16>
    %c0_16 = arith.constant 0 : index
    %c4096 = arith.constant 4096 : index
    %249 = vector.load %arg7[%c0_16, %c4096] : memref<8x6144xbf16, #tpu.memory_space<vmem>>, vector<8x1024xbf16>
    tpu.vector_store %arg7[%c0_16, %c4096], %248 {strides = array<i32>} : memref<8x6144xbf16, #tpu.memory_space<vmem>>, vector<8x1024xbf16>,
    %c45 = arith.constant 45 : index
    %250 = memref.load %arg2[%c45] : memref<54xf32, #tpu.memory_space<smem>>
    %251 = vector.broadcast %250 : f32 to vector<8x1280xf32>
    %252 = arith.mulf %251, %1 : vector<8x1280xf32>
    %c46 = arith.constant 46 : index
    %253 = memref.load %arg2[%c46] : memref<54xf32, #tpu.memory_space<smem>>
    %254 = vector.broadcast %253 : f32 to vector<8x1280xf32>
    %255 = arith.mulf %254, %2 : vector<8x1280xf32>
    %256 = arith.addf %252, %255 : vector<8x1280xf32>
    %c47 = arith.constant 47 : index
    %257 = memref.load %arg2[%c47] : memref<54xf32, #tpu.memory_space<smem>>
    %258 = vector.broadcast %257 : f32 to vector<8x1280xf32>
    %259 = arith.mulf %258, %3 : vector<8x1280xf32>
    %260 = arith.addf %256, %259 : vector<8x1280xf32>
    %c48 = arith.constant 48 : index
    %261 = memref.load %arg2[%c48] : memref<54xf32, #tpu.memory_space<smem>>
    %262 = vector.broadcast %261 : f32 to vector<8x1280xf32>
    %263 = arith.mulf %262, %4 : vector<8x1280xf32>
    %264 = arith.addf %260, %263 : vector<8x1280xf32>
    %c49 = arith.constant 49 : index
    %265 = memref.load %arg2[%c49] : memref<54xf32, #tpu.memory_space<smem>>
    %266 = vector.broadcast %265 : f32 to vector<8x1280xf32>
    %267 = arith.mulf %266, %5 : vector<8x1280xf32>
    %268 = arith.addf %264, %267 : vector<8x1280xf32>
    %c50 = arith.constant 50 : index
    %269 = memref.load %arg2[%c50] : memref<54xf32, #tpu.memory_space<smem>>
    %270 = vector.broadcast %269 : f32 to vector<8x1280xf32>
    %271 = arith.mulf %270, %6 : vector<8x1280xf32>
    %272 = arith.addf %268, %271 : vector<8x1280xf32>
    %c51 = arith.constant 51 : index
    %273 = memref.load %arg2[%c51] : memref<54xf32, #tpu.memory_space<smem>>
    %274 = vector.broadcast %273 : f32 to vector<8x1280xf32>
    %275 = arith.mulf %274, %7 : vector<8x1280xf32>
    %276 = arith.addf %272, %275 : vector<8x1280xf32>
    %c52 = arith.constant 52 : index
    %277 = memref.load %arg2[%c52] : memref<54xf32, #tpu.memory_space<smem>>
    %278 = vector.broadcast %277 : f32 to vector<8x1280xf32>
    %279 = arith.mulf %278, %8 : vector<8x1280xf32>
    %280 = arith.addf %276, %279 : vector<8x1280xf32>
    %c53 = arith.constant 53 : index
    %281 = memref.load %arg2[%c53] : memref<54xf32, #tpu.memory_space<smem>>
    %282 = vector.broadcast %281 : f32 to vector<8x1280xf32>
    %283 = arith.mulf %282, %9 : vector<8x1280xf32>
    %284 = arith.addf %280, %283 : vector<8x1280xf32>
    %c5_17 = arith.constant 5 : index
    %285 = memref.load %arg3[%c5_17] : memref<6xf32, #tpu.memory_space<smem>>
    %286 = vector.broadcast %285 : f32 to vector<8x1280xf32>
    %287 = arith.addf %284, %286 : vector<8x1280xf32>
    %cst_18 = arith.constant 0.000000e+00 : f32
    %288 = vector.broadcast %cst_18 : f32 to vector<8x1280xf32>
    %289 = arith.maximumf %287, %288 : vector<8x1280xf32>
    %290 = vector.extract_strided_slice %289 {offsets = [0, 0], sizes = [8, 1152], strides = [1, 1]} : vector<8x1280xf32> to vector<8x1152xf32>
    %291 = vector.extract_strided_slice %289 {offsets = [0, 1], sizes = [8, 1152], strides = [1, 1]} : vector<8x1280xf32> to vector<8x1152xf32>
    %292 = arith.maximumf %290, %291 : vector<8x1152xf32>
    %293 = vector.extract_strided_slice %292 {offsets = [0, 0], sizes = [8, 1024], strides = [1, 1]} : vector<8x1152xf32> to vector<8x1024xf32>
    %294 = vector.extract_strided_slice %292 {offsets = [0, 32], sizes = [8, 1024], strides = [1, 1]} : vector<8x1152xf32> to vector<8x1024xf32>
    %295 = arith.maximumf %293, %294 : vector<8x1024xf32>
    %296 = arith.truncf %295 : vector<8x1024xf32> to vector<8x1024xbf16>
    %c0_19 = arith.constant 0 : index
    %c5120 = arith.constant 5120 : index
    %297 = vector.load %arg7[%c0_19, %c5120] : memref<8x6144xbf16, #tpu.memory_space<vmem>>, vector<8x1024xbf16>
    tpu.vector_store %arg7[%c0_19, %c5120], %296 {strides = array<i32>} : memref<8x6144xbf16, #tpu.memory_space<vmem>>, vector<8x1024xbf16>,
    %c0_20 = arith.constant 0 : index
    %c0_21 = arith.constant 0 : index
    %298 = vector.load %arg7[%c0_20, %c0_21] : memref<8x6144xbf16, #tpu.memory_space<vmem>>, vector<8x6144xbf16>
    %c0_22 = arith.constant 0 : index
    %c0_23 = arith.constant 0 : index
    %299 = vector.load %arg4[%c0_22, %c0_23] : memref<10x6144xbf16, #tpu.memory_space<vmem>>, vector<10x6144xbf16>
    %cst_24 = arith.constant dense<0.000000e+00> : vector<8x10xf32>
    %300 = tpu.matmul %298, %299, %cst_24 {dimension_numbers = #tpu.dot_dimension_numbers<[1], [1], [0], [0], [0, 0, 1, 0], [], []>} : vector<8x6144xbf16>, vector<10x6144xbf16>, vector<8x10xf32> -> vector<8x10xf32>
    %c0_25 = arith.constant 0 : index
    %c0_26 = arith.constant 0 : index
    %301 = vector.load %arg5[%c0_25, %c0_26] : memref<1x10xf32, #tpu.memory_space<vmem>>, vector<1x10xf32>
    %302 = vector.broadcast %301 : vector<1x10xf32> to vector<8x10xf32>
    %303 = arith.addf %300, %302 : vector<8x10xf32>
    %c0_27 = arith.constant 0 : index
    %c0_28 = arith.constant 0 : index
    %304 = vector.load %arg6[%c0_27, %c0_28] : memref<8x10xf32, #tpu.memory_space<vmem>>, vector<8x10xf32>
    tpu.vector_store %arg6[%c0_27, %c0_28], %303 {strides = array<i32>} : memref<8x10xf32, #tpu.memory_space<vmem>>, vector<8x10xf32>,
    return
  }
  func.func @transform_0(%arg0: i32) -> (i32, i32) {
    %c0_i32 = arith.constant 0 : i32
    %c0_i32_0 = arith.constant 0 : i32
    return %arg0, %c0_i32 : i32, i32
  }
  func.func @transform_1(%arg0: i32) -> i32 {
    %c0_i32 = arith.constant 0 : i32
    %c0_i32_0 = arith.constant 0 : i32
    return %c0_i32 : i32
  }
  func.func @transform_2(%arg0: i32) -> i32 {
    %c0_i32 = arith.constant 0 : i32
    %c0_i32_0 = arith.constant 0 : i32
    return %c0_i32 : i32
  }
  func.func @transform_3(%arg0: i32) -> (i32, i32) {
    %c0_i32 = arith.constant 0 : i32
    %c0_i32_0 = arith.constant 0 : i32
    %c0_i32_1 = arith.constant 0 : i32
    return %c0_i32, %c0_i32_0 : i32, i32
  }
  func.func @transform_4(%arg0: i32) -> (i32, i32) {
    %c0_i32 = arith.constant 0 : i32
    %c0_i32_0 = arith.constant 0 : i32
    %c0_i32_1 = arith.constant 0 : i32
    return %c0_i32, %c0_i32_0 : i32, i32
  }
  func.func @transform_5(%arg0: i32) -> (i32, i32) {
    %c0_i32 = arith.constant 0 : i32
    %c0_i32_0 = arith.constant 0 : i32
    return %arg0, %c0_i32 : i32, i32
  }
}

</mosaic_0001>

<bundles_post_ra>
// kernel: tpu_custom_call.1
= control target key start
LH: loop header
LB: loop body
LE: loop exit
PB: predicated region body
PF: predicated region fallthrough
CT: control target
= control target key end

     0   :  { %10 = vsyncpa [#allocation4], 0  ;;  %s12472_s0 = inlined_call_operand.hbm [shape: f32[16,1408], index: 0, kind: input, shape index: {}]   ;;  %s12473_s1 = inlined_call_operand.vmem [shape: f32[54], index: 1, kind: input, shape index: {}]   ;;  %s12474_s2 = inlined_call_operand.vmem [shape: f32[6], index: 2, kind: input, shape index: {}]   ;;  %s12475_s3 = inlined_call_operand.hbm [shape: bf16[10,6144], index: 3, kind: input, shape index: {}]   ;;  %s12476_s4 = inlined_call_operand.vmem [shape: f32[1,10], index: 4, kind: input, shape index: {}]   ;;  %s12477_s5 = inlined_call_operand.hbm [shape: f32[16,10], index: 5, kind: output, shape index: {}]  }
   0x1   :  { %12 = vsyncpa [#allocation4 + $0x1], 0 }
   0x2   :  { %13 = vsyncpa [#allocation6], 0 }
   0x3   :  { %14 = vsyncpa [#allocation9], 0 }
   0x4   :  { %15 = vsyncpa [#allocation11], 0 }
   0x5   :  { %16 = vsyncpa [#allocation5], 0 }
   0x6   :  { %18 = vsyncpa [#allocation5 + $0x1], 0  ;;  %s7478_s18 = smov 0   ;;  %s7480_s19 = smov 0  }
   0x7   :  { %s7482_s20 = smov 0   ;;  %s7484_s21 = smov 0  }
   0x8 LB: > { %s7499_s22 = sadd.s32 4294967295, %s7431_s21   ;;  %s6584_s23 = sadd.s32 4294967294, %s7431_s21   ;;  %s7431_s21 = sphi %s7484_s21, %s12994_s21   ;;  %s7427_s20 = sphi %s7482_s20, %s12993_s20   ;;  %s7423_s19 = sphi %s7480_s19, %s12992_s19   ;;  %s7419_s18 = sphi %s7478_s18, %s12991_s18  }
   0x9   : > { %p44_p0 = scmp.ne.s32.totalorder %s7423_s19, %s7419_s18  ;;  %p12478_p1 = scmp.eq.s32.totalorder %s7499_s22, 0 }
   0xa   : > { %p158_p3 = scmp.eq.s32.totalorder %s6584_s23, 1  ;;  %p6585_p5 = scmp.ge.s32.totalorder %s7431_s21, 1 }
   0xb   : > { %p7508_p4 = por %p12478_p1, %p44_p0  ;;  %p165_p7 = scmp.lt.s32.totalorder %s7431_s21, 3 }
   0xc   : > { %p7513_p6 = por %p158_p3, %p44_p0  ;;  %s178_s28 = sshll.u32 %s12473_s1, 4  ;;  %s179_s28 = int_to_ptr.vmem [resolvable:$true] %s178_s28 }
   0xd   : > { %s12624_s24 = scalar_select %p7508_p4, 1, 0 }
   0xe   : > { %s12625_s25 = scalar_select %p7513_p6, 1, 0 }
   0xf   : > { %p7521_p8 = pnand %p6585_p5, %p165_p7  ;;  %s189_s7 = sshll.u32 %s12474_s2, 4  ;;  %s190_s7 = int_to_ptr.vmem [resolvable:$true] %s189_s7 }
  0x10   : > { %s7433_s9 = smov [#allocation10]   ;;  %s7271_s11 = scalar_lea.vmem %s179_s28, 16 }
  0x11   : > { %s12626_s29 = scalar_select %p7521_p8, 1, 0 }
  0x12   : > { %p6870_p10 = pneg %p7521_p8  ;;  %s199_s10 = sshll.u32 %s7433_s9, 4  ;;  %s7537_s10 = int_to_ptr.vmem [resolvable:$true] %s199_s10 }
  0x13   : > { %p7272_p12 = scmp.ne.s32.totalorder %s179_s28, %s7271_s11  ;;  %p7279_p5 = scmp.lt.s32.totalorder %s179_s28, %s179_s28 }
  0x14   : > { %p7533_p11 = pnand %p6870_p10, %p12478_p1  ;;  %p7280_p7 = scmp.lt.s32.totalorder %s7271_s11, %s7271_s11 }
  0x16   : > { %p7273_p13 = pneg %p7533_p11  ;;  %p7281_p10 = por %p7280_p7, %p7279_p5 }
  0x18   : > { %p7274_p0 = pnand %p7273_p13, %p7272_p12 }
  0x1a   : > { %p7275_p3 = pneg %p7274_p0 }
  0x1c   : > { %p7282_p9 = pnand %p7281_p10, %p7275_p3 }
  0x1e   : > { %7285 = shalt.err (!%p7282_p9)
}
  0x1f   : > { %s7434_s12 = smov [#allocation7]   ;;  %s7286_s13 = scalar_lea.vmem %s190_s7, 16 }
  0x20   : > { %6873 = dma.vmem_to_smem (!%p7533_p11), %s179_s28, 16, %s7434_s12, [#allocation6]  }
  0x21   : > { %p7287_p1 = scmp.ne.s32.totalorder %s190_s7, %s7286_s13  ;;  %p7294_p4 = scmp.lt.s32.totalorder %s190_s7, %s190_s7 }
  0x22   : > { %p7295_p8 = scmp.lt.s32.totalorder %s7286_s13, %s7286_s13 }
  0x23   : > { %p7289_p2 = pnand %p7287_p1, %p7273_p13 }
  0x24   : > { %p7296_p12 = por %p7295_p8, %p7294_p4 }
  0x25   : > { %p7290_p6 = pneg %p7289_p2 }
  0x27   : > { %p7297_p0 = pnand %p7296_p12, %p7290_p6 }
  0x29   : > { %7300 = shalt.err (!%p7297_p0)
}
  0x2a   : > { %s7435_s14 = smov [#allocation8]   ;;  %s7312_s15 = scalar_lea.vmem %s7537_s10, 6144 }
  0x2b   : > { %6876 = dma.vmem_to_smem (!%p7533_p11), %s190_s7, 16, %s7435_s14, [#allocation9]  }
  0x2c   : > { %p7313_p9 = scmp.ne.s32.totalorder %s7537_s10, %s7312_s15  ;;  %p7320_p2 = scmp.lt.s32.totalorder %s7537_s10, %s7537_s10 }
  0x2d   : > { %p7321_p5 = scmp.lt.s32.totalorder %s7312_s15, %s7312_s15 }
  0x2e   : > { %p7315_p3 = pnand %p7313_p9, %p7273_p13 }
  0x2f   : > { %p7322_p4 = por %p7321_p5, %p7320_p2 }
  0x30   : > { %p7316_p1 = pneg %p7315_p3 }
  0x32   : > { %p7323_p6 = pnand %p7322_p4, %p7316_p1 }
  0x34   : > { %7326 = shalt.err (!%p7323_p6)
}
  0x35   : > { %s7436_s16 = smov 3072   ;;  %s7437_s17 = smov 192  }
  0x36   : > { %6879 = dma.hbm_to_vmem [thread:$0]  (!%p7533_p11), %s12475_s3, 6144, %s7537_s10, [#allocation11], %s7436_s16, %s7436_s16, %s7437_s17  }
  0x37   : > { %s7565_s27 = sadd.s32 1, %s7431_s21   ;;  %s31_s30 = sadd.s32 1, %s7427_s20 }
  0x38   : > { %s28_s28 = ssub.s32 %s7431_s21, %s7565_s27  ;;  %p38_p13 = scmp.ne.s32.totalorder %s7427_s20, %s7423_s19 }
  0x39   : > { %p29_p8 = scmp.eq.s32.totalorder %s28_s28, 0  ;;  %p39_p7 = scmp.eq.s32.totalorder %s7431_s21, 0 }
  0x3a   : > { %p6891_p10 = scmp.lt.s32.totalorder %s7431_s21, 2  ;;  %p12628_p0 = scmp.eq.s32.totalorder %s7499_s22, 1 }
  0x3b   : > { %s7575_s6 = scalar_select %p29_p8, %s7427_s20, %s31_s30  }
  0x3c   : > { %p40_p12 = por %p39_p7, %p38_p13  ;;  %p7579_p9 = por %p12628_p0, %p38_p13 }
  0x3d   : > { %s216_s8 = sand.u32 1, %s7427_s20   ;;  %s6852_s9 = smul.u32 1408, %s7431_s21 }
  0x3e   : > { %s12629_s7 = scalar_select %p7579_p9, 1, 0 }
  0x3f   : > { %s6851_s10 = smul.u32 88, %s216_s8  ;;  %p7585_p11 = pnand %p6891_p10, %p40_p12 }
  0x40   : > { %s7592_s14 = scalar_lea.hbm %s12472_s0, %s6852_s9  ;;  %s217_s17 = scalar_lea.sflag [#allocation4], %s216_s8 }
  0x41   : > { %s220_s15 = scalar_lea.vmem [#allocation3], %s6851_s10  ;;  %s7327_s23 = scalar_lea.hbm %s7592_s14, 1408 }
  0x42   : > { %s228_s16 = sshll.u32 %s220_s15, 4  ;;  %p7328_p3 = scmp.ne.s32.totalorder %s7592_s14, %s7327_s23  ;;  %s229_s16 = int_to_ptr.vmem [resolvable:$true] %s228_s16 }
  0x43   : > { %p7329_p1 = pneg %p7585_p11  ;;  %s7332_s30 = scalar_lea.hbm %s12472_s0, 2816 }
  0x44   : > { %p7333_p4 = scmp.lt.s32.totalorder %s7592_s14, %s12472_s0  ;;  %p7334_p6 = scmp.lt.s32.totalorder %s7332_s30, %s7327_s23 }
  0x45   : > { %p7330_p2 = pnand %p7329_p1, %p7328_p3 }
  0x46   : > { %p7335_p8 = por %p7334_p6, %p7333_p4 }
  0x47   : > { %p7331_p5 = pneg %p7330_p2 }
  0x49   : > { %p7336_p13 = pnand %p7335_p8, %p7331_p5 }
  0x4b   : > { %7339 = shalt.err (!%p7336_p13)
}
  0x4c   : > { %s7340_s10 = scalar_lea.vmem %s229_s16, 1408  ;;  %s7438_s8 = smov [#allocation3]  }
  0x4d   : > { %p7341_p7 = scmp.ne.s32.totalorder %s229_s16, %s7340_s10  ;;  %s7345_s13 = sshll.u32 %s7438_s8, 4  ;;  %s7346_s13 = int_to_ptr.vmem [resolvable:$false] %s7345_s13 }
  0x4e   : > { %s7347_s15 = scalar_lea.vmem %s7346_s13, 2816  ;;  %p7348_p0 = scmp.lt.s32.totalorder %s229_s16, %s7346_s13 }
  0x4f   : > { %p7343_p10 = pnand %p7341_p7, %p7329_p1  ;;  %p7349_p3 = scmp.lt.s32.totalorder %s7347_s15, %s7340_s10 }
  0x51   : > { %p7344_p12 = pneg %p7343_p10  ;;  %p7350_p2 = por %p7349_p3, %p7348_p0 }
  0x53   : > { %p7351_p9 = pnand %p7350_p2, %p7344_p12 }
  0x55   : > { %7354 = shalt.err (!%p7351_p9)
}
  0x56   : > { %6883 = dma.hbm_to_vmem [thread:$0]  (!%p7585_p11), %s7592_s14, 1408, %s229_s16, %s217_s17  }
  0x57   : > { %p12631_p5 = scmp.ne.s32.totalorder %s12626_s29, 0 }
  0x59   : > { %237 = sbr.rel (%p12631_p5) target bundleno = 2669 (0xa6d), region = 40 }
  0x5e   : > { %s7611_s23 = sand.u32 1, %s7423_s19   ;;  %p12632_p1 = scmp.ne.s32.totalorder %s12624_s24, 0 }
  0x5f   : > { %s6853_s26 = smul.u32 88, %s7611_s23  ;;  %s240_s28 = scalar_lea.sflag [#allocation4], %s7611_s23 }
  0x61   : > { %s7615_s30 = scalar_lea.vmem [#allocation3], %s6853_s26 }
  0x62   : > { %7398 = dma.done.wait (%p12632_p1), %s240_s28, 1408  }
  0x63   : > { %7400 = vsyncadd (%p12632_p1), %s240_s28, 4294965888  ;;  %p12633_p9 = scmp.eq.s32.totalorder %s7499_s22, 0 }
  0x65   : > { %7402 = dma.done.wait (%p12633_p9), [#allocation6], 16   ;;  %p12634_p11 = pmov %p12633_p9 }
  0x66   : > { %p12635_p4 = pmov %p12633_p9 }
  0x67   : > { %7404 = vsyncadd (%p12634_p11), [#allocation6], 4294967280 }
  0x68   : > { %7406 = dma.done.wait (%p12635_p4), [#allocation9], 16   ;;  %p12636_p6 = pmov %p12635_p4 }
  0x69   : > { %p12637_p8 = pmov %p12635_p4 }
  0x6a   : > { %7408 = vsyncadd (%p12636_p6), [#allocation9], 4294967280 }
  0x6b   : > { %7410 = dma.done.wait (%p12637_p8), [#allocation11], 6144   ;;  %p12638_p13 = pmov %p12635_p4 }
  0x6d   : > { %7412 = vsyncadd (%p12638_p13), [#allocation11], 4294961152 }
  0x6e   : > { %260 = sfence }
  0x6f   : > { %s6596_s24 = sld [smem:[#allocation7 + $0x1]]  ;;  %v7634_v0 = vld [vmem:[%s7615_s30 + $0x10] sm:$0xff]  ;;  %v7637_v1 = vld [vmem:[%s7615_s30] sm:$0xff]  ;;  %v7640_v3 = vld [vmem:[%s7615_s30 + $0x18] sm:$0xff]  ;;  %s7439_s29 = smov 127   ;;  %vm353_vm0 = vcmask 1039360  }
  0x70   : > { %12639 = vst [vmem:[#allocation18_spill] sm:$0xff] %v7640_v3  ;;  %v7643_v4 = vld [vmem:[%s7615_s30 + $0x8] sm:$0xff]  ;;  %v7655_v10 = vld [vmem:[%s7615_s30 + $0x20] sm:$0xff]  ;;  %v7662_v13 = vld [vmem:[%s7615_s30 + $0x38] sm:$0xff]  ;;  %s6597_s11 = sld [smem:[#allocation7 + $0x2]]  ;;  %s7440_s14 = smov 126  }
  0x71   : > { %12640 = vst [vmem:[#allocation19_spill] sm:$0xff] %v7643_v4  ;;  %v7652_v9 = vld [vmem:[%s7615_s30 + $0x28] sm:$0xff]  ;;  %12641 = vst [vmem:[#allocation20_spill] sm:$0xff] %v7655_v10  ;;  %v7665_v14 = vld [vmem:[%s7615_s30 + $0x30] sm:$0xff]  ;;  %s6598_s16 = sld [smem:[#allocation7 + $0x3]]  ;;  %s7441_s17 = smov 96  }
  0x72   : > { %12642 = vst [vmem:[#allocation21_spill] sm:$0xff] %v7665_v14  ;;  %v7672_v17 = vld [vmem:[%s7615_s30 + $0x48] sm:$0xff]  ;;  %v7675_v18 = vld [vmem:[%s7615_s30 + $0x40] sm:$0xff]  ;;  %v7682_v22 = vld [vmem:[%s7615_s30 + $0x50] sm:$0xff]  ;;  %s6599_s12 = sld [smem:[#allocation7 + $0x4]]  ;;  %s7442_s9 = smov 95  }
  0x73   : > { %12643 = vst [vmem:[#allocation22_spill] sm:$0xff] %v7672_v17  ;;  %12644 = vst [vmem:[#allocation23_spill] sm:$0xff] %v7675_v18  ;;  %s6600_s10 = sld [smem:[#allocation7 + $0x5]]  ;;  %s7443_s8 = smov 94   ;;  %vm430_vm1 = vcmask 1031168   ;;  %vm507_vm2 = vcmask 785408  }
  0x74   : > { %12645 = vst [vmem:[#allocation24_spill] sm:$0xff] %v7682_v22  ;;  %s6601_s13 = sld [smem:[#allocation7 + $0x6]]  ;;  %s7444_s15 = smov 64   ;;  %vm584_vm3 = vcmask 777216   ;;  %vm661_vm4 = vcmask 769024   ;;  %vm738_vm5 = vcmask 523264  }
  0x75   : > { %v308_v2 = vstv %s6596_s24  ;;  %s6602_s26 = sld [smem:[#allocation7 + $0x7]]  ;;  %s7445_s28 = smov 63   ;;  %vm815_vm6 = vcmask 515072   ;;  %vm892_vm7 = vcmask 506880   ;;  %vm6466_vm8 = vcmask 80896  }
  0x76   : > { %v311_v5 = vmul.f32 %v308_v2, %v7634_v0  ;;  %v309_v6 = vmul.f32 %v308_v2, %v7637_v1  ;;  %v312_v7 = vmul.f32 %v308_v2, %v7640_v3  ;;  %v310_v8 = vmul.f32 %v308_v2, %v7643_v4  ;;  %s6603_s24 = sld [smem:[#allocation7 + $0x8]]  ;;  %p12988_p10 = scmp.ne.s32.totalorder %s12629_s7, 0 }
  0x77   : > { %v314_v11 = vmul.f32 %v308_v2, %v7652_v9  ;;  %v313_v12 = vmul.f32 %v308_v2, %v7655_v10  ;;  %v316_v15 = vmul.f32 %v308_v2, %v7662_v13  ;;  %v315_v16 = vmul.f32 %v308_v2, %v7665_v14 }
  0x78   : > { %335 = vrot.lane.b32.xlu1 %v311_v5, %s7439_s29  ;;  %331 = vrot.lane.b32.xlu0 %v309_v6, %s7439_s29  ;;  %v318_v19 = vmul.f32 %v308_v2, %v7672_v17  ;;  %v317_v20 = vmul.f32 %v308_v2, %v7675_v18  ;;  %v385_v21 = vstv %s6597_s11  ;;  %v319_v24 = vmul.f32 %v308_v2, %v7682_v22  ;;  %s7446_s11 = smov 62  }
  0x79   : > { %v386_v23 = vmul.f32 %v385_v21, %v7637_v1  ;;  %v388_v25 = vmul.f32 %v385_v21, %v7634_v0  ;;  %v387_v26 = vmul.f32 %v385_v21, %v7643_v4  ;;  %v390_v27 = vmul.f32 %v385_v21, %v7655_v10 }
  0x7a   : > { %v389_v28 = vmul.f32 %v385_v21, %v7640_v3  ;;  %v392_v29 = vmul.f32 %v385_v21, %v7665_v14  ;;  %v391_v30 = vmul.f32 %v385_v21, %v7652_v9  ;;  %v394_v31 = vmul.f32 %v385_v21, %v7675_v18 }
  0x7b   : > { %v393_v32 = vmul.f32 %v385_v21, %v7662_v13  ;;  %v396_v33 = vmul.f32 %v385_v21, %v7682_v22  ;;  %v395_v34 = vmul.f32 %v385_v21, %v7672_v17  ;;  %v462_v35 = vstv %s6598_s16  ;;  %s295_s16 = sld [smem:[#allocation7]] }
  0x7c   : > { %337 = vrot.lane.b32.xlu1 %v312_v7, %s7439_s29  ;;  %333 = vrot.lane.b32.xlu0 %v310_v8, %s7439_s29  ;;  %v464_v36 = vmul.f32 %v462_v35, %v7643_v4  ;;  %v463_v37 = vmul.f32 %v462_v35, %v7637_v1  ;;  %v466_v38 = vmul.f32 %v462_v35, %v7640_v3  ;;  %v539_v46 = vstv %s6599_s12  ;;  %s7993_s12 = sld [smem:[#allocation8]] }
  0x7d   : > { %v465_v39 = vmul.f32 %v462_v35, %v7634_v0  ;;  %v468_v40 = vmul.f32 %v462_v35, %v7652_v9  ;;  %v467_v41 = vmul.f32 %v462_v35, %v7655_v10  ;;  %v470_v42 = vmul.f32 %v462_v35, %v7662_v13 }
  0x7e   : > { %v469_v43 = vmul.f32 %v462_v35, %v7665_v14  ;;  %v472_v44 = vmul.f32 %v462_v35, %v7672_v17  ;;  %v471_v45 = vmul.f32 %v462_v35, %v7675_v18  ;;  %v540_v47 = vmul.f32 %v539_v46, %v7637_v1 }
  0x7f   : > { %v473_v48 = vmul.f32 %v462_v35, %v7682_v22  ;;  %v542_v49 = vmul.f32 %v539_v46, %v7634_v0  ;;  %v541_v50 = vmul.f32 %v539_v46, %v7643_v4  ;;  %v544_v51 = vmul.f32 %v539_v46, %v7655_v10 }
  0x80   : > { %341 = vrot.lane.b32.xlu1 %v314_v11, %s7439_s29  ;;  %339 = vrot.lane.b32.xlu0 %v313_v12, %s7439_s29  ;;  %v543_v52 = vmul.f32 %v539_v46, %v7640_v3  ;;  %v546_v53 = vmul.f32 %v539_v46, %v7665_v14  ;;  %v545_v54 = vmul.f32 %v539_v46, %v7652_v9  ;;  %v616_v59 = vstv %s6600_s10  ;;  %s6609_s10 = sld [smem:[#allocation7 + $0xa]] }
  0x81   : > { %v548_v55 = vmul.f32 %v539_v46, %v7675_v18  ;;  %v547_v56 = vmul.f32 %v539_v46, %v7662_v13  ;;  %v550_v57 = vmul.f32 %v539_v46, %v7682_v22  ;;  %v549_v58 = vmul.f32 %v539_v46, %v7672_v17 }
  0x82   : > { %v618_v60 = vmul.f32 %v616_v59, %v7643_v4  ;;  %v617_v61 = vmul.f32 %v616_v59, %v7637_v1  ;;  %v620_v62 = vmul.f32 %v616_v59, %v7640_v3  ;;  %v619_v63 = vmul.f32 %v616_v59, %v7634_v0 }
  0x83   : > { %v622_v2 = vmul.f32 %v616_v59, %v7652_v9  ;;  %v621_v5 = vmul.f32 %v616_v59, %v7655_v10  ;;  %v624_v6 = vmul.f32 %v616_v59, %v7662_v13  ;;  %v623_v7 = vmul.f32 %v616_v59, %v7665_v14 }
  0x84   : > { %345 = vrot.lane.b32.xlu1 %v316_v15, %s7439_s29  ;;  %343 = vrot.lane.b32.xlu0 %v315_v16, %s7439_s29  ;;  %v626_v8 = vmul.f32 %v616_v59, %v7672_v17  ;;  %v625_v11 = vmul.f32 %v616_v59, %v7675_v18  ;;  %v693_v12 = vstv %s6601_s13  ;;  %v627_v16 = vmul.f32 %v616_v59, %v7682_v22  ;;  %s6610_s13 = sld [smem:[#allocation7 + $0xb]] }
  0x85   : > { %v694_v15 = vmul.f32 %v693_v12, %v7637_v1  ;;  %v698_v21 = vmul.f32 %v693_v12, %v7655_v10  ;;  %v703_v35 = vmul.f32 %v693_v12, %v7672_v17 }
  0x88   : > { %349 = vrot.lane.b32.xlu1 %v318_v19, %s7439_s29  ;;  %347 = vrot.lane.b32.xlu0 %v317_v20, %s7439_s29  ;;  %v696_v19 = vmul.f32 %v693_v12, %v7634_v0  ;;  %v695_v20 = vmul.f32 %v693_v12, %v7643_v4 }
  0x8c   : > { %408 = vrot.lane.b32.xlu1 %v386_v23, %s7440_s14  ;;  %351 = vrot.lane.b32.xlu0 %v319_v24, %s7439_s29  ;;  %v697_v23 = vmul.f32 %v693_v12, %v7640_v3 }
  0x90   : > { %412 = vrot.lane.b32.xlu1 %v388_v25, %s7440_s14  ;;  %410 = vrot.lane.b32.xlu0 %v387_v26, %s7440_s14  ;;  %v700_v26 = vmul.f32 %v693_v12, %v7665_v14 }
  0x94   : > { %416 = vrot.lane.b32.xlu1 %v390_v27, %s7440_s14  ;;  %414 = vrot.lane.b32.xlu0 %v389_v28, %s7440_s14  ;;  %v699_v27 = vmul.f32 %v693_v12, %v7652_v9 }
  0x98   : > { %420 = vrot.lane.b32.xlu1 %v392_v29, %s7440_s14  ;;  %418 = vrot.lane.b32.xlu0 %v391_v30, %s7440_s14  ;;  %v702_v30 = vmul.f32 %v693_v12, %v7675_v18 }
  0x9c   : > { %424 = vrot.lane.b32.xlu1 %v394_v31, %s7440_s14  ;;  %422 = vrot.lane.b32.xlu0 %v393_v32, %s7440_s14  ;;  %v701_v31 = vmul.f32 %v693_v12, %v7662_v13 }
  0xa0   : > { %428 = vrot.lane.b32.xlu1 %v396_v33, %s7440_s14  ;;  %426 = vrot.lane.b32.xlu0 %v395_v34, %s7440_s14  ;;  %v704_v34 = vmul.f32 %v693_v12, %v7682_v22 }
  0xa4   : > { %487 = vrot.lane.b32.xlu1 %v464_v36, %s7441_s17  ;;  %485 = vrot.lane.b32.xlu0 %v463_v37, %s7441_s17  ;;  %v770_v36 = vstv %s6602_s26  ;;  %s6611_s26 = sld [smem:[#allocation7 + $0xc]] }
  0xa8   : > { %491 = vrot.lane.b32.xlu1 %v466_v38, %s7441_s17  ;;  %489 = vrot.lane.b32.xlu0 %v465_v39, %s7441_s17  ;;  %v772_v39 = vmul.f32 %v770_v36, %v7643_v4 }
  0xac   : > { %495 = vrot.lane.b32.xlu1 %v468_v40, %s7441_s17  ;;  %493 = vrot.lane.b32.xlu0 %v467_v41, %s7441_s17  ;;  %v771_v40 = vmul.f32 %v770_v36, %v7637_v1 }
  0xb0   : > { %499 = vrot.lane.b32.xlu1 %v470_v42, %s7441_s17  ;;  %497 = vrot.lane.b32.xlu0 %v469_v43, %s7441_s17  ;;  %v774_v43 = vmul.f32 %v770_v36, %v7640_v3 }
  0xb4   : > { %503 = vrot.lane.b32.xlu1 %v472_v44, %s7441_s17  ;;  %501 = vrot.lane.b32.xlu0 %v471_v45, %s7441_s17  ;;  %v773_v44 = vmul.f32 %v770_v36, %v7634_v0 }
  0xb8   : > { %562 = vrot.lane.b32.xlu1 %v540_v47, %s7442_s9  ;;  %505 = vrot.lane.b32.xlu0 %v473_v48, %s7441_s17  ;;  %v776_v47 = vmul.f32 %v770_v36, %v7652_v9  ;;  %v775_v48 = vmul.f32 %v770_v36, %v7655_v10 }
  0xbc   : > { %566 = vrot.lane.b32.xlu1 %v542_v49, %s7442_s9  ;;  %564 = vrot.lane.b32.xlu0 %v541_v50, %s7442_s9 }
  0xc0   : > { %570 = vrot.lane.b32.xlu1 %v544_v51, %s7442_s9  ;;  %568 = vrot.lane.b32.xlu0 %v543_v52, %s7442_s9  ;;  %v778_v51 = vmul.f32 %v770_v36, %v7662_v13  ;;  %v777_v52 = vmul.f32 %v770_v36, %v7665_v14 }
  0xc4   : > { %574 = vrot.lane.b32.xlu1 %v546_v53, %s7442_s9  ;;  %572 = vrot.lane.b32.xlu0 %v545_v54, %s7442_s9 }
  0xc8   : > { %578 = vrot.lane.b32.xlu1 %v548_v55, %s7442_s9  ;;  %576 = vrot.lane.b32.xlu0 %v547_v56, %s7442_s9  ;;  %v780_v55 = vmul.f32 %v770_v36, %v7672_v17  ;;  %v779_v56 = vmul.f32 %v770_v36, %v7675_v18 }
  0xcc   : > { %582 = vrot.lane.b32.xlu1 %v550_v57, %s7442_s9  ;;  %580 = vrot.lane.b32.xlu0 %v549_v58, %s7442_s9  ;;  %v847_v57 = vstv %s6603_s24  ;;  %s6612_s24 = sld [smem:[#allocation7 + $0xd]] }
  0xd0   : > { %641 = vrot.lane.b32.xlu1 %v618_v60, %s7443_s8  ;;  %639 = vrot.lane.b32.xlu0 %v617_v61, %s7443_s8  ;;  %v848_v60 = vmul.f32 %v847_v57, %v7637_v1  ;;  %v781_v61 = vmul.f32 %v770_v36, %v7682_v22 }
  0xd4   : > { %645 = vrot.lane.b32.xlu1 %v620_v62, %s7443_s8  ;;  %643 = vrot.lane.b32.xlu0 %v619_v63, %s7443_s8 }
  0xd8   : > { %649 = vrot.lane.b32.xlu1 %v622_v2, %s7443_s8  ;;  %647 = vrot.lane.b32.xlu0 %v621_v5, %s7443_s8  ;;  %v850_v2 = vmul.f32 %v847_v57, %v7634_v0  ;;  %v849_v5 = vmul.f32 %v847_v57, %v7643_v4 }
  0xdc   : > { %653 = vrot.lane.b32.xlu1 %v624_v6, %s7443_s8  ;;  %651 = vrot.lane.b32.xlu0 %v623_v7, %s7443_s8 }
  0xe0   : > { %657 = vrot.lane.b32.xlu1 %v626_v8, %s7443_s8  ;;  %655 = vrot.lane.b32.xlu0 %v625_v11, %s7443_s8  ;;  %v852_v8 = vmul.f32 %v847_v57, %v7655_v10  ;;  %v851_v11 = vmul.f32 %v847_v57, %v7640_v3 }
  0xe4   : > { %716 = vrot.lane.b32.xlu1 %v694_v15, %s7444_s15  ;;  %659 = vrot.lane.b32.xlu0 %v627_v16, %s7443_s8  ;;  %v854_v16 = vmul.f32 %v847_v57, %v7665_v14 }
  0xe8   : > { %720 = vrot.lane.b32.xlu1 %v696_v19, %s7444_s15  ;;  %718 = vrot.lane.b32.xlu0 %v695_v20, %s7444_s15  ;;  %v853_v19 = vmul.f32 %v847_v57, %v7652_v9 }
  0xea   : > { %v7784_v24 = vpop.permute.xlu1 %335  ;;  %v7786_v25 = vpop.permute.xlu0 %331 }
  0xec   : > { %724 = vrot.lane.b32.xlu1 %v698_v21, %s7444_s15  ;;  %722 = vrot.lane.b32.xlu0 %v697_v23, %s7444_s15  ;;  %v856_v23 = vmul.f32 %v847_v57, %v7675_v18 }
  0xee   : > { %v7792_v28 = vpop.permute.xlu1 %337  ;;  %v7794_v29 = vpop.permute.xlu0 %333 }
  0xf0   : > { %728 = vrot.lane.b32.xlu1 %v700_v26, %s7444_s15  ;;  %726 = vrot.lane.b32.xlu0 %v699_v27, %s7444_s15  ;;  %v855_v26 = vmul.f32 %v847_v57, %v7662_v13 }
  0xf2   : > { %v7800_v32 = vpop.permute.xlu1 %341  ;;  %v7802_v33 = vpop.permute.xlu0 %339 }
  0xf4   : > { %732 = vrot.lane.b32.xlu1 %v702_v30, %s7444_s15  ;;  %730 = vrot.lane.b32.xlu0 %v701_v31, %s7444_s15  ;;  %v858_v31 = vmul.f32 %v847_v57, %v7682_v22 }
  0xf6   : > { %v7808_v37 = vpop.permute.xlu1 %345  ;;  %v7810_v38 = vpop.permute.xlu0 %343 }
  0xf8   : > { %736 = vrot.lane.b32.xlu1 %v704_v34, %s7444_s15  ;;  %734 = vrot.lane.b32.xlu0 %v703_v35, %s7444_s15  ;;  %v857_v34 = vmul.f32 %v847_v57, %v7672_v17 }
  0xfa   : > { %v7816_v41 = vpop.permute.xlu1 %349  ;;  %v7818_v42 = vpop.permute.xlu0 %347 }
  0xfc   : > { %795 = vrot.lane.b32.xlu1 %v772_v39, %s7445_s28  ;;  %793 = vrot.lane.b32.xlu0 %v771_v40, %s7445_s28 }
  0xfe   : > { %v7824_v45 = vpop.permute.xlu1 %408  ;;  %v7826_v46 = vpop.permute.xlu0 %351 }
 0x100   : > { %799 = vrot.lane.b32.xlu1 %v774_v43, %s7445_s28  ;;  %797 = vrot.lane.b32.xlu0 %v773_v44, %s7445_s28 }
 0x102   : > { %v7832_v49 = vpop.permute.xlu1 %412  ;;  %v7834_v50 = vpop.permute.xlu0 %410 }
 0x104   : > { %803 = vrot.lane.b32.xlu1 %v776_v47, %s7445_s28  ;;  %801 = vrot.lane.b32.xlu0 %v775_v48, %s7445_s28 }
 0x106   : > { %v7840_v53 = vpop.permute.xlu1 %416  ;;  %v7842_v54 = vpop.permute.xlu0 %414 }
 0x108   : > { %807 = vrot.lane.b32.xlu1 %v778_v51, %s7445_s28  ;;  %805 = vrot.lane.b32.xlu0 %v777_v52, %s7445_s28 }
 0x10a   : > { %v7848_v58 = vpop.permute.xlu1 %420  ;;  %v7850_v59 = vpop.permute.xlu0 %418 }
 0x10c   : > { %811 = vrot.lane.b32.xlu1 %v780_v55, %s7445_s28  ;;  %809 = vrot.lane.b32.xlu0 %v779_v56, %s7445_s28 }
 0x10e   : > { %v7856_v62 = vpop.permute.xlu1 %424  ;;  %v7858_v63 = vpop.permute.xlu0 %422 }
 0x110   : > { %870 = vrot.lane.b32.xlu1 %v848_v60, %s7446_s11  ;;  %813 = vrot.lane.b32.xlu0 %v781_v61, %s7445_s28 }
 0x112   : > { %v7864_v6 = vpop.permute.xlu1 %428  ;;  %v7866_v7 = vpop.permute.xlu0 %426 }
 0x114   : > { %874 = vrot.lane.b32.xlu1 %v850_v2, %s7446_s11  ;;  %872 = vrot.lane.b32.xlu0 %v849_v5, %s7446_s11 }
 0x116   : > { %v7872_v12 = vpop.permute.xlu1 %487  ;;  %v7874_v15 = vpop.permute.xlu0 %485 }
 0x118   : > { %878 = vrot.lane.b32.xlu1 %v852_v8, %s7446_s11  ;;  %876 = vrot.lane.b32.xlu0 %v851_v11, %s7446_s11 }
 0x11a   : > { %v7880_v20 = vpop.permute.xlu1 %491  ;;  %v7882_v21 = vpop.permute.xlu0 %489 }
 0x11c   : > { %882 = vrot.lane.b32.xlu1 %v854_v16, %s7446_s11  ;;  %880 = vrot.lane.b32.xlu0 %v853_v19, %s7446_s11 }
 0x11e   : > { %v7888_v27 = vpop.permute.xlu1 %495  ;;  %v7890_v30 = vpop.permute.xlu0 %493 }
 0x120   : > { %886 = vrot.lane.b32.xlu1 %v856_v23, %s7446_s11  ;;  %884 = vrot.lane.b32.xlu0 %v855_v26, %s7446_s11 }
 0x122   : > { %v7896_v35 = vpop.permute.xlu1 %499  ;;  %v7898_v36 = vpop.permute.xlu0 %497 }
 0x124   : > { %890 = vrot.lane.b32.xlu1 %v858_v31, %s7446_s11  ;;  %888 = vrot.lane.b32.xlu0 %v857_v34, %s7446_s11 }
 0x126   : > { %v7902_v39 = vpop.permute.xlu1 %503  ;;  %v7904_v40 = vpop.permute.xlu0 %501 }
 0x12a   : > { %v7906_v43 = vpop.permute.xlu1 %562  ;;  %v7908_v44 = vpop.permute.xlu0 %505 }
 0x12e   : > { %v7910_v47 = vpop.permute.xlu1 %566  ;;  %v7912_v48 = vpop.permute.xlu0 %564 }
 0x132   : > { %v7914_v51 = vpop.permute.xlu1 %570  ;;  %v7916_v52 = vpop.permute.xlu0 %568 }
 0x136   : > { %v7918_v55 = vpop.permute.xlu1 %574  ;;  %v7920_v56 = vpop.permute.xlu0 %572 }
 0x13a   : > { %v7922_v57 = vpop.permute.xlu1 %578  ;;  %v7924_v60 = vpop.permute.xlu0 %576 }
 0x13e   : > { %v7926_v61 = vpop.permute.xlu1 %582  ;;  %v7928_v2 = vpop.permute.xlu0 %580 }
 0x13f   : > { %12646 = vst [vmem:[#allocation25_spill] sm:$0xff] %v7926_v61 }
 0x142   : > { %v7930_v5 = vpop.permute.xlu1 %641  ;;  %v7932_v8 = vpop.permute.xlu0 %639 }
 0x143   : > { %12647 = vst [vmem:[#allocation26_spill] sm:$0xff] %v7930_v5  ;;  %12648 = vst [vmem:[#allocation27_spill] sm:$0xff] %v7932_v8 }
 0x146   : > { %v7934_v11 = vpop.permute.xlu1 %645  ;;  %v7936_v16 = vpop.permute.xlu0 %643 }
 0x147   : > { %12649 = vst [vmem:[#allocation28_spill] sm:$0xff] %v7934_v11  ;;  %12650 = vst [vmem:[#allocation29_spill] sm:$0xff] %v7936_v16 }
 0x14a   : > { %v7938_v19 = vpop.permute.xlu1 %649  ;;  %v7940_v23 = vpop.permute.xlu0 %647 }
 0x14b   : > { %12651 = vst [vmem:[#allocation30_spill] sm:$0xff] %v7938_v19  ;;  %12652 = vst [vmem:[#allocation31_spill] sm:$0xff] %v7940_v23 }
 0x14e   : > { %v7942_v26 = vpop.permute.xlu1 %653  ;;  %v7944_v31 = vpop.permute.xlu0 %651 }
 0x14f   : > { %12653 = vst [vmem:[#allocation32_spill] sm:$0xff] %v7942_v26  ;;  %12654 = vst [vmem:[#allocation33_spill] sm:$0xff] %v7944_v31 }
 0x152   : > { %v7946_v34 = vpop.permute.xlu1 %657  ;;  %v7948_v22 = vpop.permute.xlu0 %655 }
 0x153   : > { %12655 = vst [vmem:[#allocation34_spill] sm:$0xff] %v7946_v34  ;;  %12656 = vst [vmem:[#allocation35_spill] sm:$0xff] %v7948_v22  ;;  %v296_v34 = vstv %s295_s16  ;;  %s6613_s16 = sld [smem:[#allocation7 + $0xe]] }
 0x156   : > { %v7950_v61 = vpop.permute.xlu1 %716  ;;  %v7952_v5 = vpop.permute.xlu0 %659 }
 0x157   : > { %12657 = vst [vmem:[#allocation36_spill] sm:$0xff] %v7950_v61  ;;  %12658 = vst [vmem:[#allocation37_spill] sm:$0xff] %v7952_v5  ;;  %v299_v5 = vmul.f32 %v296_v34, %v7634_v0  ;;  %v303_v0 = vmul.f32 %v296_v34, %v7665_v14 }
 0x15a   : > { %v7954_v8 = vpop.permute.xlu1 %720  ;;  %v7956_v11 = vpop.permute.xlu0 %718 }
 0x15b   : > { %12659 = vst [vmem:[#allocation38_spill] sm:$0xff] %v7954_v8  ;;  %12660 = vst [vmem:[#allocation39_spill] sm:$0xff] %v7956_v11  ;;  %v298_v8 = vmul.f32 %v296_v34, %v7643_v4  ;;  %v297_v11 = vmul.f32 %v296_v34, %v7637_v1  ;;  %v355_v1 = vsel %vm353_vm0, %v7794_v29, %v7784_v24 }
 0x15c   : > { %v306_v4 = vmul.f32 %v296_v34, %v7672_v17  ;;  %v360_v17 = vsel %vm353_vm0, %v7810_v38, %v7808_v37 }
 0x15d   : > { %v375_v14 = vadd.f32 %v355_v1, %v298_v8 }
 0x15e   : > { %v7958_v19 = vpop.permute.xlu1 %724  ;;  %v7960_v23 = vpop.permute.xlu0 %722 }
 0x15f   : > { %12661 = vst [vmem:[#allocation40_spill] sm:$0xff] %v7958_v19  ;;  %12662 = vst [vmem:[#allocation41_spill] sm:$0xff] %v7960_v23  ;;  %v300_v19 = vmul.f32 %v296_v34, %v7640_v3  ;;  %v301_v23 = vmul.f32 %v296_v34, %v7655_v10  ;;  %v304_v3 = vmul.f32 %v296_v34, %v7662_v13 }
 0x160   : > { %v305_v10 = vmul.f32 %v296_v34, %v7675_v18 }
 0x162   : > { %v7962_v26 = vpop.permute.xlu1 %728  ;;  %v7964_v31 = vpop.permute.xlu0 %726 }
 0x163   : > { %12663 = vst [vmem:[#allocation42_spill] sm:$0xff] %v7962_v26  ;;  %12664 = vst [vmem:[#allocation43_spill] sm:$0xff] %v7964_v31  ;;  %v356_v26 = vsel %vm353_vm0, %v7784_v24, %v7792_v28  ;;  %v358_v24 = vsel %vm353_vm0, %v7802_v33, %v7800_v32 }
 0x166   : > { %v7966_v22 = vpop.permute.xlu1 %732  ;;  %v7968_v61 = vpop.permute.xlu0 %730 }
 0x167   : > { %12665 = vst [vmem:[#allocation44_spill] sm:$0xff] %v7966_v22  ;;  %12666 = vst [vmem:[#allocation45_spill] sm:$0xff] %v7968_v61  ;;  %v354_v22 = vsel %vm353_vm0, %v7786_v25, %v7794_v29  ;;  %v302_v61 = vmul.f32 %v296_v34, %v7652_v9  ;;  %v357_v25 = vsel %vm353_vm0, %v7792_v28, %v7802_v33 }
 0x168   : > { %v376_v29 = vadd.f32 %v356_v26, %v299_v5  ;;  %v374_v18 = vadd.f32 %v354_v22, %v297_v11  ;;  %v359_v34 = vsel %vm353_vm0, %v7800_v32, %v7810_v38  ;;  %v361_v28 = vsel %vm353_vm0, %v7808_v37, %v7818_v42 }
 0x169   : > { %v362_v33 = vsel %vm353_vm0, %v7818_v42, %v7816_v41  ;;  %v363_v22 = vsel %vm353_vm0, %v7816_v41, %v7826_v46  ;;  %v377_v5 = vadd.f32 %v357_v25, %v300_v19  ;;  %v378_v11 = vadd.f32 %v358_v24, %v301_v23 }
 0x16a   : > { %v7989_v31 = vpop.permute.xlu1 %736  ;;  %v7991_v16 = vpop.permute.xlu0 %734  ;;  %v431_v32 = vsel %vm430_vm1, %v7824_v45, %v7834_v50  ;;  %v432_v38 = vsel %vm430_vm1, %v7834_v50, %v7832_v49  ;;  %v379_v42 = vadd.f32 %v359_v34, %v302_v61  ;;  %v380_v26 = vadd.f32 %v360_v17, %v303_v0 }
 0x16b   : > { %v433_v41 = vsel %vm430_vm1, %v7832_v49, %v7842_v54  ;;  %v434_v45 = vsel %vm430_vm1, %v7842_v54, %v7840_v53  ;;  %v381_v46 = vadd.f32 %v361_v28, %v304_v3  ;;  %v382_v19 = vadd.f32 %v362_v33, %v305_v10 }
 0x16c   : > { %v383_v23 = vadd.f32 %v363_v22, %v306_v4  ;;  %v435_v50 = vsel %vm430_vm1, %v7840_v53, %v7850_v59  ;;  %v451_v1 = vadd.f32 %v431_v32, %v374_v18  ;;  %v452_v25 = vadd.f32 %v432_v38, %v375_v14 }
 0x16d   : > { %v436_v17 = vsel %vm430_vm1, %v7850_v59, %v7848_v58  ;;  %v437_v49 = vsel %vm430_vm1, %v7848_v58, %v7858_v63  ;;  %v453_v61 = vadd.f32 %v433_v41, %v376_v29  ;;  %v454_v0 = vadd.f32 %v434_v45, %v377_v5 }
 0x16e   : > { %v8022_v37 = vpop.permute.xlu1 %795  ;;  %v8024_v8 = vpop.permute.xlu0 %793  ;;  %v438_v3 = vsel %vm430_vm1, %v7858_v63, %v7856_v62  ;;  %v8049_v14 = vstv %s7993_s12  ;;  %v455_v18 = vadd.f32 %v435_v50, %v378_v11  ;;  %v439_v53 = vsel %vm430_vm1, %v7856_v62, %v7866_v7  ;;  %s6614_s12 = sld [smem:[#allocation7 + $0xf]] }
 0x16f   : > { %v440_v54 = vsel %vm430_vm1, %v7866_v7, %v7864_v6  ;;  %v508_v58 = vsel %vm507_vm2, %v7874_v15, %v7872_v12  ;;  %v456_v59 = vadd.f32 %v436_v17, %v379_v42  ;;  %v457_v63 = vadd.f32 %v437_v49, %v380_v26  ;;  %v12667_v49 = vld [vmem:[#allocation25_spill] sm:$0xff] }
 0x170   : > { %v509_v24 = vsel %vm507_vm2, %v7872_v12, %v7882_v21  ;;  %v510_v29 = vsel %vm507_vm2, %v7882_v21, %v7880_v20  ;;  %v458_v34 = vadd.f32 %v438_v3, %v381_v46  ;;  %v511_v62 = vsel %vm507_vm2, %v7880_v20, %v7890_v30 }
 0x171   : > { %v512_v6 = vsel %vm507_vm2, %v7890_v30, %v7888_v27  ;;  %v513_v7 = vsel %vm507_vm2, %v7888_v27, %v7898_v36  ;;  %v459_v15 = vadd.f32 %v439_v53, %v382_v19  ;;  %v460_v28 = vadd.f32 %v440_v54, %v383_v23  ;;  %v12670_v53 = vld [vmem:[#allocation29_spill] sm:$0xff] }
 0x172   : > { %v8044_v4 = vpop.permute.xlu1 %799  ;;  %v8046_v10 = vpop.permute.xlu0 %797  ;;  %v528_v12 = vadd.f32 %v508_v58, %v451_v1  ;;  %v514_v21 = vsel %vm507_vm2, %v7898_v36, %v7896_v35  ;;  %v529_v20 = vadd.f32 %v509_v24, %v452_v25  ;;  %v530_v5 = vadd.f32 %v510_v29, %v453_v61  ;;  %v12668_v61 = vld [vmem:[#allocation26_spill] sm:$0xff]  ;;  %v12672_v24 = vld [vmem:[#allocation31_spill] sm:$0xff] }
 0x173   : > { %v515_v30 = vsel %vm507_vm2, %v7896_v35, %v7904_v40  ;;  %v516_v27 = vsel %vm507_vm2, %v7904_v40, %v7902_v39  ;;  %v531_v11 = vadd.f32 %v511_v62, %v454_v0  ;;  %v532_v32 = vadd.f32 %v512_v6, %v455_v18 }
 0x174   : > { %v533_v38 = vadd.f32 %v513_v7, %v456_v59  ;;  %v517_v36 = vsel %vm507_vm2, %v7902_v39, %v7908_v44  ;;  %v534_v42 = vadd.f32 %v514_v21, %v457_v63  ;;  %v585_v26 = vsel %vm584_vm3, %v7906_v43, %v7912_v48  ;;  %v12671_v63 = vld [vmem:[#allocation28_spill] sm:$0xff] }
 0x175   : > { %v586_v35 = vsel %vm584_vm3, %v7912_v48, %v7910_v47  ;;  %v587_v40 = vsel %vm584_vm3, %v7910_v47, %v7916_v52  ;;  %v535_v41 = vadd.f32 %v515_v30, %v458_v34  ;;  %v536_v45 = vadd.f32 %v516_v27, %v459_v15  ;;  %v12673_v34 = vld [vmem:[#allocation30_spill] sm:$0xff]  ;;  %v12674_v15 = vld [vmem:[#allocation33_spill] sm:$0xff]  ;;  %v12677_v27 = vld [vmem:[#allocation39_spill] sm:$0xff] }
 0x176   : > { %v8078_v33 = vpop.permute.xlu1 %803  ;;  %v8080_v22 = vpop.permute.xlu0 %801  ;;  %v588_v39 = vsel %vm584_vm3, %v7916_v52, %v7914_v51  ;;  %v589_v44 = vsel %vm584_vm3, %v7914_v51, %v7920_v56  ;;  %v537_v19 = vadd.f32 %v517_v36, %v460_v28  ;;  %v590_v48 = vsel %vm584_vm3, %v7920_v56, %v7918_v55 }
 0x177   : > { %v591_v47 = vsel %vm584_vm3, %v7918_v55, %v7924_v60  ;;  %v592_v52 = vsel %vm584_vm3, %v7924_v60, %v7922_v57  ;;  %v605_v23 = vadd.f32 %v585_v26, %v528_v12  ;;  %v606_v50 = vadd.f32 %v586_v35, %v529_v20  ;;  %v12669_v55 = vld [vmem:[#allocation27_spill] sm:$0xff]  ;;  %v12675_v12 = vld [vmem:[#allocation32_spill] sm:$0xff] }
 0x178   : > { %v607_v51 = vadd.f32 %v587_v40, %v530_v5  ;;  %v593_v1 = vsel %vm584_vm3, %v7922_v57, %v7928_v2  ;;  %v608_v25 = vadd.f32 %v588_v39, %v531_v11  ;;  %v609_v17 = vadd.f32 %v589_v44, %v532_v32  ;;  %v12676_v5 = vld [vmem:[#allocation35_spill] sm:$0xff]  ;;  %v12678_v11 = vld [vmem:[#allocation36_spill] sm:$0xff]  ;;  %v12680_v40 = vld [vmem:[#allocation34_spill] sm:$0xff] }
 0x179   : > { %v594_v56 = vsel %vm584_vm3, %v7928_v2, %v12667_v49  ;;  %v662_v0 = vsel %vm661_vm4, %v12669_v55, %v12668_v61  ;;  %v610_v3 = vadd.f32 %v590_v48, %v533_v38  ;;  %v611_v60 = vadd.f32 %v591_v47, %v534_v42  ;;  %v12679_v38 = vld [vmem:[#allocation38_spill] sm:$0xff] }
 0x17a   : > { %v8106_v46 = vpop.permute.xlu1 %807  ;;  %v8108_v43 = vpop.permute.xlu0 %805  ;;  %v612_v18 = vadd.f32 %v592_v52, %v535_v41  ;;  %v663_v54 = vsel %vm661_vm4, %v12668_v61, %v12670_v53  ;;  %v613_v59 = vadd.f32 %v593_v1, %v536_v45  ;;  %v664_v2 = vsel %vm661_vm4, %v12670_v53, %v12671_v63  ;;  %v12684_v61 = vld [vmem:[#allocation43_spill] sm:$0xff]  ;;  %v12685_v55 = vld [vmem:[#allocation42_spill] sm:$0xff] }
 0x17b   : > { %v665_v29 = vsel %vm661_vm4, %v12671_v63, %v12672_v24  ;;  %v666_v62 = vsel %vm661_vm4, %v12672_v24, %v12673_v34  ;;  %v8144_v6 = vadd.f32 %v594_v56, %v537_v19  ;;  %v682_v7 = vadd.f32 %v662_v0, %v605_v23  ;;  %v12683_v56 = vld [vmem:[#allocation40_spill] sm:$0xff] }
 0x17c   : > { %v667_v28 = vsel %vm661_vm4, %v12673_v34, %v12674_v15  ;;  %v668_v21 = vsel %vm661_vm4, %v12674_v15, %v12675_v12  ;;  %v683_v20 = vadd.f32 %v663_v54, %v606_v50  ;;  %v669_v30 = vsel %vm661_vm4, %v12675_v12, %v12676_v5  ;;  %v12686_v34 = vld [vmem:[#allocation45_spill] sm:$0xff]  ;;  %v12687_v12 = vld [vmem:[#allocation44_spill] sm:$0xff] }
 0x17d   : > { %v739_v32 = vsel %vm738_vm5, %v12678_v11, %v12677_v27  ;;  %v740_v36 = vsel %vm738_vm5, %v12677_v27, %v12679_v38  ;;  %v684_v42 = vadd.f32 %v664_v2, %v607_v51  ;;  %v685_v26 = vadd.f32 %v665_v29, %v608_v25  ;;  %v12681_v51 = vld [vmem:[#allocation41_spill] sm:$0xff] }
 0x17e   : > { %v8131_v58 = vpop.permute.xlu1 %811  ;;  %v8133_v57 = vpop.permute.xlu0 %809  ;;  %v686_v35 = vadd.f32 %v666_v62, %v609_v17  ;;  %v670_v41 = vsel %vm661_vm4, %v12676_v5, %v12680_v40  ;;  %v687_v44 = vadd.f32 %v667_v28, %v610_v3  ;;  %v688_v19 = vadd.f32 %v668_v21, %v611_v60  ;;  %v12682_v17 = vld [vmem:[#allocation37_spill] sm:$0xff] }
 0x17f   : > { %v816_v48 = vsel %vm815_vm6, %v8024_v8, %v8022_v37  ;;  %v817_v47 = vsel %vm815_vm6, %v8022_v37, %v8046_v10  ;;  %v689_v52 = vadd.f32 %v669_v30, %v612_v18  ;;  %v759_v23 = vadd.f32 %v739_v32, %v682_v7 }
 0x180   : > { %v760_v50 = vadd.f32 %v740_v36, %v683_v20  ;;  %v741_v1 = vsel %vm738_vm5, %v12679_v38, %v12681_v51  ;;  %v690_v25 = vadd.f32 %v670_v41, %v613_v59  ;;  %v671_v49 = vsel %vm661_vm4, %v12680_v40, %v12682_v17 }
 0x181   : > { %v742_v8 = vsel %vm738_vm5, %v12681_v51, %v12683_v56  ;;  %v743_v37 = vsel %vm738_vm5, %v12683_v56, %v12684_v61  ;;  %v744_v0 = vsel %vm738_vm5, %v12684_v61, %v12685_v55  ;;  %v836_v3 = vadd.f32 %v816_v48, %v759_v23 }
 0x182   : > { %v871_v45 = vpop.permute.xlu1 %870  ;;  %v8164_v39 = vpop.permute.xlu0 %813  ;;  %v818_v60 = vsel %vm815_vm6, %v8046_v10, %v8044_v4  ;;  %v837_v18 = vadd.f32 %v817_v47, %v760_v50  ;;  %v761_v59 = vadd.f32 %v741_v1, %v684_v42  ;;  %v819_v63 = vsel %vm815_vm6, %v8044_v4, %v8080_v22 }
 0x183   : > { %v762_v29 = vadd.f32 %v742_v8, %v685_v26  ;;  %v745_v62 = vsel %vm738_vm5, %v12685_v55, %v12686_v34  ;;  %v763_v10 = vadd.f32 %v743_v37, %v686_v35  ;;  %v764_v28 = vadd.f32 %v744_v0, %v687_v44 }
 0x184   : > { %v746_v21 = vsel %vm738_vm5, %v12686_v34, %v12687_v12  ;;  %v838_v20 = vadd.f32 %v818_v60, %v761_v59  ;;  %v820_v4 = vsel %vm815_vm6, %v8080_v22, %v8078_v33  ;;  %v765_v38 = vadd.f32 %v745_v62, %v688_v19 }
 0x185   : > { %v839_v5 = vadd.f32 %v819_v63, %v762_v29  ;;  %v821_v36 = vsel %vm815_vm6, %v8078_v33, %v8108_v43  ;;  %v747_v44 = vsel %vm738_vm5, %v12687_v12, %v7991_v16  ;;  %v840_v19 = vadd.f32 %v820_v4, %v763_v10 }
 0x186   : > { %v875_v53 = vpop.permute.xlu1 %874  ;;  %v873_v54 = vpop.permute.xlu0 %872  ;;  %v822_v33 = vsel %vm815_vm6, %v8108_v43, %v8106_v46  ;;  %v841_v48 = vadd.f32 %v821_v36, %v764_v28  ;;  %v748_v1 = vsel %vm738_vm5, %v7991_v16, %v7989_v31  ;;  %v823_v43 = vsel %vm815_vm6, %v8106_v46, %v8133_v57 }
 0x187   : > { %v893_v2 = vsel %vm892_vm7, %v871_v45, %v873_v54  ;;  %v894_v24 = vsel %vm892_vm7, %v873_v54, %v875_v53  ;;  %v766_v45 = vadd.f32 %v746_v21, %v689_v52  ;;  %v691_v0 = vadd.f32 %v671_v49, %v8144_v6 }
 0x188   : > { %v913_v7 = vadd.f32 %v893_v2, %v836_v3  ;;  %v914_v15 = vadd.f32 %v894_v24, %v837_v18  ;;  %v767_v3 = vadd.f32 %v747_v44, %v690_v25  ;;  %v842_v16 = vadd.f32 %v822_v33, %v765_v38  ;;  %v8296_v44 = vld [vmem:[%s7615_s30] sm:$0xff] }
 0x189   : > { %v824_v31 = vsel %vm815_vm6, %v8133_v57, %v8131_v58  ;;  %v843_v46 = vadd.f32 %v823_v43, %v766_v45  ;;  %v768_v6 = vadd.f32 %v748_v1, %v691_v0  ;;  %v825_v25 = vsel %vm815_vm6, %v8131_v58, %v8164_v39  ;;  %v12693_v0 = vld [vmem:[#allocation23_spill] sm:$0xff] }
 0x18a   : > { %v879_v30 = vpop.permute.xlu1 %878  ;;  %v877_v27 = vpop.permute.xlu0 %876  ;;  %v8205_v11 = vadd.f32 %v8049_v14, %v913_v7  ;;  %v8208_v32 = vadd.f32 %v8049_v14, %v914_v15  ;;  %v844_v34 = vadd.f32 %v824_v31, %v767_v3  ;;  %v1102_v36 = vstv %s6609_s10  ;;  %s6615_s10 = sld [smem:[#allocation7 + $0x10]] }
 0x18b   : > { %v895_v42 = vsel %vm892_vm7, %v875_v53, %v877_v27  ;;  %v896_v26 = vsel %vm892_vm7, %v877_v27, %v879_v30  ;;  %v845_v62 = vadd.f32 %v825_v25, %v768_v6  ;;  %v1110_v43 = vmul.f32 %v1102_v36, %v7662_v13  ;;  %v8336_v25 = vld [vmem:[%s7615_s30 + $0x18] sm:$0xff] }
 0x18c   : > { %v915_v35 = vadd.f32 %v895_v42, %v838_v20  ;;  %v916_v22 = vadd.f32 %v896_v26, %v839_v5  ;;  %v935_v40 = vmax.f32 %v8205_v11, 0.0  ;;  %v936_v41 = vmax.f32 %v8208_v32, 0.0 }
 0x18d   : > { %v1111_v3 = vmul.f32 %v1102_v36, %v12693_v0 }
 0x18e   : > { %v883_v47 = vpop.permute.xlu1 %882  ;;  %v881_v23 = vpop.permute.xlu0 %880  ;;  %v6941_v50 = vpack.i.bf16 %v936_v41, %v935_v40  ;;  %v8228_v51 = vadd.f32 %v8049_v14, %v915_v35  ;;  %v8231_v52 = vadd.f32 %v8049_v14, %v916_v22  ;;  %v12688_v35 = vld [vmem:[#allocation19_spill] sm:$0xff] }
 0x18f   : > { %v897_v17 = vsel %vm892_vm7, %v879_v30, %v881_v23  ;;  %v898_v56 = vsel %vm892_vm7, %v881_v23, %v883_v47  ;;  %v1104_v22 = vmul.f32 %v1102_v36, %v12688_v35  ;;  %v1108_v23 = vmul.f32 %v1102_v36, %v7652_v9 }
 0x190   : > { %v917_v8 = vadd.f32 %v897_v17, %v840_v19  ;;  %v918_v61 = vadd.f32 %v898_v56, %v841_v48  ;;  %6942 = vrot.lane.b32.xlu0 %v6941_v50, %s7439_s29  ;;  %v937_v37 = vmax.f32 %v8228_v51, 0.0  ;;  %v938_v55 = vmax.f32 %v8231_v52, 0.0  ;;  %v8303_v48 = vld [vmem:[%s7615_s30 + $0x10] sm:$0xff]  ;;  %v12691_v17 = vld [vmem:[#allocation21_spill] sm:$0xff] }
 0x191   : > { %v1103_v19 = vmul.f32 %v8296_v44, %v1102_v36  ;;  %v12690_v50 = vld [vmem:[#allocation20_spill] sm:$0xff]  ;;  %v1109_v56 = vmul.f32 %v1102_v36, %v12691_v17  ;;  %v1178_v9 = vstv %s6610_s13  ;;  %s6616_s13 = sld [smem:[#allocation7 + $0x11]] }
 0x192   : > { %v887_v60 = vpop.permute.xlu1 %886  ;;  %v885_v18 = vpop.permute.xlu0 %884  ;;  %v6946_v53 = vpack.i.bf16 %v938_v55, %v937_v37  ;;  %v8253_v54 = vadd.f32 %v8049_v14, %v917_v8  ;;  %v8256_v59 = vadd.f32 %v8049_v14, %v918_v61  ;;  %v1107_v1 = vmul.f32 %v1102_v36, %v12690_v50  ;;  %v12692_v8 = vld [vmem:[#allocation22_spill] sm:$0xff]  ;;  %v5043_v17 = vld [vmem:[#allocation10] sm:$0xff] }
 0x193   : > { %v899_v57 = vsel %vm892_vm7, %v883_v47, %v885_v18  ;;  %v900_v49 = vsel %vm892_vm7, %v885_v18, %v887_v60  ;;  %v1105_v47 = vmul.f32 %v8303_v48, %v1102_v36  ;;  %v1112_v61 = vmul.f32 %v1102_v36, %v12692_v8 }
 0x194   : > { %v919_v63 = vadd.f32 %v899_v57, %v842_v16  ;;  %v920_v2 = vadd.f32 %v900_v49, %v843_v46  ;;  %6947 = vrot.lane.b32.xlu1 %v6946_v53, %s7439_s29  ;;  %v939_v24 = vmax.f32 %v8253_v54, 0.0  ;;  %v940_v29 = vmax.f32 %v8256_v59, 0.0  ;;  %v12694_v16 = vld [vmem:[#allocation24_spill] sm:$0xff]  ;;  %v8331_v53 = vld [vmem:[%s7615_s30 + $0x20] sm:$0xff] }
 0x195   : > { %v1179_v13 = vmul.f32 %v8296_v44, %v1178_v9  ;;  %v1113_v31 = vmul.f32 %v1102_v36, %v12694_v16  ;;  %v1181_v46 = vmul.f32 %v8303_v48, %v1178_v9  ;;  %v1183_v6 = vmul.f32 %v8331_v53, %v1178_v9  ;;  %v8341_v49 = vld [vmem:[%s7615_s30 + $0x30] sm:$0xff]  ;;  %v5068_v16 = vld [vmem:[#allocation10 + $0xc8] sm:$0x11] }
 0x196   : > { %v891_v7 = vpop.permute.xlu1 %890  ;;  %v889_v15 = vpop.permute.xlu0 %888  ;;  %v6951_v58 = vpack.i.bf16 %v940_v29, %v939_v24  ;;  %v8271_v39 = vadd.f32 %v8049_v14, %v919_v63  ;;  %v8274_v10 = vadd.f32 %v8049_v14, %v920_v2  ;;  %v1182_v57 = vmul.f32 %v8336_v25, %v1178_v9  ;;  %v8346_v2 = vld [vmem:[%s7615_s30 + $0x28] sm:$0xff] }
 0x197   : > { %v901_v28 = vsel %vm892_vm7, %v887_v60, %v889_v15  ;;  %v902_v12 = vsel %vm892_vm7, %v889_v15, %v891_v7  ;;  %v8326_v60 = vld [vmem:[%s7615_s30 + $0x8] sm:$0xff]  ;;  %v1185_v63 = vmul.f32 %v8341_v49, %v1178_v9  ;;  %v8356_v15 = vld [vmem:[%s7615_s30 + $0x38] sm:$0xff] }
 0x198   : > { %v921_v21 = vadd.f32 %v901_v28, %v844_v34  ;;  %v922_v20 = vadd.f32 %v902_v12, %v845_v62  ;;  %6952 = vrot.lane.b32.xlu0 %v6951_v58, %s7439_s29  ;;  %v941_v4 = vmax.f32 %v8271_v39, 0.0  ;;  %v942_v5 = vmax.f32 %v8274_v10, 0.0  ;;  %v8351_v62 = vld [vmem:[%s7615_s30 + $0x40] sm:$0xff]  ;;  %v8361_v28 = vld [vmem:[%s7615_s30 + $0x50] sm:$0xff] }
 0x199   : > { %v1180_v18 = vmul.f32 %v8326_v60, %v1178_v9  ;;  %v1184_v34 = vmul.f32 %v8346_v2, %v1178_v9  ;;  %v1187_v7 = vmul.f32 %v8351_v62, %v1178_v9  ;;  %v1186_v58 = vmul.f32 %v8356_v15, %v1178_v9 }
 0x19a   : > { %v6956_v30 = vpack.i.bf16 %v942_v5, %v941_v4  ;;  %v8286_v27 = vadd.f32 %v8049_v14, %v921_v21  ;;  %v934_v38 = vadd.f32 %v8049_v14, %v922_v20  ;;  %v12689_v14 = vld [vmem:[#allocation18_spill] sm:$0xff]  ;;  %v1189_v12 = vmul.f32 %v8361_v28, %v1178_v9 }
 0x19b   : > { %v1106_v33 = vmul.f32 %v1102_v36, %v12689_v14  ;;  %v1254_v21 = vstv %s6611_s26  ;;  %v8366_v20 = vld [vmem:[%s7615_s30 + $0x48] sm:$0xff]  ;;  %s6608_s26 = sld [smem:[#allocation7 + $0x9]] }
 0x19c   : > { %6957 = vrot.lane.b32.xlu1 %v6956_v30, %s7439_s29  ;;  %v943_v42 = vmax.f32 %v8286_v27, 0.0  ;;  %v944_v26 = vmax.f32 %v934_v38, 0.0  ;;  %v1188_v30 = vmul.f32 %v8366_v20, %v1178_v9  ;;  %v1256_v38 = vmul.f32 %v8326_v60, %v1254_v21 }
 0x19d   : > { %v1255_v36 = vmul.f32 %v8296_v44, %v1254_v21  ;;  %v1257_v35 = vmul.f32 %v8303_v48, %v1254_v21  ;;  %v1261_v14 = vmul.f32 %v8341_v49, %v1254_v21 }
 0x19e   : > { %v6961_v45 = vpack.i.bf16 %v944_v26, %v943_v42  ;;  %v1258_v26 = vmul.f32 %v8336_v25, %v1254_v21 }
 0x1a0   : > { %6962 = vrot.lane.b32.xlu0 %v6961_v45, %s7439_s29  ;;  %1127 = vrot.lane.b32.xlu1 %v1104_v22, %s7439_s29  ;;  %v1260_v22 = vmul.f32 %v8346_v2, %v1254_v21  ;;  %v1259_v45 = vmul.f32 %v8331_v53, %v1254_v21 }
 0x1a4   : > { %1125 = vrot.lane.b32.xlu0 %v1103_v19, %s7439_s29  ;;  %1131 = vrot.lane.b32.xlu1 %v1106_v33, %s7439_s29  ;;  %v1262_v19 = vmul.f32 %v8356_v15, %v1254_v21  ;;  %v1264_v33 = vmul.f32 %v8366_v20, %v1254_v21 }
 0x1a8   : > { %1129 = vrot.lane.b32.xlu0 %v1105_v47, %s7439_s29  ;;  %1135 = vrot.lane.b32.xlu1 %v1108_v23, %s7439_s29  ;;  %v8387_v47 = vstv %s6612_s24  ;;  %v1263_v23 = vmul.f32 %v8351_v62, %v1254_v21  ;;  %s8823_s24 = sld [smem:[#allocation8 + $0x1]] }
 0x1a9   : > { %v1331_v50 = vmul.f32 %v8296_v44, %v8387_v47  ;;  %v1332_v39 = vmul.f32 %v8326_v60, %v8387_v47  ;;  %v1333_v10 = vmul.f32 %v8303_v48, %v8387_v47  ;;  %v1335_v27 = vmul.f32 %v8331_v53, %v8387_v47 }
 0x1ac   : > { %1133 = vrot.lane.b32.xlu0 %v1107_v1, %s7439_s29  ;;  %1139 = vrot.lane.b32.xlu1 %v1110_v43, %s7439_s29  ;;  %v1265_v1 = vmul.f32 %v8361_v28, %v1254_v21  ;;  %v8410_v21 = vld [vmem:[#allocation10 + $0xd0] sm:$0x11] }
 0x1b0   : > { %1137 = vrot.lane.b32.xlu0 %v1109_v56, %s7439_s29  ;;  %1143 = vrot.lane.b32.xlu1 %v1112_v61, %s7439_s29  ;;  %v5067_v56 = vld [vmem:[#allocation10 + $0xc0] sm:$0x11] }
 0x1b1   : > { %v6728_v9 = vcombine.high %v5043_v17, %v5067_v56  ;;  %v6727_v0 = vcombine.low %v5043_v17, %v5067_v56 }
 0x1b3   : > { %5520 = vmatprep.subr.bf16.mxu0 %v6728_v9 }
 0x1b4   : > { %1141 = vrot.lane.b32.xlu0 %v1111_v3, %s7439_s29  ;;  %1201 = vrot.lane.b32.xlu1 %v1179_v13, %s7440_s14  ;;  %v5044_v13 = vld [vmem:[#allocation10 + $0x8] sm:$0xff] }
 0x1b5   : > { %5521 = vmatpush1.bf16.xpose.msra.mxu0 %v6727_v0 }
 0x1b8   : > { %1145 = vrot.lane.b32.xlu0 %v1113_v31, %s7439_s29  ;;  %1205 = vrot.lane.b32.xlu1 %v1181_v46, %s7440_s14 }
 0x1bc   : > { %1203 = vrot.lane.b32.xlu0 %v1180_v18, %s7440_s14  ;;  %1209 = vrot.lane.b32.xlu1 %v1183_v6, %s7440_s14  ;;  %v6730_v6 = vcombine.high %v5044_v13, %v5068_v16 }
 0x1be   : > { %5560 = vmatprep.subr.bf16.mxu1 %v6730_v6 }
 0x1c0   : > { %1207 = vrot.lane.b32.xlu0 %v1182_v57, %s7440_s14  ;;  %1213 = vrot.lane.b32.xlu1 %v1185_v63, %s7440_s14  ;;  %v6729_v57 = vcombine.low %v5044_v13, %v5068_v16  ;;  %v1336_v13 = vmul.f32 %v8346_v2, %v8387_v47  ;;  %v1337_v16 = vmul.f32 %v8341_v49, %v8387_v47 }
 0x1c2   : > { %5561 = vmatpush1.bf16.xpose.msra.mxu1 %v6729_v57  ;;  %v1340_v57 = vmul.f32 %v8366_v20, %v8387_v47 }
 0x1c4   : > { %1211 = vrot.lane.b32.xlu0 %v1184_v34, %s7440_s14  ;;  %1217 = vrot.lane.b32.xlu1 %v1187_v7, %s7440_s14 }
 0x1c8   : > { %1215 = vrot.lane.b32.xlu0 %v1186_v58, %s7440_s14  ;;  %1221 = vrot.lane.b32.xlu1 %v1189_v12, %s7440_s14  ;;  %v8408_v12 = vld [vmem:[#allocation10 + $0x10] sm:$0xff] }
 0x1cc   : > { %1219 = vrot.lane.b32.xlu0 %v1188_v30, %s7440_s14  ;;  %1279 = vrot.lane.b32.xlu1 %v1256_v38, %s7441_s17 }
 0x1d0   : > { %1277 = vrot.lane.b32.xlu0 %v1255_v36, %s7441_s17  ;;  %1283 = vrot.lane.b32.xlu1 %v1258_v26, %s7441_s17  ;;  %v6732_v26 = vcombine.high %v8408_v12, %v8410_v21 }
 0x1d2   : > { %5600 = vmatprep.subr.bf16.mxu0 %v6732_v26 }
 0x1d4   : > { %1281 = vrot.lane.b32.xlu0 %v1257_v35, %s7441_s17  ;;  %1287 = vrot.lane.b32.xlu1 %v1260_v22, %s7441_s17 }
 0x1d8   : > { %1285 = vrot.lane.b32.xlu0 %v1259_v45, %s7441_s17  ;;  %1291 = vrot.lane.b32.xlu1 %v1262_v19, %s7441_s17  ;;  %v8429_v45 = vld [vmem:[#allocation10 + $0x18] sm:$0xff] }
 0x1d9   : > { %v8431_v19 = vld [vmem:[#allocation10 + $0xd8] sm:$0x11] }
 0x1da   : > { %v6734_v51 = vcombine.high %v8429_v45, %v8431_v19 }
 0x1dc   : > { %1289 = vrot.lane.b32.xlu0 %v1261_v14, %s7441_s17  ;;  %1295 = vrot.lane.b32.xlu1 %v1264_v33, %s7441_s17 }
 0x1dd   : > { %5640 = vmatprep.subr.bf16.mxu1 %v6734_v51 }
 0x1e0   : > { %1293 = vrot.lane.b32.xlu0 %v1263_v23, %s7441_s17  ;;  %1353 = vrot.lane.b32.xlu1 %v1331_v50, %s7442_s9 }
 0x1e4   : > { %1297 = vrot.lane.b32.xlu0 %v1265_v1, %s7441_s17 }
 0x202   : > { %v6943_v43 = vpop.permute.xlu0 %6942 }
 0x203   : > { %v6945_v8 = vunpack.i.h.bf16 %v6943_v43  ;;  %v6944_v61 = vunpack.i.l.bf16 %v6943_v43 }
 0x205   : > { %v975_v31 = vsel %vm353_vm0, %v6944_v61, %v6945_v8 }
 0x206   : > { %v6948_v3 = vpop.permute.xlu1 %6947  ;;  %v8402_v34 = vmax.f32 %v935_v40, %v975_v31 }
 0x207   : > { %v6950_v46 = vunpack.i.h.bf16 %v6948_v3  ;;  %v6949_v18 = vunpack.i.l.bf16 %v6948_v3 }
 0x209   : > { %v976_v63 = vsel %vm353_vm0, %v6945_v8, %v6949_v18  ;;  %v977_v30 = vsel %vm353_vm0, %v6949_v18, %v6950_v46  ;;  %v1339_v18 = vmul.f32 %v8351_v62, %v8387_v47 }
 0x20a   : > { %v8406_v7 = vmax.f32 %v936_v41, %v976_v63  ;;  %v6953_v58 = vpop.permute.xlu0 %6952  ;;  %v8422_v41 = vmax.f32 %v937_v37, %v977_v30  ;;  %v1341_v63 = vmul.f32 %v8361_v28, %v8387_v47 }
 0x20b   : > { %v6955_v38 = vunpack.i.h.bf16 %v6953_v58  ;;  %v6954_v36 = vunpack.i.l.bf16 %v6953_v58  ;;  %v1406_v58 = vstv %s6613_s16  ;;  %s6627_s16 = sld [smem:[#allocation7 + $0x17]] }
 0x20c   : > { %v6966_v11 = vpack.i.bf16 %v8406_v7, %v8402_v34  ;;  %v1408_v26 = vmul.f32 %v8326_v60, %v1406_v58 }
 0x20d   : > { %v978_v40 = vsel %vm353_vm0, %v6950_v46, %v6954_v36  ;;  %v979_v14 = vsel %vm353_vm0, %v6954_v36, %v6955_v38  ;;  %v1338_v46 = vmul.f32 %v8356_v15, %v8387_v47  ;;  %v1407_v36 = vmul.f32 %v8296_v44, %v1406_v58 }
 0x20e   : > { %v8426_v35 = vmax.f32 %v938_v55, %v978_v40  ;;  %v6958_v22 = vpop.permute.xlu1 %6957  ;;  %6967 = vrot.lane.b32.xlu1 %v6966_v11, %s7441_s17  ;;  %v8443_v50 = vmax.f32 %v939_v24, %v979_v14  ;;  %v1410_v40 = vmul.f32 %v8336_v25, %v1406_v58  ;;  %v1411_v14 = vmul.f32 %v8331_v53, %v1406_v58 }
 0x20f   : > { %v6960_v33 = vunpack.i.h.bf16 %v6958_v22  ;;  %v6959_v23 = vunpack.i.l.bf16 %v6958_v22 }
 0x210   : > { %v6971_v37 = vpack.i.bf16 %v8426_v35, %v8422_v41 }
 0x211   : > { %v980_v55 = vsel %vm353_vm0, %v6955_v38, %v6959_v23  ;;  %v981_v17 = vsel %vm353_vm0, %v6959_v23, %v6960_v33 }
 0x212   : > { %v8447_v1 = vmax.f32 %v940_v29, %v980_v55  ;;  %v6963_v43 = vpop.permute.xlu0 %6962  ;;  %6972 = vrot.lane.b32.xlu0 %v6971_v37, %s7441_s17  ;;  %v8457_v24 = vmax.f32 %v941_v4, %v981_v17  ;;  %v8474_v4 = vpop.permute.xlu1 %1127  ;;  %v1413_v37 = vmul.f32 %v8341_v49, %v1406_v58  ;;  %v1414_v55 = vmul.f32 %v8356_v15, %v1406_v58 }
 0x213   : > { %v6965_v56 = vunpack.i.h.bf16 %v6963_v43  ;;  %v6964_v8 = vunpack.i.l.bf16 %v6963_v43  ;;  %v1415_v17 = vmul.f32 %v8351_v62, %v1406_v58 }
 0x214   : > { %v6976_v61 = vpack.i.bf16 %v8447_v1, %v8443_v50 }
 0x215   : > { %v982_v9 = vsel %vm353_vm0, %v6960_v33, %v6964_v8  ;;  %v983_v54 = vsel %vm353_vm0, %v6964_v8, %v6965_v56  ;;  %v1412_v33 = vmul.f32 %v8346_v2, %v1406_v58  ;;  %v1416_v56 = vmul.f32 %v8366_v20, %v1406_v58 }
 0x216   : > { %v8461_v59 = vmax.f32 %v942_v5, %v982_v9  ;;  %6977 = vrot.lane.b32.xlu1 %v6976_v61, %s7441_s17  ;;  %v1001_v0 = vmax.f32 %v943_v42, %v983_v54  ;;  %v1334_v5 = vmul.f32 %v8336_v25, %v8387_v47  ;;  %v8482_v42 = vpop.permute.xlu0 %1125  ;;  %v8484_v3 = vpop.permute.xlu1 %1131  ;;  %v1409_v47 = vmul.f32 %v8303_v48, %v1406_v58 }
 0x217   : > { %v1482_v8 = vstv %s6614_s12  ;;  %v1417_v9 = vmul.f32 %v8361_v28, %v1406_v58  ;;  %s6628_s12 = sld [smem:[#allocation7 + $0x18]] }
 0x218   : > { %v6981_v29 = vpack.i.bf16 %v8461_v59, %v8457_v24  ;;  %v1483_v54 = vmul.f32 %v8296_v44, %v1482_v8  ;;  %v1490_v58 = vmul.f32 %v8356_v15, %v1482_v8 }
 0x21a   : > { %6982 = vrot.lane.b32.xlu0 %v6981_v29, %s7441_s17  ;;  %1027 = vrot.lane.b32.xlu1 %v1001_v0, %s7441_s17  ;;  %v8492_v31 = vpop.permute.xlu0 %1129  ;;  %v8500_v6 = vpop.permute.xlu1 %1135 }
 0x21e   : > { %1355 = vrot.lane.b32.xlu0 %v1332_v39, %s7442_s9  ;;  %1357 = vrot.lane.b32.xlu1 %v1333_v10, %s7442_s9  ;;  %v8508_v30 = vpop.permute.xlu0 %1133  ;;  %v8510_v38 = vpop.permute.xlu1 %1139  ;;  %v1484_v39 = vmul.f32 %v8326_v60, %v1482_v8  ;;  %v1485_v10 = vmul.f32 %v8303_v48, %v1482_v8 }
 0x222   : > { %1359 = vrot.lane.b32.xlu0 %v1334_v5, %s7442_s9  ;;  %1361 = vrot.lane.b32.xlu1 %v1335_v27, %s7442_s9  ;;  %v8516_v11 = vpop.permute.xlu0 %1137  ;;  %v8522_v22 = vpop.permute.xlu1 %1143  ;;  %v1486_v27 = vmul.f32 %v8336_v25, %v1482_v8 }
 0x226   : > { %1363 = vrot.lane.b32.xlu0 %v1336_v13, %s7442_s9  ;;  %1365 = vrot.lane.b32.xlu1 %v1337_v16, %s7442_s9  ;;  %v8528_v23 = vpop.permute.xlu0 %1141  ;;  %v8530_v51 = vpop.permute.xlu1 %1201  ;;  %v1487_v13 = vmul.f32 %v8331_v53, %v1482_v8 }
 0x22a   : > { %1367 = vrot.lane.b32.xlu0 %v1338_v46, %s7442_s9  ;;  %1369 = vrot.lane.b32.xlu1 %v1339_v18, %s7442_s9  ;;  %v8536_v43 = vpop.permute.xlu0 %1145  ;;  %v8542_v61 = vpop.permute.xlu1 %1205  ;;  %v1488_v46 = vmul.f32 %v8346_v2, %v1482_v8  ;;  %v1489_v18 = vmul.f32 %v8341_v49, %v1482_v8 }
 0x22e   : > { %1371 = vrot.lane.b32.xlu0 %v1340_v57, %s7442_s9  ;;  %1373 = vrot.lane.b32.xlu1 %v1341_v63, %s7442_s9  ;;  %v8548_v29 = vpop.permute.xlu0 %1203  ;;  %v8550_v0 = vpop.permute.xlu1 %1209 }
 0x232   : > { %1429 = vrot.lane.b32.xlu0 %v1407_v36, %s7443_s8  ;;  %1431 = vrot.lane.b32.xlu1 %v1408_v26, %s7443_s8  ;;  %v8556_v5 = vpop.permute.xlu0 %1207  ;;  %v8562_v16 = vpop.permute.xlu1 %1213  ;;  %v1491_v36 = vmul.f32 %v8351_v62, %v1482_v8 }
 0x236   : > { %1433 = vrot.lane.b32.xlu0 %v1409_v47, %s7443_s8  ;;  %1435 = vrot.lane.b32.xlu1 %v1410_v40, %s7443_s8  ;;  %v8568_v57 = vpop.permute.xlu0 %1211  ;;  %v8570_v63 = vpop.permute.xlu1 %1217  ;;  %v1492_v47 = vmul.f32 %v8366_v20, %v1482_v8  ;;  %v1493_v40 = vmul.f32 %v8361_v28, %v1482_v8 }
 0x23a   : > { %1437 = vrot.lane.b32.xlu0 %v1411_v14, %s7443_s8  ;;  %1439 = vrot.lane.b32.xlu1 %v1412_v33, %s7443_s8  ;;  %v8576_v26 = vpop.permute.xlu0 %1215  ;;  %v1558_v14 = vstv %s6615_s10  ;;  %v8582_v33 = vpop.permute.xlu1 %1221  ;;  %s6623_s10 = sld [smem:[#allocation7 + $0x13]] }
 0x23b   : > { %v1561_v8 = vmul.f32 %v8303_v48, %v1558_v14 }
 0x23e   : > { %1441 = vrot.lane.b32.xlu0 %v1413_v37, %s7443_s8  ;;  %1443 = vrot.lane.b32.xlu1 %v1414_v55, %s7443_s8  ;;  %v1559_v37 = vmul.f32 %v8296_v44, %v1558_v14  ;;  %v1560_v55 = vmul.f32 %v8326_v60, %v1558_v14 }
 0x242   : > { %1445 = vrot.lane.b32.xlu0 %v1415_v17, %s7443_s8  ;;  %1447 = vrot.lane.b32.xlu1 %v1416_v56, %s7443_s8  ;;  %v8588_v17 = vpop.permute.xlu0 %1219  ;;  %v8590_v56 = vpop.permute.xlu1 %1279 }
 0x246   : > { %1449 = vrot.lane.b32.xlu0 %v1417_v9, %s7443_s8  ;;  %1505 = vrot.lane.b32.xlu1 %v1483_v54, %s7444_s15  ;;  %v1562_v9 = vmul.f32 %v8336_v25, %v1558_v14  ;;  %v8596_v54 = vpop.permute.xlu0 %1277 }
 0x24a   : > { %1507 = vrot.lane.b32.xlu0 %v1484_v39, %s7444_s15  ;;  %1509 = vrot.lane.b32.xlu1 %v1485_v10, %s7444_s15  ;;  %v1563_v39 = vmul.f32 %v8331_v53, %v1558_v14  ;;  %v1564_v10 = vmul.f32 %v8346_v2, %v1558_v14 }
 0x24e   : > { %1511 = vrot.lane.b32.xlu0 %v1486_v27, %s7444_s15  ;;  %1513 = vrot.lane.b32.xlu1 %v1487_v13, %s7444_s15  ;;  %v8602_v27 = vpop.permute.xlu1 %1283  ;;  %v1565_v13 = vmul.f32 %v8341_v49, %v1558_v14 }
 0x24f   : > { %12695 = vst [vmem:[#allocation25_spill] sm:$0xff] %v8602_v27 }
 0x252   : > { %1515 = vrot.lane.b32.xlu0 %v1488_v46, %s7444_s15  ;;  %1517 = vrot.lane.b32.xlu1 %v1489_v18, %s7444_s15  ;;  %v1566_v46 = vmul.f32 %v8356_v15, %v1558_v14  ;;  %v8608_v18 = vpop.permute.xlu0 %1281 }
 0x253   : > { %12696 = vst [vmem:[#allocation26_spill] sm:$0xff] %v8608_v18 }
 0x256   : > { %1519 = vrot.lane.b32.xlu0 %v1490_v58, %s7444_s15  ;;  %1521 = vrot.lane.b32.xlu1 %v1491_v36, %s7444_s15  ;;  %v8610_v58 = vpop.permute.xlu1 %1287  ;;  %v1567_v36 = vmul.f32 %v8351_v62, %v1558_v14 }
 0x257   : > { %12697 = vst [vmem:[#allocation27_spill] sm:$0xff] %v8610_v58 }
 0x25a   : > { %1523 = vrot.lane.b32.xlu0 %v1492_v47, %s7444_s15  ;;  %1525 = vrot.lane.b32.xlu1 %v1493_v40, %s7444_s15  ;;  %v1568_v47 = vmul.f32 %v8366_v20, %v1558_v14  ;;  %v1634_v40 = vstv %s6616_s13  ;;  %s6624_s13 = sld [smem:[#allocation7 + $0x14]] }
 0x25b   : > { %v1641_v52 = vmul.f32 %v8341_v49, %v1634_v40 }
 0x25e   : > { %1581 = vrot.lane.b32.xlu0 %v1559_v37, %s7445_s28  ;;  %1583 = vrot.lane.b32.xlu1 %v1560_v55, %s7445_s28  ;;  %v8616_v37 = vpop.permute.xlu0 %1285  ;;  %v1569_v55 = vmul.f32 %v8361_v28, %v1558_v14  ;;  %v1638_v14 = vmul.f32 %v8336_v25, %v1634_v40 }
 0x25f   : > { %12698 = vst [vmem:[#allocation29_spill] sm:$0xff] %v8616_v37 }
 0x262   : > { %1585 = vrot.lane.b32.xlu0 %v1561_v8, %s7445_s28  ;;  %1587 = vrot.lane.b32.xlu1 %v1562_v9, %s7445_s28  ;;  %v1635_v8 = vmul.f32 %v8296_v44, %v1634_v40  ;;  %v8622_v9 = vpop.permute.xlu1 %1291 }
 0x263   : > { %12699 = vst [vmem:[#allocation28_spill] sm:$0xff] %v8622_v9 }
 0x266   : > { %1589 = vrot.lane.b32.xlu0 %v1563_v39, %s7445_s28  ;;  %1591 = vrot.lane.b32.xlu1 %v1564_v10, %s7445_s28  ;;  %v1636_v39 = vmul.f32 %v8326_v60, %v1634_v40  ;;  %v1637_v10 = vmul.f32 %v8303_v48, %v1634_v40 }
 0x26a   : > { %1593 = vrot.lane.b32.xlu0 %v1565_v13, %s7445_s28  ;;  %1595 = vrot.lane.b32.xlu1 %v1566_v46, %s7445_s28  ;;  %v8628_v13 = vpop.permute.xlu0 %1289  ;;  %v8630_v46 = vpop.permute.xlu1 %1295 }
 0x26b   : > { %12700 = vst [vmem:[#allocation31_spill] sm:$0xff] %v8628_v13  ;;  %12701 = vst [vmem:[#allocation30_spill] sm:$0xff] %v8630_v46 }
 0x26e   : > { %1597 = vrot.lane.b32.xlu0 %v1567_v36, %s7445_s28  ;;  %1599 = vrot.lane.b32.xlu1 %v1568_v47, %s7445_s28  ;;  %v1639_v36 = vmul.f32 %v8331_v53, %v1634_v40  ;;  %v8636_v47 = vpop.permute.xlu0 %1293 }
 0x26f   : > { %12702 = vst [vmem:[#allocation33_spill] sm:$0xff] %v8636_v47 }
 0x272   : > { %1601 = vrot.lane.b32.xlu0 %v1569_v55, %s7445_s28  ;;  %1657 = vrot.lane.b32.xlu1 %v1635_v8, %s7446_s11  ;;  %v8640_v55 = vpop.permute.xlu1 %1353  ;;  %v1640_v8 = vmul.f32 %v8346_v2, %v1634_v40  ;;  %v8648_v32 = vpop.permute.xlu0 %1297 }
 0x273   : > { %12703 = vst [vmem:[#allocation32_spill] sm:$0xff] %v8640_v55  ;;  %12704 = vst [vmem:[#allocation35_spill] sm:$0xff] %v8648_v32  ;;  %v1645_v55 = vmul.f32 %v8361_v28, %v1634_v40 }
 0x276   : > { %1659 = vrot.lane.b32.xlu0 %v1636_v39, %s7446_s11  ;;  %1661 = vrot.lane.b32.xlu1 %v1637_v10, %s7446_s11  ;;  %v1642_v39 = vmul.f32 %v8356_v15, %v1634_v40  ;;  %v1643_v10 = vmul.f32 %v8351_v62, %v1634_v40 }
 0x27a   : > { %1663 = vrot.lane.b32.xlu0 %v1638_v14, %s7446_s11  ;;  %1665 = vrot.lane.b32.xlu1 %v1639_v36, %s7446_s11  ;;  %v1644_v36 = vmul.f32 %v8366_v20, %v1634_v40 }
 0x27e   : > { %1667 = vrot.lane.b32.xlu0 %v1640_v8, %s7446_s11  ;;  %1669 = vrot.lane.b32.xlu1 %v1641_v52, %s7446_s11 }
 0x280   : > { %v6968_v46 = vpop.permute.xlu1 %6967 }
 0x281   : > { %v6970_v14 = vunpack.i.h.bf16 %v6968_v46  ;;  %v6969_v47 = vunpack.i.l.bf16 %v6968_v46 }
 0x282   : > { %1671 = vrot.lane.b32.xlu0 %v1642_v39, %s7446_s11  ;;  %1673 = vrot.lane.b32.xlu1 %v1643_v10, %s7446_s11 }
 0x283   : > { %v1029_v52 = vsel %vm507_vm2, %v6969_v47, %v6970_v14 }
 0x284   : > { %v6973_v8 = vpop.permute.xlu0 %6972  ;;  %v1045_v46 = vmax.f32 %v8402_v34, %v1029_v52 }
 0x285   : > { %v6975_v9 = vunpack.i.h.bf16 %v6973_v8  ;;  %v6974_v13 = vunpack.i.l.bf16 %v6973_v8 }
 0x286   : > { %1675 = vrot.lane.b32.xlu0 %v1644_v36, %s7446_s11  ;;  %1677 = vrot.lane.b32.xlu1 %v1645_v55, %s7446_s11  ;;  %v6803_v27 = vpack.c.bf16 %v1045_v46, %v1045_v46 }
 0x287   : > { %v1030_v32 = vsel %vm507_vm2, %v6970_v14, %v6974_v13  ;;  %v1031_v58 = vsel %vm507_vm2, %v6974_v13, %v6975_v9 }
 0x288   : > { %v6978_v39 = vpop.permute.xlu1 %6977  ;;  %v1046_v10 = vmax.f32 %v8406_v7, %v1030_v32  ;;  %v1047_v8 = vmax.f32 %v8422_v41, %v1031_v58  ;;  %v12705_v7 = vcombine.low %v8408_v12, %v8410_v21 }
 0x289   : > { %v6980_v37 = vunpack.i.h.bf16 %v6978_v39  ;;  %v6979_v28 = vunpack.i.l.bf16 %v6978_v39 }
 0x28a   : > { %v6804_v40 = vpack.c.bf16 %v1046_v10, %v1046_v10 }
 0x28b   : > { %v1032_v47 = vsel %vm507_vm2, %v6975_v9, %v6979_v28  ;;  %v1033_v36 = vsel %vm507_vm2, %v6979_v28, %v6980_v37  ;;  %v6805_v9 = vpack.c.bf16 %v1047_v8, %v1047_v8 }
 0x28c   : > { %v6983_v55 = vpop.permute.xlu0 %6982  ;;  %v1028_v18 = vpop.permute.xlu1 %1027  ;;  %5538 = vmatprep.mubr.bf16.mxu0 %v6804_v40  ;;  %v1048_v34 = vmax.f32 %v8426_v35, %v1032_v47  ;;  %v1049_v58 = vmax.f32 %v8443_v50, %v1033_v36 }
 0x28d   : > { %v6985_v14 = vunpack.i.h.bf16 %v6983_v55  ;;  %v6984_v52 = vunpack.i.l.bf16 %v6983_v55  ;;  %5539 = vmatmul.mubr.bf16.vlgmr.msra.gmra.mxu0 %v6803_v27  ;;  %v12706_v27 = vcombine.low %v8429_v45, %v8431_v19 }
 0x28e   : > { %5601 = vmatpush1.bf16.xpose.msra.mxu0 %v12705_v7  ;;  %v6806_v32 = vpack.c.bf16 %v1048_v34, %v1048_v34 }
 0x28f   : > { %v1036_v13 = vsel %vm507_vm2, %v6985_v14, %v1028_v18  ;;  %v1034_v41 = vsel %vm507_vm2, %v6980_v37, %v6984_v52  ;;  %v1035_v46 = vsel %vm507_vm2, %v6984_v52, %v6985_v14  ;;  %v6807_v37 = vpack.c.bf16 %v1049_v58, %v1049_v58 }
 0x290   : > { %v1052_v39 = vmax.f32 %v8461_v59, %v1036_v13  ;;  %v8673_v35 = vpop.permute.xlu0 %1355  ;;  %v8675_v10 = vpop.permute.xlu1 %1357  ;;  %5578 = vmatprep.mubr.bf16.mxu1 %v6806_v32  ;;  %v1050_v12 = vmax.f32 %v8447_v1, %v1034_v41  ;;  %v1051_v50 = vmax.f32 %v8457_v24, %v1035_v46 }
 0x291   : > { %5579 = vmatmul.mubr.bf16.vlgmr.msra.gmra.mxu1 %v6805_v9 }
 0x292   : > { %v6810_v21 = vpack.c.bf16 %v1052_v39, %v1052_v39  ;;  %5641 = vmatpush1.bf16.xpose.msra.mxu1 %v12706_v27  ;;  %v6808_v18 = vpack.c.bf16 %v1050_v12, %v1050_v12  ;;  %v6809_v40 = vpack.c.bf16 %v1051_v50, %v1051_v50  ;;  %v1090_v50 = vstv %s6608_s26  ;;  %s6625_s26 = sld [smem:[#allocation7 + $0x15]] }
 0x294   : > { %v8682_v28 = vpop.permute.xlu0 %1359  ;;  %v8684_v59 = vpop.permute.xlu1 %1361  ;;  %5618 = vmatprep.mubr.bf16.mxu0 %v6808_v18  ;;  %5658 = vmatprep.mubr.bf16.mxu1 %v6810_v21 }
 0x295   : > { %5619 = vmatmul.mubr.bf16.vlgmr.msra.gmra.mxu0 %v6807_v37 }
 0x298   : > { %v8686_v47 = vpop.permute.xlu0 %1363  ;;  %v8688_v1 = vpop.permute.xlu1 %1365 }
 0x299   : > { %5659 = vmatmul.mubr.bf16.vlgmr.msra.gmra.mxu1 %v6809_v40 }
 0x29c   : > { %v8690_v8 = vpop.permute.xlu0 %1367  ;;  %v8692_v45 = vpop.permute.xlu1 %1369 }
 0x2a0   : > { %v8694_v19 = vpop.permute.xlu0 %1371  ;;  %v8696_v24 = vpop.permute.xlu1 %1373 }
 0x2a4   : > { %v8698_v36 = vpop.permute.xlu0 %1429  ;;  %v8700_v55 = vpop.permute.xlu1 %1431 }
 0x2a8   : > { %v8702_v34 = vpop.permute.xlu0 %1433  ;;  %v8704_v14 = vpop.permute.xlu1 %1435 }
 0x2ac   : > { %v8706_v52 = vpop.permute.xlu0 %1437  ;;  %v8708_v7 = vpop.permute.xlu1 %1439 }
 0x2b0   : > { %v8710_v32 = vpop.permute.xlu0 %1441  ;;  %v8712_v13 = vpop.permute.xlu1 %1443 }
 0x2b4   : > { %v8714_v9 = vpop.permute.xlu0 %1445  ;;  %v8716_v41 = vpop.permute.xlu1 %1447 }
 0x2b5   : > { %12707 = vst [vmem:[#allocation39_spill] sm:$0xff] %v8716_v41 }
 0x2b8   : > { %v8718_v58 = vpop.permute.xlu0 %1449  ;;  %v8720_v46 = vpop.permute.xlu1 %1505 }
 0x2b9   : > { %12708 = vst [vmem:[#allocation36_spill] sm:$0xff] %v8718_v58  ;;  %12709 = vst [vmem:[#allocation38_spill] sm:$0xff] %v8720_v46  ;;  %v1091_v58 = vmul.f32 %v8296_v44, %v1090_v50  ;;  %v1092_v46 = vmul.f32 %v8326_v60, %v1090_v50  ;;  %v1150_v44 = vsel %vm353_vm0, %v8484_v3, %v8508_v30 }
 0x2ba   : > { %v1096_v60 = vmul.f32 %v8346_v2, %v1090_v50 }
 0x2bc   : > { %v8722_v39 = vpop.permute.xlu0 %1507  ;;  %v8724_v12 = vpop.permute.xlu1 %1509 }
 0x2bd   : > { %12710 = vst [vmem:[#allocation34_spill] sm:$0xff] %v8722_v39  ;;  %12711 = vst [vmem:[#allocation41_spill] sm:$0xff] %v8724_v12  ;;  %v1093_v12 = vmul.f32 %v8303_v48, %v1090_v50  ;;  %v1095_v48 = vmul.f32 %v8331_v53, %v1090_v50  ;;  %v1099_v53 = vmul.f32 %v8351_v62, %v1090_v50 }
 0x2c0   : > { %v8726_v21 = vpop.permute.xlu0 %1511  ;;  %v8728_v27 = vpop.permute.xlu1 %1513 }
 0x2c1   : > { %12712 = vst [vmem:[#allocation37_spill] sm:$0xff] %v8726_v21  ;;  %12713 = vst [vmem:[#allocation40_spill] sm:$0xff] %v8728_v27  ;;  %v1147_v21 = vsel %vm353_vm0, %v8482_v42, %v8474_v4  ;;  %v1097_v42 = vmul.f32 %v8341_v49, %v1090_v50  ;;  %v1100_v49 = vmul.f32 %v8366_v20, %v1090_v50 }
 0x2c2   : > { %v1223_v20 = vsel %vm430_vm1, %v8530_v51, %v8548_v29  ;;  %v1227_v51 = vsel %vm430_vm1, %v8550_v0, %v8568_v57 }
 0x2c4   : > { %v8730_v18 = vpop.permute.xlu0 %1515  ;;  %v8732_v37 = vpop.permute.xlu1 %1517 }
 0x2c5   : > { %12714 = vst [vmem:[#allocation43_spill] sm:$0xff] %v8730_v18  ;;  %12715 = vst [vmem:[#allocation42_spill] sm:$0xff] %v8732_v37  ;;  %v1148_v18 = vsel %vm353_vm0, %v8474_v4, %v8492_v31  ;;  %v1151_v4 = vsel %vm353_vm0, %v8508_v30, %v8500_v6  ;;  %v1154_v30 = vsel %vm353_vm0, %v8510_v38, %v8528_v23 }
 0x2c6   : > { %v1168_v2 = vadd.f32 %v1148_v18, %v1092_v46 }
 0x2c8   : > { %v8734_v40 = vpop.permute.xlu0 %1519  ;;  %v8736_v41 = vpop.permute.xlu1 %1521 }
 0x2c9   : > { %12716 = vst [vmem:[#allocation45_spill] sm:$0xff] %v8734_v40  ;;  %12717 = vst [vmem:[#allocation44_spill] sm:$0xff] %v8736_v41  ;;  %v1149_v40 = vsel %vm353_vm0, %v8492_v31, %v8484_v3  ;;  %v1094_v41 = vmul.f32 %v8336_v25, %v1090_v50  ;;  %v1152_v25 = vsel %vm353_vm0, %v8500_v6, %v8516_v11 }
 0x2ca   : > { %v1098_v3 = vmul.f32 %v8356_v15, %v1090_v50  ;;  %v1167_v31 = vadd.f32 %v1147_v21, %v1091_v58  ;;  %v1169_v39 = vadd.f32 %v1149_v40, %v1093_v12  ;;  %v1155_v15 = vsel %vm353_vm0, %v8528_v23, %v8522_v22 }
 0x2cb   : > { %v1171_v6 = vadd.f32 %v1151_v4, %v1095_v48  ;;  %v1172_v62 = vadd.f32 %v1152_v25, %v1096_v60  ;;  %v1156_v58 = vsel %vm353_vm0, %v8522_v22, %v8536_v43  ;;  %v1225_v23 = vsel %vm430_vm1, %v8542_v61, %v8556_v5  ;;  %v12721_v25 = vld [vmem:[#allocation25_spill] sm:$0xff] }
 0x2cc   : > { %v8757_v37 = vpop.permute.xlu0 %1523  ;;  %v8759_v27 = vpop.permute.xlu1 %1525  ;;  %v1226_v22 = vsel %vm430_vm1, %v8556_v5, %v8550_v0  ;;  %v1174_v46 = vadd.f32 %v1154_v30, %v1098_v3  ;;  %v1175_v12 = vadd.f32 %v1155_v15, %v1099_v53  ;;  %v1228_v21 = vsel %vm430_vm1, %v8568_v57, %v8562_v16  ;;  %v12722_v3 = vld [vmem:[#allocation29_spill] sm:$0xff]  ;;  %v12724_v53 = vld [vmem:[#allocation31_spill] sm:$0xff] }
 0x2cd   : > { %12718 = vst [vmem:[#allocation19_spill] sm:$0xff] %v8757_v37  ;;  %12719 = vst [vmem:[#allocation18_spill] sm:$0xff] %v8759_v27  ;;  %v1170_v37 = vadd.f32 %v1150_v44, %v1094_v41  ;;  %v1153_v27 = vsel %vm353_vm0, %v8516_v11, %v8510_v38  ;;  %v1224_v38 = vsel %vm430_vm1, %v8548_v29, %v8542_v61 }
 0x2ce   : > { %v1173_v43 = vadd.f32 %v1153_v27, %v1097_v42  ;;  %v1176_v29 = vadd.f32 %v1156_v58, %v1100_v49  ;;  %v1243_v18 = vadd.f32 %v1223_v20, %v1167_v31  ;;  %v1229_v61 = vsel %vm430_vm1, %v8562_v16, %v8576_v26  ;;  %v12720_v42 = vld [vmem:[#allocation26_spill] sm:$0xff] }
 0x2cf   : > { %v1230_v5 = vsel %vm430_vm1, %v8576_v26, %v8570_v63  ;;  %v1244_v50 = vadd.f32 %v1224_v38, %v1168_v2  ;;  %v1245_v40 = vadd.f32 %v1225_v23, %v1169_v39  ;;  %v1246_v0 = vadd.f32 %v1226_v22, %v1170_v37  ;;  %v12725_v2 = vld [vmem:[#allocation28_spill] sm:$0xff]  ;;  %v12727_v22 = vld [vmem:[#allocation30_spill] sm:$0xff] }
 0x2d0   : > { %v8785_v41 = vpop.permute.xlu0 %1581  ;;  %v8787_v11 = vpop.permute.xlu1 %1583  ;;  %v1247_v27 = vadd.f32 %v1227_v51, %v1171_v6  ;;  %v1248_v60 = vadd.f32 %v1228_v21, %v1172_v62  ;;  %v1231_v57 = vsel %vm430_vm1, %v8570_v63, %v8588_v17  ;;  %v1232_v16 = vsel %vm430_vm1, %v8588_v17, %v8582_v33  ;;  %v12723_v17 = vld [vmem:[#allocation27_spill] sm:$0xff]  ;;  %v12726_v6 = vld [vmem:[#allocation33_spill] sm:$0xff] }
 0x2d1   : > { %v1299_v26 = vsel %vm507_vm2, %v8596_v54, %v8590_v56  ;;  %v1249_v39 = vadd.f32 %v1229_v61, %v1173_v43  ;;  %v1250_v37 = vadd.f32 %v1230_v5, %v1174_v46  ;;  %v1300_v4 = vsel %vm507_vm2, %v8590_v56, %v12720_v42  ;;  %v12728_v43 = vld [vmem:[#allocation35_spill] sm:$0xff]  ;;  %v12729_v5 = vld [vmem:[#allocation32_spill] sm:$0xff] }
 0x2d2   : > { %v1301_v63 = vsel %vm507_vm2, %v12720_v42, %v12721_v25  ;;  %v1302_v33 = vsel %vm507_vm2, %v12721_v25, %v12722_v3  ;;  %v1303_v54 = vsel %vm507_vm2, %v12722_v3, %v12723_v17  ;;  %v1304_v31 = vsel %vm507_vm2, %v12723_v17, %v12724_v53 }
 0x2d3   : > { %v1305_v56 = vsel %vm507_vm2, %v12724_v53, %v12725_v2  ;;  %v1251_v49 = vadd.f32 %v1231_v57, %v1175_v12  ;;  %v1252_v30 = vadd.f32 %v1232_v16, %v1176_v29  ;;  %v1319_v15 = vadd.f32 %v1299_v26, %v1243_v18 }
 0x2d4   : > { %v8810_v44 = vpop.permute.xlu0 %1585  ;;  %v8812_v48 = vpop.permute.xlu1 %1587  ;;  %v1306_v62 = vsel %vm507_vm2, %v12725_v2, %v12726_v6  ;;  %v1320_v38 = vadd.f32 %v1300_v4, %v1244_v50  ;;  %v1321_v23 = vadd.f32 %v1301_v63, %v1245_v40  ;;  %v1307_v51 = vsel %vm507_vm2, %v12726_v6, %v12727_v22  ;;  %v12732_v6 = vld [vmem:[#allocation41_spill] sm:$0xff] }
 0x2d5   : > { %v1308_v46 = vsel %vm507_vm2, %v12727_v22, %v12728_v43  ;;  %v1322_v12 = vadd.f32 %v1302_v33, %v1246_v0  ;;  %v1323_v21 = vadd.f32 %v1303_v54, %v1247_v27  ;;  %v1324_v29 = vadd.f32 %v1304_v31, %v1248_v60  ;;  %v12733_v22 = vld [vmem:[#allocation39_spill] sm:$0xff] }
 0x2d6   : > { %v1325_v18 = vadd.f32 %v1305_v56, %v1249_v39  ;;  %v1326_v61 = vadd.f32 %v1306_v62, %v1250_v37  ;;  %v1375_v57 = vsel %vm584_vm3, %v12729_v5, %v8673_v35  ;;  %v1376_v50 = vsel %vm584_vm3, %v8673_v35, %v8675_v10  ;;  %v12734_v5 = vld [vmem:[#allocation37_spill] sm:$0xff] }
 0x2d7   : > { %v1377_v40 = vsel %vm584_vm3, %v8675_v10, %v8682_v28  ;;  %v1327_v16 = vadd.f32 %v1307_v51, %v1251_v49  ;;  %v1328_v26 = vadd.f32 %v1308_v46, %v1252_v30  ;;  %v1378_v0 = vsel %vm584_vm3, %v8682_v28, %v8684_v59  ;;  %v12730_v30 = vld [vmem:[#allocation34_spill] sm:$0xff] }
 0x2d8   : > { %v8846_v58 = vpop.permute.xlu0 %1589  ;;  %v8848_v20 = vpop.permute.xlu1 %1591  ;;  %v1379_v27 = vsel %vm584_vm3, %v8684_v59, %v8686_v47  ;;  %v1380_v35 = vsel %vm584_vm3, %v8686_v47, %v8688_v1  ;;  %v1381_v10 = vsel %vm584_vm3, %v8688_v1, %v8690_v8  ;;  %v1382_v28 = vsel %vm584_vm3, %v8690_v8, %v8692_v45 }
 0x2d9   : > { %v8885_v37 = vstv %s8823_s24  ;;  %v1395_v42 = vadd.f32 %v1375_v57, %v1319_v15  ;;  %v1396_v59 = vadd.f32 %v1376_v50, %v1320_v38  ;;  %v1397_v4 = vadd.f32 %v1377_v40, %v1321_v23  ;;  %v12731_v15 = vld [vmem:[#allocation38_spill] sm:$0xff]  ;;  %v12735_v50 = vld [vmem:[#allocation36_spill] sm:$0xff]  ;;  %s6626_s24 = sld [smem:[#allocation7 + $0x16]] }
 0x2da   : > { %v1383_v25 = vsel %vm584_vm3, %v8692_v45, %v8694_v19  ;;  %v1398_v63 = vadd.f32 %v1378_v0, %v1322_v12  ;;  %v1399_v3 = vadd.f32 %v1379_v27, %v1323_v21  ;;  %v1384_v47 = vsel %vm584_vm3, %v8694_v19, %v8696_v24  ;;  %v12738_v0 = vld [vmem:[#allocation42_spill] sm:$0xff] }
 0x2db   : > { %v1451_v1 = vsel %vm661_vm4, %v8698_v36, %v8700_v55  ;;  %v1400_v8 = vadd.f32 %v1380_v35, %v1324_v29  ;;  %v1401_v33 = vadd.f32 %v1381_v10, %v1325_v18  ;;  %v1402_v17 = vadd.f32 %v1382_v28, %v1326_v61 }
 0x2dc   : > { %v8871_v60 = vpop.permute.xlu0 %1593  ;;  %v8873_v39 = vpop.permute.xlu1 %1595  ;;  %v1452_v54 = vsel %vm661_vm4, %v8700_v55, %v8702_v34  ;;  %v1403_v31 = vadd.f32 %v1383_v25, %v1327_v16  ;;  %v1453_v19 = vsel %vm661_vm4, %v8702_v34, %v8704_v14  ;;  %v1454_v24 = vsel %vm661_vm4, %v8704_v14, %v8706_v52  ;;  %v12736_v16 = vld [vmem:[#allocation40_spill] sm:$0xff] }
 0x2dd   : > { %v1455_v36 = vsel %vm661_vm4, %v8706_v52, %v8708_v7  ;;  %v8912_v2 = vadd.f32 %v1384_v47, %v1328_v26  ;;  %v1471_v55 = vadd.f32 %v1451_v1, %v1395_v42  ;;  %v1456_v56 = vsel %vm661_vm4, %v8708_v7, %v8710_v32  ;;  %v12737_v26 = vld [vmem:[#allocation43_spill] sm:$0xff]  ;;  %v12739_v1 = vld [vmem:[#allocation45_spill] sm:$0xff] }
 0x2de   : > { %v1457_v49 = vsel %vm661_vm4, %v8710_v32, %v8712_v13  ;;  %v1472_v34 = vadd.f32 %v1452_v54, %v1396_v59  ;;  %v1458_v14 = vsel %vm661_vm4, %v8712_v13, %v8714_v9  ;;  %v1527_v52 = vsel %vm738_vm5, %v12731_v15, %v12730_v30 }
 0x2df   : > { %v1528_v62 = vsel %vm738_vm5, %v12730_v30, %v12732_v6  ;;  %v1473_v38 = vadd.f32 %v1453_v19, %v1397_v4  ;;  %v1474_v23 = vadd.f32 %v1454_v24, %v1398_v63  ;;  %v1475_v7 = vadd.f32 %v1455_v36, %v1399_v3 }
 0x2e0   : > { %v8899_v53 = vpop.permute.xlu0 %1597  ;;  %v8901_v45 = vpop.permute.xlu1 %1599  ;;  %v1459_v32 = vsel %vm661_vm4, %v8714_v9, %v12733_v22  ;;  %v1476_v46 = vadd.f32 %v1456_v56, %v1400_v8  ;;  %v1477_v13 = vadd.f32 %v1457_v49, %v1401_v33  ;;  %v1603_v12 = vsel %vm815_vm6, %v8785_v41, %v8787_v11 }
 0x2e1   : > { %v1604_v21 = vsel %vm815_vm6, %v8787_v11, %v8810_v44  ;;  %v1478_v29 = vadd.f32 %v1458_v14, %v1402_v17  ;;  %v1547_v18 = vadd.f32 %v1527_v52, %v1471_v55  ;;  %v1548_v61 = vadd.f32 %v1528_v62, %v1472_v34 }
 0x2e2   : > { %v1529_v9 = vsel %vm738_vm5, %v12732_v6, %v12734_v5  ;;  %v1479_v57 = vadd.f32 %v1459_v32, %v1403_v31  ;;  %v1460_v40 = vsel %vm661_vm4, %v12733_v22, %v12735_v50  ;;  %v1530_v41 = vsel %vm738_vm5, %v12734_v5, %v12736_v16  ;;  %v12740_v31 = vld [vmem:[#allocation44_spill] sm:$0xff] }
 0x2e3   : > { %v1531_v11 = vsel %vm738_vm5, %v12736_v16, %v12737_v26  ;;  %v1532_v27 = vsel %vm738_vm5, %v12737_v26, %v12738_v0  ;;  %v1623_v35 = vadd.f32 %v1603_v12, %v1547_v18  ;;  %v1624_v10 = vadd.f32 %v1604_v21, %v1548_v61  ;;  %v12742_v18 = vld [vmem:[#allocation18_spill] sm:$0xff] }
 0x2e4   : > { %v8932_v51 = vpop.permute.xlu0 %1601  ;;  %v1658_v43 = vpop.permute.xlu1 %1657  ;;  %v1605_v28 = vsel %vm815_vm6, %v8810_v44, %v8812_v48  ;;  %v1549_v4 = vadd.f32 %v1529_v9, %v1473_v38  ;;  %v1606_v25 = vsel %vm815_vm6, %v8812_v48, %v8846_v58  ;;  %v1550_v47 = vadd.f32 %v1530_v41, %v1474_v23 }
 0x2e5   : > { %v1533_v8 = vsel %vm738_vm5, %v12738_v0, %v12739_v1  ;;  %v1551_v54 = vadd.f32 %v1531_v11, %v1475_v7  ;;  %v1552_v44 = vadd.f32 %v1532_v27, %v1476_v46  ;;  %v1534_v19 = vsel %vm738_vm5, %v12739_v1, %v12740_v31  ;;  %v12741_v7 = vld [vmem:[#allocation19_spill] sm:$0xff] }
 0x2e6   : > { %v1625_v24 = vadd.f32 %v1605_v28, %v1549_v4  ;;  %v1626_v36 = vadd.f32 %v1606_v25, %v1550_v47  ;;  %v1607_v48 = vsel %vm815_vm6, %v8846_v58, %v8848_v20  ;;  %v1553_v14 = vadd.f32 %v1533_v8, %v1477_v13 }
 0x2e7   : > { %v1608_v30 = vsel %vm815_vm6, %v8848_v20, %v8871_v60  ;;  %v1554_v23 = vadd.f32 %v1534_v19, %v1478_v29  ;;  %v1535_v22 = vsel %vm738_vm5, %v12740_v31, %v12741_v7  ;;  %v1627_v32 = vadd.f32 %v1607_v48, %v1551_v54 }
 0x2e8   : > { %v1660_v42 = vpop.permute.xlu0 %1659  ;;  %v1662_v59 = vpop.permute.xlu1 %1661  ;;  %v1609_v20 = vsel %vm815_vm6, %v8871_v60, %v8873_v39  ;;  %v1536_v61 = vsel %vm738_vm5, %v12741_v7, %v12742_v18  ;;  %v1610_v60 = vsel %vm815_vm6, %v8873_v39, %v8899_v53  ;;  %v1480_v11 = vadd.f32 %v1460_v40, %v8912_v2 }
 0x2e9   : > { %v1679_v63 = vsel %vm892_vm7, %v1658_v43, %v1660_v42  ;;  %v1680_v3 = vsel %vm892_vm7, %v1660_v42, %v1662_v59  ;;  %v1628_v43 = vadd.f32 %v1608_v30, %v1552_v44  ;;  %v1555_v0 = vadd.f32 %v1535_v22, %v1479_v57 }
 0x2ea   : > { %v1699_v33 = vadd.f32 %v1679_v63, %v1623_v35  ;;  %v1700_v17 = vadd.f32 %v1680_v3, %v1624_v10  ;;  %v1629_v27 = vadd.f32 %v1609_v20, %v1553_v14  ;;  %v1611_v39 = vsel %vm815_vm6, %v8899_v53, %v8901_v45 }
 0x2eb   : > { %v1630_v35 = vadd.f32 %v1610_v60, %v1554_v23  ;;  %v1556_v57 = vadd.f32 %v1536_v61, %v1480_v11  ;;  %v1612_v40 = vsel %vm815_vm6, %v8901_v45, %v8932_v51  ;;  %v1631_v1 = vadd.f32 %v1611_v39, %v1555_v0 }
 0x2ec   : > { %v8973_v55 = vadd.f32 %v8885_v37, %v1699_v33  ;;  %v8976_v56 = vadd.f32 %v8885_v37, %v1700_v17  ;;  %v1664_v49 = vpop.permute.xlu0 %1663  ;;  %v1666_v34 = vpop.permute.xlu1 %1665 }
 0x2ed   : > { %v1681_v15 = vsel %vm892_vm7, %v1662_v59, %v1664_v49  ;;  %v1682_v52 = vsel %vm892_vm7, %v1664_v49, %v1666_v34  ;;  %v1632_v8 = vadd.f32 %v1612_v40, %v1556_v57 }
 0x2ee   : > { %v1721_v6 = vmax.f32 %v8973_v55, 0.0  ;;  %v1722_v58 = vmax.f32 %v8976_v56, 0.0  ;;  %v1701_v62 = vadd.f32 %v1681_v15, %v1625_v24  ;;  %v1702_v38 = vadd.f32 %v1682_v52, %v1626_v36 }
 0x2f0   : > { %v8992_v46 = vadd.f32 %v8885_v37, %v1701_v62  ;;  %v8995_v13 = vadd.f32 %v8885_v37, %v1702_v38  ;;  %v1668_v12 = vpop.permute.xlu0 %1667  ;;  %v1670_v21 = vpop.permute.xlu1 %1669  ;;  %v6986_v29 = vpack.i.bf16 %v1722_v58, %v1721_v6  ;;  %v6678_v62 = vld [vmem:[%s12476_s4] ss:$0 sm:$0xff] }
 0x2f1   : > { %v1683_v5 = vsel %vm892_vm7, %v1666_v34, %v1668_v12  ;;  %v1684_v9 = vsel %vm892_vm7, %v1668_v12, %v1670_v21 }
 0x2f2   : > { %v1723_v50 = vmax.f32 %v8992_v46, 0.0  ;;  %v1724_v16 = vmax.f32 %v8995_v13, 0.0  ;;  %v1703_v41 = vadd.f32 %v1683_v5, %v1627_v32  ;;  %v1704_v26 = vadd.f32 %v1684_v9, %v1628_v43  ;;  %6987 = vrot.lane.b32.xlu0 %v6986_v29, %s7439_s29 }
 0x2f4   : > { %v9017_v10 = vadd.f32 %v8885_v37, %v1703_v41  ;;  %v9020_v28 = vadd.f32 %v8885_v37, %v1704_v26  ;;  %v1672_v42 = vpop.permute.xlu0 %1671  ;;  %v1674_v59 = vpop.permute.xlu1 %1673  ;;  %v6991_v2 = vpack.i.bf16 %v1724_v16, %v1723_v50 }
 0x2f5   : > { %v1685_v53 = vsel %vm892_vm7, %v1670_v21, %v1672_v42  ;;  %v1686_v4 = vsel %vm892_vm7, %v1672_v42, %v1674_v59  ;;  %v5047_v42 = vld [vmem:[#allocation10 + $0x20] sm:$0xff] }
 0x2f6   : > { %v1725_v25 = vmax.f32 %v9017_v10, 0.0  ;;  %v1726_v63 = vmax.f32 %v9020_v28, 0.0  ;;  %v1705_v3 = vadd.f32 %v1685_v53, %v1629_v27  ;;  %v1706_v47 = vadd.f32 %v1686_v4, %v1630_v35  ;;  %6992 = vrot.lane.b32.xlu1 %v6991_v2, %s7439_s29 }
 0x2f8   : > { %v9035_v33 = vadd.f32 %v8885_v37, %v1705_v3  ;;  %v9038_v17 = vadd.f32 %v8885_v37, %v1706_v47  ;;  %v1676_v45 = vpop.permute.xlu0 %1675  ;;  %v1678_v51 = vpop.permute.xlu1 %1677  ;;  %v6996_v54 = vpack.i.bf16 %v1726_v63, %v1725_v25  ;;  %v5048_v47 = vld [vmem:[#allocation10 + $0x28] sm:$0xff] }
 0x2f9   : > { %v1687_v44 = vsel %vm892_vm7, %v1674_v59, %v1676_v45  ;;  %v1688_v31 = vsel %vm892_vm7, %v1676_v45, %v1678_v51  ;;  %v5071_v59 = vld [vmem:[#allocation10 + $0xe0] sm:$0x11] }
 0x2fa   : > { %v1727_v19 = vmax.f32 %v9035_v33, 0.0  ;;  %v1728_v24 = vmax.f32 %v9038_v17, 0.0  ;;  %v1707_v36 = vadd.f32 %v1687_v44, %v1631_v1  ;;  %v1708_v48 = vadd.f32 %v1688_v31, %v1632_v8  ;;  %6997 = vrot.lane.b32.xlu0 %v6996_v54, %s7439_s29  ;;  %v5072_v1 = vld [vmem:[#allocation10 + $0xe8] sm:$0x11] }
 0x2fb   : > { %v6736_v2 = vcombine.high %v5047_v42, %v5071_v59  ;;  %v6735_v57 = vcombine.low %v5047_v42, %v5071_v59  ;;  %v6738_v8 = vcombine.high %v5048_v47, %v5072_v1  ;;  %v6737_v51 = vcombine.low %v5048_v47, %v5072_v1  ;;  %v9140_v33 = vld [vmem:[%s7615_s30] sm:$0xff]  ;;  %v9170_v42 = vld [vmem:[%s7615_s30 + $0x30] sm:$0xff] }
 0x2fc   : > { %v9050_v49 = vadd.f32 %v8885_v37, %v1707_v36  ;;  %v1720_v34 = vadd.f32 %v8885_v37, %v1708_v48  ;;  %v7001_v14 = vpack.i.bf16 %v1728_v24, %v1727_v19  ;;  %v1964_v47 = vstv %s6624_s13  ;;  %v9190_v1 = vld [vmem:[%s7615_s30 + $0x50] sm:$0xff]  ;;  %s6630_s13 = sld [smem:[#allocation7 + $0x1a]] }
 0x2fd   : > { %5680 = vmatprep.subr.bf16.mxu0 %v6736_v2  ;;  %5720 = vmatprep.subr.bf16.mxu1 %v6738_v8  ;;  %v9174_v2 = vld [vmem:[%s7615_s30 + $0x38] sm:$0xff] }
 0x2fe   : > { %v1729_v30 = vmax.f32 %v9050_v49, 0.0  ;;  %v1730_v15 = vmax.f32 %v1720_v34, 0.0  ;;  %7002 = vrot.lane.b32.xlu1 %v7001_v14, %s7439_s29  ;;  %5681 = vmatpush1.bf16.xpose.msra.mxu0 %v6735_v57  ;;  %v9078_v14 = vld [vmem:[#allocation10 + $0x30] sm:$0xff]  ;;  %v9150_v49 = vld [vmem:[%s7615_s30 + $0x10] sm:$0xff] }
 0x2ff   : > { %5721 = vmatpush1.bf16.xpose.msra.mxu1 %v6737_v51 }
 0x300   : > { %v7006_v52 = vpack.i.bf16 %v1730_v15, %v1729_v30  ;;  %v9080_v15 = vld [vmem:[#allocation10 + $0xf0] sm:$0x11] }
 0x302   : > { %7007 = vrot.lane.b32.xlu0 %v7006_v52, %s7439_s29 }
 0x34d   : > { %v5540_v37 = vpop.f32.mrf.mxu0 }
 0x34e   : > { %v5541_v23 = vadd.f32 %v6678_v62, %v5540_v37 }
 0x34f   : > { %v5542_v38 = vpop.f32.mrf.mxu0 }
 0x351   : > { %v5543_v7 = vpop.f32.mrf.mxu0  ;;  %v5580_v22 = vpop.f32.mrf.mxu1 }
 0x352   : > { %v5581_v32 = vadd.f32 %v5580_v22, %v5541_v23  ;;  %v9099_v22 = vld [vmem:[#allocation10 + $0x38] sm:$0xff] }
 0x353   : > { %v5544_v20 = vpop.f32.mrf.mxu0  ;;  %v5582_v43 = vpop.f32.mrf.mxu1 }
 0x355   : > { %v5583_v12 = vpop.f32.mrf.mxu1  ;;  %v5620_v21 = vpop.f32.mrf.mxu0 }
 0x356   : > { %v5621_v29 = vadd.f32 %v5620_v21, %v5581_v32  ;;  %v9101_v32 = vld [vmem:[#allocation10 + $0xf8] sm:$0x11] }
 0x357   : > { %v5584_v18 = vpop.f32.mrf.mxu1  ;;  %v5622_v61 = vpop.f32.mrf.mxu0  ;;  %v6742_v13 = vcombine.high %v9099_v22, %v9101_v32 }
 0x359   : > { %v5623_v60 = vpop.f32.mrf.mxu0  ;;  %v5660_v5 = vpop.f32.mrf.mxu1  ;;  %5800 = vmatprep.subr.bf16.mxu1 %v6742_v13 }
 0x35a   : > { %v9065_v9 = vadd.f32 %v5660_v5, %v5621_v29  ;;  %v1888_v60 = vstv %s6623_s10  ;;  %s6629_s10 = sld [smem:[#allocation7 + $0x19]] }
 0x35b   : > { %v5624_v41 = vpop.f32.mrf.mxu0  ;;  %v5662_v26 = vpop.f32.mrf.mxu1  ;;  %v1889_v17 = vmul.f32 %v9140_v33, %v1888_v60  ;;  %v1895_v59 = vmul.f32 %v9170_v42, %v1888_v60  ;;  %v1896_v57 = vmul.f32 %v9174_v2, %v1888_v60  ;;  %v1899_v8 = vmul.f32 %v9190_v1, %v1888_v60 }
 0x35c   : > { %12743 = vst [vmem:[#allocation20_spill] sm:$0xff] %v9065_v9  ;;  %v9154_v26 = vld [vmem:[%s7615_s30 + $0x18] sm:$0xff] }
 0x35d   : > { %v5663_v11 = vpop.f32.mrf.mxu1 }
 0x35e   : > { %v1892_v11 = vmul.f32 %v9154_v26, %v1888_v60 }
 0x35f   : > { %v5664_v0 = vpop.f32.mrf.mxu1 }
 0x360   : > { %v9160_v0 = vld [vmem:[%s7615_s30 + $0x20] sm:$0xff] }
 0x364   : > { %v6988_v27 = vpop.permute.xlu0 %6987 }
 0x365   : > { %v6990_v39 = vunpack.i.h.bf16 %v6988_v27  ;;  %v6989_v35 = vunpack.i.l.bf16 %v6988_v27  ;;  %v1893_v27 = vmul.f32 %v9160_v0, %v1888_v60 }
 0x367   : > { %v1761_v53 = vsel %vm353_vm0, %v6989_v35, %v6990_v39 }
 0x368   : > { %v6993_v40 = vpop.permute.xlu1 %6992  ;;  %v9071_v54 = vmax.f32 %v1721_v6, %v1761_v53  ;;  %v6740_v6 = vcombine.high %v9078_v14, %v9080_v15 }
 0x369   : > { %v6995_v4 = vunpack.i.h.bf16 %v6993_v40  ;;  %v6994_v3 = vunpack.i.l.bf16 %v6993_v40  ;;  %v9180_v40 = vld [vmem:[%s7615_s30 + $0x40] sm:$0xff] }
 0x36a   : > { %5760 = vmatprep.subr.bf16.mxu0 %v6740_v6  ;;  %v1897_v53 = vmul.f32 %v9180_v40, %v1888_v60  ;;  %v1972_v6 = vmul.f32 %v9174_v2, %v1964_v47 }
 0x36b   : > { %v1762_v45 = vsel %vm353_vm0, %v6990_v39, %v6994_v3  ;;  %v1763_v36 = vsel %vm353_vm0, %v6994_v3, %v6995_v4  ;;  %v9164_v39 = vld [vmem:[%s7615_s30 + $0x28] sm:$0xff] }
 0x36c   : > { %v9075_v44 = vmax.f32 %v1722_v58, %v1762_v45  ;;  %v6998_v31 = vpop.permute.xlu0 %6997  ;;  %v6739_v58 = vcombine.low %v9078_v14, %v9080_v15  ;;  %v9091_v52 = vmax.f32 %v1723_v50, %v1763_v36  ;;  %v1894_v35 = vmul.f32 %v9164_v39, %v1888_v60 }
 0x36d   : > { %v7000_v48 = vunpack.i.h.bf16 %v6998_v31  ;;  %v6999_v34 = vunpack.i.l.bf16 %v6998_v31  ;;  %v1965_v45 = vmul.f32 %v9140_v33, %v1964_v47  ;;  %v1967_v31 = vmul.f32 %v9150_v49, %v1964_v47 }
 0x36e   : > { %v7011_v55 = vpack.i.bf16 %v9075_v44, %v9071_v54  ;;  %v1968_v36 = vmul.f32 %v9154_v26, %v1964_v47 }
 0x36f   : > { %v1764_v56 = vsel %vm353_vm0, %v6995_v4, %v6999_v34  ;;  %v1765_v38 = vsel %vm353_vm0, %v6999_v34, %v7000_v48  ;;  %v9184_v4 = vld [vmem:[%s7615_s30 + $0x48] sm:$0xff]  ;;  %v1970_v34 = vmul.f32 %v9164_v39, %v1964_v47 }
 0x370   : > { %v9095_v62 = vmax.f32 %v1724_v16, %v1764_v56  ;;  %v7003_v37 = vpop.permute.xlu1 %7002  ;;  %7012 = vrot.lane.b32.xlu1 %v7011_v55, %s7441_s17  ;;  %v6741_v16 = vcombine.low %v9099_v22, %v9101_v32  ;;  %v9112_v20 = vmax.f32 %v1725_v25, %v1765_v38  ;;  %v1898_v3 = vmul.f32 %v9184_v4, %v1888_v60 }
 0x371   : > { %v7005_v23 = vunpack.i.h.bf16 %v7003_v37  ;;  %v7004_v7 = vunpack.i.l.bf16 %v7003_v37  ;;  %v1971_v55 = vmul.f32 %v9170_v42, %v1964_v47  ;;  %v1973_v56 = vmul.f32 %v9180_v40, %v1964_v47 }
 0x372   : > { %v7016_v46 = vpack.i.bf16 %v9095_v62, %v9091_v52  ;;  %v1974_v37 = vmul.f32 %v9184_v4, %v1964_v47  ;;  %v1975_v38 = vmul.f32 %v9190_v1, %v1964_v47 }
 0x373   : > { %v1766_v50 = vsel %vm353_vm0, %v7000_v48, %v7004_v7  ;;  %v1767_v21 = vsel %vm353_vm0, %v7004_v7, %v7005_v23  ;;  %v1969_v48 = vmul.f32 %v9160_v0, %v1964_v47 }
 0x374   : > { %v9116_v43 = vmax.f32 %v1726_v63, %v1766_v50  ;;  %v7008_v12 = vpop.permute.xlu0 %7007  ;;  %7017 = vrot.lane.b32.xlu0 %v7016_v46, %s7441_s17  ;;  %v9126_v25 = vmax.f32 %v1727_v19, %v1767_v21  ;;  %v9144_v19 = vld [vmem:[%s7615_s30 + $0x8] sm:$0xff] }
 0x375   : > { %v7010_v29 = vunpack.i.h.bf16 %v7008_v12  ;;  %v7009_v18 = vunpack.i.l.bf16 %v7008_v12  ;;  %v1966_v51 = vmul.f32 %v9144_v19, %v1964_v47 }
 0x376   : > { %v7021_v61 = vpack.i.bf16 %v9116_v43, %v9112_v20 }
 0x377   : > { %v1768_v10 = vsel %vm353_vm0, %v7005_v23, %v7009_v18  ;;  %v1769_v28 = vsel %vm353_vm0, %v7009_v18, %v7010_v29  ;;  %v2040_v23 = vstv %s6625_s26  ;;  %s6622_s26 = sld [smem:[#allocation7 + $0x12]] }
 0x378   : > { %v9130_v63 = vmax.f32 %v1728_v24, %v1768_v10  ;;  %7022 = vrot.lane.b32.xlu1 %v7021_v61, %s7441_s17  ;;  %v1787_v41 = vmax.f32 %v1729_v30, %v1769_v28  ;;  %v1890_v24 = vmul.f32 %v9144_v19, %v1888_v60  ;;  %v1891_v30 = vmul.f32 %v9150_v49, %v1888_v60 }
 0x379   : > { %v2041_v7 = vmul.f32 %v9140_v33, %v2040_v23  ;;  %v2042_v46 = vmul.f32 %v9144_v19, %v2040_v23  ;;  %v2043_v13 = vmul.f32 %v9150_v49, %v2040_v23  ;;  %v2044_v50 = vmul.f32 %v9154_v26, %v2040_v23 }
 0x37a   : > { %v7026_v5 = vpack.i.bf16 %v9130_v63, %v9126_v25  ;;  %v2045_v12 = vmul.f32 %v9160_v0, %v2040_v23  ;;  %v2046_v21 = vmul.f32 %v9164_v39, %v2040_v23  ;;  %v2047_v29 = vmul.f32 %v9170_v42, %v2040_v23 }
 0x37b   : > { %v2048_v18 = vmul.f32 %v9174_v2, %v2040_v23  ;;  %v2049_v61 = vmul.f32 %v9180_v40, %v2040_v23  ;;  %v2050_v10 = vmul.f32 %v9184_v4, %v2040_v23  ;;  %v2116_v28 = vstv %s6626_s24  ;;  %s9535_s24 = sld [smem:[#allocation8 + $0x2]] }
 0x37c   : > { %7027 = vrot.lane.b32.xlu0 %v7026_v5, %s7441_s17  ;;  %1813 = vrot.lane.b32.xlu1 %v1787_v41, %s7441_s17  ;;  %v2051_v60 = vmul.f32 %v9190_v1, %v2040_v23  ;;  %v2117_v5 = vmul.f32 %v9140_v33, %v2116_v28  ;;  %v2118_v41 = vmul.f32 %v9144_v19, %v2116_v28  ;;  %v9278_v23 = vstv %s6628_s12  ;;  %s6638_s12 = sld [smem:[#allocation7 + $0x1d]] }
 0x37d   : > { %v2274_v15 = vmul.f32 %v9164_v39, %v9278_v23  ;;  %v2276_v22 = vmul.f32 %v9174_v2, %v9278_v23  ;;  %v2277_v32 = vmul.f32 %v9180_v40, %v9278_v23 }
 0x380   : > { %1911 = vrot.lane.b32.xlu0 %v1889_v17, %s7439_s29  ;;  %1913 = vrot.lane.b32.xlu1 %v1890_v24, %s7439_s29  ;;  %v2119_v17 = vmul.f32 %v9150_v49, %v2116_v28  ;;  %v2120_v24 = vmul.f32 %v9154_v26, %v2116_v28 }
 0x384   : > { %1915 = vrot.lane.b32.xlu0 %v1891_v30, %s7439_s29  ;;  %1917 = vrot.lane.b32.xlu1 %v1892_v11, %s7439_s29  ;;  %v2121_v30 = vmul.f32 %v9160_v0, %v2116_v28  ;;  %v2122_v11 = vmul.f32 %v9164_v39, %v2116_v28 }
 0x388   : > { %1919 = vrot.lane.b32.xlu0 %v1893_v27, %s7439_s29  ;;  %1921 = vrot.lane.b32.xlu1 %v1894_v35, %s7439_s29  ;;  %v2123_v27 = vmul.f32 %v9170_v42, %v2116_v28  ;;  %v2124_v35 = vmul.f32 %v9174_v2, %v2116_v28 }
 0x38c   : > { %1923 = vrot.lane.b32.xlu0 %v1895_v59, %s7439_s29  ;;  %1925 = vrot.lane.b32.xlu1 %v1896_v57, %s7439_s29  ;;  %v2125_v59 = vmul.f32 %v9180_v40, %v2116_v28  ;;  %v2126_v57 = vmul.f32 %v9184_v4, %v2116_v28 }
 0x390   : > { %1927 = vrot.lane.b32.xlu0 %v1897_v53, %s7439_s29  ;;  %1929 = vrot.lane.b32.xlu1 %v1898_v3, %s7439_s29  ;;  %v2127_v53 = vmul.f32 %v9190_v1, %v2116_v28  ;;  %v2192_v3 = vstv %s6627_s16  ;;  %s6637_s16 = sld [smem:[#allocation7 + $0x1c]] }
 0x391   : > { %v2193_v47 = vmul.f32 %v9140_v33, %v2192_v3 }
 0x394   : > { %1931 = vrot.lane.b32.xlu0 %v1899_v8, %s7439_s29  ;;  %1987 = vrot.lane.b32.xlu1 %v1965_v45, %s7440_s14  ;;  %v2194_v8 = vmul.f32 %v9144_v19, %v2192_v3  ;;  %v2195_v45 = vmul.f32 %v9150_v49, %v2192_v3 }
 0x398   : > { %1989 = vrot.lane.b32.xlu0 %v1966_v51, %s7440_s14  ;;  %1991 = vrot.lane.b32.xlu1 %v1967_v31, %s7440_s14  ;;  %v2196_v51 = vmul.f32 %v9154_v26, %v2192_v3  ;;  %v2197_v31 = vmul.f32 %v9160_v0, %v2192_v3 }
 0x39c   : > { %1993 = vrot.lane.b32.xlu0 %v1968_v36, %s7440_s14  ;;  %1995 = vrot.lane.b32.xlu1 %v1969_v48, %s7440_s14  ;;  %v2198_v36 = vmul.f32 %v9164_v39, %v2192_v3  ;;  %v2199_v48 = vmul.f32 %v9170_v42, %v2192_v3 }
 0x3a0   : > { %1997 = vrot.lane.b32.xlu0 %v1970_v34, %s7440_s14  ;;  %1999 = vrot.lane.b32.xlu1 %v1971_v55, %s7440_s14  ;;  %v2200_v34 = vmul.f32 %v9174_v2, %v2192_v3 }
 0x3a4   : > { %2001 = vrot.lane.b32.xlu0 %v1972_v6, %s7440_s14  ;;  %2003 = vrot.lane.b32.xlu1 %v1973_v56, %s7440_s14 }
 0x3a8   : > { %2005 = vrot.lane.b32.xlu0 %v1974_v37, %s7440_s14  ;;  %2007 = vrot.lane.b32.xlu1 %v1975_v38, %s7440_s14  ;;  %v2201_v37 = vmul.f32 %v9180_v40, %v2192_v3  ;;  %v2202_v38 = vmul.f32 %v9184_v4, %v2192_v3 }
 0x3ac   : > { %2063 = vrot.lane.b32.xlu0 %v2041_v7, %s7441_s17  ;;  %2065 = vrot.lane.b32.xlu1 %v2042_v46, %s7441_s17 }
 0x3b0   : > { %2067 = vrot.lane.b32.xlu0 %v2043_v13, %s7441_s17  ;;  %2069 = vrot.lane.b32.xlu1 %v2044_v50, %s7441_s17 }
 0x3b4   : > { %2071 = vrot.lane.b32.xlu0 %v2045_v12, %s7441_s17  ;;  %2073 = vrot.lane.b32.xlu1 %v2046_v21, %s7441_s17  ;;  %v2203_v12 = vmul.f32 %v9190_v1, %v2192_v3  ;;  %v2269_v21 = vmul.f32 %v9140_v33, %v9278_v23 }
 0x3b8   : > { %2075 = vrot.lane.b32.xlu0 %v2047_v29, %s7441_s17  ;;  %2077 = vrot.lane.b32.xlu1 %v2048_v18, %s7441_s17 }
 0x3bc   : > { %2079 = vrot.lane.b32.xlu0 %v2049_v61, %s7441_s17  ;;  %2081 = vrot.lane.b32.xlu1 %v2050_v10, %s7441_s17 }
 0x3c0   : > { %2083 = vrot.lane.b32.xlu0 %v2051_v60, %s7441_s17  ;;  %2139 = vrot.lane.b32.xlu1 %v2117_v5, %s7442_s9 }
 0x3c4   : > { %2141 = vrot.lane.b32.xlu0 %v2118_v41, %s7442_s9  ;;  %2143 = vrot.lane.b32.xlu1 %v2119_v17, %s7442_s9  ;;  %v2270_v17 = vmul.f32 %v9144_v19, %v9278_v23 }
 0x3c8   : > { %2145 = vrot.lane.b32.xlu0 %v2120_v24, %s7442_s9  ;;  %2147 = vrot.lane.b32.xlu1 %v2121_v30, %s7442_s9  ;;  %v2271_v24 = vmul.f32 %v9150_v49, %v9278_v23 }
 0x3cc   : > { %2149 = vrot.lane.b32.xlu0 %v2122_v11, %s7442_s9  ;;  %2151 = vrot.lane.b32.xlu1 %v2123_v27, %s7442_s9 }
 0x3d0   : > { %2153 = vrot.lane.b32.xlu0 %v2124_v35, %s7442_s9  ;;  %2155 = vrot.lane.b32.xlu1 %v2125_v59, %s7442_s9 }
 0x3d4   : > { %2157 = vrot.lane.b32.xlu0 %v2126_v57, %s7442_s9  ;;  %2159 = vrot.lane.b32.xlu1 %v2127_v53, %s7442_s9 }
 0x3d8   : > { %2215 = vrot.lane.b32.xlu0 %v2193_v47, %s7443_s8  ;;  %2217 = vrot.lane.b32.xlu1 %v2194_v8, %s7443_s8  ;;  %v2272_v47 = vmul.f32 %v9154_v26, %v9278_v23 }
 0x3dc   : > { %2219 = vrot.lane.b32.xlu0 %v2195_v45, %s7443_s8  ;;  %2221 = vrot.lane.b32.xlu1 %v2196_v51, %s7443_s8 }
 0x3e0   : > { %2223 = vrot.lane.b32.xlu0 %v2197_v31, %s7443_s8  ;;  %2225 = vrot.lane.b32.xlu1 %v2198_v36, %s7443_s8 }
 0x3e2   : > { %v7013_v55 = vpop.permute.xlu1 %7012 }
 0x3e3   : > { %v7015_v6 = vunpack.i.h.bf16 %v7013_v55  ;;  %v7014_v56 = vunpack.i.l.bf16 %v7013_v55 }
 0x3e4   : > { %2227 = vrot.lane.b32.xlu0 %v2199_v48, %s7443_s8  ;;  %2229 = vrot.lane.b32.xlu1 %v2200_v34, %s7443_s8 }
 0x3e5   : > { %v1815_v7 = vsel %vm507_vm2, %v7014_v56, %v7015_v6 }
 0x3e6   : > { %v7018_v46 = vpop.permute.xlu0 %7017  ;;  %v1831_v18 = vmax.f32 %v9071_v54, %v1815_v7  ;;  %v2279_v7 = vmul.f32 %v9190_v1, %v9278_v23 }
 0x3e7   : > { %v7020_v13 = vunpack.i.h.bf16 %v7018_v46  ;;  %v7019_v50 = vunpack.i.l.bf16 %v7018_v46  ;;  %v2344_v46 = vstv %s6629_s10  ;;  %s6639_s10 = sld [smem:[#allocation7 + $0x1e]] }
 0x3e8   : > { %2231 = vrot.lane.b32.xlu0 %v2201_v37, %s7443_s8  ;;  %2233 = vrot.lane.b32.xlu1 %v2202_v38, %s7443_s8  ;;  %v6811_v30 = vpack.c.bf16 %v1831_v18, %v1831_v18 }
 0x3e9   : > { %v1816_v29 = vsel %vm507_vm2, %v7015_v6, %v7019_v50  ;;  %v1817_v61 = vsel %vm507_vm2, %v7019_v50, %v7020_v13 }
 0x3ea   : > { %v7023_v10 = vpop.permute.xlu1 %7022  ;;  %v1832_v28 = vmax.f32 %v9075_v44, %v1816_v29  ;;  %v1833_v11 = vmax.f32 %v9091_v52, %v1817_v61  ;;  %v2273_v52 = vmul.f32 %v9160_v0, %v9278_v23  ;;  %v2348_v61 = vmul.f32 %v9154_v26, %v2344_v46 }
 0x3eb   : > { %v7025_v60 = vunpack.i.h.bf16 %v7023_v10  ;;  %v7024_v5 = vunpack.i.l.bf16 %v7023_v10 }
 0x3ec   : > { %2235 = vrot.lane.b32.xlu0 %v2203_v12, %s7443_s8  ;;  %2291 = vrot.lane.b32.xlu1 %v2269_v21, %s7444_s15  ;;  %v6812_v41 = vpack.c.bf16 %v1832_v28, %v1832_v28  ;;  %v2345_v12 = vmul.f32 %v9140_v33, %v2344_v46  ;;  %v2346_v21 = vmul.f32 %v9144_v19, %v2344_v46 }
 0x3ed   : > { %v1818_v54 = vsel %vm507_vm2, %v7020_v13, %v7024_v5  ;;  %v1819_v59 = vsel %vm507_vm2, %v7024_v5, %v7025_v60  ;;  %v2350_v5 = vmul.f32 %v9164_v39, %v2344_v46 }
 0x3ee   : > { %v7028_v27 = vpop.permute.xlu0 %7027  ;;  %v1814_v44 = vpop.permute.xlu1 %1813  ;;  %5698 = vmatprep.mubr.bf16.mxu0 %v6812_v41  ;;  %v1834_v35 = vmax.f32 %v9095_v62, %v1818_v54  ;;  %v6813_v62 = vpack.c.bf16 %v1833_v11, %v1833_v11  ;;  %v1835_v34 = vmax.f32 %v9112_v20, %v1819_v59 }
 0x3ef   : > { %v7030_v57 = vunpack.i.h.bf16 %v7028_v27  ;;  %v7029_v53 = vunpack.i.l.bf16 %v7028_v27  ;;  %5699 = vmatmul.mubr.bf16.vlgmr.msra.gmra.mxu0 %v6811_v30  ;;  %v2352_v30 = vmul.f32 %v9174_v2, %v2344_v46  ;;  %v2353_v27 = vmul.f32 %v9180_v40, %v2344_v46 }
 0x3f0   : > { %2293 = vrot.lane.b32.xlu0 %v2270_v17, %s7444_s15  ;;  %2295 = vrot.lane.b32.xlu1 %v2271_v24, %s7444_s15  ;;  %v6814_v3 = vpack.c.bf16 %v1834_v35, %v1834_v35  ;;  %v2351_v24 = vmul.f32 %v9170_v42, %v2344_v46 }
 0x3f1   : > { %v1822_v8 = vsel %vm507_vm2, %v7030_v57, %v1814_v44  ;;  %5761 = vmatpush1.bf16.xpose.msra.mxu0 %v6739_v58  ;;  %v1820_v45 = vsel %vm507_vm2, %v7025_v60, %v7029_v53  ;;  %v1821_v55 = vsel %vm507_vm2, %v7029_v53, %v7030_v57  ;;  %v2275_v58 = vmul.f32 %v9170_v42, %v9278_v23 }
 0x3f2   : > { %v1838_v51 = vmax.f32 %v9130_v63, %v1822_v8  ;;  %v9312_v31 = vpop.permute.xlu0 %1911  ;;  %v9314_v36 = vpop.permute.xlu1 %1913  ;;  %5738 = vmatprep.mubr.bf16.mxu1 %v6814_v3  ;;  %v1836_v48 = vmax.f32 %v9116_v43, %v1820_v45  ;;  %v6815_v63 = vpack.c.bf16 %v1835_v34, %v1835_v34  ;;  %v1837_v56 = vmax.f32 %v9126_v25, %v1821_v55 }
 0x3f3   : > { %5739 = vmatmul.mubr.bf16.vlgmr.msra.gmra.mxu1 %v6813_v62  ;;  %v2278_v25 = vmul.f32 %v9184_v4, %v9278_v23  ;;  %v2347_v23 = vmul.f32 %v9150_v49, %v2344_v46  ;;  %v2349_v60 = vmul.f32 %v9160_v0, %v2344_v46  ;;  %v2354_v44 = vmul.f32 %v9184_v4, %v2344_v46 }
 0x3f4   : > { %v6818_v6 = vpack.c.bf16 %v1838_v51, %v1838_v51  ;;  %2297 = vrot.lane.b32.xlu0 %v2272_v47, %s7444_s15  ;;  %2299 = vrot.lane.b32.xlu1 %v2273_v52, %s7444_s15  ;;  %v6816_v14 = vpack.c.bf16 %v1836_v48, %v1836_v48  ;;  %v6817_v38 = vpack.c.bf16 %v1837_v56, %v1837_v56  ;;  %v2420_v57 = vstv %s6630_s13  ;;  %s6640_s13 = sld [smem:[#allocation7 + $0x1f]] }
 0x3f5   : > { %5801 = vmatpush1.bf16.xpose.msra.mxu1 %v6741_v16  ;;  %v2355_v53 = vmul.f32 %v9190_v1, %v2344_v46  ;;  %v2421_v3 = vmul.f32 %v9140_v33, %v2420_v57  ;;  %v2422_v8 = vmul.f32 %v9144_v19, %v2420_v57  ;;  %v2423_v62 = vmul.f32 %v9150_v49, %v2420_v57 }
 0x3f6   : > { %v9328_v20 = vpop.permute.xlu0 %1915  ;;  %v9330_v43 = vpop.permute.xlu1 %1917  ;;  %5778 = vmatprep.mubr.bf16.mxu0 %v6816_v14  ;;  %5818 = vmatprep.mubr.bf16.mxu1 %v6818_v6  ;;  %v2424_v48 = vmul.f32 %v9154_v26, %v2420_v57  ;;  %v2425_v34 = vmul.f32 %v9160_v0, %v2420_v57  ;;  %v2426_v14 = vmul.f32 %v9164_v39, %v2420_v57 }
 0x3f7   : > { %v2428_v56 = vmul.f32 %v9174_v2, %v2420_v57 }
 0x3f8   : > { %5779 = vmatmul.mubr.bf16.vlgmr.msra.gmra.mxu0 %v6815_v63  ;;  %2301 = vrot.lane.b32.xlu0 %v2274_v15, %s7444_s15  ;;  %v2427_v15 = vmul.f32 %v9170_v42, %v2420_v57 }
 0x3f9   : > { %2303 = vrot.lane.b32.xlu1 %v2275_v58, %s7444_s15 }
 0x3fa   : > { %v9339_v16 = vpop.permute.xlu0 %1919  ;;  %v9341_v37 = vpop.permute.xlu1 %1921 }
 0x3fc   : > { %5819 = vmatmul.mubr.bf16.vlgmr.msra.gmra.mxu1 %v6817_v38  ;;  %2305 = vrot.lane.b32.xlu0 %v2276_v22, %s7444_s15  ;;  %v2429_v22 = vmul.f32 %v9180_v40, %v2420_v57 }
 0x3fd   : > { %2307 = vrot.lane.b32.xlu1 %v2277_v32, %s7444_s15 }
 0x3fe   : > { %v9349_v13 = vpop.permute.xlu0 %1923  ;;  %v9351_v50 = vpop.permute.xlu1 %1925 }
 0x400   : > { %2309 = vrot.lane.b32.xlu0 %v2278_v25, %s7444_s15  ;;  %v2430_v25 = vmul.f32 %v9184_v4, %v2420_v57 }
 0x401   : > { %2311 = vrot.lane.b32.xlu1 %v2279_v7, %s7444_s15  ;;  %v2431_v7 = vmul.f32 %v9190_v1, %v2420_v57 }
 0x402   : > { %v9357_v29 = vpop.permute.xlu0 %1927  ;;  %v9359_v18 = vpop.permute.xlu1 %1929 }
 0x404   : > { %2367 = vrot.lane.b32.xlu0 %v2345_v12, %s7445_s28 }
 0x405   : > { %2369 = vrot.lane.b32.xlu1 %v2346_v21, %s7445_s28 }
 0x406   : > { %v9365_v10 = vpop.permute.xlu0 %1931  ;;  %v9367_v28 = vpop.permute.xlu1 %1987 }
 0x408   : > { %2371 = vrot.lane.b32.xlu0 %v2347_v23, %s7445_s28 }
 0x409   : > { %2373 = vrot.lane.b32.xlu1 %v2348_v61, %s7445_s28 }
 0x40a   : > { %v9373_v41 = vpop.permute.xlu0 %1989  ;;  %v9375_v17 = vpop.permute.xlu1 %1991 }
 0x40c   : > { %2375 = vrot.lane.b32.xlu0 %v2349_v60, %s7445_s28 }
 0x40d   : > { %2377 = vrot.lane.b32.xlu1 %v2350_v5, %s7445_s28 }
 0x40e   : > { %v9381_v54 = vpop.permute.xlu0 %1993  ;;  %v9383_v11 = vpop.permute.xlu1 %1995 }
 0x410   : > { %2379 = vrot.lane.b32.xlu0 %v2351_v24, %s7445_s28 }
 0x411   : > { %2381 = vrot.lane.b32.xlu1 %v2352_v30, %s7445_s28 }
 0x412   : > { %v9389_v35 = vpop.permute.xlu0 %1997  ;;  %v9391_v59 = vpop.permute.xlu1 %1999 }
 0x414   : > { %2383 = vrot.lane.b32.xlu0 %v2353_v27, %s7445_s28 }
 0x415   : > { %2385 = vrot.lane.b32.xlu1 %v2354_v44, %s7445_s28 }
 0x416   : > { %v9397_v47 = vpop.permute.xlu0 %2001  ;;  %v9399_v52 = vpop.permute.xlu1 %2003 }
 0x418   : > { %2387 = vrot.lane.b32.xlu0 %v2355_v53, %s7445_s28 }
 0x419   : > { %2443 = vrot.lane.b32.xlu1 %v2421_v3, %s7446_s11 }
 0x41a   : > { %v9405_v45 = vpop.permute.xlu0 %2005  ;;  %v9407_v51 = vpop.permute.xlu1 %2007 }
 0x41c   : > { %2445 = vrot.lane.b32.xlu0 %v2422_v8, %s7446_s11 }
 0x41d   : > { %2447 = vrot.lane.b32.xlu1 %v2423_v62, %s7446_s11 }
 0x41e   : > { %v9413_v55 = vpop.permute.xlu0 %2063  ;;  %v9415_v6 = vpop.permute.xlu1 %2065 }
 0x420   : > { %2449 = vrot.lane.b32.xlu0 %v2424_v48, %s7446_s11 }
 0x421   : > { %2451 = vrot.lane.b32.xlu1 %v2425_v34, %s7446_s11 }
 0x422   : > { %v9421_v58 = vpop.permute.xlu0 %2067  ;;  %v9423_v63 = vpop.permute.xlu1 %2069 }
 0x424   : > { %2453 = vrot.lane.b32.xlu0 %v2426_v14, %s7446_s11 }
 0x425   : > { %2455 = vrot.lane.b32.xlu1 %v2427_v15, %s7446_s11 }
 0x426   : > { %v9429_v32 = vpop.permute.xlu0 %2071  ;;  %v9431_v38 = vpop.permute.xlu1 %2073 }
 0x428   : > { %2457 = vrot.lane.b32.xlu0 %v2428_v56, %s7446_s11 }
 0x429   : > { %2459 = vrot.lane.b32.xlu1 %v2429_v22, %s7446_s11 }
 0x42a   : > { %v9437_v46 = vpop.permute.xlu0 %2075  ;;  %v9439_v12 = vpop.permute.xlu1 %2077 }
 0x42c   : > { %2461 = vrot.lane.b32.xlu0 %v2430_v25, %s7446_s11 }
 0x42d   : > { %2463 = vrot.lane.b32.xlu1 %v2431_v7, %s7446_s11 }
 0x42e   : > { %v9443_v21 = vpop.permute.xlu0 %2079  ;;  %v9445_v23 = vpop.permute.xlu1 %2081 }
 0x432   : > { %v9447_v61 = vpop.permute.xlu0 %2083  ;;  %v9449_v60 = vpop.permute.xlu1 %2139 }
 0x436   : > { %v9451_v5 = vpop.permute.xlu0 %2141  ;;  %v9453_v24 = vpop.permute.xlu1 %2143 }
 0x43a   : > { %v9455_v1 = vpop.permute.xlu0 %2145  ;;  %v9457_v30 = vpop.permute.xlu1 %2147 }
 0x43e   : > { %v9459_v27 = vpop.permute.xlu0 %2149  ;;  %v9461_v44 = vpop.permute.xlu1 %2151 }
 0x442   : > { %v9463_v57 = vpop.permute.xlu0 %2153  ;;  %v9465_v53 = vpop.permute.xlu1 %2155 }
 0x446   : > { %v9467_v3 = vpop.permute.xlu0 %2157  ;;  %v9469_v8 = vpop.permute.xlu1 %2159 }
 0x447   : > { %12744 = vst [vmem:[#allocation21_spill] sm:$0xff] %v9469_v8 }
 0x44a   : > { %v9471_v62 = vpop.permute.xlu0 %2215  ;;  %v9473_v48 = vpop.permute.xlu1 %2217 }
 0x44b   : > { %12745 = vst [vmem:[#allocation22_spill] sm:$0xff] %v9471_v62  ;;  %12746 = vst [vmem:[#allocation23_spill] sm:$0xff] %v9473_v48 }
 0x44e   : > { %v9475_v34 = vpop.permute.xlu0 %2219  ;;  %v9477_v14 = vpop.permute.xlu1 %2221 }
 0x44f   : > { %12747 = vst [vmem:[#allocation24_spill] sm:$0xff] %v9475_v34  ;;  %12748 = vst [vmem:[#allocation26_spill] sm:$0xff] %v9477_v14 }
 0x452   : > { %v9479_v15 = vpop.permute.xlu0 %2223  ;;  %v9481_v56 = vpop.permute.xlu1 %2225 }
 0x453   : > { %12749 = vst [vmem:[#allocation25_spill] sm:$0xff] %v9479_v15  ;;  %12750 = vst [vmem:[#allocation29_spill] sm:$0xff] %v9481_v56 }
 0x456   : > { %v9483_v22 = vpop.permute.xlu0 %2227  ;;  %v9485_v25 = vpop.permute.xlu1 %2229 }
 0x457   : > { %12751 = vst [vmem:[#allocation27_spill] sm:$0xff] %v9483_v22  ;;  %12752 = vst [vmem:[#allocation31_spill] sm:$0xff] %v9485_v25 }
 0x45a   : > { %v9487_v7 = vpop.permute.xlu0 %2231  ;;  %v9489_v9 = vpop.permute.xlu1 %2233 }
 0x45b   : > { %12753 = vst [vmem:[#allocation28_spill] sm:$0xff] %v9487_v7  ;;  %12754 = vst [vmem:[#allocation33_spill] sm:$0xff] %v9489_v9  ;;  %v1876_v7 = vstv %s6622_s26  ;;  %s6641_s26 = sld [smem:[#allocation7 + $0x20]] }
 0x45e   : > { %v9491_v8 = vpop.permute.xlu0 %2235  ;;  %v9493_v62 = vpop.permute.xlu1 %2291 }
 0x45f   : > { %12755 = vst [vmem:[#allocation30_spill] sm:$0xff] %v9491_v8  ;;  %12756 = vst [vmem:[#allocation35_spill] sm:$0xff] %v9493_v62  ;;  %v1877_v8 = vmul.f32 %v9140_v33, %v1876_v7  ;;  %v1878_v62 = vmul.f32 %v9144_v19, %v1876_v7  ;;  %v1935_v33 = vsel %vm353_vm0, %v9328_v20, %v9330_v43 }
 0x460   : > { %v1936_v19 = vsel %vm353_vm0, %v9330_v43, %v9339_v16  ;;  %v1940_v43 = vsel %vm353_vm0, %v9351_v50, %v9357_v29 }
 0x462   : > { %v9495_v48 = vpop.permute.xlu0 %2293  ;;  %v9497_v34 = vpop.permute.xlu1 %2295 }
 0x463   : > { %12757 = vst [vmem:[#allocation32_spill] sm:$0xff] %v9497_v34  ;;  %v1933_v34 = vsel %vm353_vm0, %v9312_v31, %v9314_v36  ;;  %v1884_v31 = vmul.f32 %v9174_v2, %v1876_v7  ;;  %v1939_v2 = vsel %vm353_vm0, %v9349_v13, %v9351_v50  ;;  %v2010_v50 = vsel %vm430_vm1, %v9373_v41, %v9375_v17 }
 0x466   : > { %v9499_v15 = vpop.permute.xlu0 %2297  ;;  %v9501_v56 = vpop.permute.xlu1 %2299 }
 0x467   : > { %12758 = vst [vmem:[#allocation34_spill] sm:$0xff] %v9499_v15  ;;  %12759 = vst [vmem:[#allocation38_spill] sm:$0xff] %v9501_v56  ;;  %v1879_v15 = vmul.f32 %v9150_v49, %v1876_v7  ;;  %v1883_v49 = vmul.f32 %v9170_v42, %v1876_v7  ;;  %v1938_v42 = vsel %vm353_vm0, %v9341_v37, %v9349_v13 }
 0x468   : > { %v2009_v13 = vsel %vm430_vm1, %v9367_v28, %v9373_v41  ;;  %v2013_v41 = vsel %vm430_vm1, %v9383_v11, %v9389_v35 }
 0x46a   : > { %v9503_v22 = vpop.permute.xlu0 %2301 }
 0x46b   : > { %12760 = vst [vmem:[#allocation41_spill] sm:$0xff] %v9503_v22  ;;  %v9505_v25 = vpop.permute.xlu1 %2303  ;;  %v1934_v22 = vsel %vm353_vm0, %v9314_v36, %v9328_v20  ;;  %v1886_v20 = vmul.f32 %v9184_v4, %v1876_v7  ;;  %v1942_v4 = vsel %vm353_vm0, %v9359_v18, %v9365_v10  ;;  %v2012_v10 = vsel %vm430_vm1, %v9381_v54, %v9383_v11 }
 0x46c   : > { %12761 = vst [vmem:[#allocation39_spill] sm:$0xff] %v9505_v25  ;;  %v1880_v25 = vmul.f32 %v9154_v26, %v1876_v7  ;;  %v1953_v26 = vadd.f32 %v1933_v34, %v1877_v8  ;;  %v1955_v8 = vadd.f32 %v1935_v33, %v1879_v15  ;;  %v2015_v33 = vsel %vm430_vm1, %v9391_v59, %v9397_v47 }
 0x46d   : > { %v1962_v28 = vadd.f32 %v1942_v4, %v1886_v20  ;;  %v2017_v11 = vsel %vm430_vm1, %v9399_v52, %v9405_v45  ;;  %v2088_v20 = vsel %vm507_vm2, %v9423_v63, %v9429_v32 }
 0x46e   : > { %v9507_v14 = vpop.permute.xlu0 %2305  ;;  %v1956_v34 = vadd.f32 %v1936_v19, %v1880_v25  ;;  %v2029_v25 = vadd.f32 %v2009_v13, %v1953_v26  ;;  %v2094_v13 = vsel %vm507_vm2, %v9445_v23, %v9447_v61  ;;  %v2165_v61 = vsel %vm584_vm3, %v9457_v30, %v9459_v27 }
 0x46f   : > { %12762 = vst [vmem:[#allocation37_spill] sm:$0xff] %v9507_v14  ;;  %v9509_v9 = vpop.permute.xlu1 %2307  ;;  %v1881_v14 = vmul.f32 %v9160_v0, %v1876_v7  ;;  %v1937_v0 = vsel %vm353_vm0, %v9339_v16, %v9341_v37 }
 0x470   : > { %12763 = vst [vmem:[#allocation36_spill] sm:$0xff] %v9509_v9  ;;  %v1882_v9 = vmul.f32 %v9164_v39, %v1876_v7  ;;  %v1885_v39 = vmul.f32 %v9180_v40, %v1876_v7  ;;  %v1941_v40 = vsel %vm353_vm0, %v9357_v29, %v9359_v18  ;;  %v1960_v18 = vadd.f32 %v1940_v43, %v1884_v31 }
 0x471   : > { %v1957_v37 = vadd.f32 %v1937_v0, %v1881_v14  ;;  %v2085_v0 = vsel %vm507_vm2, %v9413_v55, %v9415_v6 }
 0x472   : > { %v9523_v56 = vpop.permute.xlu0 %2309  ;;  %v1958_v15 = vadd.f32 %v1938_v42, %v1882_v9  ;;  %v1961_v14 = vadd.f32 %v1941_v40, %v1885_v39  ;;  %v2105_v43 = vadd.f32 %v2085_v0, %v2029_v25 }
 0x473   : > { %12764 = vst [vmem:[#allocation40_spill] sm:$0xff] %v9523_v56  ;;  %v9533_v36 = vpop.permute.xlu1 %2311  ;;  %v1954_v56 = vadd.f32 %v1934_v22, %v1878_v62  ;;  %v2011_v62 = vsel %vm430_vm1, %v9375_v17, %v9381_v54  ;;  %v1959_v22 = vadd.f32 %v1939_v2, %v1883_v49  ;;  %v2014_v17 = vsel %vm430_vm1, %v9389_v35, %v9391_v59 }
 0x474   : > { %v2031_v9 = vadd.f32 %v2011_v62, %v1955_v8  ;;  %v2032_v54 = vadd.f32 %v2012_v10, %v1956_v34  ;;  %v2016_v49 = vsel %vm430_vm1, %v9397_v47, %v9399_v52  ;;  %v9593_v35 = vstv %s9535_s24  ;;  %s6642_s24 = sld [smem:[#allocation7 + $0x21]] }
 0x475   : > { %v2030_v7 = vadd.f32 %v2010_v50, %v1954_v56  ;;  %v2033_v56 = vadd.f32 %v2013_v41, %v1957_v37  ;;  %v2034_v26 = vadd.f32 %v2014_v17, %v1958_v15  ;;  %v2018_v59 = vsel %vm430_vm1, %v9405_v45, %v9407_v51  ;;  %v12765_v41 = vld [vmem:[#allocation21_spill] sm:$0xff] }
 0x476   : > { %v9557_v16 = vpop.permute.xlu0 %2367  ;;  %v2035_v39 = vadd.f32 %v2015_v33, %v1959_v22  ;;  %v2086_v47 = vsel %vm507_vm2, %v9415_v6, %v9421_v58  ;;  %v2087_v52 = vsel %vm507_vm2, %v9421_v58, %v9423_v63  ;;  %v2036_v42 = vadd.f32 %v2016_v49, %v1960_v18  ;;  %v12767_v33 = vld [vmem:[#allocation22_spill] sm:$0xff] }
 0x477   : > { %v9568_v29 = vpop.permute.xlu1 %2369  ;;  %v2037_v2 = vadd.f32 %v2017_v11, %v1961_v14  ;;  %v2089_v45 = vsel %vm507_vm2, %v9429_v32, %v9431_v38  ;;  %v2090_v51 = vsel %vm507_vm2, %v9431_v38, %v9437_v46  ;;  %v2038_v6 = vadd.f32 %v2018_v59, %v1962_v28  ;;  %v12768_v11 = vld [vmem:[#allocation24_spill] sm:$0xff] }
 0x478   : > { %v2091_v58 = vsel %vm507_vm2, %v9437_v46, %v9439_v12  ;;  %v2092_v63 = vsel %vm507_vm2, %v9439_v12, %v9443_v21  ;;  %v2106_v34 = vadd.f32 %v2086_v47, %v2030_v7  ;;  %v2107_v32 = vadd.f32 %v2087_v52, %v2031_v9  ;;  %v12766_v9 = vld [vmem:[#allocation23_spill] sm:$0xff]  ;;  %v12771_v52 = vld [vmem:[#allocation29_spill] sm:$0xff] }
 0x479   : > { %v2108_v40 = vadd.f32 %v2088_v20, %v2032_v54  ;;  %v2093_v38 = vsel %vm507_vm2, %v9443_v21, %v9445_v23  ;;  %v2109_v4 = vadd.f32 %v2089_v45, %v2033_v56  ;;  %v2110_v37 = vadd.f32 %v2090_v51, %v2034_v26  ;;  %v12773_v51 = vld [vmem:[#allocation31_spill] sm:$0xff] }
 0x47a   : > { %v9582_v19 = vpop.permute.xlu0 %2371  ;;  %v2161_v46 = vsel %vm584_vm3, %v9449_v60, %v9451_v5  ;;  %v2111_v12 = vadd.f32 %v2091_v58, %v2035_v39  ;;  %v2112_v50 = vadd.f32 %v2092_v63, %v2036_v42  ;;  %v2162_v62 = vsel %vm584_vm3, %v9451_v5, %v9453_v24  ;;  %v12770_v39 = vld [vmem:[#allocation25_spill] sm:$0xff] }
 0x47b   : > { %v9590_v31 = vpop.permute.xlu1 %2373  ;;  %v2163_v21 = vsel %vm584_vm3, %v9453_v24, %v9455_v1  ;;  %v2113_v22 = vadd.f32 %v2093_v38, %v2037_v2  ;;  %v2164_v23 = vsel %vm584_vm3, %v9455_v1, %v9457_v30  ;;  %v2166_v60 = vsel %vm584_vm3, %v9459_v27, %v9461_v44  ;;  %v12772_v2 = vld [vmem:[#allocation27_spill] sm:$0xff]  ;;  %v12776_v38 = vld [vmem:[#allocation32_spill] sm:$0xff] }
 0x47c   : > { %v2114_v18 = vadd.f32 %v2094_v13, %v2038_v6  ;;  %v2181_v10 = vadd.f32 %v2161_v46, %v2105_v43  ;;  %v2167_v24 = vsel %vm584_vm3, %v9461_v44, %v9463_v57  ;;  %v2168_v1 = vsel %vm584_vm3, %v9463_v57, %v9465_v53  ;;  %v12774_v43 = vld [vmem:[#allocation35_spill] sm:$0xff] }
 0x47d   : > { %v2182_v14 = vadd.f32 %v2162_v62, %v2106_v34  ;;  %v2183_v28 = vadd.f32 %v2163_v21, %v2107_v32  ;;  %v2169_v30 = vsel %vm584_vm3, %v9465_v53, %v9467_v3  ;;  %v2170_v27 = vsel %vm584_vm3, %v9467_v3, %v12765_v41  ;;  %v12769_v53 = vld [vmem:[#allocation26_spill] sm:$0xff]  ;;  %v12775_v32 = vld [vmem:[#allocation28_spill] sm:$0xff]  ;;  %v12781_v41 = vld [vmem:[#allocation39_spill] sm:$0xff] }
 0x47e   : > { %v9616_v55 = vpop.permute.xlu0 %2375  ;;  %v2184_v17 = vadd.f32 %v2164_v23, %v2108_v40  ;;  %v2185_v25 = vadd.f32 %v2165_v61, %v2109_v4  ;;  %v2186_v7 = vadd.f32 %v2166_v60, %v2110_v37  ;;  %v2237_v44 = vsel %vm661_vm4, %v12767_v33, %v12766_v9 }
 0x47f   : > { %v9624_v8 = vpop.permute.xlu1 %2377  ;;  %v2187_v57 = vadd.f32 %v2167_v24, %v2111_v12  ;;  %v2188_v49 = vadd.f32 %v2168_v1, %v2112_v50  ;;  %v2238_v56 = vsel %vm661_vm4, %v12766_v9, %v12768_v11  ;;  %v2239_v26 = vsel %vm661_vm4, %v12768_v11, %v12769_v53  ;;  %v12777_v12 = vld [vmem:[#allocation33_spill] sm:$0xff]  ;;  %v12779_v1 = vld [vmem:[#allocation38_spill] sm:$0xff] }
 0x480   : > { %v2189_v59 = vadd.f32 %v2169_v30, %v2113_v22  ;;  %v9679_v0 = vadd.f32 %v2170_v27, %v2114_v18  ;;  %v2240_v47 = vsel %vm661_vm4, %v12769_v53, %v12770_v39  ;;  %v2241_v20 = vsel %vm661_vm4, %v12770_v39, %v12771_v52  ;;  %v12782_v53 = vld [vmem:[#allocation30_spill] sm:$0xff]  ;;  %v12783_v39 = vld [vmem:[#allocation37_spill] sm:$0xff] }
 0x481   : > { %v2257_v42 = vadd.f32 %v2237_v44, %v2181_v10  ;;  %v2242_v45 = vsel %vm661_vm4, %v12771_v52, %v12772_v2  ;;  %v2243_v6 = vsel %vm661_vm4, %v12772_v2, %v12773_v51  ;;  %v2313_v58 = vsel %vm738_vm5, %v12774_v43, %v9495_v48  ;;  %v12778_v10 = vld [vmem:[#allocation34_spill] sm:$0xff] }
 0x482   : > { %v9641_v15 = vpop.permute.xlu0 %2379  ;;  %v2258_v63 = vadd.f32 %v2238_v56, %v2182_v14  ;;  %v2259_v34 = vadd.f32 %v2239_v26, %v2183_v28  ;;  %v2244_v40 = vsel %vm661_vm4, %v12773_v51, %v12775_v32  ;;  %v2314_v4 = vsel %vm738_vm5, %v9495_v48, %v12776_v38 }
 0x483   : > { %v9652_v5 = vpop.permute.xlu1 %2381  ;;  %v2260_v13 = vadd.f32 %v2240_v47, %v2184_v17  ;;  %v2261_v46 = vadd.f32 %v2241_v20, %v2185_v25  ;;  %v2245_v50 = vsel %vm661_vm4, %v12775_v32, %v12777_v12  ;;  %v2389_v62 = vsel %vm815_vm6, %v9557_v16, %v9568_v29  ;;  %v12780_v16 = vld [vmem:[#allocation41_spill] sm:$0xff] }
 0x484   : > { %v2262_v22 = vadd.f32 %v2242_v45, %v2186_v7  ;;  %v2263_v23 = vadd.f32 %v2243_v6, %v2187_v57  ;;  %v2333_v61 = vadd.f32 %v2313_v58, %v2257_v42  ;;  %v2390_v48 = vsel %vm815_vm6, %v9568_v29, %v9582_v19 }
 0x485   : > { %v2264_v60 = vadd.f32 %v2244_v40, %v2188_v49  ;;  %v2334_v18 = vadd.f32 %v2314_v4, %v2258_v63  ;;  %v2315_v24 = vsel %vm738_vm5, %v12776_v38, %v12778_v10  ;;  %v2316_v14 = vsel %vm738_vm5, %v12778_v10, %v12779_v1  ;;  %v12784_v38 = vld [vmem:[#allocation36_spill] sm:$0xff] }
 0x486   : > { %v9669_v54 = vpop.permute.xlu0 %2383  ;;  %v2265_v28 = vadd.f32 %v2245_v50, %v2189_v59  ;;  %v2317_v30 = vsel %vm738_vm5, %v12779_v1, %v12780_v16  ;;  %v2318_v27 = vsel %vm738_vm5, %v12780_v16, %v12781_v41  ;;  %v2409_v29 = vadd.f32 %v2389_v62, %v2333_v61  ;;  %v12785_v4 = vld [vmem:[#allocation40_spill] sm:$0xff] }
 0x487   : > { %v9677_v3 = vpop.permute.xlu1 %2385  ;;  %v2410_v25 = vadd.f32 %v2390_v48, %v2334_v18  ;;  %v2391_v7 = vsel %vm815_vm6, %v9582_v19, %v9590_v31  ;;  %v2392_v9 = vsel %vm815_vm6, %v9590_v31, %v9616_v55  ;;  %v2335_v57 = vadd.f32 %v2315_v24, %v2259_v34 }
 0x488   : > { %v2336_v49 = vadd.f32 %v2316_v14, %v2260_v13  ;;  %v2246_v26 = vsel %vm661_vm4, %v12777_v12, %v12782_v53  ;;  %v2337_v59 = vadd.f32 %v2317_v30, %v2261_v46  ;;  %v2319_v19 = vsel %vm738_vm5, %v12781_v41, %v12783_v39 }
 0x489   : > { %v2338_v52 = vadd.f32 %v2318_v27, %v2262_v22  ;;  %v2411_v31 = vadd.f32 %v2391_v7, %v2335_v57  ;;  %v2393_v45 = vsel %vm815_vm6, %v9616_v55, %v9624_v8  ;;  %v2394_v51 = vsel %vm815_vm6, %v9624_v8, %v9641_v15 }
 0x48a   : > { %v9702_v37 = vpop.permute.xlu0 %2387  ;;  %v2412_v20 = vadd.f32 %v2392_v9, %v2336_v49  ;;  %v2339_v63 = vadd.f32 %v2319_v19, %v2263_v23  ;;  %v2320_v55 = vsel %vm738_vm5, %v12783_v39, %v12784_v38  ;;  %v2321_v8 = vsel %vm738_vm5, %v12784_v38, %v12785_v4 }
 0x48b   : > { %v2444_v21 = vpop.permute.xlu1 %2443  ;;  %v2413_v12 = vadd.f32 %v2393_v45, %v2337_v59  ;;  %v2414_v50 = vadd.f32 %v2394_v51, %v2338_v52  ;;  %v2395_v62 = vsel %vm815_vm6, %v9641_v15, %v9652_v5  ;;  %v2396_v23 = vsel %vm815_vm6, %v9652_v5, %v9669_v54 }
 0x48c   : > { %v2340_v15 = vadd.f32 %v2320_v55, %v2264_v60  ;;  %v2266_v16 = vadd.f32 %v2246_v26, %v9679_v0  ;;  %v2341_v5 = vadd.f32 %v2321_v8, %v2265_v28  ;;  %v2322_v27 = vsel %vm738_vm5, %v12785_v4, %v9533_v36  ;;  %v12786_v55 = vld [vmem:[#allocation20_spill] sm:$0xff] }
 0x48d   : > { %v2397_v0 = vsel %vm815_vm6, %v9669_v54, %v9677_v3 }
 0x48e   : > { %v2446_v17 = vpop.permute.xlu0 %2445  ;;  %v2342_v49 = vadd.f32 %v2322_v27, %v2266_v16  ;;  %v2417_v53 = vadd.f32 %v2397_v0, %v2341_v5 }
 0x48f   : > { %v2465_v33 = vsel %vm892_vm7, %v2444_v21, %v2446_v17  ;;  %v2448_v44 = vpop.permute.xlu1 %2447 }
 0x490   : > { %v2485_v11 = vadd.f32 %v2465_v33, %v2409_v29  ;;  %v2466_v56 = vsel %vm892_vm7, %v2446_v17, %v2448_v44  ;;  %v2415_v29 = vadd.f32 %v2395_v62, %v2339_v63  ;;  %v2416_v17 = vadd.f32 %v2396_v23, %v2340_v15 }
 0x491   : > { %v2486_v47 = vadd.f32 %v2466_v56, %v2410_v25  ;;  %v2398_v33 = vsel %vm815_vm6, %v9677_v3, %v9702_v37 }
 0x492   : > { %v9740_v42 = vadd.f32 %v9593_v35, %v2485_v11  ;;  %v2450_v2 = vpop.permute.xlu0 %2449  ;;  %v2418_v39 = vadd.f32 %v2398_v33, %v2342_v49 }
 0x493   : > { %v9749_v6 = vadd.f32 %v9593_v35, %v2486_v47  ;;  %v2467_v43 = vsel %vm892_vm7, %v2448_v44, %v2450_v2  ;;  %v2452_v58 = vpop.permute.xlu1 %2451 }
 0x494   : > { %v2507_v34 = vmax.f32 %v9740_v42, 0.0  ;;  %v2487_v32 = vadd.f32 %v2467_v43, %v2411_v31  ;;  %v2468_v40 = vsel %vm892_vm7, %v2450_v2, %v2452_v58 }
 0x495   : > { %v2508_v13 = vmax.f32 %v9749_v6, 0.0  ;;  %v2488_v46 = vadd.f32 %v2468_v40, %v2412_v20 }
 0x496   : > { %v9765_v21 = vadd.f32 %v9593_v35, %v2487_v32  ;;  %v2454_v22 = vpop.permute.xlu0 %2453 }
 0x497   : > { %v9771_v61 = vadd.f32 %v9593_v35, %v2488_v46  ;;  %v2469_v48 = vsel %vm892_vm7, %v2452_v58, %v2454_v22  ;;  %v2456_v18 = vpop.permute.xlu1 %2455  ;;  %v7031_v10 = vpack.i.bf16 %v2508_v13, %v2507_v34 }
 0x498   : > { %v2509_v24 = vmax.f32 %v9765_v21, 0.0  ;;  %v2489_v1 = vadd.f32 %v2469_v48, %v2413_v12  ;;  %v2470_v14 = vsel %vm892_vm7, %v2454_v22, %v2456_v18 }
 0x499   : > { %v2510_v30 = vmax.f32 %v9771_v61, 0.0  ;;  %v2490_v41 = vadd.f32 %v2470_v14, %v2414_v50  ;;  %7032 = vrot.lane.b32.xlu0 %v7031_v10, %s7439_s29 }
 0x49a   : > { %v9787_v60 = vadd.f32 %v9593_v35, %v2489_v1  ;;  %v2458_v25 = vpop.permute.xlu0 %2457 }
 0x49b   : > { %v9793_v28 = vadd.f32 %v9593_v35, %v2490_v41  ;;  %v2471_v7 = vsel %vm892_vm7, %v2456_v18, %v2458_v25  ;;  %v2460_v9 = vpop.permute.xlu1 %2459  ;;  %v7036_v36 = vpack.i.bf16 %v2510_v30, %v2509_v24 }
 0x49c   : > { %v2511_v44 = vmax.f32 %v9787_v60, 0.0  ;;  %v2491_v57 = vadd.f32 %v2471_v7, %v2415_v29  ;;  %v2472_v54 = vsel %vm892_vm7, %v2458_v25, %v2460_v9  ;;  %v5075_v25 = vld [vmem:[#allocation10 + $0x100] sm:$0x11] }
 0x49d   : > { %v2512_v11 = vmax.f32 %v9793_v28, 0.0  ;;  %v2492_v56 = vadd.f32 %v2472_v54, %v2416_v17  ;;  %7037 = vrot.lane.b32.xlu1 %v7036_v36, %s7439_s29  ;;  %v5051_v17 = vld [vmem:[#allocation10 + $0x40] sm:$0xff]  ;;  %v5076_v54 = vld [vmem:[#allocation10 + $0x108] sm:$0x11] }
 0x49e   : > { %v9808_v26 = vadd.f32 %v9593_v35, %v2491_v57  ;;  %v2462_v59 = vpop.permute.xlu0 %2461  ;;  %v6743_v36 = vcombine.low %v5051_v17, %v5075_v25  ;;  %v5052_v57 = vld [vmem:[#allocation10 + $0x48] sm:$0xff] }
 0x49f   : > { %v9811_v19 = vadd.f32 %v9593_v35, %v2492_v56  ;;  %v2473_v3 = vsel %vm892_vm7, %v2460_v9, %v2462_v59  ;;  %v2464_v37 = vpop.permute.xlu1 %2463  ;;  %v7041_v47 = vpack.i.bf16 %v2512_v11, %v2511_v44  ;;  %v6744_v9 = vcombine.high %v5051_v17, %v5075_v25  ;;  %v9935_v17 = vld [vmem:[%s7615_s30 + $0x28] sm:$0xff] }
 0x4a0   : > { %v2513_v52 = vmax.f32 %v9808_v26, 0.0  ;;  %v2493_v31 = vadd.f32 %v2473_v3, %v2417_v53  ;;  %v2474_v20 = vsel %vm892_vm7, %v2462_v59, %v2464_v37  ;;  %v6746_v59 = vcombine.high %v5052_v57, %v5076_v54  ;;  %v9911_v26 = vld [vmem:[%s7615_s30] sm:$0xff] }
 0x4a1   : > { %v2514_v2 = vmax.f32 %v9811_v19, 0.0  ;;  %v2494_v45 = vadd.f32 %v2474_v20, %v2418_v39  ;;  %7042 = vrot.lane.b32.xlu0 %v7041_v47, %s7439_s29  ;;  %5840 = vmatprep.subr.bf16.mxu0 %v6744_v9  ;;  %v6745_v39 = vcombine.low %v5052_v57, %v5076_v54  ;;  %v9848_v20 = vld [vmem:[#allocation10 + $0x50] sm:$0xff]  ;;  %v9945_v9 = vld [vmem:[%s7615_s30 + $0x38] sm:$0xff] }
 0x4a2   : > { %v9823_v51 = vadd.f32 %v9593_v35, %v2493_v31  ;;  %5841 = vmatpush1.bf16.xpose.msra.mxu0 %v6743_v36  ;;  %5880 = vmatprep.subr.bf16.mxu1 %v6746_v59  ;;  %v9955_v54 = vld [vmem:[%s7615_s30 + $0x48] sm:$0xff] }
 0x4a3   : > { %v2506_v43 = vadd.f32 %v9593_v35, %v2494_v45  ;;  %v7046_v58 = vpack.i.bf16 %v2514_v2, %v2513_v52  ;;  %5881 = vmatpush1.bf16.xpose.msra.mxu1 %v6745_v39  ;;  %v9850_v45 = vld [vmem:[#allocation10 + $0x110] sm:$0x11] }
 0x4a4   : > { %v2515_v63 = vmax.f32 %v9823_v51, 0.0  ;;  %v6747_v6 = vcombine.low %v9848_v20, %v9850_v45  ;;  %v9921_v51 = vld [vmem:[%s7615_s30 + $0x10] sm:$0xff] }
 0x4a5   : > { %v2516_v32 = vmax.f32 %v2506_v43, 0.0  ;;  %7047 = vrot.lane.b32.xlu1 %v7046_v58, %s7439_s29 }
 0x4a7   : > { %v7051_v40 = vpack.i.bf16 %v2516_v32, %v2515_v63 }
 0x4a9   : > { %7052 = vrot.lane.b32.xlu0 %v7051_v40, %s7439_s29  ;;  %v6748_v40 = vcombine.high %v9848_v20, %v9850_v45 }
 0x4ab   : > { %5920 = vmatprep.subr.bf16.mxu0 %v6748_v40 }
 0x4af   : > { %v5700_v38 = vpop.f32.mrf.mxu0 }
 0x4b0   : > { %v5701_v4 = vadd.f32 %v5700_v38, %v12786_v55 }
 0x4b1   : > { %v5702_v8 = vpop.f32.mrf.mxu0 }
 0x4b3   : > { %v5703_v35 = vpop.f32.mrf.mxu0  ;;  %v5740_v46 = vpop.f32.mrf.mxu1 }
 0x4b4   : > { %v5741_v12 = vadd.f32 %v5740_v46, %v5701_v4  ;;  %v9870_v46 = vld [vmem:[#allocation10 + $0x58] sm:$0xff] }
 0x4b5   : > { %v5704_v50 = vpop.f32.mrf.mxu0  ;;  %v5742_v62 = vpop.f32.mrf.mxu1 }
 0x4b7   : > { %v5743_v22 = vpop.f32.mrf.mxu1 }
 0x4b8   : > { %v5780_v23 = vpop.f32.mrf.mxu0 }
 0x4b9   : > { %v5781_v48 = vadd.f32 %v5780_v23, %v5741_v12  ;;  %v5744_v18 = vpop.f32.mrf.mxu1  ;;  %v9872_v12 = vld [vmem:[#allocation10 + $0x118] sm:$0x11] }
 0x4ba   : > { %v5782_v10 = vpop.f32.mrf.mxu0  ;;  %v6750_v61 = vcombine.high %v9870_v46, %v9872_v12 }
 0x4bc   : > { %v5783_v15 = vpop.f32.mrf.mxu0  ;;  %v5820_v1 = vpop.f32.mrf.mxu1  ;;  %5960 = vmatprep.subr.bf16.mxu1 %v6750_v61 }
 0x4bd   : > { %v9836_v14 = vadd.f32 %v5820_v1, %v5781_v48  ;;  %v2674_v15 = vstv %s6637_s16  ;;  %s6643_s16 = sld [smem:[#allocation7 + $0x22]] }
 0x4be   : > { %v5784_v16 = vpop.f32.mrf.mxu0  ;;  %v5822_v5 = vpop.f32.mrf.mxu1  ;;  %v2675_v19 = vmul.f32 %v9911_v26, %v2674_v15  ;;  %v2680_v25 = vmul.f32 %v9935_v17, %v2674_v15  ;;  %v2682_v36 = vmul.f32 %v9945_v9, %v2674_v15 }
 0x4bf   : > { %12787 = vst [vmem:[#allocation43_spill] sm:$0xff] %v9836_v14  ;;  %v9925_v5 = vld [vmem:[%s7615_s30 + $0x18] sm:$0xff] }
 0x4c0   : > { %v5823_v41 = vpop.f32.mrf.mxu1 }
 0x4c1   : > { %v2678_v41 = vmul.f32 %v9925_v5, %v2674_v15 }
 0x4c2   : > { %v5824_v27 = vpop.f32.mrf.mxu1 }
 0x4c3   : > { %v9931_v27 = vld [vmem:[%s7615_s30 + $0x20] sm:$0xff] }
 0x50b   : > { %v7033_v29 = vpop.permute.xlu0 %7032 }
 0x50c   : > { %v7035_v0 = vunpack.i.h.bf16 %v7033_v29  ;;  %v7034_v7 = vunpack.i.l.bf16 %v7033_v29  ;;  %v2679_v29 = vmul.f32 %v9931_v27, %v2674_v15 }
 0x50e   : > { %v2547_v49 = vsel %vm353_vm0, %v7034_v7, %v7035_v0 }
 0x50f   : > { %v7038_v33 = vpop.permute.xlu1 %7037  ;;  %v9842_v37 = vmax.f32 %v2507_v34, %v2547_v49  ;;  %v2684_v49 = vmul.f32 %v9955_v54, %v2674_v15 }
 0x510   : > { %v7040_v56 = vunpack.i.h.bf16 %v7038_v33  ;;  %v7039_v53 = vunpack.i.l.bf16 %v7038_v33  ;;  %v9951_v33 = vld [vmem:[%s7615_s30 + $0x40] sm:$0xff] }
 0x511   : > { %v2683_v57 = vmul.f32 %v9951_v33, %v2674_v15 }
 0x512   : > { %v2548_v3 = vsel %vm353_vm0, %v7035_v0, %v7039_v53  ;;  %v2549_v43 = vsel %vm353_vm0, %v7039_v53, %v7040_v56  ;;  %v9941_v0 = vld [vmem:[%s7615_s30 + $0x30] sm:$0xff] }
 0x513   : > { %v9846_v47 = vmax.f32 %v2508_v13, %v2548_v3  ;;  %v7043_v31 = vpop.permute.xlu0 %7042  ;;  %v9862_v13 = vmax.f32 %v2509_v24, %v2549_v43  ;;  %v2681_v7 = vmul.f32 %v9941_v0, %v2674_v15  ;;  %v9961_v53 = vld [vmem:[%s7615_s30 + $0x50] sm:$0xff] }
 0x514   : > { %v7045_v58 = vunpack.i.h.bf16 %v7043_v31  ;;  %v7044_v32 = vunpack.i.l.bf16 %v7043_v31  ;;  %v2685_v59 = vmul.f32 %v9961_v53, %v2674_v15 }
 0x515   : > { %v7056_v42 = vpack.i.bf16 %v9846_v47, %v9842_v37 }
 0x516   : > { %v2550_v34 = vsel %vm353_vm0, %v7040_v56, %v7044_v32  ;;  %v2551_v4 = vsel %vm353_vm0, %v7044_v32, %v7045_v58  ;;  %v2750_v56 = vstv %s6638_s12  ;;  %s6644_s12 = sld [smem:[#allocation7 + $0x23]] }
 0x517   : > { %v9866_v38 = vmax.f32 %v2510_v30, %v2550_v34  ;;  %v7048_v55 = vpop.permute.xlu1 %7047  ;;  %7057 = vrot.lane.b32.xlu1 %v7056_v42, %s7441_s17  ;;  %v6749_v30 = vcombine.low %v9870_v46, %v9872_v12  ;;  %v9883_v50 = vmax.f32 %v2511_v44, %v2551_v4  ;;  %v2751_v39 = vmul.f32 %v9911_v26, %v2750_v56 }
 0x518   : > { %v7050_v8 = vunpack.i.h.bf16 %v7048_v55  ;;  %v7049_v35 = vunpack.i.l.bf16 %v7048_v55  ;;  %v2753_v31 = vmul.f32 %v9921_v51, %v2750_v56  ;;  %v2754_v43 = vmul.f32 %v9925_v5, %v2750_v56 }
 0x519   : > { %v7061_v21 = vpack.i.bf16 %v9866_v38, %v9862_v13  ;;  %v2756_v32 = vmul.f32 %v9935_v17, %v2750_v56  ;;  %v2757_v40 = vmul.f32 %v9941_v0, %v2750_v56  ;;  %v2758_v42 = vmul.f32 %v9945_v9, %v2750_v56 }
 0x51a   : > { %v2552_v24 = vsel %vm353_vm0, %v7045_v58, %v7049_v35  ;;  %v2553_v23 = vsel %vm353_vm0, %v7049_v35, %v7050_v8  ;;  %v2755_v58 = vmul.f32 %v9931_v27, %v2750_v56  ;;  %v2759_v34 = vmul.f32 %v9951_v33, %v2750_v56 }
 0x51b   : > { %v9887_v62 = vmax.f32 %v2512_v11, %v2552_v24  ;;  %v7053_v22 = vpop.permute.xlu0 %7052  ;;  %7062 = vrot.lane.b32.xlu0 %v7061_v21, %s7441_s17  ;;  %v9897_v44 = vmax.f32 %v2513_v52, %v2553_v23  ;;  %v9915_v52 = vld [vmem:[%s7615_s30 + $0x8] sm:$0xff]  ;;  %v2760_v55 = vmul.f32 %v9955_v54, %v2750_v56  ;;  %v2761_v4 = vmul.f32 %v9961_v53, %v2750_v56 }
 0x51c   : > { %v7055_v48 = vunpack.i.h.bf16 %v7053_v22  ;;  %v7054_v18 = vunpack.i.l.bf16 %v7053_v22  ;;  %v2752_v3 = vmul.f32 %v9915_v52, %v2750_v56 }
 0x51d   : > { %v7066_v10 = vpack.i.bf16 %v9887_v62, %v9883_v50 }
 0x51e   : > { %v2554_v60 = vsel %vm353_vm0, %v7050_v8, %v7054_v18  ;;  %v2555_v28 = vsel %vm353_vm0, %v7054_v18, %v7055_v48  ;;  %v2826_v8 = vstv %s6639_s10  ;;  %s6636_s10 = sld [smem:[#allocation7 + $0x1b]] }
 0x51f   : > { %v9901_v11 = vmax.f32 %v2514_v2, %v2554_v60  ;;  %7067 = vrot.lane.b32.xlu1 %v7066_v10, %s7441_s17  ;;  %v2573_v16 = vmax.f32 %v2515_v63, %v2555_v28  ;;  %v2676_v2 = vmul.f32 %v9915_v52, %v2674_v15  ;;  %v2677_v63 = vmul.f32 %v9921_v51, %v2674_v15 }
 0x520   : > { %v2827_v35 = vmul.f32 %v9911_v26, %v2826_v8  ;;  %v2828_v21 = vmul.f32 %v9915_v52, %v2826_v8  ;;  %v2829_v61 = vmul.f32 %v9921_v51, %v2826_v8  ;;  %v2830_v24 = vmul.f32 %v9925_v5, %v2826_v8 }
 0x521   : > { %v7071_v1 = vpack.i.bf16 %v9901_v11, %v9897_v44  ;;  %v2831_v22 = vmul.f32 %v9931_v27, %v2826_v8  ;;  %v2832_v23 = vmul.f32 %v9935_v17, %v2826_v8  ;;  %v2833_v48 = vmul.f32 %v9941_v0, %v2826_v8 }
 0x522   : > { %v2834_v18 = vmul.f32 %v9945_v9, %v2826_v8  ;;  %v2835_v10 = vmul.f32 %v9951_v33, %v2826_v8  ;;  %v2836_v60 = vmul.f32 %v9955_v54, %v2826_v8  ;;  %v2902_v28 = vstv %s6640_s13  ;;  %s10306_s13 = sld [smem:[#allocation8 + $0x3]] }
 0x523   : > { %7072 = vrot.lane.b32.xlu0 %v7071_v1, %s7441_s17  ;;  %2599 = vrot.lane.b32.xlu1 %v2573_v16, %s7441_s17  ;;  %v2837_v15 = vmul.f32 %v9961_v53, %v2826_v8  ;;  %v2903_v1 = vmul.f32 %v9911_v26, %v2902_v28  ;;  %v2904_v16 = vmul.f32 %v9915_v52, %v2902_v28  ;;  %v10049_v8 = vstv %s6642_s24  ;;  %s6652_s24 = sld [smem:[#allocation7 + $0x26]] }
 0x524   : > { %v3060_v45 = vmul.f32 %v9935_v17, %v10049_v8  ;;  %v3062_v46 = vmul.f32 %v9945_v9, %v10049_v8  ;;  %v3063_v12 = vmul.f32 %v9951_v33, %v10049_v8 }
 0x527   : > { %2697 = vrot.lane.b32.xlu0 %v2675_v19, %s7439_s29  ;;  %2699 = vrot.lane.b32.xlu1 %v2676_v2, %s7439_s29  ;;  %v2905_v19 = vmul.f32 %v9921_v51, %v2902_v28  ;;  %v2906_v2 = vmul.f32 %v9925_v5, %v2902_v28 }
 0x52b   : > { %2701 = vrot.lane.b32.xlu0 %v2677_v63, %s7439_s29  ;;  %2703 = vrot.lane.b32.xlu1 %v2678_v41, %s7439_s29  ;;  %v2907_v63 = vmul.f32 %v9931_v27, %v2902_v28  ;;  %v2908_v41 = vmul.f32 %v9935_v17, %v2902_v28 }
 0x52f   : > { %2705 = vrot.lane.b32.xlu0 %v2679_v29, %s7439_s29  ;;  %2707 = vrot.lane.b32.xlu1 %v2680_v25, %s7439_s29  ;;  %v2909_v29 = vmul.f32 %v9941_v0, %v2902_v28  ;;  %v2910_v25 = vmul.f32 %v9945_v9, %v2902_v28 }
 0x533   : > { %2709 = vrot.lane.b32.xlu0 %v2681_v7, %s7439_s29  ;;  %2711 = vrot.lane.b32.xlu1 %v2682_v36, %s7439_s29  ;;  %v2911_v7 = vmul.f32 %v9951_v33, %v2902_v28  ;;  %v2912_v36 = vmul.f32 %v9955_v54, %v2902_v28 }
 0x537   : > { %2713 = vrot.lane.b32.xlu0 %v2683_v57, %s7439_s29  ;;  %2715 = vrot.lane.b32.xlu1 %v2684_v49, %s7439_s29  ;;  %v2913_v57 = vmul.f32 %v9961_v53, %v2902_v28  ;;  %v2978_v49 = vstv %s6641_s26  ;;  %s6651_s26 = sld [smem:[#allocation7 + $0x25]] }
 0x538   : > { %v2979_v56 = vmul.f32 %v9911_v26, %v2978_v49 }
 0x53b   : > { %2717 = vrot.lane.b32.xlu0 %v2685_v59, %s7439_s29  ;;  %2773 = vrot.lane.b32.xlu1 %v2751_v39, %s7440_s14  ;;  %v2980_v59 = vmul.f32 %v9915_v52, %v2978_v49  ;;  %v2981_v39 = vmul.f32 %v9921_v51, %v2978_v49 }
 0x53f   : > { %2775 = vrot.lane.b32.xlu0 %v2752_v3, %s7440_s14  ;;  %2777 = vrot.lane.b32.xlu1 %v2753_v31, %s7440_s14  ;;  %v2982_v3 = vmul.f32 %v9925_v5, %v2978_v49  ;;  %v2983_v31 = vmul.f32 %v9931_v27, %v2978_v49 }
 0x543   : > { %2779 = vrot.lane.b32.xlu0 %v2754_v43, %s7440_s14  ;;  %2781 = vrot.lane.b32.xlu1 %v2755_v58, %s7440_s14  ;;  %v2984_v43 = vmul.f32 %v9935_v17, %v2978_v49  ;;  %v2985_v58 = vmul.f32 %v9941_v0, %v2978_v49 }
 0x547   : > { %2783 = vrot.lane.b32.xlu0 %v2756_v32, %s7440_s14  ;;  %2785 = vrot.lane.b32.xlu1 %v2757_v40, %s7440_s14  ;;  %v2986_v32 = vmul.f32 %v9945_v9, %v2978_v49 }
 0x54b   : > { %2787 = vrot.lane.b32.xlu0 %v2758_v42, %s7440_s14  ;;  %2789 = vrot.lane.b32.xlu1 %v2759_v34, %s7440_s14 }
 0x54f   : > { %2791 = vrot.lane.b32.xlu0 %v2760_v55, %s7440_s14  ;;  %2793 = vrot.lane.b32.xlu1 %v2761_v4, %s7440_s14  ;;  %v2987_v55 = vmul.f32 %v9951_v33, %v2978_v49  ;;  %v2988_v4 = vmul.f32 %v9955_v54, %v2978_v49 }
 0x553   : > { %2849 = vrot.lane.b32.xlu0 %v2827_v35, %s7441_s17  ;;  %2851 = vrot.lane.b32.xlu1 %v2828_v21, %s7441_s17 }
 0x557   : > { %2853 = vrot.lane.b32.xlu0 %v2829_v61, %s7441_s17  ;;  %2855 = vrot.lane.b32.xlu1 %v2830_v24, %s7441_s17 }
 0x55b   : > { %2857 = vrot.lane.b32.xlu0 %v2831_v22, %s7441_s17  ;;  %2859 = vrot.lane.b32.xlu1 %v2832_v23, %s7441_s17  ;;  %v2989_v22 = vmul.f32 %v9961_v53, %v2978_v49  ;;  %v3055_v23 = vmul.f32 %v9911_v26, %v10049_v8 }
 0x55f   : > { %2861 = vrot.lane.b32.xlu0 %v2833_v48, %s7441_s17  ;;  %2863 = vrot.lane.b32.xlu1 %v2834_v18, %s7441_s17 }
 0x563   : > { %2865 = vrot.lane.b32.xlu0 %v2835_v10, %s7441_s17  ;;  %2867 = vrot.lane.b32.xlu1 %v2836_v60, %s7441_s17 }
 0x567   : > { %2869 = vrot.lane.b32.xlu0 %v2837_v15, %s7441_s17  ;;  %2925 = vrot.lane.b32.xlu1 %v2903_v1, %s7442_s9 }
 0x56b   : > { %2927 = vrot.lane.b32.xlu0 %v2904_v16, %s7442_s9  ;;  %2929 = vrot.lane.b32.xlu1 %v2905_v19, %s7442_s9  ;;  %v3056_v19 = vmul.f32 %v9915_v52, %v10049_v8 }
 0x56f   : > { %2931 = vrot.lane.b32.xlu0 %v2906_v2, %s7442_s9  ;;  %2933 = vrot.lane.b32.xlu1 %v2907_v63, %s7442_s9  ;;  %v3057_v2 = vmul.f32 %v9921_v51, %v10049_v8 }
 0x573   : > { %2935 = vrot.lane.b32.xlu0 %v2908_v41, %s7442_s9  ;;  %2937 = vrot.lane.b32.xlu1 %v2909_v29, %s7442_s9 }
 0x577   : > { %2939 = vrot.lane.b32.xlu0 %v2910_v25, %s7442_s9  ;;  %2941 = vrot.lane.b32.xlu1 %v2911_v7, %s7442_s9 }
 0x57b   : > { %2943 = vrot.lane.b32.xlu0 %v2912_v36, %s7442_s9  ;;  %2945 = vrot.lane.b32.xlu1 %v2913_v57, %s7442_s9 }
 0x57f   : > { %3001 = vrot.lane.b32.xlu0 %v2979_v56, %s7443_s8  ;;  %3003 = vrot.lane.b32.xlu1 %v2980_v59, %s7443_s8  ;;  %v3058_v56 = vmul.f32 %v9925_v5, %v10049_v8 }
 0x583   : > { %3005 = vrot.lane.b32.xlu0 %v2981_v39, %s7443_s8  ;;  %3007 = vrot.lane.b32.xlu1 %v2982_v3, %s7443_s8 }
 0x587   : > { %3009 = vrot.lane.b32.xlu0 %v2983_v31, %s7443_s8  ;;  %3011 = vrot.lane.b32.xlu1 %v2984_v43, %s7443_s8 }
 0x589   : > { %v7058_v40 = vpop.permute.xlu1 %7057 }
 0x58a   : > { %v7060_v42 = vunpack.i.h.bf16 %v7058_v40  ;;  %v7059_v34 = vunpack.i.l.bf16 %v7058_v40 }
 0x58b   : > { %3013 = vrot.lane.b32.xlu0 %v2985_v58, %s7443_s8  ;;  %3015 = vrot.lane.b32.xlu1 %v2986_v32, %s7443_s8 }
 0x58c   : > { %v2601_v35 = vsel %vm507_vm2, %v7059_v34, %v7060_v42 }
 0x58d   : > { %v7063_v21 = vpop.permute.xlu0 %7062  ;;  %v2617_v18 = vmax.f32 %v9842_v37, %v2601_v35  ;;  %v3065_v35 = vmul.f32 %v9961_v53, %v10049_v8 }
 0x58e   : > { %v7065_v61 = vunpack.i.h.bf16 %v7063_v21  ;;  %v7064_v24 = vunpack.i.l.bf16 %v7063_v21  ;;  %v3130_v21 = vstv %s6643_s16  ;;  %s6653_s16 = sld [smem:[#allocation7 + $0x27]] }
 0x58f   : > { %3017 = vrot.lane.b32.xlu0 %v2987_v55, %s7443_s8  ;;  %3019 = vrot.lane.b32.xlu1 %v2988_v4, %s7443_s8  ;;  %v6819_v63 = vpack.c.bf16 %v2617_v18, %v2617_v18 }
 0x590   : > { %v2602_v48 = vsel %vm507_vm2, %v7060_v42, %v7064_v24  ;;  %v2603_v10 = vsel %vm507_vm2, %v7064_v24, %v7065_v61 }
 0x591   : > { %v7068_v60 = vpop.permute.xlu1 %7067  ;;  %v2618_v28 = vmax.f32 %v9846_v47, %v2602_v48  ;;  %v2619_v41 = vmax.f32 %v9862_v13, %v2603_v10  ;;  %v3059_v13 = vmul.f32 %v9931_v27, %v10049_v8  ;;  %v3134_v10 = vmul.f32 %v9925_v5, %v3130_v21 }
 0x592   : > { %v7070_v15 = vunpack.i.h.bf16 %v7068_v60  ;;  %v7069_v1 = vunpack.i.l.bf16 %v7068_v60 }
 0x593   : > { %3021 = vrot.lane.b32.xlu0 %v2989_v22, %s7443_s8  ;;  %3077 = vrot.lane.b32.xlu1 %v3055_v23, %s7444_s15  ;;  %v6820_v16 = vpack.c.bf16 %v2618_v28, %v2618_v28  ;;  %v3131_v22 = vmul.f32 %v9911_v26, %v3130_v21  ;;  %v3132_v23 = vmul.f32 %v9915_v52, %v3130_v21 }
 0x594   : > { %v2604_v37 = vsel %vm507_vm2, %v7065_v61, %v7069_v1  ;;  %v2605_v7 = vsel %vm507_vm2, %v7069_v1, %v7070_v15  ;;  %v3136_v1 = vmul.f32 %v9935_v17, %v3130_v21 }
 0x595   : > { %v7073_v29 = vpop.permute.xlu0 %7072  ;;  %v2600_v47 = vpop.permute.xlu1 %2599  ;;  %5858 = vmatprep.mubr.bf16.mxu0 %v6820_v16  ;;  %v2620_v25 = vmax.f32 %v9866_v38, %v2604_v37  ;;  %v6821_v38 = vpack.c.bf16 %v2619_v41, %v2619_v41  ;;  %v2621_v32 = vmax.f32 %v9883_v50, %v2605_v7 }
 0x596   : > { %v7075_v36 = vunpack.i.h.bf16 %v7073_v29  ;;  %v7074_v57 = vunpack.i.l.bf16 %v7073_v29  ;;  %5859 = vmatmul.mubr.bf16.vlgmr.msra.gmra.mxu0 %v6819_v63  ;;  %v3138_v63 = vmul.f32 %v9945_v9, %v3130_v21  ;;  %v3139_v29 = vmul.f32 %v9951_v33, %v3130_v21 }
 0x597   : > { %3079 = vrot.lane.b32.xlu0 %v3056_v19, %s7444_s15  ;;  %3081 = vrot.lane.b32.xlu1 %v3057_v2, %s7444_s15  ;;  %v6822_v49 = vpack.c.bf16 %v2620_v25, %v2620_v25  ;;  %v3137_v2 = vmul.f32 %v9941_v0, %v3130_v21 }
 0x598   : > { %v2608_v59 = vsel %vm507_vm2, %v7075_v36, %v2600_v47  ;;  %5921 = vmatpush1.bf16.xpose.msra.mxu0 %v6747_v6  ;;  %v2606_v39 = vsel %vm507_vm2, %v7070_v15, %v7074_v57  ;;  %v2607_v40 = vsel %vm507_vm2, %v7074_v57, %v7075_v36  ;;  %v3061_v6 = vmul.f32 %v9941_v0, %v10049_v8 }
 0x599   : > { %v2624_v3 = vmax.f32 %v9901_v11, %v2608_v59  ;;  %v10083_v31 = vpop.permute.xlu0 %2697  ;;  %v10085_v43 = vpop.permute.xlu1 %2699  ;;  %5898 = vmatprep.mubr.bf16.mxu1 %v6822_v49  ;;  %v2622_v58 = vmax.f32 %v9887_v62, %v2606_v39  ;;  %v6823_v11 = vpack.c.bf16 %v2621_v32, %v2621_v32  ;;  %v2623_v34 = vmax.f32 %v9897_v44, %v2607_v40 }
 0x59a   : > { %5899 = vmatmul.mubr.bf16.vlgmr.msra.gmra.mxu1 %v6821_v38  ;;  %v3064_v44 = vmul.f32 %v9955_v54, %v10049_v8  ;;  %v3133_v8 = vmul.f32 %v9921_v51, %v3130_v21  ;;  %v3135_v15 = vmul.f32 %v9931_v27, %v3130_v21  ;;  %v3140_v47 = vmul.f32 %v9955_v54, %v3130_v21 }
 0x59b   : > { %v6826_v42 = vpack.c.bf16 %v2624_v3, %v2624_v3  ;;  %3083 = vrot.lane.b32.xlu0 %v3058_v56, %s7444_s15  ;;  %3085 = vrot.lane.b32.xlu1 %v3059_v13, %s7444_s15  ;;  %v6824_v20 = vpack.c.bf16 %v2622_v58, %v2622_v58  ;;  %v6825_v4 = vpack.c.bf16 %v2623_v34, %v2623_v34  ;;  %v3206_v36 = vstv %s6644_s12  ;;  %s6654_s12 = sld [smem:[#allocation7 + $0x28]] }
 0x59c   : > { %5961 = vmatpush1.bf16.xpose.msra.mxu1 %v6749_v30  ;;  %v3141_v57 = vmul.f32 %v9961_v53, %v3130_v21  ;;  %v3207_v49 = vmul.f32 %v9911_v26, %v3206_v36  ;;  %v3208_v59 = vmul.f32 %v9915_v52, %v3206_v36  ;;  %v3209_v38 = vmul.f32 %v9921_v51, %v3206_v36 }
 0x59d   : > { %v10099_v50 = vpop.permute.xlu0 %2701  ;;  %v10101_v62 = vpop.permute.xlu1 %2703  ;;  %5938 = vmatprep.mubr.bf16.mxu0 %v6824_v20  ;;  %5978 = vmatprep.mubr.bf16.mxu1 %v6826_v42  ;;  %v3210_v58 = vmul.f32 %v9925_v5, %v3206_v36  ;;  %v3211_v32 = vmul.f32 %v9931_v27, %v3206_v36  ;;  %v3212_v20 = vmul.f32 %v9935_v17, %v3206_v36 }
 0x59e   : > { %v3214_v34 = vmul.f32 %v9945_v9, %v3206_v36 }
 0x59f   : > { %5939 = vmatmul.mubr.bf16.vlgmr.msra.gmra.mxu0 %v6823_v11  ;;  %3087 = vrot.lane.b32.xlu0 %v3060_v45, %s7444_s15  ;;  %v3213_v45 = vmul.f32 %v9941_v0, %v3206_v36 }
 0x5a0   : > { %3089 = vrot.lane.b32.xlu1 %v3061_v6, %s7444_s15 }
 0x5a1   : > { %v10110_v30 = vpop.permute.xlu0 %2705  ;;  %v10112_v55 = vpop.permute.xlu1 %2707 }
 0x5a3   : > { %5979 = vmatmul.mubr.bf16.vlgmr.msra.gmra.mxu1 %v6825_v4  ;;  %3091 = vrot.lane.b32.xlu0 %v3062_v46, %s7444_s15  ;;  %v3215_v46 = vmul.f32 %v9951_v33, %v3206_v36 }
 0x5a4   : > { %3093 = vrot.lane.b32.xlu1 %v3063_v12, %s7444_s15 }
 0x5a5   : > { %v10120_v61 = vpop.permute.xlu0 %2709  ;;  %v10122_v24 = vpop.permute.xlu1 %2711 }
 0x5a7   : > { %3095 = vrot.lane.b32.xlu0 %v3064_v44, %s7444_s15  ;;  %v3216_v44 = vmul.f32 %v9955_v54, %v3206_v36 }
 0x5a8   : > { %3097 = vrot.lane.b32.xlu1 %v3065_v35, %s7444_s15  ;;  %v3217_v35 = vmul.f32 %v9961_v53, %v3206_v36 }
 0x5a9   : > { %v10128_v48 = vpop.permute.xlu0 %2713  ;;  %v10130_v18 = vpop.permute.xlu1 %2715 }
 0x5ab   : > { %3153 = vrot.lane.b32.xlu0 %v3131_v22, %s7445_s28 }
 0x5ac   : > { %3155 = vrot.lane.b32.xlu1 %v3132_v23, %s7445_s28 }
 0x5ad   : > { %v10136_v60 = vpop.permute.xlu0 %2717  ;;  %v10138_v28 = vpop.permute.xlu1 %2773 }
 0x5af   : > { %3157 = vrot.lane.b32.xlu0 %v3133_v8, %s7445_s28 }
 0x5b0   : > { %3159 = vrot.lane.b32.xlu1 %v3134_v10, %s7445_s28 }
 0x5b1   : > { %v10144_v16 = vpop.permute.xlu0 %2775  ;;  %v10146_v19 = vpop.permute.xlu1 %2777 }
 0x5b3   : > { %3161 = vrot.lane.b32.xlu0 %v3135_v15, %s7445_s28 }
 0x5b4   : > { %3163 = vrot.lane.b32.xlu1 %v3136_v1, %s7445_s28 }
 0x5b5   : > { %v10152_v37 = vpop.permute.xlu0 %2779  ;;  %v10154_v41 = vpop.permute.xlu1 %2781 }
 0x5b7   : > { %3165 = vrot.lane.b32.xlu0 %v3137_v2, %s7445_s28 }
 0x5b8   : > { %3167 = vrot.lane.b32.xlu1 %v3138_v63, %s7445_s28 }
 0x5b9   : > { %v10160_v25 = vpop.permute.xlu0 %2783  ;;  %v10162_v7 = vpop.permute.xlu1 %2785 }
 0x5bb   : > { %3169 = vrot.lane.b32.xlu0 %v3139_v29, %s7445_s28 }
 0x5bc   : > { %3171 = vrot.lane.b32.xlu1 %v3140_v47, %s7445_s28 }
 0x5bd   : > { %v10168_v56 = vpop.permute.xlu0 %2787  ;;  %v10170_v13 = vpop.permute.xlu1 %2789 }
 0x5bf   : > { %3173 = vrot.lane.b32.xlu0 %v3141_v57, %s7445_s28 }
 0x5c0   : > { %3229 = vrot.lane.b32.xlu1 %v3207_v49, %s7446_s11 }
 0x5c1   : > { %v10176_v39 = vpop.permute.xlu0 %2791  ;;  %v10178_v3 = vpop.permute.xlu1 %2793 }
 0x5c3   : > { %3231 = vrot.lane.b32.xlu0 %v3208_v59, %s7446_s11 }
 0x5c4   : > { %3233 = vrot.lane.b32.xlu1 %v3209_v38, %s7446_s11 }
 0x5c5   : > { %v10184_v40 = vpop.permute.xlu0 %2849  ;;  %v10186_v42 = vpop.permute.xlu1 %2851 }
 0x5c7   : > { %3235 = vrot.lane.b32.xlu0 %v3210_v58, %s7446_s11 }
 0x5c8   : > { %3237 = vrot.lane.b32.xlu1 %v3211_v32, %s7446_s11 }
 0x5c9   : > { %v10192_v6 = vpop.permute.xlu0 %2853  ;;  %v10194_v11 = vpop.permute.xlu1 %2855 }
 0x5cb   : > { %3239 = vrot.lane.b32.xlu0 %v3212_v20, %s7446_s11 }
 0x5cc   : > { %3241 = vrot.lane.b32.xlu1 %v3213_v45, %s7446_s11 }
 0x5cd   : > { %v10200_v12 = vpop.permute.xlu0 %2857  ;;  %v10202_v4 = vpop.permute.xlu1 %2859 }
 0x5cf   : > { %3243 = vrot.lane.b32.xlu0 %v3214_v34, %s7446_s11 }
 0x5d0   : > { %3245 = vrot.lane.b32.xlu1 %v3215_v46, %s7446_s11 }
 0x5d1   : > { %v10208_v21 = vpop.permute.xlu0 %2861  ;;  %v10210_v22 = vpop.permute.xlu1 %2863 }
 0x5d3   : > { %3247 = vrot.lane.b32.xlu0 %v3216_v44, %s7446_s11 }
 0x5d4   : > { %3249 = vrot.lane.b32.xlu1 %v3217_v35, %s7446_s11 }
 0x5d5   : > { %v10214_v23 = vpop.permute.xlu0 %2865  ;;  %v10216_v8 = vpop.permute.xlu1 %2867 }
 0x5d9   : > { %v10218_v10 = vpop.permute.xlu0 %2869  ;;  %v10220_v15 = vpop.permute.xlu1 %2925 }
 0x5dd   : > { %v10222_v1 = vpop.permute.xlu0 %2927  ;;  %v10224_v2 = vpop.permute.xlu1 %2929 }
 0x5e1   : > { %v10226_v53 = vpop.permute.xlu0 %2931  ;;  %v10228_v63 = vpop.permute.xlu1 %2933 }
 0x5e5   : > { %v10230_v29 = vpop.permute.xlu0 %2935  ;;  %v10232_v47 = vpop.permute.xlu1 %2937 }
 0x5e9   : > { %v10234_v36 = vpop.permute.xlu0 %2939  ;;  %v10236_v57 = vpop.permute.xlu1 %2941 }
 0x5ed   : > { %v10238_v49 = vpop.permute.xlu0 %2943  ;;  %v10240_v59 = vpop.permute.xlu1 %2945 }
 0x5ee   : > { %12788 = vst [vmem:[#allocation42_spill] sm:$0xff] %v10240_v59 }
 0x5f1   : > { %v10242_v38 = vpop.permute.xlu0 %3001  ;;  %v10244_v58 = vpop.permute.xlu1 %3003 }
 0x5f2   : > { %12789 = vst [vmem:[#allocation45_spill] sm:$0xff] %v10242_v38  ;;  %12790 = vst [vmem:[#allocation44_spill] sm:$0xff] %v10244_v58 }
 0x5f5   : > { %v10246_v32 = vpop.permute.xlu0 %3005  ;;  %v10248_v20 = vpop.permute.xlu1 %3007 }
 0x5f6   : > { %12791 = vst [vmem:[#allocation19_spill] sm:$0xff] %v10246_v32  ;;  %12792 = vst [vmem:[#allocation18_spill] sm:$0xff] %v10248_v20 }
 0x5f9   : > { %v10250_v45 = vpop.permute.xlu0 %3009  ;;  %v10252_v34 = vpop.permute.xlu1 %3011 }
 0x5fa   : > { %12793 = vst [vmem:[#allocation21_spill] sm:$0xff] %v10250_v45  ;;  %12794 = vst [vmem:[#allocation23_spill] sm:$0xff] %v10252_v34 }
 0x5fd   : > { %v10254_v46 = vpop.permute.xlu0 %3013  ;;  %v10256_v44 = vpop.permute.xlu1 %3015 }
 0x5fe   : > { %12795 = vst [vmem:[#allocation22_spill] sm:$0xff] %v10254_v46  ;;  %12796 = vst [vmem:[#allocation24_spill] sm:$0xff] %v10256_v44 }
 0x601   : > { %v10258_v35 = vpop.permute.xlu0 %3017  ;;  %v10260_v14 = vpop.permute.xlu1 %3019 }
 0x602   : > { %12797 = vst [vmem:[#allocation26_spill] sm:$0xff] %v10258_v35  ;;  %12798 = vst [vmem:[#allocation25_spill] sm:$0xff] %v10260_v14  ;;  %v2662_v35 = vstv %s6636_s10  ;;  %s6655_s10 = sld [smem:[#allocation7 + $0x29]] }
 0x605   : > { %v10262_v59 = vpop.permute.xlu0 %3021  ;;  %v10264_v38 = vpop.permute.xlu1 %3077 }
 0x606   : > { %12799 = vst [vmem:[#allocation29_spill] sm:$0xff] %v10262_v59  ;;  %12800 = vst [vmem:[#allocation27_spill] sm:$0xff] %v10264_v38  ;;  %v2663_v59 = vmul.f32 %v9911_v26, %v2662_v35  ;;  %v2664_v38 = vmul.f32 %v9915_v52, %v2662_v35  ;;  %v2721_v26 = vsel %vm353_vm0, %v10099_v50, %v10101_v62 }
 0x607   : > { %v2722_v52 = vsel %vm353_vm0, %v10101_v62, %v10110_v30  ;;  %v2726_v62 = vsel %vm353_vm0, %v10122_v24, %v10128_v48 }
 0x609   : > { %v10266_v58 = vpop.permute.xlu0 %3079  ;;  %v10268_v32 = vpop.permute.xlu1 %3081 }
 0x60a   : > { %12801 = vst [vmem:[#allocation31_spill] sm:$0xff] %v10268_v32  ;;  %v2719_v32 = vsel %vm353_vm0, %v10083_v31, %v10085_v43  ;;  %v2670_v31 = vmul.f32 %v9945_v9, %v2662_v35  ;;  %v2725_v9 = vsel %vm353_vm0, %v10120_v61, %v10122_v24  ;;  %v2796_v24 = vsel %vm430_vm1, %v10144_v16, %v10146_v19 }
 0x60d   : > { %v10270_v45 = vpop.permute.xlu0 %3083  ;;  %v10272_v34 = vpop.permute.xlu1 %3085 }
 0x60e   : > { %12802 = vst [vmem:[#allocation35_spill] sm:$0xff] %v10270_v45  ;;  %12803 = vst [vmem:[#allocation28_spill] sm:$0xff] %v10272_v34  ;;  %v2665_v45 = vmul.f32 %v9921_v51, %v2662_v35  ;;  %v2669_v51 = vmul.f32 %v9941_v0, %v2662_v35  ;;  %v2724_v0 = vsel %vm353_vm0, %v10112_v55, %v10120_v61 }
 0x60f   : > { %v2795_v61 = vsel %vm430_vm1, %v10138_v28, %v10144_v16  ;;  %v2799_v16 = vsel %vm430_vm1, %v10154_v41, %v10160_v25 }
 0x611   : > { %v10274_v46 = vpop.permute.xlu0 %3087 }
 0x612   : > { %12804 = vst [vmem:[#allocation32_spill] sm:$0xff] %v10274_v46  ;;  %v10276_v44 = vpop.permute.xlu1 %3089  ;;  %v2720_v46 = vsel %vm353_vm0, %v10085_v43, %v10099_v50  ;;  %v2672_v50 = vmul.f32 %v9955_v54, %v2662_v35  ;;  %v2728_v54 = vsel %vm353_vm0, %v10130_v18, %v10136_v60  ;;  %v2798_v60 = vsel %vm430_vm1, %v10152_v37, %v10154_v41 }
 0x613   : > { %12805 = vst [vmem:[#allocation33_spill] sm:$0xff] %v10276_v44  ;;  %v2666_v44 = vmul.f32 %v9925_v5, %v2662_v35  ;;  %v2739_v5 = vadd.f32 %v2719_v32, %v2663_v59  ;;  %v2741_v59 = vadd.f32 %v2721_v26, %v2665_v45  ;;  %v2801_v26 = vsel %vm430_vm1, %v10162_v7, %v10168_v56 }
 0x614   : > { %v2748_v28 = vadd.f32 %v2728_v54, %v2672_v50  ;;  %v2803_v41 = vsel %vm430_vm1, %v10170_v13, %v10176_v39  ;;  %v2874_v50 = vsel %vm507_vm2, %v10194_v11, %v10200_v12 }
 0x615   : > { %v10278_v20 = vpop.permute.xlu0 %3091  ;;  %v2742_v32 = vadd.f32 %v2722_v52, %v2666_v44  ;;  %v2815_v44 = vadd.f32 %v2795_v61, %v2739_v5  ;;  %v2880_v61 = vsel %vm507_vm2, %v10216_v8, %v10218_v10  ;;  %v2951_v10 = vsel %vm584_vm3, %v10228_v63, %v10230_v29 }
 0x616   : > { %12806 = vst [vmem:[#allocation34_spill] sm:$0xff] %v10278_v20  ;;  %v10280_v14 = vpop.permute.xlu1 %3093  ;;  %v2667_v20 = vmul.f32 %v9931_v27, %v2662_v35  ;;  %v2723_v27 = vsel %vm353_vm0, %v10110_v30, %v10112_v55 }
 0x617   : > { %12807 = vst [vmem:[#allocation38_spill] sm:$0xff] %v10280_v14  ;;  %v2668_v14 = vmul.f32 %v9935_v17, %v2662_v35  ;;  %v2671_v17 = vmul.f32 %v9951_v33, %v2662_v35  ;;  %v2727_v33 = vsel %vm353_vm0, %v10128_v48, %v10130_v18  ;;  %v2746_v18 = vadd.f32 %v2726_v62, %v2670_v31 }
 0x618   : > { %v2743_v55 = vadd.f32 %v2723_v27, %v2667_v20  ;;  %v2871_v27 = vsel %vm507_vm2, %v10184_v40, %v10186_v42 }
 0x619   : > { %v10294_v34 = vpop.permute.xlu0 %3095  ;;  %v2744_v45 = vadd.f32 %v2724_v0, %v2668_v14  ;;  %v2747_v20 = vadd.f32 %v2727_v33, %v2671_v17  ;;  %v2891_v62 = vadd.f32 %v2871_v27, %v2815_v44 }
 0x61a   : > { %12808 = vst [vmem:[#allocation41_spill] sm:$0xff] %v10294_v34  ;;  %v10304_v43 = vpop.permute.xlu1 %3097  ;;  %v2740_v34 = vadd.f32 %v2720_v46, %v2664_v38  ;;  %v2797_v38 = vsel %vm430_vm1, %v10146_v19, %v10152_v37  ;;  %v2745_v46 = vadd.f32 %v2725_v9, %v2669_v51  ;;  %v2800_v19 = vsel %vm430_vm1, %v10160_v25, %v10162_v7 }
 0x61b   : > { %v2817_v14 = vadd.f32 %v2797_v38, %v2741_v59  ;;  %v2818_v37 = vadd.f32 %v2798_v60, %v2742_v32  ;;  %v2802_v51 = vsel %vm430_vm1, %v10168_v56, %v10170_v13  ;;  %v10364_v25 = vstv %s10306_s13  ;;  %s6656_s13 = sld [smem:[#allocation7 + $0x2a]] }
 0x61c   : > { %v2816_v35 = vadd.f32 %v2796_v24, %v2740_v34  ;;  %v2819_v34 = vadd.f32 %v2799_v16, %v2743_v55  ;;  %v2820_v5 = vadd.f32 %v2800_v19, %v2744_v45  ;;  %v2804_v7 = vsel %vm430_vm1, %v10176_v39, %v10178_v3  ;;  %v12809_v16 = vld [vmem:[#allocation42_spill] sm:$0xff] }
 0x61d   : > { %v10328_v30 = vpop.permute.xlu0 %3153  ;;  %v2821_v17 = vadd.f32 %v2801_v26, %v2745_v46  ;;  %v2872_v56 = vsel %vm507_vm2, %v10186_v42, %v10192_v6  ;;  %v2873_v13 = vsel %vm507_vm2, %v10192_v6, %v10194_v11  ;;  %v2822_v0 = vadd.f32 %v2802_v51, %v2746_v18  ;;  %v12811_v26 = vld [vmem:[#allocation45_spill] sm:$0xff] }
 0x61e   : > { %v10339_v48 = vpop.permute.xlu1 %3155  ;;  %v2823_v9 = vadd.f32 %v2803_v41, %v2747_v20  ;;  %v2875_v39 = vsel %vm507_vm2, %v10200_v12, %v10202_v4  ;;  %v2876_v3 = vsel %vm507_vm2, %v10202_v4, %v10208_v21  ;;  %v2824_v42 = vadd.f32 %v2804_v7, %v2748_v28  ;;  %v12812_v41 = vld [vmem:[#allocation19_spill] sm:$0xff] }
 0x61f   : > { %v2877_v6 = vsel %vm507_vm2, %v10208_v21, %v10210_v22  ;;  %v2878_v11 = vsel %vm507_vm2, %v10210_v22, %v10214_v23  ;;  %v2892_v32 = vadd.f32 %v2872_v56, %v2816_v35  ;;  %v2893_v12 = vadd.f32 %v2873_v13, %v2817_v14  ;;  %v12810_v14 = vld [vmem:[#allocation44_spill] sm:$0xff]  ;;  %v12815_v13 = vld [vmem:[#allocation23_spill] sm:$0xff] }
 0x620   : > { %v2894_v33 = vadd.f32 %v2874_v50, %v2818_v37  ;;  %v2879_v4 = vsel %vm507_vm2, %v10214_v23, %v10216_v8  ;;  %v2895_v54 = vadd.f32 %v2875_v39, %v2819_v34  ;;  %v2896_v55 = vadd.f32 %v2876_v3, %v2820_v5  ;;  %v12817_v3 = vld [vmem:[#allocation24_spill] sm:$0xff] }
 0x621   : > { %v10353_v52 = vpop.permute.xlu0 %3157  ;;  %v2947_v21 = vsel %vm584_vm3, %v10220_v15, %v10222_v1  ;;  %v2897_v22 = vadd.f32 %v2877_v6, %v2821_v17  ;;  %v2898_v24 = vadd.f32 %v2878_v11, %v2822_v0  ;;  %v2948_v38 = vsel %vm584_vm3, %v10222_v1, %v10224_v2  ;;  %v12814_v17 = vld [vmem:[#allocation21_spill] sm:$0xff] }
 0x622   : > { %v10361_v31 = vpop.permute.xlu1 %3159  ;;  %v2949_v23 = vsel %vm584_vm3, %v10224_v2, %v10226_v53  ;;  %v2899_v46 = vadd.f32 %v2879_v4, %v2823_v9  ;;  %v2950_v8 = vsel %vm584_vm3, %v10226_v53, %v10228_v63  ;;  %v2952_v15 = vsel %vm584_vm3, %v10230_v29, %v10232_v47  ;;  %v12816_v9 = vld [vmem:[#allocation22_spill] sm:$0xff]  ;;  %v12820_v4 = vld [vmem:[#allocation31_spill] sm:$0xff] }
 0x623   : > { %v2900_v18 = vadd.f32 %v2880_v61, %v2824_v42  ;;  %v2967_v60 = vadd.f32 %v2947_v21, %v2891_v62  ;;  %v2953_v2 = vsel %vm584_vm3, %v10232_v47, %v10234_v36  ;;  %v2954_v53 = vsel %vm584_vm3, %v10234_v36, %v10236_v57  ;;  %v12818_v62 = vld [vmem:[#allocation27_spill] sm:$0xff] }
 0x624   : > { %v2968_v20 = vadd.f32 %v2948_v38, %v2892_v32  ;;  %v2969_v28 = vadd.f32 %v2949_v23, %v2893_v12  ;;  %v2955_v63 = vsel %vm584_vm3, %v10236_v57, %v10238_v49  ;;  %v2956_v29 = vsel %vm584_vm3, %v10238_v49, %v12809_v16  ;;  %v12813_v57 = vld [vmem:[#allocation18_spill] sm:$0xff]  ;;  %v12825_v16 = vld [vmem:[#allocation33_spill] sm:$0xff] }
 0x625   : > { %v10387_v40 = vpop.permute.xlu0 %3161  ;;  %v2970_v19 = vadd.f32 %v2950_v8, %v2894_v33  ;;  %v2971_v44 = vadd.f32 %v2951_v10, %v2895_v54  ;;  %v2972_v35 = vadd.f32 %v2952_v15, %v2896_v55  ;;  %v3023_v47 = vsel %vm661_vm4, %v12811_v26, %v12810_v14  ;;  %v12819_v12 = vld [vmem:[#allocation26_spill] sm:$0xff] }
 0x626   : > { %v10395_v59 = vpop.permute.xlu1 %3163  ;;  %v2973_v36 = vadd.f32 %v2953_v2, %v2897_v22  ;;  %v2974_v51 = vadd.f32 %v2954_v53, %v2898_v24  ;;  %v3024_v34 = vsel %vm661_vm4, %v12810_v14, %v12812_v41  ;;  %v3025_v5 = vsel %vm661_vm4, %v12812_v41, %v12813_v57  ;;  %v12821_v22 = vld [vmem:[#allocation25_spill] sm:$0xff]  ;;  %v12823_v53 = vld [vmem:[#allocation28_spill] sm:$0xff] }
 0x627   : > { %v2975_v7 = vadd.f32 %v2955_v63, %v2899_v46  ;;  %v10450_v27 = vadd.f32 %v2956_v29, %v2900_v18  ;;  %v3026_v56 = vsel %vm661_vm4, %v12813_v57, %v12814_v17  ;;  %v3027_v50 = vsel %vm661_vm4, %v12814_v17, %v12815_v13  ;;  %v12826_v57 = vld [vmem:[#allocation29_spill] sm:$0xff]  ;;  %v12827_v17 = vld [vmem:[#allocation34_spill] sm:$0xff] }
 0x628   : > { %v3043_v0 = vadd.f32 %v3023_v47, %v2967_v60  ;;  %v3028_v39 = vsel %vm661_vm4, %v12815_v13, %v12816_v9  ;;  %v3029_v42 = vsel %vm661_vm4, %v12816_v9, %v12817_v3  ;;  %v3099_v6 = vsel %vm738_vm5, %v12818_v62, %v10266_v58  ;;  %v12822_v60 = vld [vmem:[#allocation35_spill] sm:$0xff] }
 0x629   : > { %v10412_v45 = vpop.permute.xlu0 %3165  ;;  %v3044_v11 = vadd.f32 %v3024_v34, %v2968_v20  ;;  %v3045_v32 = vadd.f32 %v3025_v5, %v2969_v28  ;;  %v3030_v33 = vsel %vm661_vm4, %v12817_v3, %v12819_v12  ;;  %v3100_v54 = vsel %vm738_vm5, %v10266_v58, %v12820_v4 }
 0x62a   : > { %v10423_v1 = vpop.permute.xlu1 %3167  ;;  %v3046_v61 = vadd.f32 %v3026_v56, %v2970_v19  ;;  %v3047_v21 = vadd.f32 %v3027_v50, %v2971_v44  ;;  %v3031_v24 = vsel %vm661_vm4, %v12819_v12, %v12821_v22  ;;  %v3175_v38 = vsel %vm815_vm6, %v10328_v30, %v10339_v48  ;;  %v12824_v30 = vld [vmem:[#allocation32_spill] sm:$0xff] }
 0x62b   : > { %v3048_v46 = vadd.f32 %v3028_v39, %v2972_v35  ;;  %v3049_v8 = vadd.f32 %v3029_v42, %v2973_v36  ;;  %v3119_v10 = vadd.f32 %v3099_v6, %v3043_v0  ;;  %v3176_v58 = vsel %vm815_vm6, %v10339_v48, %v10353_v52 }
 0x62c   : > { %v3050_v15 = vadd.f32 %v3030_v33, %v2974_v51  ;;  %v3120_v18 = vadd.f32 %v3100_v54, %v3044_v11  ;;  %v3101_v2 = vsel %vm738_vm5, %v12820_v4, %v12822_v60  ;;  %v3102_v20 = vsel %vm738_vm5, %v12822_v60, %v12823_v53  ;;  %v12828_v4 = vld [vmem:[#allocation38_spill] sm:$0xff]  ;;  %v12829_v54 = vld [vmem:[#allocation41_spill] sm:$0xff] }
 0x62d   : > { %v10440_v37 = vpop.permute.xlu0 %3169  ;;  %v3051_v28 = vadd.f32 %v3031_v24, %v2975_v7  ;;  %v3103_v63 = vsel %vm738_vm5, %v12823_v53, %v12824_v30  ;;  %v3104_v29 = vsel %vm738_vm5, %v12824_v30, %v12825_v16  ;;  %v3195_v48 = vadd.f32 %v3175_v38, %v3119_v10 }
 0x62e   : > { %v10448_v49 = vpop.permute.xlu1 %3171  ;;  %v3196_v44 = vadd.f32 %v3176_v58, %v3120_v18  ;;  %v3177_v35 = vsel %vm815_vm6, %v10353_v52, %v10361_v31  ;;  %v3178_v14 = vsel %vm815_vm6, %v10361_v31, %v10387_v40  ;;  %v3121_v36 = vadd.f32 %v3101_v2, %v3045_v32 }
 0x62f   : > { %v3122_v51 = vadd.f32 %v3102_v20, %v3046_v61  ;;  %v3032_v5 = vsel %vm661_vm4, %v12821_v22, %v12826_v57  ;;  %v3123_v7 = vadd.f32 %v3103_v63, %v3047_v21  ;;  %v3105_v52 = vsel %vm738_vm5, %v12825_v16, %v12827_v17 }
 0x630   : > { %v3124_v13 = vadd.f32 %v3104_v29, %v3048_v46  ;;  %v3197_v31 = vadd.f32 %v3177_v35, %v3121_v36  ;;  %v3179_v39 = vsel %vm815_vm6, %v10387_v40, %v10395_v59  ;;  %v3180_v3 = vsel %vm815_vm6, %v10395_v59, %v10412_v45 }
 0x631   : > { %v10473_v55 = vpop.permute.xlu0 %3173  ;;  %v3198_v50 = vadd.f32 %v3178_v14, %v3122_v51  ;;  %v3125_v11 = vadd.f32 %v3105_v52, %v3049_v8  ;;  %v3106_v40 = vsel %vm738_vm5, %v12827_v17, %v12828_v4  ;;  %v3107_v59 = vsel %vm738_vm5, %v12828_v4, %v12829_v54 }
 0x632   : > { %v3230_v23 = vpop.permute.xlu1 %3229  ;;  %v3199_v22 = vadd.f32 %v3179_v39, %v3123_v7  ;;  %v3200_v24 = vadd.f32 %v3180_v3, %v3124_v13  ;;  %v3181_v38 = vsel %vm815_vm6, %v10412_v45, %v10423_v1  ;;  %v3182_v8 = vsel %vm815_vm6, %v10423_v1, %v10440_v37 }
 0x633   : > { %v3126_v45 = vadd.f32 %v3106_v40, %v3050_v15  ;;  %v3052_v30 = vadd.f32 %v3032_v5, %v10450_v27  ;;  %v3127_v1 = vadd.f32 %v3107_v59, %v3051_v28  ;;  %v3108_v29 = vsel %vm738_vm5, %v12829_v54, %v10304_v43  ;;  %v12830_v40 = vld [vmem:[#allocation43_spill] sm:$0xff] }
 0x634   : > { %v3183_v27 = vsel %vm815_vm6, %v10440_v37, %v10448_v49 }
 0x635   : > { %v3232_v19 = vpop.permute.xlu0 %3231  ;;  %v3128_v51 = vadd.f32 %v3108_v29, %v3052_v30  ;;  %v3203_v57 = vadd.f32 %v3183_v27, %v3127_v1 }
 0x636   : > { %v3251_v26 = vsel %vm892_vm7, %v3230_v23, %v3232_v19  ;;  %v3234_v47 = vpop.permute.xlu1 %3233 }
 0x637   : > { %v3271_v41 = vadd.f32 %v3251_v26, %v3195_v48  ;;  %v3252_v34 = vsel %vm892_vm7, %v3232_v19, %v3234_v47  ;;  %v3201_v48 = vadd.f32 %v3181_v38, %v3125_v11  ;;  %v3202_v19 = vadd.f32 %v3182_v8, %v3126_v45 }
 0x638   : > { %v3272_v56 = vadd.f32 %v3252_v34, %v3196_v44  ;;  %v3184_v26 = vsel %vm815_vm6, %v10448_v49, %v10473_v55 }
 0x639   : > { %v10511_v0 = vadd.f32 %v10364_v25, %v3271_v41  ;;  %v3236_v9 = vpop.permute.xlu0 %3235  ;;  %v3204_v17 = vadd.f32 %v3184_v26, %v3128_v51 }
 0x63a   : > { %v10520_v42 = vadd.f32 %v10364_v25, %v3272_v56  ;;  %v3253_v62 = vsel %vm892_vm7, %v3234_v47, %v3236_v9  ;;  %v3238_v6 = vpop.permute.xlu1 %3237 }
 0x63b   : > { %v3293_v32 = vmax.f32 %v10511_v0, 0.0  ;;  %v3273_v12 = vadd.f32 %v3253_v62, %v3197_v31  ;;  %v3254_v33 = vsel %vm892_vm7, %v3236_v9, %v3238_v6 }
 0x63c   : > { %v3294_v61 = vmax.f32 %v10520_v42, 0.0  ;;  %v3274_v21 = vadd.f32 %v3254_v33, %v3198_v50 }
 0x63d   : > { %v10536_v23 = vadd.f32 %v10364_v25, %v3273_v12  ;;  %v3240_v46 = vpop.permute.xlu0 %3239 }
 0x63e   : > { %v10542_v10 = vadd.f32 %v10364_v25, %v3274_v21  ;;  %v3255_v58 = vsel %vm892_vm7, %v3238_v6, %v3240_v46  ;;  %v3242_v18 = vpop.permute.xlu1 %3241  ;;  %v7076_v60 = vpack.i.bf16 %v3294_v61, %v3293_v32 }
 0x63f   : > { %v3295_v2 = vmax.f32 %v10536_v23, 0.0  ;;  %v3275_v53 = vadd.f32 %v3255_v58, %v3199_v22  ;;  %v3256_v20 = vsel %vm892_vm7, %v3240_v46, %v3242_v18 }
 0x640   : > { %v3296_v63 = vmax.f32 %v10542_v10, 0.0  ;;  %v3276_v16 = vadd.f32 %v3256_v20, %v3200_v24  ;;  %7077 = vrot.lane.b32.xlu0 %v7076_v60, %s7439_s29 }
 0x641   : > { %v10558_v15 = vadd.f32 %v10364_v25, %v3275_v53  ;;  %v3244_v44 = vpop.permute.xlu0 %3243 }
 0x642   : > { %v10564_v28 = vadd.f32 %v10364_v25, %v3276_v16  ;;  %v3257_v35 = vsel %vm892_vm7, %v3242_v18, %v3244_v44  ;;  %v3246_v14 = vpop.permute.xlu1 %3245  ;;  %v7081_v43 = vpack.i.bf16 %v3296_v63, %v3295_v2 }
 0x643   : > { %v3297_v47 = vmax.f32 %v10558_v15, 0.0  ;;  %v3277_v36 = vadd.f32 %v3257_v35, %v3201_v48  ;;  %v3258_v37 = vsel %vm892_vm7, %v3244_v44, %v3246_v14  ;;  %v5079_v44 = vld [vmem:[#allocation10 + $0x120] sm:$0x11] }
 0x644   : > { %v3298_v41 = vmax.f32 %v10564_v28, 0.0  ;;  %v3278_v34 = vadd.f32 %v3258_v37, %v3202_v19  ;;  %7082 = vrot.lane.b32.xlu1 %v7081_v43, %s7439_s29  ;;  %v5055_v19 = vld [vmem:[#allocation10 + $0x60] sm:$0xff]  ;;  %v5080_v37 = vld [vmem:[#allocation10 + $0x128] sm:$0x11] }
 0x645   : > { %v10579_v5 = vadd.f32 %v10364_v25, %v3277_v36  ;;  %v3248_v7 = vpop.permute.xlu0 %3247  ;;  %v6751_v43 = vcombine.low %v5055_v19, %v5079_v44  ;;  %v5056_v36 = vld [vmem:[#allocation10 + $0x68] sm:$0xff] }
 0x646   : > { %v10582_v52 = vadd.f32 %v10364_v25, %v3278_v34  ;;  %v3259_v49 = vsel %vm892_vm7, %v3246_v14, %v3248_v7  ;;  %v3250_v55 = vpop.permute.xlu1 %3249  ;;  %v7086_v56 = vpack.i.bf16 %v3298_v41, %v3297_v47  ;;  %v6752_v14 = vcombine.high %v5055_v19, %v5079_v44  ;;  %v10713_v19 = vld [vmem:[%s7615_s30 + $0x28] sm:$0xff] }
 0x647   : > { %v3299_v13 = vmax.f32 %v10579_v5, 0.0  ;;  %v3279_v31 = vadd.f32 %v3259_v49, %v3203_v57  ;;  %v3260_v50 = vsel %vm892_vm7, %v3248_v7, %v3250_v55  ;;  %v6754_v7 = vcombine.high %v5056_v36, %v5080_v37  ;;  %v10684_v5 = vld [vmem:[%s7615_s30] sm:$0xff] }
 0x648   : > { %v3300_v9 = vmax.f32 %v10582_v52, 0.0  ;;  %v3280_v39 = vadd.f32 %v3260_v50, %v3204_v17  ;;  %7087 = vrot.lane.b32.xlu0 %v7086_v56, %s7439_s29  ;;  %6000 = vmatprep.subr.bf16.mxu0 %v6752_v14  ;;  %v6753_v17 = vcombine.low %v5056_v36, %v5080_v37  ;;  %v10619_v50 = vld [vmem:[#allocation10 + $0x70] sm:$0xff] }
 0x649   : > { %v10594_v3 = vadd.f32 %v10364_v25, %v3279_v31  ;;  %6001 = vmatpush1.bf16.xpose.msra.mxu0 %v6751_v43  ;;  %6040 = vmatprep.subr.bf16.mxu1 %v6754_v7  ;;  %v10746_v7 = vstv %s6653_s16  ;;  %s6665_s16 = sld [smem:[#allocation7 + $0x2e]] }
 0x64a   : > { %v3292_v62 = vadd.f32 %v10364_v25, %v3280_v39  ;;  %v7091_v6 = vpack.i.bf16 %v3300_v9, %v3299_v13  ;;  %6041 = vmatpush1.bf16.xpose.msra.mxu1 %v6753_v17  ;;  %v10621_v39 = vld [vmem:[#allocation10 + $0x130] sm:$0x11] }
 0x64b   : > { %v3301_v11 = vmax.f32 %v10594_v3, 0.0  ;;  %v6755_v42 = vcombine.low %v10619_v50, %v10621_v39  ;;  %v10696_v3 = vld [vmem:[%s7615_s30 + $0x10] sm:$0xff] }
 0x64c   : > { %v3302_v12 = vmax.f32 %v3292_v62, 0.0  ;;  %7092 = vrot.lane.b32.xlu1 %v7091_v6, %s7439_s29 }
 0x64e   : > { %v7096_v33 = vpack.i.bf16 %v3302_v12, %v3301_v11 }
 0x650   : > { %7097 = vrot.lane.b32.xlu0 %v7096_v33, %s7439_s29  ;;  %v6756_v33 = vcombine.high %v10619_v50, %v10621_v39 }
 0x652   : > { %6080 = vmatprep.subr.bf16.mxu0 %v6756_v33  ;;  %v10766_v33 = vstv %s6654_s12  ;;  %s6666_s12 = sld [smem:[#allocation7 + $0x2f]] }
 0x656   : > { %v5860_v4 = vpop.f32.mrf.mxu0 }
 0x657   : > { %v5861_v54 = vadd.f32 %v5860_v4, %v12830_v40 }
 0x658   : > { %v5862_v59 = vpop.f32.mrf.mxu0 }
 0x65a   : > { %v5863_v25 = vpop.f32.mrf.mxu0  ;;  %v5900_v21 = vpop.f32.mrf.mxu1 }
 0x65b   : > { %v5901_v22 = vadd.f32 %v5900_v21, %v5861_v54  ;;  %v10641_v21 = vld [vmem:[#allocation10 + $0x78] sm:$0xff] }
 0x65c   : > { %v5864_v24 = vpop.f32.mrf.mxu0  ;;  %v5902_v38 = vpop.f32.mrf.mxu1 }
 0x65e   : > { %v5903_v46 = vpop.f32.mrf.mxu1 }
 0x65f   : > { %v5940_v8 = vpop.f32.mrf.mxu0 }
 0x660   : > { %v5941_v58 = vadd.f32 %v5940_v8, %v5901_v22  ;;  %v5904_v18 = vpop.f32.mrf.mxu1  ;;  %v10643_v22 = vld [vmem:[#allocation10 + $0x138] sm:$0x11] }
 0x661   : > { %v5942_v60 = vpop.f32.mrf.mxu0  ;;  %v6758_v10 = vcombine.high %v10641_v21, %v10643_v22 }
 0x663   : > { %v5943_v45 = vpop.f32.mrf.mxu0  ;;  %v5980_v53 = vpop.f32.mrf.mxu1  ;;  %6120 = vmatprep.subr.bf16.mxu1 %v6758_v10  ;;  %v3689_v10 = vmul.f32 %v10684_v5, %v10766_v33 }
 0x664   : > { %v10607_v20 = vadd.f32 %v5980_v53, %v5941_v58  ;;  %v10675_v45 = vstv %s6651_s26  ;;  %s6657_s26 = sld [smem:[#allocation7 + $0x2b]] }
 0x665   : > { %v5944_v30 = vpop.f32.mrf.mxu0  ;;  %v5982_v1 = vpop.f32.mrf.mxu1  ;;  %v3461_v52 = vmul.f32 %v10684_v5, %v10675_v45  ;;  %v3466_v44 = vmul.f32 %v10713_v19, %v10675_v45 }
 0x666   : > { %12831 = vst [vmem:[#allocation39_spill] sm:$0xff] %v10607_v20  ;;  %v10701_v1 = vld [vmem:[%s7615_s30 + $0x18] sm:$0xff] }
 0x667   : > { %v5983_v16 = vpop.f32.mrf.mxu1 }
 0x668   : > { %v3464_v16 = vmul.f32 %v10701_v1, %v10675_v45 }
 0x669   : > { %v5984_v29 = vpop.f32.mrf.mxu1 }
 0x66a   : > { %v10708_v29 = vld [vmem:[%s7615_s30 + $0x20] sm:$0xff] }
 0x6b2   : > { %v7078_v48 = vpop.permute.xlu0 %7077 }
 0x6b3   : > { %v7080_v27 = vunpack.i.h.bf16 %v7078_v48  ;;  %v7079_v35 = vunpack.i.l.bf16 %v7078_v48  ;;  %v3465_v48 = vmul.f32 %v10708_v29, %v10675_v45 }
 0x6b5   : > { %v3333_v51 = vsel %vm353_vm0, %v7079_v35, %v7080_v27  ;;  %v10722_v35 = vld [vmem:[%s7615_s30 + $0x30] sm:$0xff] }
 0x6b6   : > { %v7083_v26 = vpop.permute.xlu1 %7082  ;;  %v10613_v55 = vmax.f32 %v3293_v32, %v3333_v51  ;;  %v3467_v14 = vmul.f32 %v10722_v35, %v10675_v45 }
 0x6b7   : > { %v7085_v34 = vunpack.i.h.bf16 %v7083_v26  ;;  %v7084_v57 = vunpack.i.l.bf16 %v7083_v26 }
 0x6b9   : > { %v3334_v49 = vsel %vm353_vm0, %v7080_v27, %v7084_v57  ;;  %v3335_v62 = vsel %vm353_vm0, %v7084_v57, %v7085_v34  ;;  %v10717_v27 = vstv %s6652_s24  ;;  %s6658_s24 = sld [smem:[#allocation7 + $0x2c]] }
 0x6ba   : > { %v10617_v56 = vmax.f32 %v3294_v61, %v3334_v49  ;;  %v7088_v31 = vpop.permute.xlu0 %7087  ;;  %v10633_v61 = vmax.f32 %v3295_v2, %v3335_v62  ;;  %v3539_v26 = vmul.f32 %v10696_v3, %v10717_v27  ;;  %v3540_v36 = vmul.f32 %v10701_v1, %v10717_v27 }
 0x6bb   : > { %v7090_v6 = vunpack.i.h.bf16 %v7088_v31  ;;  %v7089_v12 = vunpack.i.l.bf16 %v7088_v31  ;;  %v3541_v37 = vmul.f32 %v10708_v29, %v10717_v27  ;;  %v3542_v51 = vmul.f32 %v10713_v19, %v10717_v27 }
 0x6bc   : > { %v7101_v0 = vpack.i.bf16 %v10617_v56, %v10613_v55  ;;  %v3537_v57 = vmul.f32 %v10684_v5, %v10717_v27  ;;  %v3615_v49 = vmul.f32 %v10696_v3, %v10746_v7  ;;  %v3616_v31 = vmul.f32 %v10701_v1, %v10746_v7 }
 0x6bd   : > { %v3336_v32 = vsel %vm353_vm0, %v7085_v34, %v7089_v12  ;;  %v3337_v54 = vsel %vm353_vm0, %v7089_v12, %v7090_v6  ;;  %v3543_v34 = vmul.f32 %v10722_v35, %v10717_v27  ;;  %v3617_v62 = vmul.f32 %v10708_v29, %v10746_v7 }
 0x6be   : > { %v10637_v4 = vmax.f32 %v3296_v63, %v3336_v32  ;;  %v7093_v40 = vpop.permute.xlu1 %7092  ;;  %7102 = vrot.lane.b32.xlu1 %v7101_v0, %s7441_s17  ;;  %v6757_v63 = vcombine.low %v10641_v21, %v10643_v22  ;;  %v10654_v24 = vmax.f32 %v3297_v47, %v3337_v54  ;;  %v3619_v12 = vmul.f32 %v10722_v35, %v10746_v7 }
 0x6bf   : > { %v7095_v59 = vunpack.i.h.bf16 %v7093_v40  ;;  %v7094_v25 = vunpack.i.l.bf16 %v7093_v40  ;;  %v3613_v0 = vmul.f32 %v10684_v5, %v10746_v7  ;;  %v3691_v40 = vmul.f32 %v10696_v3, %v10766_v33 }
 0x6c0   : > { %v7106_v23 = vpack.i.bf16 %v10637_v4, %v10633_v61  ;;  %v3692_v54 = vmul.f32 %v10701_v1, %v10766_v33 }
 0x6c1   : > { %v3338_v2 = vsel %vm353_vm0, %v7090_v6, %v7094_v25  ;;  %v3339_v8 = vsel %vm353_vm0, %v7094_v25, %v7095_v59  ;;  %v3618_v6 = vmul.f32 %v10713_v19, %v10746_v7  ;;  %v3694_v25 = vmul.f32 %v10713_v19, %v10766_v33 }
 0x6c2   : > { %v10658_v38 = vmax.f32 %v3298_v41, %v3338_v2  ;;  %v7098_v46 = vpop.permute.xlu0 %7097  ;;  %7107 = vrot.lane.b32.xlu0 %v7106_v23, %s7441_s17  ;;  %v10668_v28 = vmax.f32 %v3299_v13, %v3339_v8  ;;  %v10689_v13 = vld [vmem:[%s7615_s30 + $0x8] sm:$0xff]  ;;  %v3695_v23 = vmul.f32 %v10722_v35, %v10766_v33  ;;  %v10795_v2 = vld [vmem:[%s7615_s30 + $0x38] sm:$0xff]  ;;  %v10800_v8 = vld [vmem:[%s7615_s30 + $0x40] sm:$0xff] }
 0x6c3   : > { %v7100_v58 = vunpack.i.h.bf16 %v7098_v46  ;;  %v7099_v18 = vunpack.i.l.bf16 %v7098_v46  ;;  %v3538_v43 = vmul.f32 %v10689_v13, %v10717_v27  ;;  %v3614_v17 = vmul.f32 %v10689_v13, %v10746_v7 }
 0x6c4   : > { %v7111_v60 = vpack.i.bf16 %v10658_v38, %v10654_v24  ;;  %v3690_v32 = vmul.f32 %v10689_v13, %v10766_v33  ;;  %v3468_v46 = vmul.f32 %v10795_v2, %v10675_v45 }
 0x6c5   : > { %v3340_v15 = vsel %vm353_vm0, %v7095_v59, %v7099_v18  ;;  %v3341_v47 = vsel %vm353_vm0, %v7099_v18, %v7100_v58  ;;  %v3693_v59 = vmul.f32 %v10708_v29, %v10766_v33  ;;  %v3469_v58 = vmul.f32 %v10800_v8, %v10675_v45  ;;  %v10807_v18 = vld [vmem:[%s7615_s30 + $0x48] sm:$0xff] }
 0x6c6   : > { %v10672_v41 = vmax.f32 %v3300_v9, %v3340_v15  ;;  %7112 = vrot.lane.b32.xlu1 %v7111_v60, %s7441_s17  ;;  %v3359_v30 = vmax.f32 %v3301_v11, %v3341_v47  ;;  %v3462_v9 = vmul.f32 %v10689_v13, %v10675_v45  ;;  %v3463_v11 = vmul.f32 %v10696_v3, %v10675_v45  ;;  %v10812_v15 = vld [vmem:[%s7615_s30 + $0x50] sm:$0xff] }
 0x6c7   : > { %v3470_v60 = vmul.f32 %v10807_v18, %v10675_v45  ;;  %12832 = vst [vmem:[#allocation30_spill] sm:$0xff] %v10812_v15  ;;  %v3471_v47 = vmul.f32 %v10812_v15, %v10675_v45  ;;  %v3698_v21 = vmul.f32 %v10807_v18, %v10766_v33 }
 0x6c8   : > { %v7116_v53 = vpack.i.bf16 %v10672_v41, %v10668_v28 }
 0x6ca   : > { %7117 = vrot.lane.b32.xlu0 %v7116_v53, %s7441_s17  ;;  %3385 = vrot.lane.b32.xlu1 %v3359_v30, %s7441_s17  ;;  %v10816_v53 = vstv %s6655_s10  ;;  %s6667_s10 = sld [smem:[#allocation7 + $0x30]] }
 0x6cb   : > { %v3766_v30 = vmul.f32 %v10689_v13, %v10816_v53  ;;  %v3769_v45 = vmul.f32 %v10708_v29, %v10816_v53 }
 0x6ce   : > { %3483 = vrot.lane.b32.xlu0 %v3461_v52, %s7439_s29  ;;  %3485 = vrot.lane.b32.xlu1 %v3462_v9, %s7439_s29  ;;  %v3767_v52 = vmul.f32 %v10696_v3, %v10816_v53  ;;  %v3768_v9 = vmul.f32 %v10701_v1, %v10816_v53 }
 0x6d2   : > { %3487 = vrot.lane.b32.xlu0 %v3463_v11, %s7439_s29  ;;  %3489 = vrot.lane.b32.xlu1 %v3464_v16, %s7439_s29  ;;  %v3770_v11 = vmul.f32 %v10713_v19, %v10816_v53  ;;  %v3771_v16 = vmul.f32 %v10722_v35, %v10816_v53 }
 0x6d6   : > { %3491 = vrot.lane.b32.xlu0 %v3465_v48, %s7439_s29  ;;  %3493 = vrot.lane.b32.xlu1 %v3466_v44, %s7439_s29  ;;  %v3765_v48 = vmul.f32 %v10684_v5, %v10816_v53  ;;  %v3544_v44 = vmul.f32 %v10795_v2, %v10717_v27 }
 0x6da   : > { %3495 = vrot.lane.b32.xlu0 %v3467_v14, %s7439_s29  ;;  %3561 = vrot.lane.b32.xlu1 %v3538_v43, %s7440_s14  ;;  %v3545_v14 = vmul.f32 %v10800_v8, %v10717_v27  ;;  %v3546_v43 = vmul.f32 %v10807_v18, %v10717_v27 }
 0x6de   : > { %3563 = vrot.lane.b32.xlu0 %v3539_v26, %s7440_s14  ;;  %3565 = vrot.lane.b32.xlu1 %v3540_v36, %s7440_s14  ;;  %v10848_v26 = vstv %s6656_s13  ;;  %v3547_v36 = vmul.f32 %v10812_v15, %v10717_v27  ;;  %s6668_s13 = sld [smem:[#allocation7 + $0x31]] }
 0x6df   : > { %v3845_v27 = vmul.f32 %v10708_v29, %v10848_v26 }
 0x6e2   : > { %3567 = vrot.lane.b32.xlu0 %v3541_v37, %s7440_s14  ;;  %3569 = vrot.lane.b32.xlu1 %v3542_v51, %s7440_s14  ;;  %v3842_v37 = vmul.f32 %v10689_v13, %v10848_v26  ;;  %v3843_v51 = vmul.f32 %v10696_v3, %v10848_v26 }
 0x6e4   : > { %v11180_v20 = vstv %s6668_s13  ;;  %s11455_s13 = sld [smem:[#allocation7 + $0x35]] }
 0x6e6   : > { %3571 = vrot.lane.b32.xlu0 %v3543_v34, %s7440_s14  ;;  %3559 = vrot.lane.b32.xlu1 %v3537_v57, %s7440_s14  ;;  %v3844_v34 = vmul.f32 %v10701_v1, %v10848_v26  ;;  %v3846_v57 = vmul.f32 %v10713_v19, %v10848_v26 }
 0x6ea   : > { %3637 = vrot.lane.b32.xlu0 %v3614_v17, %s7441_s17  ;;  %3639 = vrot.lane.b32.xlu1 %v3615_v49, %s7441_s17  ;;  %v3847_v17 = vmul.f32 %v10722_v35, %v10848_v26  ;;  %v3841_v49 = vmul.f32 %v10684_v5, %v10848_v26 }
 0x6ee   : > { %3641 = vrot.lane.b32.xlu0 %v3616_v31, %s7441_s17  ;;  %3643 = vrot.lane.b32.xlu1 %v3617_v62, %s7441_s17  ;;  %v3620_v31 = vmul.f32 %v10795_v2, %v10746_v7  ;;  %v3621_v62 = vmul.f32 %v10800_v8, %v10746_v7 }
 0x6f2   : > { %3645 = vrot.lane.b32.xlu0 %v3618_v6, %s7441_s17  ;;  %3647 = vrot.lane.b32.xlu1 %v3619_v12, %s7441_s17 }
 0x6f6   : > { %3635 = vrot.lane.b32.xlu0 %v3613_v0, %s7441_s17  ;;  %3713 = vrot.lane.b32.xlu1 %v3690_v32, %s7442_s9  ;;  %v3622_v32 = vmul.f32 %v10807_v18, %v10746_v7 }
 0x6fa   : > { %3715 = vrot.lane.b32.xlu0 %v3691_v40, %s7442_s9  ;;  %3717 = vrot.lane.b32.xlu1 %v3692_v54, %s7442_s9  ;;  %v3623_v40 = vmul.f32 %v10812_v15, %v10746_v7  ;;  %v10886_v54 = vstv %s6657_s26  ;;  %s6669_s26 = sld [smem:[#allocation7 + $0x32]] }
 0x6fe   : > { %3719 = vrot.lane.b32.xlu0 %v3693_v59, %s7442_s9  ;;  %3721 = vrot.lane.b32.xlu1 %v3694_v25, %s7442_s9 }
 0x702   : > { %3723 = vrot.lane.b32.xlu0 %v3695_v23, %s7442_s9  ;;  %3711 = vrot.lane.b32.xlu1 %v3689_v10, %s7442_s9 }
 0x706   : > { %3497 = vrot.lane.b32.xlu0 %v3468_v46, %s7439_s29  ;;  %3499 = vrot.lane.b32.xlu1 %v3469_v58, %s7439_s29  ;;  %v3918_v46 = vmul.f32 %v10689_v13, %v10886_v54  ;;  %v3919_v58 = vmul.f32 %v10696_v3, %v10886_v54 }
 0x70a   : > { %3501 = vrot.lane.b32.xlu0 %v3470_v60, %s7439_s29  ;;  %3503 = vrot.lane.b32.xlu1 %v3471_v47, %s7439_s29 }
 0x70e   : > { %3789 = vrot.lane.b32.xlu0 %v3766_v30, %s7443_s8  ;;  %3791 = vrot.lane.b32.xlu1 %v3767_v52, %s7443_s8 }
 0x712   : > { %3793 = vrot.lane.b32.xlu0 %v3768_v9, %s7443_s8  ;;  %3795 = vrot.lane.b32.xlu1 %v3769_v45, %s7443_s8 }
 0x716   : > { %3797 = vrot.lane.b32.xlu0 %v3770_v11, %s7443_s8  ;;  %3799 = vrot.lane.b32.xlu1 %v3771_v16, %s7443_s8  ;;  %v3920_v16 = vmul.f32 %v10701_v1, %v10886_v54 }
 0x71a   : > { %3787 = vrot.lane.b32.xlu0 %v3765_v48, %s7443_s8  ;;  %3573 = vrot.lane.b32.xlu1 %v3544_v44, %s7440_s14  ;;  %v3921_v48 = vmul.f32 %v10708_v29, %v10886_v54 }
 0x71e   : > { %3575 = vrot.lane.b32.xlu0 %v3545_v14, %s7440_s14  ;;  %3577 = vrot.lane.b32.xlu1 %v3546_v43, %s7440_s14 }
 0x722   : > { %3579 = vrot.lane.b32.xlu0 %v3547_v36, %s7440_s14  ;;  %3865 = vrot.lane.b32.xlu1 %v3842_v37, %s7444_s15 }
 0x726   : > { %3867 = vrot.lane.b32.xlu0 %v3843_v51, %s7444_s15  ;;  %3869 = vrot.lane.b32.xlu1 %v3844_v34, %s7444_s15 }
 0x72a   : > { %3871 = vrot.lane.b32.xlu0 %v3845_v27, %s7444_s15  ;;  %3873 = vrot.lane.b32.xlu1 %v3846_v57, %s7444_s15  ;;  %v3922_v57 = vmul.f32 %v10713_v19, %v10886_v54 }
 0x72e   : > { %3875 = vrot.lane.b32.xlu0 %v3847_v17, %s7444_s15  ;;  %3863 = vrot.lane.b32.xlu1 %v3841_v49, %s7444_s15 }
 0x730   : > { %v7103_v6 = vpop.permute.xlu1 %7102 }
 0x731   : > { %v7105_v12 = vunpack.i.h.bf16 %v7103_v6  ;;  %v7104_v0 = vunpack.i.l.bf16 %v7103_v6 }
 0x732   : > { %3649 = vrot.lane.b32.xlu0 %v3620_v31, %s7441_s17  ;;  %3651 = vrot.lane.b32.xlu1 %v3621_v62, %s7441_s17 }
 0x733   : > { %v3387_v59 = vsel %vm507_vm2, %v7104_v0, %v7105_v12 }
 0x734   : > { %v7108_v25 = vpop.permute.xlu0 %7107  ;;  %v3403_v7 = vmax.f32 %v10613_v55, %v3387_v59 }
 0x735   : > { %v7110_v23 = vunpack.i.h.bf16 %v7108_v25  ;;  %v7109_v10 = vunpack.i.l.bf16 %v7108_v25  ;;  %v3697_v25 = vmul.f32 %v10800_v8, %v10766_v33 }
 0x736   : > { %3653 = vrot.lane.b32.xlu0 %v3622_v32, %s7441_s17  ;;  %3655 = vrot.lane.b32.xlu1 %v3623_v40, %s7441_s17  ;;  %v6827_v44 = vpack.c.bf16 %v3403_v7, %v3403_v7 }
 0x737   : > { %v3388_v60 = vsel %vm507_vm2, %v7105_v12, %v7109_v10  ;;  %v3389_v47 = vsel %vm507_vm2, %v7109_v10, %v7110_v23  ;;  %v10952_v10 = vstv %s6658_s24  ;;  %s6670_s24 = sld [smem:[#allocation7 + $0x33]] }
 0x738   : > { %v7113_v30 = vpop.permute.xlu1 %7112  ;;  %v3404_v52 = vmax.f32 %v10617_v56, %v3388_v60  ;;  %v3405_v14 = vmax.f32 %v10633_v61, %v3389_v47  ;;  %v3923_v61 = vmul.f32 %v10722_v35, %v10886_v54  ;;  %v3995_v7 = vmul.f32 %v10696_v3, %v10952_v10 }
 0x739   : > { %v7115_v9 = vunpack.i.h.bf16 %v7113_v30  ;;  %v7114_v45 = vunpack.i.l.bf16 %v7113_v30  ;;  %v3996_v47 = vmul.f32 %v10701_v1, %v10952_v10 }
 0x73a   : > { %3941 = vrot.lane.b32.xlu0 %v3918_v46, %s7445_s28  ;;  %3943 = vrot.lane.b32.xlu1 %v3919_v58, %s7445_s28  ;;  %v6828_v11 = vpack.c.bf16 %v3404_v52, %v3404_v52  ;;  %v3994_v46 = vmul.f32 %v10689_v13, %v10952_v10  ;;  %v3997_v52 = vmul.f32 %v10708_v29, %v10952_v10 }
 0x73b   : > { %v3390_v55 = vsel %vm507_vm2, %v7110_v23, %v7114_v45  ;;  %v3391_v37 = vsel %vm507_vm2, %v7114_v45, %v7115_v9 }
 0x73c   : > { %v7118_v43 = vpop.permute.xlu0 %7117  ;;  %v3386_v56 = vpop.permute.xlu1 %3385  ;;  %6018 = vmatprep.mubr.bf16.mxu0 %v6828_v11  ;;  %v3406_v36 = vmax.f32 %v10637_v4, %v3390_v55  ;;  %v6829_v4 = vpack.c.bf16 %v3405_v14, %v3405_v14  ;;  %v3407_v0 = vmax.f32 %v10654_v24, %v3391_v37  ;;  %v3696_v24 = vmul.f32 %v10795_v2, %v10766_v33 }
 0x73d   : > { %v7120_v51 = vunpack.i.h.bf16 %v7118_v43  ;;  %v7119_v34 = vunpack.i.l.bf16 %v7118_v43  ;;  %6019 = vmatmul.mubr.bf16.vlgmr.msra.gmra.mxu0 %v6827_v44  ;;  %v3772_v14 = vmul.f32 %v10795_v2, %v10816_v53  ;;  %v3773_v43 = vmul.f32 %v10800_v8, %v10816_v53 }
 0x73e   : > { %3945 = vrot.lane.b32.xlu0 %v3920_v16, %s7445_s28  ;;  %3947 = vrot.lane.b32.xlu1 %v3921_v48, %s7445_s28  ;;  %v6830_v27 = vpack.c.bf16 %v3406_v36, %v3406_v36  ;;  %v6831_v40 = vpack.c.bf16 %v3407_v0, %v3407_v0  ;;  %v3999_v16 = vmul.f32 %v10722_v35, %v10952_v10 }
 0x73f   : > { %v3394_v17 = vsel %vm507_vm2, %v7120_v51, %v3386_v56  ;;  %6081 = vmatpush1.bf16.xpose.msra.mxu0 %v6755_v42  ;;  %v3392_v49 = vsel %vm507_vm2, %v7115_v9, %v7119_v34  ;;  %v3393_v32 = vsel %vm507_vm2, %v7119_v34, %v7120_v51  ;;  %v3917_v42 = vmul.f32 %v10684_v5, %v10886_v54 }
 0x740   : > { %v3410_v31 = vmax.f32 %v10672_v41, %v3394_v17  ;;  %v10921_v62 = vpop.permute.xlu0 %3483  ;;  %v10923_v6 = vpop.permute.xlu1 %3485  ;;  %6058 = vmatprep.mubr.bf16.mxu1 %v6830_v27  ;;  %v3408_v12 = vmax.f32 %v10658_v38, %v3392_v49  ;;  %v3409_v59 = vmax.f32 %v10668_v28, %v3393_v32  ;;  %v3699_v28 = vmul.f32 %v10812_v15, %v10766_v33 }
 0x741   : > { %6059 = vmatmul.mubr.bf16.vlgmr.msra.gmra.mxu1 %v6829_v4  ;;  %v3998_v9 = vmul.f32 %v10713_v19, %v10952_v10  ;;  %v3993_v48 = vmul.f32 %v10684_v5, %v10952_v10  ;;  %v3774_v37 = vmul.f32 %v10807_v18, %v10816_v53  ;;  %v3775_v51 = vmul.f32 %v10812_v15, %v10816_v53 }
 0x742   : > { %v6834_v50 = vpack.c.bf16 %v3410_v31, %v3410_v31  ;;  %3949 = vrot.lane.b32.xlu0 %v3922_v57, %s7445_s28  ;;  %3951 = vrot.lane.b32.xlu1 %v3923_v61, %s7445_s28  ;;  %v6832_v39 = vpack.c.bf16 %v3408_v12, %v3408_v12  ;;  %v6833_v23 = vpack.c.bf16 %v3409_v59, %v3409_v59  ;;  %v11010_v34 = vstv %s6665_s16  ;;  %s6671_s16 = sld [smem:[#allocation7 + $0x34]] }
 0x743   : > { %6121 = vmatpush1.bf16.xpose.msra.mxu1 %v6757_v63  ;;  %v4248_v61 = vmul.f32 %v10689_v13, %v11010_v34  ;;  %v4249_v17 = vmul.f32 %v10696_v3, %v11010_v34  ;;  %v4250_v53 = vmul.f32 %v10701_v1, %v11010_v34  ;;  %v4251_v31 = vmul.f32 %v10708_v29, %v11010_v34 }
 0x744   : > { %v10937_v38 = vpop.permute.xlu0 %3487  ;;  %v10939_v41 = vpop.permute.xlu1 %3489  ;;  %6098 = vmatprep.mubr.bf16.mxu0 %v6832_v39  ;;  %6138 = vmatprep.mubr.bf16.mxu1 %v6834_v50  ;;  %v4252_v32 = vmul.f32 %v10713_v19, %v11010_v34  ;;  %v4253_v50 = vmul.f32 %v10722_v35, %v11010_v34 }
 0x746   : > { %6099 = vmatmul.mubr.bf16.vlgmr.msra.gmra.mxu0 %v6831_v40  ;;  %3939 = vrot.lane.b32.xlu0 %v3917_v42, %s7445_s28  ;;  %v3848_v40 = vmul.f32 %v10795_v2, %v10848_v26 }
 0x747   : > { %3725 = vrot.lane.b32.xlu1 %v3696_v24, %s7442_s9  ;;  %v4247_v24 = vmul.f32 %v10684_v5, %v11010_v34 }
 0x748   : > { %v10948_v22 = vpop.permute.xlu0 %3491  ;;  %v10950_v63 = vpop.permute.xlu1 %3493 }
 0x74a   : > { %6139 = vmatmul.mubr.bf16.vlgmr.msra.gmra.mxu1 %v6833_v23  ;;  %3727 = vrot.lane.b32.xlu0 %v3697_v25, %s7442_s9  ;;  %v3850_v23 = vmul.f32 %v10807_v18, %v10848_v26 }
 0x74b   : > { %3729 = vrot.lane.b32.xlu1 %v3698_v21, %s7442_s9  ;;  %v3849_v21 = vmul.f32 %v10800_v8, %v10848_v26 }
 0x74c   : > { %v10960_v58 = vpop.permute.xlu0 %3495  ;;  %v10962_v60 = vpop.permute.xlu1 %3561 }
 0x74e   : > { %3731 = vrot.lane.b32.xlu0 %v3699_v28, %s7442_s9 }
 0x74f   : > { %4017 = vrot.lane.b32.xlu1 %v3994_v46, %s7446_s11 }
 0x750   : > { %v10970_v33 = vpop.permute.xlu0 %3563  ;;  %v10972_v30 = vpop.permute.xlu1 %3565 }
 0x752   : > { %4019 = vrot.lane.b32.xlu0 %v3995_v7, %s7446_s11  ;;  %v11066_v7 = vstv %s6666_s12  ;;  %s11354_s12 = sld [smem:[#allocation7 + $0x2d]] }
 0x753   : > { %4021 = vrot.lane.b32.xlu1 %v3996_v47, %s7446_s11  ;;  %v3851_v47 = vmul.f32 %v10812_v15, %v10848_v26 }
 0x754   : > { %v10980_v45 = vpop.permute.xlu0 %3567  ;;  %v10982_v11 = vpop.permute.xlu1 %3569 }
 0x756   : > { %4023 = vrot.lane.b32.xlu0 %v3997_v52, %s7446_s11  ;;  %v4324_v52 = vmul.f32 %v10689_v13, %v11066_v7 }
 0x757   : > { %4025 = vrot.lane.b32.xlu1 %v3998_v9, %s7446_s11 }
 0x758   : > { %v10990_v44 = vpop.permute.xlu0 %3571  ;;  %v10992_v55 = vpop.permute.xlu1 %3559 }
 0x75a   : > { %4027 = vrot.lane.b32.xlu0 %v3999_v16, %s7446_s11 }
 0x75b   : > { %4015 = vrot.lane.b32.xlu1 %v3993_v48, %s7446_s11  ;;  %v4325_v48 = vmul.f32 %v10696_v3, %v11066_v7 }
 0x75c   : > { %v11000_v56 = vpop.permute.xlu0 %3637  ;;  %v11002_v36 = vpop.permute.xlu1 %3639 }
 0x75e   : > { %3801 = vrot.lane.b32.xlu0 %v3772_v14, %s7443_s8  ;;  %v4326_v14 = vmul.f32 %v10701_v1, %v11066_v7 }
 0x75f   : > { %3803 = vrot.lane.b32.xlu1 %v3773_v43, %s7443_s8 }
 0x760   : > { %v11012_v27 = vpop.permute.xlu0 %3641  ;;  %v11014_v57 = vpop.permute.xlu1 %3643 }
 0x762   : > { %3805 = vrot.lane.b32.xlu0 %v3774_v37, %s7443_s8  ;;  %v4327_v37 = vmul.f32 %v10708_v29, %v11066_v7 }
 0x763   : > { %3807 = vrot.lane.b32.xlu1 %v3775_v51, %s7443_s8  ;;  %v4328_v51 = vmul.f32 %v10713_v19, %v11066_v7 }
 0x764   : > { %v11022_v4 = vpop.permute.xlu0 %3645  ;;  %v11024_v49 = vpop.permute.xlu1 %3647 }
 0x766   : > { %4271 = vrot.lane.b32.xlu0 %v4248_v61, %s7439_s29 }
 0x767   : > { %4273 = vrot.lane.b32.xlu1 %v4249_v17, %s7439_s29 }
 0x768   : > { %v11032_v12 = vpop.permute.xlu0 %3635  ;;  %v11034_v0 = vpop.permute.xlu1 %3713 }
 0x76a   : > { %4275 = vrot.lane.b32.xlu0 %v4250_v53, %s7439_s29  ;;  %v4329_v53 = vmul.f32 %v10722_v35, %v11066_v7 }
 0x76b   : > { %4277 = vrot.lane.b32.xlu1 %v4251_v31, %s7439_s29  ;;  %v4323_v31 = vmul.f32 %v10684_v5, %v11066_v7 }
 0x76c   : > { %v11042_v39 = vpop.permute.xlu0 %3715  ;;  %v11044_v42 = vpop.permute.xlu1 %3717 }
 0x76e   : > { %4279 = vrot.lane.b32.xlu0 %v4252_v32, %s7439_s29 }
 0x76f   : > { %4281 = vrot.lane.b32.xlu1 %v4253_v50, %s7439_s29 }
 0x770   : > { %v11052_v59 = vpop.permute.xlu0 %3719  ;;  %v11054_v25 = vpop.permute.xlu1 %3721 }
 0x772   : > { %4269 = vrot.lane.b32.xlu0 %v4247_v24, %s7439_s29  ;;  %v3924_v24 = vmul.f32 %v10795_v2, %v10886_v54 }
 0x773   : > { %3877 = vrot.lane.b32.xlu1 %v3848_v40, %s7444_s15  ;;  %v3925_v40 = vmul.f32 %v10800_v8, %v10886_v54 }
 0x774   : > { %v11062_v28 = vpop.permute.xlu0 %3723  ;;  %v11064_v46 = vpop.permute.xlu1 %3711 }
 0x776   : > { %3879 = vrot.lane.b32.xlu0 %v3849_v21, %s7444_s15 }
 0x777   : > { %3881 = vrot.lane.b32.xlu1 %v3850_v23, %s7444_s15 }
 0x778   : > { %v11074_v9 = vpop.permute.xlu0 %3497  ;;  %v11076_v16 = vpop.permute.xlu1 %3499 }
 0x77a   : > { %3883 = vrot.lane.b32.xlu0 %v3851_v47, %s7444_s15  ;;  %v3926_v47 = vmul.f32 %v10807_v18, %v10886_v54 }
 0x77b   : > { %4347 = vrot.lane.b32.xlu1 %v4324_v52, %s7440_s14  ;;  %v3927_v52 = vmul.f32 %v10812_v15, %v10886_v54 }
 0x77c   : > { %v11084_v26 = vpop.permute.xlu0 %3501  ;;  %v11086_v43 = vpop.permute.xlu1 %3503 }
 0x77e   : > { %4349 = vrot.lane.b32.xlu0 %v4325_v48, %s7440_s14  ;;  %v11124_v48 = vstv %s6667_s10  ;;  %s11362_s10 = sld [smem:[#allocation8 + $0x4]] }
 0x77f   : > { %4351 = vrot.lane.b32.xlu1 %v4326_v14, %s7440_s14  ;;  %v4402_v54 = vmul.f32 %v10701_v1, %v11124_v48 }
 0x780   : > { %v11094_v61 = vpop.permute.xlu0 %3789  ;;  %v11096_v17 = vpop.permute.xlu1 %3791 }
 0x781   : > { %12833 = vst [vmem:[#allocation37_spill] sm:$0xff] %v11094_v61  ;;  %v3510_v61 = vsel %vm353_vm0, %v10950_v63, %v10960_v58 }
 0x782   : > { %4353 = vrot.lane.b32.xlu0 %v4327_v37, %s7440_s14 }
 0x783   : > { %4355 = vrot.lane.b32.xlu1 %v4328_v51, %s7440_s14  ;;  %v4400_v51 = vmul.f32 %v10689_v13, %v11124_v48 }
 0x784   : > { %v11104_v32 = vpop.permute.xlu0 %3793  ;;  %v11106_v50 = vpop.permute.xlu1 %3795 }
 0x785   : > { %12834 = vst [vmem:[#allocation36_spill] sm:$0xff] %v11104_v32  ;;  %12835 = vst [vmem:[#allocation40_spill] sm:$0xff] %v11106_v50  ;;  %v3509_v32 = vsel %vm353_vm0, %v10948_v22, %v10950_v63  ;;  %v3585_v63 = vsel %vm430_vm1, %v10980_v45, %v10982_v11 }
 0x786   : > { %4357 = vrot.lane.b32.xlu0 %v4329_v53, %s7440_s14  ;;  %v4401_v53 = vmul.f32 %v10696_v3, %v11124_v48 }
 0x787   : > { %4345 = vrot.lane.b32.xlu1 %v4323_v31, %s7440_s14 }
 0x788   : > { %v11114_v21 = vpop.permute.xlu0 %3797  ;;  %v11116_v23 = vpop.permute.xlu1 %3799 }
 0x789   : > { %12836 = vst [vmem:[#allocation20_spill] sm:$0xff] %v11114_v21  ;;  %12837 = vst [vmem:[#allocation42_spill] sm:$0xff] %v11116_v23 }
 0x78a   : > { %3953 = vrot.lane.b32.xlu0 %v3924_v24, %s7445_s28 }
 0x78b   : > { %3955 = vrot.lane.b32.xlu1 %v3925_v40, %s7445_s28  ;;  %v4403_v40 = vmul.f32 %v10708_v29, %v11124_v48 }
 0x78c   : > { %v11126_v14 = vpop.permute.xlu0 %3787  ;;  %v11128_v37 = vpop.permute.xlu1 %3573 }
 0x78d   : > { %12838 = vst [vmem:[#allocation44_spill] sm:$0xff] %v11126_v14  ;;  %12839 = vst [vmem:[#allocation45_spill] sm:$0xff] %v11128_v37 }
 0x78e   : > { %3957 = vrot.lane.b32.xlu0 %v3926_v47, %s7445_s28 }
 0x78f   : > { %3959 = vrot.lane.b32.xlu1 %v3927_v52, %s7445_s28 }
 0x790   : > { %v11136_v31 = vpop.permute.xlu0 %3575  ;;  %v11138_v24 = vpop.permute.xlu1 %3577 }
 0x791   : > { %12840 = vst [vmem:[#allocation19_spill] sm:$0xff] %v11136_v31  ;;  %12841 = vst [vmem:[#allocation18_spill] sm:$0xff] %v11138_v24  ;;  %v4404_v31 = vmul.f32 %v10713_v19, %v11124_v48 }
 0x792   : > { %4423 = vrot.lane.b32.xlu0 %v4400_v51, %s7441_s17  ;;  %v4405_v51 = vmul.f32 %v10722_v35, %v11124_v48 }
 0x793   : > { %4425 = vrot.lane.b32.xlu1 %v4401_v53, %s7441_s17 }
 0x794   : > { %v11146_v47 = vpop.permute.xlu0 %3579  ;;  %v11148_v52 = vpop.permute.xlu1 %3865 }
 0x795   : > { %12842 = vst [vmem:[#allocation21_spill] sm:$0xff] %v11146_v47  ;;  %12843 = vst [vmem:[#allocation23_spill] sm:$0xff] %v11148_v52  ;;  %v4399_v52 = vmul.f32 %v10684_v5, %v11124_v48 }
 0x796   : > { %4427 = vrot.lane.b32.xlu0 %v4402_v54, %s7441_s17  ;;  %v4000_v54 = vmul.f32 %v10795_v2, %v10952_v10 }
 0x797   : > { %4429 = vrot.lane.b32.xlu1 %v4403_v40, %s7441_s17 }
 0x798   : > { %v11156_v24 = vpop.permute.xlu0 %3867  ;;  %v11158_v53 = vpop.permute.xlu1 %3869 }
 0x799   : > { %12844 = vst [vmem:[#allocation22_spill] sm:$0xff] %v11156_v24  ;;  %12845 = vst [vmem:[#allocation24_spill] sm:$0xff] %v11158_v53  ;;  %v4001_v53 = vmul.f32 %v10800_v8, %v10952_v10 }
 0x79a   : > { %4431 = vrot.lane.b32.xlu0 %v4404_v31, %s7441_s17  ;;  %v4002_v31 = vmul.f32 %v10807_v18, %v10952_v10 }
 0x79b   : > { %4433 = vrot.lane.b32.xlu1 %v4405_v51, %s7441_s17 }
 0x79c   : > { %v11166_v47 = vpop.permute.xlu0 %3871  ;;  %v11168_v40 = vpop.permute.xlu1 %3873 }
 0x79d   : > { %12846 = vst [vmem:[#allocation27_spill] sm:$0xff] %v11166_v47  ;;  %12847 = vst [vmem:[#allocation26_spill] sm:$0xff] %v11168_v40  ;;  %v4003_v40 = vmul.f32 %v10812_v15, %v10952_v10 }
 0x79e   : > { %4421 = vrot.lane.b32.xlu0 %v4399_v52, %s7441_s17  ;;  %v4476_v52 = vmul.f32 %v10689_v13, %v11180_v20 }
 0x79f   : > { %4029 = vrot.lane.b32.xlu1 %v4000_v54, %s7446_s11 }
 0x7a0   : > { %v11176_v24 = vpop.permute.xlu0 %3875  ;;  %v11178_v51 = vpop.permute.xlu1 %3863 }
 0x7a1   : > { %12848 = vst [vmem:[#allocation31_spill] sm:$0xff] %v11176_v24  ;;  %12849 = vst [vmem:[#allocation25_spill] sm:$0xff] %v11178_v51  ;;  %v4477_v51 = vmul.f32 %v10696_v3, %v11180_v20 }
 0x7a2   : > { %4031 = vrot.lane.b32.xlu0 %v4001_v53, %s7446_s11  ;;  %v4478_v53 = vmul.f32 %v10701_v1, %v11180_v20 }
 0x7a3   : > { %4033 = vrot.lane.b32.xlu1 %v4002_v31, %s7446_s11 }
 0x7a4   : > { %v11188_v54 = vpop.permute.xlu0 %3649  ;;  %v11190_v47 = vpop.permute.xlu1 %3651 }
 0x7a5   : > { %12850 = vst [vmem:[#allocation35_spill] sm:$0xff] %v11188_v54  ;;  %12851 = vst [vmem:[#allocation28_spill] sm:$0xff] %v11190_v47  ;;  %v4479_v54 = vmul.f32 %v10708_v29, %v11180_v20 }
 0x7a6   : > { %4035 = vrot.lane.b32.xlu0 %v4003_v40, %s7446_s11  ;;  %v4480_v40 = vmul.f32 %v10713_v19, %v11180_v20 }
 0x7a7   : > { %4499 = vrot.lane.b32.xlu1 %v4476_v52, %s7442_s9 }
 0x7a8   : > { %v11198_v10 = vpop.permute.xlu0 %3653  ;;  %v11200_v31 = vpop.permute.xlu1 %3655 }
 0x7a9   : > { %12852 = vst [vmem:[#allocation32_spill] sm:$0xff] %v11198_v10  ;;  %12853 = vst [vmem:[#allocation33_spill] sm:$0xff] %v11200_v31  ;;  %v4481_v10 = vmul.f32 %v10722_v35, %v11180_v20 }
 0x7aa   : > { %4501 = vrot.lane.b32.xlu0 %v4477_v51, %s7442_s9  ;;  %v4475_v51 = vmul.f32 %v10684_v5, %v11180_v20 }
 0x7ab   : > { %4503 = vrot.lane.b32.xlu1 %v4478_v53, %s7442_s9 }
 0x7ac   : > { %v11208_v47 = vpop.permute.xlu0 %3941  ;;  %v11210_v52 = vpop.permute.xlu1 %3943 }
 0x7ad   : > { %12854 = vst [vmem:[#allocation29_spill] sm:$0xff] %v11208_v47  ;;  %12855 = vst [vmem:[#allocation34_spill] sm:$0xff] %v11210_v52  ;;  %v4254_v47 = vmul.f32 %v10795_v2, %v11010_v34 }
 0x7ae   : > { %4505 = vrot.lane.b32.xlu0 %v4479_v54, %s7442_s9  ;;  %v4255_v54 = vmul.f32 %v10800_v8, %v11010_v34 }
 0x7af   : > { %4507 = vrot.lane.b32.xlu1 %v4480_v40, %s7442_s9 }
 0x7b0   : > { %v11218_v31 = vpop.permute.xlu0 %3945  ;;  %v11220_v53 = vpop.permute.xlu1 %3947 }
 0x7b1   : > { %12856 = vst [vmem:[#allocation38_spill] sm:$0xff] %v11218_v31  ;;  %12857 = vst [vmem:[#allocation41_spill] sm:$0xff] %v11220_v53  ;;  %v4256_v31 = vmul.f32 %v10807_v18, %v11010_v34  ;;  %v11238_v53 = vstv %s6669_s26 }
 0x7b2   : > { %4509 = vrot.lane.b32.xlu0 %v4481_v10, %s7442_s9  ;;  %v4257_v10 = vmul.f32 %v10812_v15, %v11010_v34  ;;  %12860 = vst [vmem:[#allocation47_spill] sm:$0xff] %v11238_v53  ;;  %v4554_v34 = vmul.f32 %v10701_v1, %v11238_v53 }
 0x7b3   : > { %4497 = vrot.lane.b32.xlu1 %v4475_v51, %s7442_s9 }
 0x7b4   : > { %v11228_v52 = vpop.permute.xlu0 %3949  ;;  %v11230_v40 = vpop.permute.xlu1 %3951 }
 0x7b5   : > { %12858 = vst [vmem:[#allocation43_spill] sm:$0xff] %v11228_v52  ;;  %12859 = vst [vmem:[#allocation46_spill] sm:$0xff] %v11230_v40  ;;  %v4552_v40 = vmul.f32 %v10689_v13, %v11238_v53 }
 0x7b6   : > { %4283 = vrot.lane.b32.xlu0 %v4254_v47, %s7439_s29  ;;  %v4553_v47 = vmul.f32 %v10696_v3, %v11238_v53 }
 0x7b7   : > { %4285 = vrot.lane.b32.xlu1 %v4255_v54, %s7439_s29 }
 0x7b8   : > { %v11240_v51 = vpop.permute.xlu0 %3939 }
 0x7b9   : > { %12861 = vst [vmem:[#allocation48_spill] sm:$0xff] %v11240_v51  ;;  %v11242_v24 = vpop.permute.xlu1 %3725 }
 0x7ba   : > { %12862 = vst [vmem:[#allocation49_spill] sm:$0xff] %v11242_v24  ;;  %4287 = vrot.lane.b32.xlu0 %v4256_v31, %s7439_s29  ;;  %v4555_v31 = vmul.f32 %v10708_v29, %v11238_v53 }
 0x7bb   : > { %4289 = vrot.lane.b32.xlu1 %v4257_v10, %s7439_s29 }
 0x7bc   : > { %v11250_v54 = vpop.permute.xlu0 %3727 }
 0x7bd   : > { %12863 = vst [vmem:[#allocation50_spill] sm:$0xff] %v11250_v54  ;;  %v11252_v52 = vpop.permute.xlu1 %3729  ;;  %v4556_v54 = vmul.f32 %v10713_v19, %v11238_v53 }
 0x7be   : > { %12864 = vst [vmem:[#allocation51_spill] sm:$0xff] %v11252_v52  ;;  %4575 = vrot.lane.b32.xlu0 %v4552_v40, %s7443_s8  ;;  %v4557_v40 = vmul.f32 %v10722_v35, %v11238_v53 }
 0x7bf   : > { %4577 = vrot.lane.b32.xlu1 %v4553_v47, %s7443_s8 }
 0x7c0   : > { %v11260_v24 = vpop.permute.xlu0 %3731 }
 0x7c1   : > { %12865 = vst [vmem:[#allocation52_spill] sm:$0xff] %v11260_v24  ;;  %v11262_v10 = vpop.permute.xlu1 %4017  ;;  %v4551_v24 = vmul.f32 %v10684_v5, %v11238_v53 }
 0x7c2   : > { %12866 = vst [vmem:[#allocation53_spill] sm:$0xff] %v11262_v10  ;;  %4579 = vrot.lane.b32.xlu0 %v4554_v34, %s7443_s8  ;;  %v4330_v34 = vmul.f32 %v10795_v2, %v11066_v7  ;;  %v4331_v10 = vmul.f32 %v10800_v8, %v11066_v7 }
 0x7c3   : > { %4581 = vrot.lane.b32.xlu1 %v4555_v31, %s7443_s8 }
 0x7c4   : > { %v11270_v52 = vpop.permute.xlu0 %4019 }
 0x7c5   : > { %12867 = vst [vmem:[#allocation54_spill] sm:$0xff] %v11270_v52  ;;  %v11272_v47 = vpop.permute.xlu1 %4021 }
 0x7c6   : > { %12868 = vst [vmem:[#allocation55_spill] sm:$0xff] %v11272_v47  ;;  %4583 = vrot.lane.b32.xlu0 %v4556_v54, %s7443_s8  ;;  %v4332_v54 = vmul.f32 %v10807_v18, %v11066_v7 }
 0x7c7   : > { %4585 = vrot.lane.b32.xlu1 %v4557_v40, %s7443_s8  ;;  %v11292_v40 = vstv %s6670_s24  ;;  %s7447_s24 = smov [#allocation12]  }
 0x7c8   : > { %v11280_v51 = vpop.permute.xlu0 %4023  ;;  %12872 = vst [vmem:[#allocation59_spill] sm:$0xff] %v11292_v40 }
 0x7c9   : > { %12869 = vst [vmem:[#allocation56_spill] sm:$0xff] %v11280_v51  ;;  %v11282_v31 = vpop.permute.xlu1 %4025 }
 0x7ca   : > { %12870 = vst [vmem:[#allocation57_spill] sm:$0xff] %v11282_v31  ;;  %4573 = vrot.lane.b32.xlu0 %v4551_v24, %s7443_s8  ;;  %v4333_v31 = vmul.f32 %v10812_v15, %v11066_v7  ;;  %v4628_v24 = vmul.f32 %v10689_v13, %v11292_v40 }
 0x7cb   : > { %4359 = vrot.lane.b32.xlu1 %v4330_v34, %s7440_s14 }
 0x7cc   : > { %v11290_v47 = vpop.permute.xlu0 %4027 }
 0x7cd   : > { %12871 = vst [vmem:[#allocation58_spill] sm:$0xff] %v11290_v47  ;;  %v11294_v52 = vpop.permute.xlu1 %4015  ;;  %v4629_v47 = vmul.f32 %v10696_v3, %v11292_v40 }
 0x7ce   : > { %12873 = vst [vmem:[#allocation60_spill] sm:$0xff] %v11294_v52  ;;  %4361 = vrot.lane.b32.xlu0 %v4331_v10, %s7440_s14  ;;  %v4630_v10 = vmul.f32 %v10701_v1, %v11292_v40 }
 0x7cf   : > { %4363 = vrot.lane.b32.xlu1 %v4332_v54, %s7440_s14 }
 0x7d0   : > { %v11302_v34 = vpop.permute.xlu0 %3801 }
 0x7d1   : > { %12874 = vst [vmem:[#allocation61_spill] sm:$0xff] %v11302_v34  ;;  %v11304_v51 = vpop.permute.xlu1 %3803  ;;  %v4631_v34 = vmul.f32 %v10708_v29, %v11292_v40 }
 0x7d2   : > { %12875 = vst [vmem:[#allocation62_spill] sm:$0xff] %v11304_v51  ;;  %4365 = vrot.lane.b32.xlu0 %v4333_v31, %s7440_s14  ;;  %v4632_v31 = vmul.f32 %v10713_v19, %v11292_v40  ;;  %s6650_s14 = sld [smem:[#allocation7 + $0x24]] }
 0x7d3   : > { %4651 = vrot.lane.b32.xlu1 %v4628_v24, %s7444_s15 }
 0x7d4   : > { %v11312_v7 = vpop.permute.xlu0 %3805 }
 0x7d5   : > { %12876 = vst [vmem:[#allocation63_spill] sm:$0xff] %v11312_v7  ;;  %v11314_v54 = vpop.permute.xlu1 %3807 }
 0x7d6   : > { %12877 = vst [vmem:[#allocation64_spill] sm:$0xff] %v11314_v54  ;;  %4653 = vrot.lane.b32.xlu0 %v4629_v47, %s7444_s15  ;;  %v4633_v54 = vmul.f32 %v10722_v35, %v11292_v40  ;;  %v4627_v47 = vmul.f32 %v10684_v5, %v11292_v40 }
 0x7d7   : > { %4655 = vrot.lane.b32.xlu1 %v4630_v10, %s7444_s15 }
 0x7d8   : > { %v11322_v51 = vpop.permute.xlu0 %4271  ;;  %v3448_v52 = vstv %s6650_s14  ;;  %s7359_s14 = sshll.u32 %s7447_s24, 4  ;;  %s7360_s14 = int_to_ptr.vmem [resolvable:$false] %s7359_s14 }
 0x7d9   : > { %12878 = vst [vmem:[#allocation65_spill] sm:$0xff] %v11322_v51  ;;  %v11324_v24 = vpop.permute.xlu1 %4273  ;;  %v4406_v51 = vmul.f32 %v10795_v2, %v11124_v48  ;;  %v3452_v40 = vmul.f32 %v10701_v1, %v3448_v52  ;;  %v3453_v37 = vmul.f32 %v10708_v29, %v3448_v52  ;;  %v11381_v14 = vmul.f32 %v10722_v35, %v3448_v52 }
 0x7da   : > { %12879 = vst [vmem:[#allocation66_spill] sm:$0xff] %v11324_v24  ;;  %4657 = vrot.lane.b32.xlu0 %v4631_v34, %s7444_s15  ;;  %v4407_v34 = vmul.f32 %v10800_v8, %v11124_v48  ;;  %v11396_v23 = vmul.f32 %v10807_v18, %v3448_v52 }
 0x7db   : > { %4659 = vrot.lane.b32.xlu1 %v4632_v31, %s7444_s15 }
 0x7dc   : > { %v11332_v10 = vpop.permute.xlu0 %4275 }
 0x7dd   : > { %12880 = vst [vmem:[#allocation67_spill] sm:$0xff] %v11332_v10  ;;  %v11334_v7 = vpop.permute.xlu1 %4277  ;;  %v11352_v10 = vstv %s6671_s16  ;;  %s7361_s16 = scalar_lea.vmem %s7360_s14, 256 }
 0x7de   : > { %12881 = vst [vmem:[#allocation68_spill] sm:$0xff] %v11334_v7  ;;  %4661 = vrot.lane.b32.xlu0 %v4633_v54, %s7444_s15  ;;  %v4408_v7 = vmul.f32 %v10807_v18, %v11124_v48  ;;  %v4409_v54 = vmul.f32 %v10812_v15, %v11124_v48  ;;  %v3505_v48 = vsel %vm353_vm0, %v10921_v62, %v10923_v6 }
 0x7df   : > { %4649 = vrot.lane.b32.xlu1 %v4627_v47, %s7444_s15  ;;  %v4704_v53 = vmul.f32 %v10689_v13, %v11352_v10  ;;  %v4705_v62 = vmul.f32 %v10696_v3, %v11352_v10 }
 0x7e0   : > { %v11342_v24 = vpop.permute.xlu0 %4279 }
 0x7e1   : > { %12882 = vst [vmem:[#allocation69_spill] sm:$0xff] %v11342_v24  ;;  %v11344_v31 = vpop.permute.xlu1 %4281  ;;  %v3449_v24 = vmul.f32 %v10684_v5, %v3448_v52  ;;  %v3507_v5 = vsel %vm353_vm0, %v10937_v38, %v10939_v41 }
 0x7e2   : > { %12883 = vst [vmem:[#allocation70_spill] sm:$0xff] %v11344_v31  ;;  %4435 = vrot.lane.b32.xlu0 %v4406_v51, %s7441_s17  ;;  %v3450_v31 = vmul.f32 %v10689_v13, %v3448_v52  ;;  %v3451_v51 = vmul.f32 %v10696_v3, %v3448_v52 }
 0x7e3   : > { %4437 = vrot.lane.b32.xlu1 %v4407_v34, %s7441_s17  ;;  %v3525_v50 = vadd.f32 %v3505_v48, %v3449_v24  ;;  %v3583_v24 = vsel %vm430_vm1, %v10970_v33, %v10972_v30  ;;  %v11433_v48 = vstv %s11354_s12 }
 0x7e4   : > { %v11356_v47 = vpop.permute.xlu0 %4269  ;;  %v3527_v15 = vadd.f32 %v3507_v5, %v3451_v51  ;;  %v3529_v51 = vadd.f32 %v3509_v32, %v3453_v37  ;;  %12887 = vst [vmem:[#allocation74_spill] sm:$0xff] %v11433_v48 }
 0x7e5   : > { %12884 = vst [vmem:[#allocation71_spill] sm:$0xff] %v11356_v47  ;;  %v11364_v34 = vpop.permute.xlu1 %3877  ;;  %v3506_v47 = vsel %vm353_vm0, %v10923_v6, %v10937_v38  ;;  %v3508_v6 = vsel %vm353_vm0, %v10939_v41, %v10948_v22  ;;  %v11390_v38 = vmul.f32 %v10795_v2, %v3448_v52  ;;  %v4706_v22 = vmul.f32 %v10701_v1, %v11352_v10 }
 0x7e6   : > { %12885 = vst [vmem:[#allocation72_spill] sm:$0xff] %v11364_v34  ;;  %4439 = vrot.lane.b32.xlu0 %v4408_v7, %s7441_s17  ;;  %v3454_v34 = vmul.f32 %v10713_v19, %v3448_v52  ;;  %v11393_v7 = vmul.f32 %v10800_v8, %v3448_v52  ;;  %v3582_v52 = vsel %vm430_vm1, %v10962_v60, %v10970_v33 }
 0x7e7   : > { %4441 = vrot.lane.b32.xlu1 %v4409_v54, %s7441_s17  ;;  %v3526_v54 = vadd.f32 %v3506_v47, %v3450_v31  ;;  %v3528_v31 = vadd.f32 %v3508_v6, %v3452_v40  ;;  %v3584_v47 = vsel %vm430_vm1, %v10972_v30, %v10980_v45  ;;  %v4707_v33 = vmul.f32 %v10708_v29, %v11352_v10 }
 0x7e8   : > { %v11398_v21 = vpop.permute.xlu0 %3879  ;;  %v3581_v40 = vsel %vm430_vm1, %v10992_v55, %v10962_v60  ;;  %v3530_v5 = vadd.f32 %v3510_v61, %v3454_v34  ;;  %v3603_v6 = vadd.f32 %v3583_v24, %v3527_v15  ;;  %v3605_v37 = vadd.f32 %v3585_v63, %v3529_v51 }
 0x7e9   : > { %v11403_v41 = vpop.permute.xlu1 %3881  ;;  %v3602_v45 = vadd.f32 %v3582_v52, %v3526_v54  ;;  %v3604_v32 = vadd.f32 %v3584_v47, %v3528_v31  ;;  %v4708_v60 = vmul.f32 %v10713_v19, %v11352_v10  ;;  %v11450_v15 = vmul.f32 %v10689_v13, %v11433_v48 }
 0x7ea   : > { %12886 = vst [vmem:[#allocation73_spill] sm:$0xff] %v11403_v41  ;;  %4727 = vrot.lane.b32.xlu0 %v4704_v53, %s7445_s28  ;;  %v3586_v53 = vsel %vm430_vm1, %v10982_v11, %v10990_v44  ;;  %v3658_v11 = vsel %vm507_vm2, %v11000_v56, %v11002_v36  ;;  %v4709_v61 = vmul.f32 %v10722_v35, %v11352_v10 }
 0x7eb   : > { %4729 = vrot.lane.b32.xlu1 %v4705_v62, %s7445_s28  ;;  %v11438_v62 = vstv %s11362_s10  ;;  %v3606_v55 = vadd.f32 %v3586_v53, %v3530_v5  ;;  %v3659_v34 = vsel %vm507_vm2, %v11002_v36, %v11012_v27  ;;  %v11465_v13 = vmul.f32 %v10696_v3, %v11433_v48 }
 0x7ec   : > { %v11435_v30 = vpop.permute.xlu0 %3883  ;;  %v11469_v54 = vmul.f32 %v10701_v1, %v11433_v48  ;;  %v3678_v52 = vadd.f32 %v3658_v11, %v3602_v45  ;;  %v3661_v24 = vsel %vm507_vm2, %v11014_v57, %v11022_v4  ;;  %v3662_v36 = vsel %vm507_vm2, %v11022_v4, %v11024_v49  ;;  %v11497_v4 = vld [vmem:[%s7615_s30] sm:$0xff] }
 0x7ed   : > { %12888 = vst [vmem:[#allocation75_spill] sm:$0xff] %v11435_v30  ;;  %v11440_v41 = vpop.permute.xlu1 %4347  ;;  %v3601_v30 = vadd.f32 %v3581_v40, %v3525_v50  ;;  %v3660_v50 = vsel %vm507_vm2, %v11012_v27, %v11014_v57  ;;  %v3657_v3 = vsel %vm507_vm2, %v11032_v12, %v11000_v56  ;;  %v3734_v1 = vsel %vm584_vm3, %v11034_v0, %v11042_v39 }
 0x7ee   : > { %4731 = vrot.lane.b32.xlu0 %v4706_v22, %s7445_s28  ;;  %v11489_v22 = vmul.f32 %v10708_v29, %v11433_v48  ;;  %v11493_v57 = vmul.f32 %v10713_v19, %v11433_v48  ;;  %v4703_v56 = vmul.f32 %v11497_v4, %v11352_v10  ;;  %v3679_v12 = vadd.f32 %v3659_v34, %v3603_v6 }
 0x7ef   : > { %4733 = vrot.lane.b32.xlu1 %v4707_v33, %s7445_s28  ;;  %v3680_v31 = vadd.f32 %v3660_v50, %v3604_v32  ;;  %v11503_v47 = vmul.f32 %v11497_v4, %v11433_v48  ;;  %v4482_v29 = vmul.f32 %v10795_v2, %v11180_v20  ;;  %v3681_v19 = vadd.f32 %v3661_v24, %v3605_v37  ;;  %v7261_v24 = vld [vmem:[%s7615_s30 + $0x8] sm:$0xff] }
 0x7f0   : > { %v11471_v35 = vpop.permute.xlu0 %4349  ;;  %v3682_v63 = vadd.f32 %v3662_v36, %v3606_v55  ;;  %v3677_v33 = vadd.f32 %v3657_v3, %v3601_v30  ;;  %v3735_v51 = vsel %vm584_vm3, %v11042_v39, %v11044_v42  ;;  %v3754_v40 = vadd.f32 %v3734_v1, %v3678_v52  ;;  %v12894_v52 = vld [vmem:[#allocation36_spill] sm:$0xff]  ;;  %v12917_v48 = vld [vmem:[#allocation27_spill] sm:$0xff] }
 0x7f1   : > { %v11482_v27 = vpop.permute.xlu1 %4351  ;;  %v3736_v5 = vsel %vm584_vm3, %v11044_v42, %v11052_v59  ;;  %v3737_v45 = vsel %vm584_vm3, %v11052_v59, %v11054_v25  ;;  %v3738_v2 = vsel %vm584_vm3, %v11054_v25, %v11062_v28  ;;  %v3733_v39 = vsel %vm584_vm3, %v11064_v46, %v11034_v0  ;;  %v12896_v3 = vld [vmem:[#allocation40_spill] sm:$0xff] }
 0x7f2   : > { %4735 = vrot.lane.b32.xlu0 %v4708_v60, %s7445_s28  ;;  %v3511_v6 = vsel %vm353_vm0, %v10960_v58, %v11074_v9  ;;  %v3512_v42 = vsel %vm353_vm0, %v11074_v9, %v11076_v16  ;;  %v4483_v59 = vmul.f32 %v10800_v8, %v11180_v20  ;;  %v3755_v25 = vadd.f32 %v3735_v51, %v3679_v12 }
 0x7f3   : > { %4737 = vrot.lane.b32.xlu1 %v4709_v61, %s7445_s28  ;;  %v3513_v32 = vsel %vm353_vm0, %v11076_v16, %v11084_v26  ;;  %v4484_v0 = vmul.f32 %v10807_v18, %v11180_v20  ;;  %v11543_v58 = vstv %s11455_s13  ;;  %v3756_v46 = vadd.f32 %v3736_v5, %v3680_v31  ;;  %v12892_v18 = vld [vmem:[#allocation37_spill] sm:$0xff] }
 0x7f4   : > { %v11511_v53 = vpop.permute.xlu0 %4353  ;;  %v3757_v9 = vadd.f32 %v3737_v45, %v3681_v19  ;;  %v3758_v37 = vadd.f32 %v3738_v2, %v3682_v63  ;;  %v3514_v8 = vsel %vm353_vm0, %v11084_v26, %v11086_v43  ;;  %v3753_v60 = vadd.f32 %v3733_v39, %v3677_v33  ;;  %v12895_v43 = vld [vmem:[#allocation30_spill] sm:$0xff]  ;;  %v12900_v45 = vld [vmem:[#allocation44_spill] sm:$0xff] }
 0x7f5   : > { %12889 = vst [vmem:[#allocation76_spill] sm:$0xff] %v11511_v53  ;;  %v11522_v30 = vpop.permute.xlu1 %4355  ;;  %v3531_v16 = vadd.f32 %v3511_v6, %v11381_v14  ;;  %v3532_v55 = vadd.f32 %v3512_v42, %v11390_v38  ;;  %v3810_v61 = vsel %vm661_vm4, %v12892_v18, %v11096_v17  ;;  %v3533_v50 = vadd.f32 %v3513_v32, %v11393_v7  ;;  %v7262_v7 = vld [vmem:[%s7615_s30 + $0x10] sm:$0xff]  ;;  %v7264_v33 = vld [vmem:[%s7615_s30 + $0x20] sm:$0xff] }
 0x7f6   : > { %12890 = vst [vmem:[#allocation77_spill] sm:$0xff] %v11522_v30  ;;  %4725 = vrot.lane.b32.xlu0 %v4703_v56, %s7445_s28  ;;  %v3811_v26 = vsel %vm661_vm4, %v11096_v17, %v12894_v52  ;;  %v4485_v14 = vmul.f32 %v12895_v43, %v11180_v20  ;;  %v4780_v38 = vmul.f32 %v7261_v24, %v11543_v58  ;;  %v7263_v56 = vld [vmem:[%s7615_s30 + $0x18] sm:$0xff]  ;;  %v12905_v43 = vld [vmem:[#allocation19_spill] sm:$0xff]  ;;  %v12906_v24 = vld [vmem:[#allocation18_spill] sm:$0xff] }
 0x7f7   : > { %4511 = vrot.lane.b32.xlu1 %v4482_v29, %s7442_s9  ;;  %v3534_v36 = vadd.f32 %v3514_v8, %v11396_v23  ;;  %v3812_v1 = vsel %vm661_vm4, %v12894_v52, %v12896_v3  ;;  %v4781_v17 = vmul.f32 %v7262_v7, %v11543_v58  ;;  %v4782_v12 = vmul.f32 %v7263_v56, %v11543_v58  ;;  %v12897_v20 = vld [vmem:[#allocation20_spill] sm:$0xff]  ;;  %v12898_v23 = vld [vmem:[#allocation42_spill] sm:$0xff]  ;;  %v12903_v8 = vld [vmem:[#allocation39_spill] sm:$0xff] }
 0x7f8   : > { %v11548_v11 = vpop.permute.xlu0 %4357  ;;  %v3830_v31 = vadd.f32 %v3810_v61, %v3754_v40  ;;  %v3813_v29 = vsel %vm661_vm4, %v12896_v3, %v12897_v20  ;;  %v3814_v19 = vsel %vm661_vm4, %v12897_v20, %v12898_v23  ;;  %v4783_v51 = vmul.f32 %v7264_v33, %v11543_v58  ;;  %v12901_v40 = vld [vmem:[#allocation45_spill] sm:$0xff] }
 0x7f9   : > { %12891 = vst [vmem:[#allocation78_spill] sm:$0xff] %v11548_v11  ;;  %v11555_v34 = vpop.permute.xlu1 %4345  ;;  %v3831_v5 = vadd.f32 %v3811_v26, %v3755_v25  ;;  %v3809_v2 = vsel %vm661_vm4, %v12900_v45, %v12892_v18  ;;  %v3587_v39 = vsel %vm430_vm1, %v10990_v44, %v12901_v40  ;;  %v11598_v25 = vld [vmem:[%s7615_s30 + $0x30] sm:$0xff]  ;;  %v11606_v44 = vmul.f32 %v11497_v4, %v11543_v58  ;;  %v11627_v20 = vld [vmem:[%s7615_s30 + $0x40] sm:$0xff] }
 0x7fa   : > { %12893 = vst [vmem:[#allocation37_spill] sm:$0xff] %v11555_v34  ;;  %4513 = vrot.lane.b32.xlu0 %v4483_v59, %s7442_s9  ;;  %v7265_v59 = vld [vmem:[%s7615_s30 + $0x28] sm:$0xff]  ;;  %12904 = vst [vmem:[#allocation40_spill] sm:$0xff] %v11598_v25  ;;  %v11602_v18 = vmul.f32 %v11598_v25, %v11543_v58  ;;  %v3833_v52 = vadd.f32 %v3813_v29, %v3757_v9  ;;  %v3834_v26 = vadd.f32 %v3814_v19, %v3758_v37  ;;  %v11620_v9 = vld [vmem:[%s7615_s30 + $0x38] sm:$0xff] }
 0x7fb   : > { %4515 = vrot.lane.b32.xlu1 %v4484_v0, %s7442_s9  ;;  %v4784_v32 = vmul.f32 %v7265_v59, %v11543_v58  ;;  %v3832_v0 = vadd.f32 %v3812_v1, %v3756_v46  ;;  %v3588_v46 = vsel %vm430_vm1, %v12901_v40, %v12905_v43  ;;  %v3829_v1 = vadd.f32 %v3809_v2, %v3753_v60  ;;  %v12909_v37 = vld [vmem:[#allocation47_spill] sm:$0xff]  ;;  %v12911_v19 = vld [vmem:[#allocation21_spill] sm:$0xff] }
 0x7fc   : > { %v11581_v63 = vpop.permute.xlu0 %3953  ;;  %v11615_v7 = vadd.f32 %v3587_v39, %v3531_v16  ;;  %12908 = vst [vmem:[#allocation42_spill] sm:$0xff] %v11620_v9  ;;  %v11624_v56 = vmul.f32 %v11620_v9, %v12909_v37  ;;  %12910 = vst [vmem:[#allocation44_spill] sm:$0xff] %v11627_v20  ;;  %v11631_v29 = vmul.f32 %v11627_v20, %v12909_v37  ;;  %v12912_v16 = vld [vmem:[#allocation22_spill] sm:$0xff]  ;;  %v12935_v53 = vld [vmem:[#allocation33_spill] sm:$0xff] }
 0x7fd   : > { %12899 = vst [vmem:[#allocation36_spill] sm:$0xff] %v11581_v63  ;;  %v11591_v6 = vpop.permute.xlu1 %3955  ;;  %v6020_v42 = vpop.f32.mrf.mxu0  ;;  %v3590_v60 = vsel %vm430_vm1, %v12906_v24, %v12911_v19  ;;  %v11642_v40 = vld [vmem:[%s7615_s30 + $0x48] sm:$0xff] }
 0x7fe   : > { %12902 = vst [vmem:[#allocation30_spill] sm:$0xff] %v11591_v6  ;;  %v6021_v61 = vadd.f32 %v6020_v42, %v12903_v8  ;;  %4517 = vrot.lane.b32.xlu0 %v4485_v14, %s7442_s9  ;;  %v3589_v14 = vsel %vm430_vm1, %v12905_v43, %v12906_v24  ;;  %v11646_v39 = vmul.f32 %v11642_v40, %v12909_v37  ;;  %v11649_v42 = vld [vmem:[%s7615_s30 + $0x50] sm:$0xff]  ;;  %s6673_s30 = sld [smem:[#allocation8 + $0x5]] }
 0x7ff   : > { %4803 = vrot.lane.b32.xlu1 %v4780_v38, %s7446_s11  ;;  %v6022_v3 = vpop.f32.mrf.mxu0  ;;  %v12913_v38 = vld [vmem:[#allocation23_spill] sm:$0xff]  ;;  %v11653_v59 = vmul.f32 %v11649_v42, %v12909_v37  ;;  %v11655_v8 = vadd.f32 %v3588_v46, %v3532_v55  ;;  %v11657_v43 = vadd.f32 %v3589_v14, %v3533_v50  ;;  %v12915_v24 = vld [vmem:[#allocation24_spill] sm:$0xff] }
 0x800   : > { %v11617_v4 = vpop.permute.xlu0 %3957  ;;  %v3886_v33 = vsel %vm738_vm5, %v12913_v38, %v12912_v16  ;;  %v3887_v3 = vsel %vm738_vm5, %v12912_v16, %v12915_v24  ;;  %v3888_v37 = vsel %vm738_vm5, %v12915_v24, %v12917_v48 }
 0x801   : > { %12907 = vst [vmem:[#allocation20_spill] sm:$0xff] %v11617_v4  ;;  %v11639_v45 = vpop.permute.xlu1 %3959  ;;  %v6023_v2 = vpop.f32.mrf.mxu0  ;;  %v12918_v4 = vld [vmem:[#allocation26_spill] sm:$0xff]  ;;  %v3906_v16 = vadd.f32 %v3886_v33, %v3830_v31  ;;  %v3908_v33 = vadd.f32 %v3888_v37, %v3832_v0  ;;  %v11713_v0 = vmul.f32 %v11642_v40, %v11352_v10 }
 0x802   : > { %12914 = vst [vmem:[#allocation45_spill] sm:$0xff] %v11639_v45  ;;  %v6060_v19 = vpop.f32.mrf.mxu1  ;;  %4805 = vrot.lane.b32.xlu0 %v4781_v17, %s7446_s11  ;;  %v12916_v2 = vld [vmem:[#allocation59_spill] sm:$0xff]  ;;  %v3889_v55 = vsel %vm738_vm5, %v12917_v48, %v12918_v4  ;;  %v3610_v17 = vadd.f32 %v3590_v60, %v3534_v36  ;;  %v11696_v60 = vmul.f32 %v11620_v9, %v11352_v10 }
 0x803   : > { %v11665_v25 = vmul.f32 %v11620_v9, %v12916_v2  ;;  %v6061_v50 = vadd.f32 %v6060_v19, %v6021_v61  ;;  %4807 = vrot.lane.b32.xlu1 %v4782_v12, %s7446_s11  ;;  %v6024_v46 = vpop.f32.mrf.mxu0  ;;  %v11676_v14 = vmul.f32 %v11627_v20, %v12916_v2  ;;  %v11682_v24 = vmul.f32 %v11642_v40, %v12916_v2  ;;  %v12919_v12 = vld [vmem:[#allocation31_spill] sm:$0xff] }
 0x804   : > { %v6062_v45 = vpop.f32.mrf.mxu1  ;;  %v11678_v63 = vpop.permute.xlu0 %4423  ;;  %v11686_v48 = vmul.f32 %v11649_v42, %v12916_v2  ;;  %v3907_v61 = vadd.f32 %v3887_v3, %v3831_v5  ;;  %v3890_v19 = vsel %vm738_vm5, %v12918_v4, %v12919_v12  ;;  %v12920_v46 = vld [vmem:[#allocation25_spill] sm:$0xff]  ;;  %12921 = vst [vmem:[#allocation39_spill] sm:$0xff] %v11696_v60  ;;  %v11705_v4 = vmul.f32 %v11627_v20, %v11352_v10  ;;  %v12930_v60 = vld [vmem:[#allocation28_spill] sm:$0xff] }
 0x805   : > { %v3885_v36 = vsel %vm738_vm5, %v12920_v46, %v12913_v38  ;;  %v4426_v31 = vpop.permute.xlu1 %4425  ;;  %v3909_v45 = vadd.f32 %v3889_v55, %v3833_v52  ;;  %v12924_v38 = vld [vmem:[#allocation34_spill] sm:$0xff]  ;;  %v12925_v46 = vld [vmem:[#allocation29_spill] sm:$0xff]  ;;  %12926 = vst [vmem:[#allocation47_spill] sm:$0xff] %v11713_v0  ;;  %v11717_v52 = vmul.f32 %v11649_v42, %v11352_v10  ;;  %v12928_v55 = vld [vmem:[#allocation35_spill] sm:$0xff] }
 0x806   : > { %v11700_v2 = vsel %vm507_vm2, %v11678_v63, %v4426_v31  ;;  %v6063_v5 = vpop.f32.mrf.mxu1  ;;  %v6100_v3 = vpop.f32.mrf.mxu0  ;;  %4809 = vrot.lane.b32.xlu0 %v4783_v51, %s7446_s11  ;;  %12923 = vst [vmem:[#allocation18_spill] sm:$0xff] %v11705_v4  ;;  %v3962_v6 = vsel %vm815_vm6, %v12925_v46, %v12924_v38  ;;  %v3910_v51 = vadd.f32 %v3890_v19, %v3834_v26  ;;  %v12929_v4 = vld [vmem:[#allocation38_spill] sm:$0xff] }
 0x807   : > { %12922 = vst [vmem:[#allocation19_spill] sm:$0xff] %v11700_v2  ;;  %v6101_v34 = vadd.f32 %v6100_v3, %v6061_v50  ;;  %4811 = vrot.lane.b32.xlu1 %v4784_v32, %s7446_s11  ;;  %12927 = vst [vmem:[#allocation21_spill] sm:$0xff] %v11717_v52  ;;  %v3905_v37 = vadd.f32 %v3885_v36, %v3829_v1  ;;  %v3663_v5 = vsel %vm507_vm2, %v11024_v49, %v12928_v55  ;;  %v12931_v2 = vld [vmem:[#allocation32_spill] sm:$0xff]  ;;  %v12932_v26 = vld [vmem:[#allocation54_spill] sm:$0xff] }
 0x808   : > { %v3963_v50 = vsel %vm815_vm6, %v12924_v38, %v12929_v4  ;;  %v6064_v3 = vpop.f32.mrf.mxu1  ;;  %v6102_v32 = vpop.f32.mrf.mxu0  ;;  %v3664_v0 = vsel %vm507_vm2, %v12928_v55, %v12930_v60  ;;  %v3665_v10 = vsel %vm507_vm2, %v12930_v60, %v12931_v2  ;;  %v12933_v1 = vld [vmem:[#allocation53_spill] sm:$0xff]  ;;  %v11736_v52 = vmul.f32 %v11620_v9, %v11543_v58 }
 0x809   : > { %v4038_v19 = vsel %vm892_vm7, %v12933_v1, %v12932_v26  ;;  %v4428_v36 = vpop.permute.xlu0 %4427  ;;  %v4430_v49 = vpop.permute.xlu1 %4429  ;;  %v3982_v38 = vadd.f32 %v3962_v6, %v3906_v16  ;;  %v12934_v3 = vld [vmem:[#allocation55_spill] sm:$0xff]  ;;  %v3666_v9 = vsel %vm507_vm2, %v12931_v2, %v12935_v53  ;;  %v3983_v6 = vadd.f32 %v3963_v50, %v3907_v61 }
 0x80a   : > { %v4039_v32 = vsel %vm892_vm7, %v12932_v26, %v12934_v3  ;;  %v11742_v55 = vsel %vm507_vm2, %v4426_v31, %v4428_v36  ;;  %v11745_v60 = vsel %vm507_vm2, %v4428_v36, %v4430_v49  ;;  %v6103_v11 = vpop.f32.mrf.mxu0  ;;  %v6140_v30 = vpop.f32.mrf.mxu1  ;;  %4813 = vrot.lane.b32.xlu0 %v11602_v18, %s7446_s11  ;;  %v11758_v31 = vmul.f32 %v11627_v20, %v11543_v58  ;;  %v12937_v26 = vld [vmem:[#allocation41_spill] sm:$0xff]  ;;  %v12938_v36 = vld [vmem:[#allocation43_spill] sm:$0xff] }
 0x80b   : > { %v11752_v16 = vadd.f32 %v6140_v30, %v6101_v34  ;;  %4801 = vrot.lane.b32.xlu1 %v11606_v44, %s7446_s11  ;;  %v3683_v11 = vadd.f32 %v3663_v5, %v11615_v7  ;;  %v3964_v18 = vsel %vm815_vm6, %v12929_v4, %v12937_v26  ;;  %v3965_v53 = vsel %vm815_vm6, %v12937_v26, %v12938_v36  ;;  %v12939_v5 = vld [vmem:[#allocation56_spill] sm:$0xff]  ;;  %v12943_v26 = vld [vmem:[#allocation49_spill] sm:$0xff] }
 0x80c   : > { %v4058_v61 = vadd.f32 %v4038_v19, %v3982_v38  ;;  %v6104_v30 = vpop.f32.mrf.mxu0  ;;  %v6142_v34 = vpop.f32.mrf.mxu1  ;;  %v3684_v2 = vadd.f32 %v3664_v0, %v11655_v8  ;;  %v3685_v44 = vadd.f32 %v3665_v10, %v11657_v43  ;;  %v4059_v50 = vadd.f32 %v4039_v32, %v3983_v6  ;;  %v12940_v38 = vld [vmem:[#allocation57_spill] sm:$0xff]  ;;  %v12941_v6 = vld [vmem:[#allocation46_spill] sm:$0xff] }
 0x80d   : > { %12936 = vst [vmem:[#allocation22_spill] sm:$0xff] %v11752_v16  ;;  %v11769_v16 = vpop.permute.xlu0 %4431  ;;  %v11771_v20 = vpop.permute.xlu1 %4433  ;;  %v11775_v7 = vmul.f32 %v11642_v40, %v11543_v58  ;;  %v3686_v4 = vadd.f32 %v3666_v9, %v3610_v17  ;;  %v4040_v19 = vsel %vm892_vm7, %v12934_v3, %v12939_v5  ;;  %v4041_v8 = vsel %vm892_vm7, %v12939_v5, %v12940_v38  ;;  %v12942_v17 = vld [vmem:[#allocation48_spill] sm:$0xff]  ;;  %v12944_v30 = vld [vmem:[#allocation50_spill] sm:$0xff] }
 0x80e   : > { %v11785_v43 = vsel %vm507_vm2, %v4430_v49, %v11769_v16  ;;  %v6143_v0 = vpop.f32.mrf.mxu1  ;;  %4587 = vrot.lane.b32.xlu0 %v11624_v56, %s7443_s8  ;;  %v3984_v10 = vadd.f32 %v3964_v18, %v3908_v33  ;;  %v3985_v32 = vadd.f32 %v3965_v53, %v3909_v45  ;;  %v3966_v9 = vsel %vm815_vm6, %v12938_v36, %v12941_v6  ;;  %v12945_v33 = vld [vmem:[#allocation51_spill] sm:$0xff] }
 0x80f   : > { %v3961_v3 = vsel %vm815_vm6, %v12942_v17, %v12925_v46  ;;  %4589 = vrot.lane.b32.xlu1 %v11631_v29, %s7443_s8  ;;  %v3739_v49 = vsel %vm584_vm3, %v11062_v28, %v12943_v26  ;;  %v3740_v56 = vsel %vm584_vm3, %v12943_v26, %v12944_v30  ;;  %v3741_v45 = vsel %vm584_vm3, %v12944_v30, %v12945_v33  ;;  %v12946_v46 = vld [vmem:[#allocation52_spill] sm:$0xff] }
 0x810   : > { %v11807_v18 = vadd.f32 %v11438_v62, %v4058_v61  ;;  %v6144_v36 = vpop.f32.mrf.mxu1  ;;  %v3742_v29 = vsel %vm584_vm3, %v12945_v33, %v12946_v46  ;;  %v11813_v53 = vadd.f32 %v11438_v62, %v4059_v50  ;;  %v4060_v28 = vadd.f32 %v4040_v19, %v3984_v10  ;;  %v12947_v19 = vld [vmem:[#allocation58_spill] sm:$0xff]  ;;  %v12954_v46 = vld [vmem:[#allocation63_spill] sm:$0xff] }
 0x811   : > { %v4061_v34 = vadd.f32 %v4041_v8, %v3985_v32  ;;  %v4422_v5 = vpop.permute.xlu0 %4421  ;;  %v11815_v0 = vpop.permute.xlu1 %4029  ;;  %v3986_v17 = vadd.f32 %v3966_v9, %v3910_v51  ;;  %v3981_v26 = vadd.f32 %v3961_v3, %v3905_v37  ;;  %v11825_v61 = vmul.f32 %v11649_v42, %v11543_v58  ;;  %v12948_v51 = vld [vmem:[#allocation60_spill] sm:$0xff]  ;;  %v12949_v32 = vld [vmem:[#allocation61_spill] sm:$0xff] }
 0x812   : > { %v11819_v30 = vsel %vm507_vm2, %v4422_v5, %v11678_v63  ;;  %4591 = vrot.lane.b32.xlu0 %v11646_v39, %s7443_s8  ;;  %v3759_v50 = vadd.f32 %v3739_v49, %v3683_v11  ;;  %v3760_v33 = vadd.f32 %v3740_v56, %v3684_v2  ;;  %v4042_v8 = vsel %vm892_vm7, %v12940_v38, %v12947_v19  ;;  %v12952_v3 = vld [vmem:[#allocation65_spill] sm:$0xff]  ;;  %v12953_v56 = vld [vmem:[#allocation67_spill] sm:$0xff]  ;;  %v12956_v5 = vld [vmem:[#allocation68_spill] sm:$0xff] }
 0x813   : > { %v4037_v37 = vsel %vm892_vm7, %v12948_v51, %v12933_v1  ;;  %4593 = vrot.lane.b32.xlu1 %v11653_v59, %s7443_s8  ;;  %v3761_v63 = vadd.f32 %v3741_v45, %v3685_v44  ;;  %v3762_v10 = vadd.f32 %v3742_v29, %v3686_v4  ;;  %v4080_v39 = vmax.f32 %v11807_v18, 0.0  ;;  %v12950_v1 = vld [vmem:[#allocation62_spill] sm:$0xff] }
 0x814   : > { %v3815_v58 = vsel %vm661_vm4, %v12898_v23, %v12949_v32  ;;  %v4081_v42 = vmax.f32 %v11813_v53, 0.0  ;;  %v11841_v11 = vadd.f32 %v11438_v62, %v4060_v28  ;;  %v11844_v2 = vadd.f32 %v11438_v62, %v4061_v34  ;;  %v12951_v23 = vld [vmem:[#allocation66_spill] sm:$0xff]  ;;  %v12955_v28 = vld [vmem:[#allocation64_spill] sm:$0xff] }
 0x815   : > { %v3816_v59 = vsel %vm661_vm4, %v12949_v32, %v12950_v1  ;;  %v11849_v44 = vpop.permute.xlu0 %4031  ;;  %v11851_v4 = vpop.permute.xlu1 %4033  ;;  %v11853_v38 = vadd.f32 %v4042_v8, %v3986_v17  ;;  %v11855_v9 = vadd.f32 %v4037_v37, %v3981_v26  ;;  %v4292_v49 = vsel %vm353_vm0, %v12952_v3, %v12951_v23  ;;  %v12957_v8 = vld [vmem:[#allocation69_spill] sm:$0xff] }
 0x816   : > { %v4293_v45 = vsel %vm353_vm0, %v12951_v23, %v12953_v56  ;;  %4663 = vrot.lane.b32.xlu0 %v11665_v25, %s7444_s15  ;;  %v3835_v36 = vadd.f32 %v3815_v58, %v3759_v50  ;;  %v3817_v29 = vsel %vm661_vm4, %v12950_v1, %v12954_v46  ;;  %v3818_v34 = vsel %vm661_vm4, %v12954_v46, %v12955_v28  ;;  %v12958_v58 = vld [vmem:[#allocation70_spill] sm:$0xff] }
 0x817   : > { %v4294_v17 = vsel %vm353_vm0, %v12953_v56, %v12956_v5  ;;  %4665 = vrot.lane.b32.xlu1 %v11676_v14, %s7444_s15  ;;  %v3836_v26 = vadd.f32 %v3816_v59, %v3760_v33  ;;  %v4295_v25 = vsel %vm353_vm0, %v12956_v5, %v12957_v8  ;;  %v4368_v50 = vsel %vm430_vm1, %v11440_v41, %v11471_v35  ;;  %v12959_v33 = vld [vmem:[#allocation71_spill] sm:$0xff] }
 0x818   : > { %v4369_v51 = vsel %vm430_vm1, %v11471_v35, %v11482_v27  ;;  %v4312_v37 = vadd.f32 %v4292_v49, %v11450_v15  ;;  %v4313_v32 = vadd.f32 %v4293_v45, %v11465_v13  ;;  %v4296_v14 = vsel %vm353_vm0, %v12957_v8, %v12958_v58  ;;  %v12960_v35 = vld [vmem:[#allocation72_spill] sm:$0xff] }
 0x819   : > { %v4291_v1 = vsel %vm353_vm0, %v12959_v33, %v12952_v3  ;;  %v4036_v59 = vpop.permute.xlu0 %4035  ;;  %v11893_v23 = vpop.permute.xlu1 %4499  ;;  %v3837_v56 = vadd.f32 %v3817_v29, %v3761_v63  ;;  %v3838_v46 = vadd.f32 %v3818_v34, %v3762_v10  ;;  %v4314_v28 = vadd.f32 %v4294_v17, %v11469_v54  ;;  %v12961_v10 = vld [vmem:[#allocation76_spill] sm:$0xff]  ;;  %v12963_v34 = vld [vmem:[#allocation78_spill] sm:$0xff]  ;;  %v12964_v17 = vld [vmem:[#allocation19_spill] sm:$0xff] }
 0x81a   : > { %v3891_v15 = vsel %vm738_vm5, %v12919_v12, %v12960_v35  ;;  %4667 = vrot.lane.b32.xlu0 %v11682_v24, %s7444_s15  ;;  %v4315_v13 = vadd.f32 %v4295_v25, %v11489_v22  ;;  %v3892_v3 = vsel %vm738_vm5, %v12960_v35, %v11398_v21  ;;  %v4388_v49 = vadd.f32 %v4368_v50, %v4312_v37  ;;  %v12962_v24 = vld [vmem:[#allocation77_spill] sm:$0xff]  ;;  %v12966_v37 = vld [vmem:[#allocation39_spill] sm:$0xff] }
 0x81b   : > { %v4389_v45 = vadd.f32 %v4369_v51, %v4313_v32  ;;  %4669 = vrot.lane.b32.xlu1 %v11686_v48, %s7444_s15  ;;  %v4316_v54 = vadd.f32 %v4296_v14, %v11493_v57  ;;  %v4311_v63 = vadd.f32 %v4291_v1, %v11503_v47  ;;  %v4370_v12 = vsel %vm430_vm1, %v11482_v27, %v12961_v10  ;;  %v12965_v50 = vld [vmem:[#allocation37_spill] sm:$0xff]  ;;  %v12969_v35 = vld [vmem:[#allocation75_spill] sm:$0xff] }
 0x81c   : > { %v4371_v22 = vsel %vm430_vm1, %v12961_v10, %v12962_v24  ;;  %v3911_v29 = vadd.f32 %v3891_v15, %v3835_v36  ;;  %v4372_v5 = vsel %vm430_vm1, %v12962_v24, %v12963_v34  ;;  %v4464_v8 = vadd.f32 %v12964_v17, %v4388_v49  ;;  %v12968_v1 = vld [vmem:[#allocation73_spill] sm:$0xff]  ;;  %v12970_v49 = vld [vmem:[#allocation30_spill] sm:$0xff] }
 0x81d   : > { %v4465_v48 = vadd.f32 %v11742_v55, %v4389_v45  ;;  %v4502_v57 = vpop.permute.xlu0 %4501  ;;  %v4504_v25 = vpop.permute.xlu1 %4503  ;;  %v3912_v47 = vadd.f32 %v3892_v3, %v3836_v26  ;;  %v4367_v27 = vsel %vm430_vm1, %v12965_v50, %v11440_v41  ;;  %v4390_v32 = vadd.f32 %v4370_v12, %v4314_v28  ;;  %v12967_v26 = vld [vmem:[#allocation18_spill] sm:$0xff]  ;;  %v12971_v45 = vld [vmem:[#allocation36_spill] sm:$0xff] }
 0x81e   : > { %v4520_v51 = vsel %vm584_vm3, %v11893_v23, %v4502_v57  ;;  %v4521_v36 = vsel %vm584_vm3, %v4502_v57, %v4504_v25  ;;  %4739 = vrot.lane.b32.xlu0 %v12966_v37, %s7445_s28  ;;  %v4391_v14 = vadd.f32 %v4371_v22, %v4315_v13  ;;  %v3893_v41 = vsel %vm738_vm5, %v11398_v21, %v12968_v1 }
 0x81f   : > { %v11928_v33 = vadd.f32 %v4520_v51, %v4464_v8  ;;  %v11930_v55 = vadd.f32 %v4521_v36, %v4465_v48  ;;  %4741 = vrot.lane.b32.xlu1 %v12967_v26, %s7445_s28  ;;  %v3894_v15 = vsel %vm738_vm5, %v12968_v1, %v12969_v35  ;;  %v4392_v3 = vadd.f32 %v4372_v5, %v4316_v54  ;;  %v12973_v8 = vld [vmem:[#allocation45_spill] sm:$0xff] }
 0x820   : > { %v3968_v28 = vsel %vm815_vm6, %v12971_v45, %v12970_v49  ;;  %v4387_v13 = vadd.f32 %v4367_v27, %v4311_v63  ;;  %v3967_v10 = vsel %vm815_vm6, %v12941_v6, %v12971_v45  ;;  %v4466_v12 = vadd.f32 %v11745_v60, %v4390_v32  ;;  %v12972_v6 = vld [vmem:[#allocation47_spill] sm:$0xff] }
 0x821   : > { %v4467_v24 = vadd.f32 %v11785_v43, %v4391_v14  ;;  %v4506_v22 = vpop.permute.xlu0 %4505  ;;  %v4508_v21 = vpop.permute.xlu1 %4507  ;;  %v4448_v17 = vsel %vm507_vm2, %v11769_v16, %v11771_v20  ;;  %v4044_v54 = vsel %vm892_vm7, %v11815_v0, %v11849_v44  ;;  %v3988_v60 = vadd.f32 %v3968_v28, %v3912_v47  ;;  %v12974_v43 = vld [vmem:[#allocation20_spill] sm:$0xff]  ;;  %v12975_v16 = vld [vmem:[#allocation21_spill] sm:$0xff] }
 0x822   : > { %v4522_v63 = vsel %vm584_vm3, %v4504_v25, %v4506_v22  ;;  %v4523_v5 = vsel %vm584_vm3, %v4506_v22, %v4508_v21  ;;  %4743 = vrot.lane.b32.xlu0 %v12972_v6, %s7445_s28  ;;  %v3970_v48 = vsel %vm815_vm6, %v12974_v43, %v12973_v8  ;;  %v3914_v27 = vadd.f32 %v3894_v15, %v3838_v46 }
 0x823   : > { %v11961_v57 = vadd.f32 %v4522_v63, %v4466_v12  ;;  %v11963_v50 = vadd.f32 %v4523_v5, %v4467_v24  ;;  %4745 = vrot.lane.b32.xlu1 %v12975_v16, %s7445_s28  ;;  %v3987_v51 = vadd.f32 %v3967_v10, %v3911_v29  ;;  %v3969_v25 = vsel %vm815_vm6, %v12970_v49, %v12974_v43 }
 0x824   : > { %v4043_v47 = vsel %vm892_vm7, %v12947_v19, %v11815_v0  ;;  %v4468_v36 = vadd.f32 %v4448_v17, %v4392_v3  ;;  %v4463_v37 = vadd.f32 %v11819_v30, %v4387_v13  ;;  %v4064_v32 = vadd.f32 %v4044_v54, %v3988_v60 }
 0x825   : > { %v4046_v14 = vsel %vm892_vm7, %v11851_v4, %v4036_v59  ;;  %v11976_v26 = vpop.permute.xlu0 %4509  ;;  %v4498_v1 = vpop.permute.xlu1 %4497  ;;  %v3913_v46 = vadd.f32 %v3893_v41, %v3837_v56  ;;  %v3990_v29 = vadd.f32 %v3970_v48, %v3914_v27  ;;  %v4063_v0 = vadd.f32 %v4043_v47, %v3987_v51  ;;  %v12976_v51 = vld [vmem:[#allocation74_spill] sm:$0xff] }
 0x826   : > { %v4524_v35 = vsel %vm584_vm3, %v4508_v21, %v11976_v26  ;;  %v4519_v15 = vsel %vm584_vm3, %v4498_v1, %v11893_v23  ;;  %4815 = vrot.lane.b32.xlu0 %v11736_v52, %s7446_s11  ;;  %v4045_v30 = vsel %vm892_vm7, %v11849_v44, %v11851_v4  ;;  %v11993_v56 = vadd.f32 %v11438_v62, %v11853_v38  ;;  %v12978_v1 = vld [vmem:[#allocation42_spill] sm:$0xff] }
 0x827   : > { %v11987_v19 = vadd.f32 %v4524_v35, %v4468_v36  ;;  %v4539_v59 = vadd.f32 %v4519_v15, %v4463_v37  ;;  %4817 = vrot.lane.b32.xlu1 %v11758_v31, %s7446_s11  ;;  %v11997_v23 = vadd.f32 %v11438_v62, %v11855_v9  ;;  %v3989_v52 = vadd.f32 %v3969_v25, %v3913_v46  ;;  %v12977_v25 = vld [vmem:[#allocation40_spill] sm:$0xff] }
 0x828   : > { %v4066_v41 = vadd.f32 %v4046_v14, %v3990_v29  ;;  %v12623_v3 = vmax.f32 %v11841_v11, 0.0  ;;  %v12621_v44 = vmax.f32 %v11844_v2, 0.0  ;;  %v12002_v4 = vadd.f32 %v11438_v62, %v4064_v32  ;;  %v12979_v29 = vld [vmem:[#allocation44_spill] sm:$0xff] }
 0x829   : > { %v4284_v49 = vpop.permute.xlu0 %4283  ;;  %v4286_v45 = vpop.permute.xlu1 %4285  ;;  %v4065_v31 = vadd.f32 %v4045_v30, %v3989_v52  ;;  %v12008_v38 = vadd.f32 %v11438_v62, %v4063_v0  ;;  %v12620_v9 = vmax.f32 %v11993_v56, 0.0  ;;  %v12622_v13 = vmax.f32 %v11997_v23, 0.0 }
 0x82a   : > { %v4298_v28 = vsel %vm353_vm0, %v4284_v49, %v4286_v45  ;;  %4819 = vrot.lane.b32.xlu0 %v11775_v7, %s7446_s11  ;;  %v4078_v10 = vadd.f32 %v11438_v62, %v4066_v41  ;;  %v7121_v12 = vpack.i.bf16 %v4081_v42, %v4080_v39  ;;  %v12618_v24 = vmax.f32 %v12002_v4, 0.0 }
 0x82b   : > { %4821 = vrot.lane.b32.xlu1 %v11825_v61, %s7446_s11  ;;  %v7126_v61 = vpack.i.bf16 %v12621_v44, %v12623_v3  ;;  %v12025_v21 = vadd.f32 %v11438_v62, %v4065_v31  ;;  %v12619_v63 = vmax.f32 %v12008_v38, 0.0  ;;  %v7131_v5 = vpack.i.bf16 %v12622_v13, %v12620_v9 }
 0x82c   : > { %v4088_v6 = vmax.f32 %v4078_v10, 0.0  ;;  %v4241_v47 = vmul.f32 %v12977_v25, %v12976_v51  ;;  %v4297_v32 = vsel %vm353_vm0, %v12958_v58, %v4284_v49  ;;  %v4242_v46 = vmul.f32 %v12978_v1, %v12976_v51 }
 0x82d   : > { %v4288_v7 = vpop.permute.xlu0 %4287  ;;  %v4290_v22 = vpop.permute.xlu1 %4289  ;;  %v7136_v62 = vpack.i.bf16 %v12618_v24, %v12619_v63  ;;  %v12617_v43 = vmax.f32 %v12025_v21, 0.0  ;;  %v4243_v35 = vmul.f32 %v12979_v29, %v12976_v51  ;;  %v4244_v49 = vmul.f32 %v11642_v40, %v12976_v51 }
 0x82e   : > { %v4299_v17 = vsel %vm353_vm0, %v4286_v45, %v4288_v7  ;;  %v4300_v54 = vsel %vm353_vm0, %v4288_v7, %v4290_v22  ;;  %7122 = vrot.lane.b32.xlu0 %v7121_v12, %s7439_s29  ;;  %v4317_v14 = vadd.f32 %v4297_v32, %v4241_v47  ;;  %v4318_v31 = vadd.f32 %v4298_v28, %v4242_v46 }
 0x82f   : > { %7127 = vrot.lane.b32.xlu1 %v7126_v61, %s7439_s29  ;;  %v7141_v48 = vpack.i.bf16 %v4088_v6, %v12617_v43  ;;  %v4319_v58 = vadd.f32 %v4299_v17, %v4243_v35  ;;  %v12107_v44 = vstv %s6673_s30 }
 0x831   : > { %v4576_v60 = vpop.permute.xlu0 %4575  ;;  %v4578_v8 = vpop.permute.xlu1 %4577 }
 0x832   : > { %7132 = vrot.lane.b32.xlu0 %v7131_v5, %s7439_s29 }
 0x833   : > { %7137 = vrot.lane.b32.xlu1 %v7136_v62, %s7439_s29 }
 0x835   : > { %v4580_v16 = vpop.permute.xlu0 %4579  ;;  %v4582_v27 = vpop.permute.xlu1 %4581 }
 0x836   : > { %7142 = vrot.lane.b32.xlu0 %v7141_v48, %s7439_s29 }
 0x839   : > { %v4584_v36 = vpop.permute.xlu0 %4583  ;;  %v12048_v37 = vpop.permute.xlu1 %4585 }
 0x83a   : > { %v4599_v43 = vsel %vm661_vm4, %v4582_v27, %v4584_v36 }
 0x83d   : > { %v4574_v15 = vpop.permute.xlu0 %4573  ;;  %v4360_v0 = vpop.permute.xlu1 %4359 }
 0x83e   : > { %v4595_v30 = vsel %vm661_vm4, %v4574_v15, %v4576_v60  ;;  %v4373_v52 = vsel %vm430_vm1, %v12963_v34, %v4360_v0  ;;  %v4320_v34 = vadd.f32 %v4300_v54, %v4244_v49 }
 0x83f   : > { %v12059_v41 = vadd.f32 %v4595_v30, %v4539_v59  ;;  %v12061_v45 = vadd.f32 %v4373_v52, %v4317_v14 }
 0x841   : > { %v4362_v10 = vpop.permute.xlu0 %4361  ;;  %v4364_v12 = vpop.permute.xlu1 %4363 }
 0x842   : > { %v4374_v7 = vsel %vm430_vm1, %v4360_v0, %v4362_v10  ;;  %v4375_v22 = vsel %vm430_vm1, %v4362_v10, %v4364_v12 }
 0x843   : > { %v12067_v61 = vadd.f32 %v4374_v7, %v4318_v31  ;;  %v12069_v5 = vadd.f32 %v4375_v22, %v4319_v58  ;;  %v4596_v58 = vsel %vm661_vm4, %v4576_v60, %v4578_v8  ;;  %v4600_v60 = vsel %vm661_vm4, %v4584_v36, %v12048_v37 }
 0x844   : > { %v4616_v7 = vadd.f32 %v4596_v58, %v11928_v33 }
 0x845   : > { %v4366_v59 = vpop.permute.xlu0 %4365  ;;  %v4652_v6 = vpop.permute.xlu1 %4651 }
 0x846   : > { %v4376_v62 = vsel %vm430_vm1, %v4364_v12, %v4366_v59  ;;  %v4597_v12 = vsel %vm661_vm4, %v4578_v8, %v4580_v16 }
 0x847   : > { %v12072_v28 = vadd.f32 %v4376_v62, %v4320_v34  ;;  %v4617_v59 = vadd.f32 %v4597_v12, %v11930_v55  ;;  %v4598_v62 = vsel %vm661_vm4, %v4580_v16, %v4582_v27  ;;  %v4619_v16 = vadd.f32 %v4599_v43, %v11963_v50 }
 0x848   : > { %v4618_v55 = vadd.f32 %v4598_v62, %v11961_v57  ;;  %v4620_v27 = vadd.f32 %v4600_v60, %v11987_v19 }
 0x849   : > { %v4654_v17 = vpop.permute.xlu0 %4653  ;;  %v4656_v48 = vpop.permute.xlu1 %4655 }
 0x84a   : > { %v4672_v22 = vsel %vm738_vm5, %v4652_v6, %v4654_v17  ;;  %v4673_v34 = vsel %vm738_vm5, %v4654_v17, %v4656_v48 }
 0x84b   : > { %v4692_v58 = vadd.f32 %v4672_v22, %v4616_v7  ;;  %v4693_v9 = vadd.f32 %v4673_v34, %v4617_v59 }
 0x84d   : > { %v4658_v40 = vpop.permute.xlu0 %4657  ;;  %v4660_v51 = vpop.permute.xlu1 %4659 }
 0x84e   : > { %v4674_v17 = vsel %vm738_vm5, %v4656_v48, %v4658_v40  ;;  %v4675_v36 = vsel %vm738_vm5, %v4658_v40, %v4660_v51 }
 0x84f   : > { %v4694_v48 = vadd.f32 %v4674_v17, %v4618_v55  ;;  %v4695_v43 = vadd.f32 %v4675_v36, %v4619_v16 }
 0x851   : > { %v12074_v25 = vpop.permute.xlu0 %4661  ;;  %v4650_v47 = vpop.permute.xlu1 %4649 }
 0x852   : > { %v4676_v12 = vsel %vm738_vm5, %v4660_v51, %v12074_v25  ;;  %v4671_v19 = vsel %vm738_vm5, %v4650_v47, %v4652_v6 }
 0x853   : > { %v4696_v62 = vadd.f32 %v4676_v12, %v4620_v27 }
 0x855   : > { %v12076_v32 = vpop.permute.xlu0 %4435  ;;  %v12078_v14 = vpop.permute.xlu1 %4437 }
 0x859   : > { %v12080_v1 = vpop.permute.xlu0 %4439  ;;  %v12082_v54 = vpop.permute.xlu1 %4441 }
 0x85d   : > { %v4728_v46 = vpop.permute.xlu0 %4727  ;;  %v4730_v29 = vpop.permute.xlu1 %4729 }
 0x85e   : > { %v4748_v8 = vsel %vm815_vm6, %v4728_v46, %v4730_v29 }
 0x85f   : > { %v4768_v13 = vadd.f32 %v4748_v8, %v4692_v58  ;;  %v4691_v58 = vadd.f32 %v4671_v19, %v12059_v41 }
 0x861   : > { %v4732_v35 = vpop.permute.xlu0 %4731  ;;  %v4734_v15 = vpop.permute.xlu1 %4733 }
 0x862   : > { %v4749_v33 = vsel %vm815_vm6, %v4730_v29, %v4732_v35  ;;  %v4750_v29 = vsel %vm815_vm6, %v4732_v35, %v4734_v15 }
 0x863   : > { %v4769_v3 = vadd.f32 %v4749_v33, %v4693_v9  ;;  %v4770_v51 = vadd.f32 %v4750_v29, %v4694_v48 }
 0x865   : > { %v4736_v0 = vpop.permute.xlu0 %4735  ;;  %v12084_v30 = vpop.permute.xlu1 %4737 }
 0x866   : > { %v4751_v34 = vsel %vm815_vm6, %v4734_v15, %v4736_v0  ;;  %v4752_v9 = vsel %vm815_vm6, %v4736_v0, %v12084_v30 }
 0x867   : > { %v4771_v60 = vadd.f32 %v4751_v34, %v4695_v43  ;;  %v4772_v16 = vadd.f32 %v4752_v9, %v4696_v62 }
 0x869   : > { %v4726_v52 = vpop.permute.xlu0 %4725  ;;  %v12086_v31 = vpop.permute.xlu1 %4511 }
 0x86a   : > { %v4747_v6 = vsel %vm815_vm6, %v4726_v52, %v4728_v46 }
 0x86b   : > { %v4767_v27 = vadd.f32 %v4747_v6, %v4691_v58 }
 0x86d   : > { %v12089_v49 = vpop.permute.xlu0 %4513  ;;  %v12091_v10 = vpop.permute.xlu1 %4515 }
 0x871   : > { %v12102_v24 = vpop.permute.xlu0 %4517  ;;  %v4804_v63 = vpop.permute.xlu1 %4803 }
 0x875   : > { %v4806_v7 = vpop.permute.xlu0 %4805  ;;  %v4808_v22 = vpop.permute.xlu1 %4807 }
 0x876   : > { %v4824_v57 = vsel %vm892_vm7, %v4804_v63, %v4806_v7  ;;  %v4825_v50 = vsel %vm892_vm7, %v4806_v7, %v4808_v22 }
 0x877   : > { %v4844_v40 = vadd.f32 %v4824_v57, %v4768_v13  ;;  %v4845_v59 = vadd.f32 %v4825_v50, %v4769_v3 }
 0x879   : > { %v12123_v35 = vadd.f32 %v12107_v44, %v4844_v40  ;;  %v12126_v15 = vadd.f32 %v12107_v44, %v4845_v59  ;;  %v4810_v8 = vpop.permute.xlu0 %4809  ;;  %v4812_v33 = vpop.permute.xlu1 %4811  ;;  %v4449_v59 = vsel %vm507_vm2, %v11771_v20, %v12076_v32 }
 0x87a   : > { %v4826_v3 = vsel %vm892_vm7, %v4808_v22, %v4810_v8  ;;  %v4827_v13 = vsel %vm892_vm7, %v4810_v8, %v4812_v33  ;;  %v4469_v9 = vadd.f32 %v4449_v59, %v12061_v45 }
 0x87b   : > { %v4866_v47 = vmax.f32 %v12123_v35, 0.0  ;;  %v4867_v0 = vmax.f32 %v12126_v15, 0.0  ;;  %v4846_v17 = vadd.f32 %v4826_v3, %v4770_v51  ;;  %v4847_v55 = vadd.f32 %v4827_v13, %v4771_v60 }
 0x87c   : > { %v4525_v60 = vsel %vm584_vm3, %v11976_v26, %v12086_v31 }
 0x87d   : > { %v7146_v36 = vpack.i.bf16 %v4867_v0, %v4866_v47  ;;  %v12139_v41 = vadd.f32 %v12107_v44, %v4846_v17  ;;  %v12142_v46 = vadd.f32 %v12107_v44, %v4847_v55  ;;  %v12144_v52 = vpop.permute.xlu0 %4813  ;;  %v4802_v12 = vpop.permute.xlu1 %4801  ;;  %v4545_v6 = vadd.f32 %v4525_v60, %v4469_v9 }
 0x87e   : > { %v4828_v29 = vsel %vm892_vm7, %v4812_v33, %v12144_v52  ;;  %v4823_v7 = vsel %vm892_vm7, %v4802_v12, %v4804_v63  ;;  %v4451_v12 = vsel %vm507_vm2, %v12078_v14, %v12080_v1 }
 0x87f   : > { %v4868_v22 = vmax.f32 %v12139_v41, 0.0  ;;  %v4869_v48 = vmax.f32 %v12142_v46, 0.0  ;;  %v4848_v34 = vadd.f32 %v4828_v29, %v4772_v16  ;;  %v4843_v57 = vadd.f32 %v4823_v7, %v4767_v27  ;;  %7147 = vrot.lane.b32.xlu1 %v7146_v36, %s7439_s29 }
 0x880   : > { %v4450_v27 = vsel %vm507_vm2, %v12076_v32, %v12078_v14  ;;  %v4527_v32 = vsel %vm584_vm3, %v12089_v49, %v12091_v10 }
 0x881   : > { %v7151_v50 = vpack.i.bf16 %v4869_v48, %v4868_v22  ;;  %v12157_v43 = vadd.f32 %v12107_v44, %v4848_v34  ;;  %v12160_v19 = vadd.f32 %v12107_v44, %v4843_v57  ;;  %v4588_v63 = vpop.permute.xlu0 %4587  ;;  %v4590_v40 = vpop.permute.xlu1 %4589  ;;  %v4470_v36 = vadd.f32 %v4450_v27, %v12067_v61 }
 0x882   : > { %v4601_v20 = vsel %vm661_vm4, %v12048_v37, %v4588_v63  ;;  %v4526_v37 = vsel %vm584_vm3, %v12086_v31, %v12089_v49  ;;  %v4602_v34 = vsel %vm661_vm4, %v4588_v63, %v4590_v40  ;;  %v4471_v31 = vadd.f32 %v4451_v12, %v12069_v5 }
 0x883   : > { %v4870_v62 = vmax.f32 %v12157_v43, 0.0  ;;  %v4865_v51 = vmax.f32 %v12160_v19, 0.0  ;;  %7152 = vrot.lane.b32.xlu0 %v7151_v50, %s7439_s29  ;;  %v4621_v3 = vadd.f32 %v4601_v20, %v4545_v6  ;;  %v4546_v57 = vadd.f32 %v4526_v37, %v4470_v36 }
 0x884   : > { %v4528_v61 = vsel %vm584_vm3, %v12091_v10, %v12102_v24  ;;  %v4547_v60 = vadd.f32 %v4527_v32, %v4471_v31  ;;  %v5060_v31 = vld [vmem:[#allocation10 + $0x88] sm:$0xff] }
 0x885   : > { %v7156_v8 = vpack.i.bf16 %v4865_v51, %v4870_v62  ;;  %v4592_v33 = vpop.permute.xlu0 %4591  ;;  %v4594_v58 = vpop.permute.xlu1 %4593  ;;  %v4622_v59 = vadd.f32 %v4602_v34, %v4546_v57 }
 0x886   : > { %v4604_v9 = vsel %vm661_vm4, %v4592_v33, %v4594_v58 }
 0x887   : > { %7157 = vrot.lane.b32.xlu1 %v7156_v8, %s7439_s29 }
 0x889   : > { %v4664_v13 = vpop.permute.xlu0 %4663  ;;  %v4666_v17 = vpop.permute.xlu1 %4665 }
 0x88a   : > { %v4677_v26 = vsel %vm738_vm5, %v12074_v25, %v4664_v13  ;;  %v4452_v25 = vsel %vm507_vm2, %v12080_v1, %v12082_v54  ;;  %v4678_v14 = vsel %vm738_vm5, %v4664_v13, %v4666_v17  ;;  %v4603_v1 = vsel %vm661_vm4, %v4590_v40, %v4592_v33 }
 0x88b   : > { %v4697_v45 = vadd.f32 %v4677_v26, %v4621_v3  ;;  %v4472_v50 = vadd.f32 %v4452_v25, %v12072_v28  ;;  %v4698_v20 = vadd.f32 %v4678_v14, %v4622_v59  ;;  %v4623_v10 = vadd.f32 %v4603_v1, %v4547_v60 }
 0x88d   : > { %v4668_v55 = vpop.permute.xlu0 %4667  ;;  %v4670_v16 = vpop.permute.xlu1 %4669  ;;  %v4548_v8 = vadd.f32 %v4528_v61, %v4472_v50 }
 0x88e   : > { %v4679_v24 = vsel %vm738_vm5, %v4666_v17, %v4668_v55  ;;  %v4680_v28 = vsel %vm738_vm5, %v4668_v55, %v4670_v16  ;;  %v5059_v55 = vld [vmem:[#allocation10 + $0x80] sm:$0xff] }
 0x88f   : > { %v4624_v6 = vadd.f32 %v4604_v9, %v4548_v8  ;;  %v4699_v33 = vadd.f32 %v4679_v24, %v4623_v10  ;;  %v5083_v16 = vld [vmem:[#allocation10 + $0x140] sm:$0x11] }
 0x890   : > { %v6760_v32 = vcombine.high %v5059_v55, %v5083_v16  ;;  %v6759_v50 = vcombine.low %v5059_v55, %v5083_v16 }
 0x891   : > { %v4740_v29 = vpop.permute.xlu0 %4739  ;;  %v4742_v7 = vpop.permute.xlu1 %4741  ;;  %v4700_v36 = vadd.f32 %v4680_v28, %v4624_v6 }
 0x892   : > { %v4753_v49 = vsel %vm815_vm6, %v12084_v30, %v4740_v29  ;;  %v4754_v5 = vsel %vm815_vm6, %v4740_v29, %v4742_v7  ;;  %6160 = vmatprep.subr.bf16.mxu0 %v6760_v32  ;;  %v12980_v32 = vmax.f32 %v11841_v11, 0.0 }
 0x893   : > { %v4773_v3 = vadd.f32 %v4753_v49, %v4697_v45  ;;  %v4774_v40 = vadd.f32 %v4754_v5, %v4698_v20  ;;  %6161 = vmatpush1.bf16.xpose.msra.mxu0 %v6759_v50 }
 0x895   : > { %v4744_v54 = vpop.permute.xlu0 %4743  ;;  %v4746_v63 = vpop.permute.xlu1 %4745 }
 0x896   : > { %v4755_v13 = vsel %vm815_vm6, %v4742_v7, %v4744_v54  ;;  %v4756_v58 = vsel %vm815_vm6, %v4744_v54, %v4746_v63 }
 0x897   : > { %v4775_v29 = vadd.f32 %v4755_v13, %v4699_v33  ;;  %v4776_v45 = vadd.f32 %v4756_v58, %v4700_v36  ;;  %v12238_v33 = vld [vmem:[#allocation10 + $0x90] sm:$0xff] }
 0x898   : > { %v12240_v58 = vld [vmem:[#allocation10 + $0x150] sm:$0x11] }
 0x899   : > { %v4816_v26 = vpop.permute.xlu0 %4815  ;;  %v4818_v27 = vpop.permute.xlu1 %4817  ;;  %v6763_v18 = vcombine.low %v12238_v33, %v12240_v58 }
 0x89a   : > { %v4829_v30 = vsel %vm892_vm7, %v12144_v52, %v4816_v26  ;;  %v4830_v37 = vsel %vm892_vm7, %v4816_v26, %v4818_v27  ;;  %v5084_v52 = vld [vmem:[#allocation10 + $0x148] sm:$0x11] }
 0x89b   : > { %v4849_v17 = vadd.f32 %v4829_v30, %v4773_v3  ;;  %v4850_v12 = vadd.f32 %v4830_v37, %v4774_v40  ;;  %v6762_v59 = vcombine.high %v5060_v31, %v5084_v52  ;;  %v6761_v9 = vcombine.low %v5060_v31, %v5084_v52 }
 0x89c   : > { %v12981_v52 = vmax.f32 %v11997_v23, 0.0 }
 0x89d   : > { %v12217_v25 = vadd.f32 %v12107_v44, %v4849_v17  ;;  %v12220_v7 = vadd.f32 %v12107_v44, %v4850_v12  ;;  %v4820_v34 = vpop.permute.xlu0 %4819  ;;  %v4822_v57 = vpop.permute.xlu1 %4821  ;;  %6200 = vmatprep.subr.bf16.mxu1 %v6762_v59  ;;  %v12983_v59 = vmax.f32 %v11993_v56, 0.0 }
 0x89e   : > { %v4831_v61 = vsel %vm892_vm7, %v4818_v27, %v4820_v34  ;;  %v4832_v14 = vsel %vm892_vm7, %v4820_v34, %v4822_v57  ;;  %6201 = vmatpush1.bf16.xpose.msra.mxu1 %v6761_v9 }
 0x89f   : > { %v4871_v1 = vmax.f32 %v12217_v25, 0.0  ;;  %v4872_v54 = vmax.f32 %v12220_v7, 0.0  ;;  %v4851_v63 = vadd.f32 %v4831_v61, %v4775_v29  ;;  %v4852_v60 = vadd.f32 %v4832_v14, %v4776_v45 }
 0x8a0   : > { %v12982_v14 = vmax.f32 %v11844_v2, 0.0 }
 0x8a1   : > { %v7161_v49 = vpack.i.bf16 %v4872_v54, %v4871_v1  ;;  %v12231_v5 = vadd.f32 %v12107_v44, %v4851_v63  ;;  %v4864_v8 = vadd.f32 %v12107_v44, %v4852_v60  ;;  %v7123_v20 = vpop.permute.xlu0 %7122  ;;  %v7128_v24 = vpop.permute.xlu1 %7127 }
 0x8a2   : > { %v7125_v10 = vunpack.i.h.bf16 %v7123_v20  ;;  %v7124_v28 = vunpack.i.l.bf16 %v7123_v20  ;;  %v7130_v6 = vunpack.i.h.bf16 %v7128_v24  ;;  %v7129_v3 = vunpack.i.l.bf16 %v7128_v24 }
 0x8a3   : > { %v4873_v40 = vmax.f32 %v12231_v5, 0.0  ;;  %v4874_v13 = vmax.f32 %v4864_v8, 0.0  ;;  %7162 = vrot.lane.b32.xlu0 %v7161_v49, %s7439_s29  ;;  %v12984_v8 = vmax.f32 %v12008_v38, 0.0  ;;  %v12985_v20 = vmax.f32 %v12002_v4, 0.0 }
 0x8a4   : > { %v4120_v26 = vsel %vm353_vm0, %v7124_v28, %v7125_v10  ;;  %v4121_v27 = vsel %vm353_vm0, %v7125_v10, %v7129_v3  ;;  %v4122_v37 = vsel %vm353_vm0, %v7129_v3, %v7130_v6 }
 0x8a5   : > { %v7166_v44 = vpack.i.bf16 %v4874_v13, %v4873_v40  ;;  %v12246_v30 = vmax.f32 %v4080_v39, %v4120_v26  ;;  %v12251_v36 = vmax.f32 %v4081_v42, %v4121_v27  ;;  %v7133_v17 = vpop.permute.xlu0 %7132  ;;  %v7138_v12 = vpop.permute.xlu1 %7137  ;;  %v6764_v39 = vcombine.high %v12238_v33, %v12240_v58  ;;  %v12305_v13 = vld [vmem:[#allocation10 + $0xa8] sm:$0xff] }
 0x8a6   : > { %v7135_v29 = vunpack.i.h.bf16 %v7133_v17  ;;  %v7134_v55 = vunpack.i.l.bf16 %v7133_v17  ;;  %v7140_v16 = vunpack.i.h.bf16 %v7138_v12  ;;  %v7139_v45 = vunpack.i.l.bf16 %v7138_v12  ;;  %v12307_v26 = vld [vmem:[#allocation10 + $0x168] sm:$0x11] }
 0x8a7   : > { %7167 = vrot.lane.b32.xlu1 %v7166_v44, %s7439_s29  ;;  %v7171_v34 = vpack.i.bf16 %v12251_v36, %v12246_v30  ;;  %v12265_v31 = vmax.f32 %v12980_v32, %v4122_v37  ;;  %6240 = vmatprep.subr.bf16.mxu0 %v6764_v39  ;;  %v6769_v17 = vcombine.low %v12305_v13, %v12307_v26  ;;  %s6595_s29 = sshll.u32 %s7611_s23, 3 }
 0x8a8   : > { %v4119_v53 = vsel %vm353_vm0, %v7135_v29, %v7124_v28  ;;  %v4123_v42 = vsel %vm353_vm0, %v7130_v6, %v7134_v55  ;;  %v4124_v57 = vsel %vm353_vm0, %v7134_v55, %v7139_v45  ;;  %v4125_v9 = vsel %vm353_vm0, %v7139_v45, %v7140_v16  ;;  %v12299_v28 = vld [vmem:[#allocation10 + $0x98] sm:$0xff]  ;;  %s282_s9 = scalar_lea.vmem [#allocation12], %s6595_s29 }
 0x8a9   : > { %v12269_v61 = vmax.f32 %v12981_v52, %v4119_v53  ;;  %v12273_v50 = vmax.f32 %v12982_v14, %v4123_v42  ;;  %v12277_v63 = vmax.f32 %v12983_v59, %v4124_v57  ;;  %v7143_v60 = vpop.permute.xlu0 %7142  ;;  %7172 = vrot.lane.b32.xlu0 %v7171_v34, %s7441_s17  ;;  %v12288_v56 = vmax.f32 %v12984_v8, %v4125_v9  ;;  %v12301_v6 = vld [vmem:[#allocation10 + $0x158] sm:$0x11]  ;;  %v12349_v9 = vld [vmem:[#allocation10 + $0x170] sm:$0x11]  ;;  %s6482_s8 = sshll.u32 %s282_s9, 4  ;;  %s12431_s8 = int_to_ptr.vmem [resolvable:$true] %s6482_s8 }
 0x8aa   : > { %v7144_v11 = vunpack.i.l.bf16 %v7143_v60  ;;  %v6766_v38 = vcombine.high %v12299_v28, %v12301_v6  ;;  %v7145_v4 = vunpack.i.h.bf16 %v7143_v60  ;;  %v12986_v29 = vmax.f32 %v12025_v21, 0.0  ;;  %s7355_s26 = scalar_lea.vmem %s12431_s8, 128  ;;  %p7362_p3 = scmp.lt.s32.totalorder %s12431_s8, %s7360_s14 }
 0x8ab   : > { %v7176_v23 = vpack.i.bf16 %v12273_v50, %v12265_v31  ;;  %v7181_v49 = vpack.i.bf16 %v12277_v63, %v12269_v61  ;;  %p7356_p7 = scmp.ne.s32.totalorder %s12431_s8, %s7355_s26  ;;  %p7363_p2 = scmp.lt.s32.totalorder %s7361_s16, %s7355_s26 }
 0x8ac   : > { %v4126_v2 = vsel %vm353_vm0, %v7140_v16, %v7144_v11  ;;  %6280 = vmatprep.subr.bf16.mxu1 %v6766_v38  ;;  %v4127_v27 = vsel %vm353_vm0, %v7144_v11, %v7145_v4 }
 0x8ad   : > { %v12292_v24 = vmax.f32 %v12985_v20, %v4126_v2  ;;  %7177 = vrot.lane.b32.xlu1 %v7176_v23, %s7441_s17  ;;  %7182 = vrot.lane.b32.xlu0 %v7181_v49, %s7441_s17  ;;  %v4145_v55 = vmax.f32 %v12986_v29, %v4127_v27  ;;  %p7357_p12 = pnand %p7356_p7, %p12988_p10  ;;  %p7364_p5 = por %p7363_p2, %p7362_p3 }
 0x8af   : > { %v7186_v10 = vpack.i.bf16 %v12292_v24, %v12288_v56  ;;  %p7358_p0 = pneg %p7357_p12 }
 0x8b1   : > { %7187 = vrot.lane.b32.xlu1 %v7186_v10, %s7441_s17  ;;  %p7365_p1 = pnand %p7364_p5, %p7358_p0 }
 0x8f1   : > { %v7148_v3 = vpop.permute.xlu1 %7147 }
 0x8f2   : > { %v7150_v44 = vunpack.i.h.bf16 %v7148_v3  ;;  %v7149_v37 = vunpack.i.l.bf16 %v7148_v3 }
 0x8f4   : > { %v4906_v12 = vsel %vm353_vm0, %v7149_v37, %v7150_v44 }
 0x8f5   : > { %v12317_v16 = vmax.f32 %v4866_v47, %v4906_v12  ;;  %v7153_v45 = vpop.permute.xlu0 %7152 }
 0x8f6   : > { %v7155_v34 = vunpack.i.h.bf16 %v7153_v45  ;;  %v7154_v39 = vunpack.i.l.bf16 %v7153_v45 }
 0x8f7   : > { %v7191_v53 = vpack.i.bf16 %v12317_v16, %v4145_v55 }
 0x8f8   : > { %v4907_v42 = vsel %vm353_vm0, %v7150_v44, %v7154_v39  ;;  %v4908_v57 = vsel %vm353_vm0, %v7154_v39, %v7155_v34 }
 0x8f9   : > { %v12324_v32 = vmax.f32 %v4867_v0, %v4907_v42  ;;  %v12328_v21 = vmax.f32 %v4868_v22, %v4908_v57  ;;  %v7158_v35 = vpop.permute.xlu1 %7157  ;;  %7192 = vrot.lane.b32.xlu0 %v7191_v53, %s7441_s17  ;;  %v12347_v22 = vld [vmem:[#allocation10 + $0xb0] sm:$0xff]  ;;  %v5063_v42 = vld [vmem:[#allocation10 + $0xa0] sm:$0xff] }
 0x8fa   : > { %v7160_v47 = vunpack.i.h.bf16 %v7158_v35  ;;  %v7159_v52 = vunpack.i.l.bf16 %v7158_v35  ;;  %v6771_v19 = vcombine.low %v12347_v22, %v12349_v9  ;;  %v5087_v57 = vld [vmem:[#allocation10 + $0x160] sm:$0x11] }
 0x8fb   : > { %v7196_v14 = vpack.i.bf16 %v12328_v21, %v12324_v32 }
 0x8fc   : > { %v4905_v59 = vsel %vm353_vm0, %v7160_v47, %v7149_v37  ;;  %v4909_v60 = vsel %vm353_vm0, %v7155_v34, %v7159_v52 }
 0x8fd   : > { %v12337_v15 = vmax.f32 %v4865_v51, %v4905_v59  ;;  %v12341_v0 = vmax.f32 %v4869_v48, %v4909_v60  ;;  %7197 = vrot.lane.b32.xlu1 %v7196_v14, %s7441_s17  ;;  %v6765_v59 = vcombine.low %v12299_v28, %v12301_v6  ;;  %v6767_v6 = vcombine.low %v5063_v42, %v5087_v57 }
 0x8ff   : > { %v7201_v41 = vpack.i.bf16 %v12337_v15, %v12341_v0 }
 0x901   : > { %7202 = vrot.lane.b32.xlu0 %v7201_v41, %s7441_s17 }
 0x915   : > { %v7163_v51 = vpop.permute.xlu0 %7162 }
 0x916   : > { %v7165_v11 = vunpack.i.h.bf16 %v7163_v51  ;;  %v7164_v23 = vunpack.i.l.bf16 %v7163_v51 }
 0x918   : > { %v4910_v46 = vsel %vm353_vm0, %v7159_v52, %v7164_v23  ;;  %v4911_v48 = vsel %vm353_vm0, %v7164_v23, %v7165_v11 }
 0x919   : > { %v12357_v49 = vmax.f32 %v4870_v62, %v4910_v46  ;;  %v12361_v2 = vmax.f32 %v4871_v1, %v4911_v48  ;;  %v7168_v8 = vpop.permute.xlu1 %7167 }
 0x91a   : > { %v7170_v20 = vunpack.i.h.bf16 %v7168_v8  ;;  %v7169_v10 = vunpack.i.l.bf16 %v7168_v8  ;;  %v6772_v8 = vcombine.high %v12347_v22, %v12349_v9 }
 0x91b   : > { %v7173_v38 = vpop.permute.xlu0 %7172  ;;  %v7206_v4 = vpack.i.bf16 %v12361_v2, %v12357_v49 }
 0x91c   : > { %v4912_v3 = vsel %vm353_vm0, %v7165_v11, %v7169_v10  ;;  %v4913_v27 = vsel %vm353_vm0, %v7169_v10, %v7170_v20  ;;  %v7175_v44 = vunpack.i.h.bf16 %v7173_v38  ;;  %v7174_v37 = vunpack.i.l.bf16 %v7173_v38 }
 0x91d   : > { %v12369_v43 = vmax.f32 %v4872_v54, %v4912_v3  ;;  %v4931_v62 = vmax.f32 %v4873_v40, %v4913_v27  ;;  %7207 = vrot.lane.b32.xlu1 %v7206_v4, %s7441_s17  ;;  %v6768_v11 = vcombine.high %v5063_v42, %v5087_v57  ;;  %v5066_v4 = vld [vmem:[#allocation10 + $0xb8] sm:$0xff] }
 0x91e   : > { %v4174_v25 = vsel %vm507_vm2, %v7174_v37, %v7175_v44  ;;  %v5090_v3 = vld [vmem:[#allocation10 + $0x178] sm:$0x11] }
 0x91f   : > { %v7178_v1 = vpop.permute.xlu1 %7177  ;;  %v7183_v12 = vpop.permute.xlu0 %7182  ;;  %v7211_v29 = vpack.i.bf16 %v4931_v62, %v12369_v43  ;;  %v4190_v55 = vmax.f32 %v12246_v30, %v4174_v25  ;;  %v6773_v42 = vcombine.low %v5066_v4, %v5090_v3 }
 0x920   : > { %v7180_v45 = vunpack.i.h.bf16 %v7178_v1  ;;  %v7179_v34 = vunpack.i.l.bf16 %v7178_v1  ;;  %v7184_v39 = vunpack.i.l.bf16 %v7183_v12  ;;  %v7185_v5 = vunpack.i.h.bf16 %v7183_v12 }
 0x921   : > { %7212 = vrot.lane.b32.xlu0 %v7211_v29, %s7441_s17  ;;  %v6836_v7 = vpack.c.bf16 %v4190_v55, %v4190_v55  ;;  %v6774_v12 = vcombine.high %v5066_v4, %v5090_v3  ;;  %s6776_s17 = sshll.u32 %s7499_s22, 7  ;;  %s6469_s22 = scalar_lea.sflag [#allocation5], %s7611_s23 }
 0x922   : > { %v4175_v54 = vsel %vm507_vm2, %v7175_v44, %v7179_v34  ;;  %v4173_v40 = vsel %vm507_vm2, %v7184_v39, %v7174_v37  ;;  %v4176_v53 = vsel %vm507_vm2, %v7179_v34, %v7180_v45  ;;  %v4177_v23 = vsel %vm507_vm2, %v7180_v45, %v7185_v5  ;;  %s12429_s11 = scalar_lea.hbm %s12477_s5, %s6776_s17 }
 0x923   : > { %v4191_v35 = vmax.f32 %v12251_v36, %v4175_v54  ;;  %v4189_v47 = vmax.f32 %v12269_v61, %v4173_v40  ;;  %v7188_v30 = vpop.permute.xlu1 %7187  ;;  %6178 = vmatprep.mubr.bf16.mxu0 %v6836_v7  ;;  %v4192_v52 = vmax.f32 %v12265_v31, %v4176_v53  ;;  %v6770_v36 = vcombine.high %v12305_v13, %v12307_v26 }
 0x924   : > { %v7189_v14 = vunpack.i.l.bf16 %v7188_v30  ;;  %v4193_v31 = vmax.f32 %v12273_v50, %v4177_v23 }
 0x925   : > { %v6835_v60 = vpack.c.bf16 %v4189_v47, %v4189_v47  ;;  %v6838_v41 = vpack.c.bf16 %v4192_v52, %v4192_v52  ;;  %v6837_v51 = vpack.c.bf16 %v4191_v35, %v4191_v35 }
 0x926   : > { %v4178_v46 = vsel %vm507_vm2, %v7185_v5, %v7189_v14  ;;  %v6839_v48 = vpack.c.bf16 %v4193_v31, %v4193_v31 }
 0x927   : > { %6179 = vmatmul.mubr.bf16.vlgmr.msra.gmra.mxu0 %v6835_v60  ;;  %6218 = vmatprep.mubr.bf16.mxu1 %v6838_v41  ;;  %v4194_v61 = vmax.f32 %v12277_v63, %v4178_v46  ;;  %v7190_v63 = vunpack.i.h.bf16 %v7188_v30 }
 0x928   : > { %6219 = vmatmul.mubr.bf16.vlgmr.msra.gmra.mxu1 %v6837_v51  ;;  %6241 = vmatpush1.bf16.xpose.msra.mxu0 %v6763_v18 }
 0x929   : > { %v6840_v28 = vpack.c.bf16 %v4194_v61, %v4194_v61  ;;  %6281 = vmatpush1.bf16.xpose.msra.mxu1 %v6765_v59  ;;  %6320 = vmatprep.subr.bf16.mxu0 %v6768_v11  ;;  %v4179_v20 = vsel %vm507_vm2, %v7189_v14, %v7190_v63 }
 0x92a   : > { %6360 = vmatprep.subr.bf16.mxu1 %v6770_v36  ;;  %v4195_v18 = vmax.f32 %v12288_v56, %v4179_v20 }
 0x92b   : > { %6258 = vmatprep.mubr.bf16.mxu0 %v6840_v28 }
 0x92c   : > { %v6841_v25 = vpack.c.bf16 %v4195_v18, %v4195_v18 }
 0x92f   : > { %6259 = vmatmul.mubr.bf16.vlgmr.msra.gmra.mxu0 %v6839_v48 }
 0x930   : > { %6321 = vmatpush1.bf16.xpose.msra.mxu0 %v6767_v6 }
 0x931   : > { %6400 = vmatprep.subr.bf16.mxu0 %v6772_v8 }
 0x96b   : > { %v7193_v33 = vpop.permute.xlu0 %7192 }
 0x96c   : > { %v7194_v58 = vunpack.i.l.bf16 %v7193_v33  ;;  %v7195_v27 = vunpack.i.h.bf16 %v7193_v33 }
 0x96e   : > { %v4180_v50 = vsel %vm507_vm2, %v7190_v63, %v7194_v58 }
 0x96f   : > { %v7198_v10 = vpop.permute.xlu1 %7197  ;;  %v4196_v38 = vmax.f32 %v12292_v24, %v4180_v50 }
 0x970   : > { %v7200_v44 = vunpack.i.h.bf16 %v7198_v10  ;;  %v7199_v37 = vunpack.i.l.bf16 %v7198_v10 }
 0x971   : > { %v6842_v62 = vpack.c.bf16 %v4196_v38, %v4196_v38 }
 0x972   : > { %v4960_v1 = vsel %vm507_vm2, %v7195_v27, %v7199_v37  ;;  %v4961_v29 = vsel %vm507_vm2, %v7199_v37, %v7200_v44 }
 0x973   : > { %v7203_v55 = vpop.permute.xlu0 %7202  ;;  %6298 = vmatprep.mubr.bf16.mxu1 %v6842_v62  ;;  %v4976_v56 = vmax.f32 %v12317_v16, %v4960_v1  ;;  %v4977_v39 = vmax.f32 %v12324_v32, %v4961_v29 }
 0x974   : > { %v7205_v45 = vunpack.i.h.bf16 %v7203_v55  ;;  %v7204_v34 = vunpack.i.l.bf16 %v7203_v55  ;;  %6299 = vmatmul.mubr.bf16.vlgmr.msra.gmra.mxu1 %v6841_v25 }
 0x975   : > { %6361 = vmatpush1.bf16.xpose.msra.mxu1 %v6769_v17  ;;  %v6844_v24 = vpack.c.bf16 %v4976_v56, %v4976_v56  ;;  %v6845_v57 = vpack.c.bf16 %v4977_v39, %v4977_v39 }
 0x976   : > { %v4959_v7 = vsel %vm507_vm2, %v7205_v45, %v7195_v27  ;;  %v4962_v54 = vsel %vm507_vm2, %v7200_v44, %v7204_v34  ;;  %6440 = vmatprep.subr.bf16.mxu1 %v6774_v12 }
 0x977   : > { %v4975_v5 = vmax.f32 %v12337_v15, %v4959_v7  ;;  %6338 = vmatprep.mubr.bf16.mxu0 %v6844_v24  ;;  %v4978_v16 = vmax.f32 %v12328_v21, %v4962_v54 }
 0x979   : > { %v6843_v40 = vpack.c.bf16 %v4975_v5, %v4975_v5  ;;  %v6846_v53 = vpack.c.bf16 %v4978_v16, %v4978_v16 }
 0x97b   : > { %6339 = vmatmul.mubr.bf16.vlgmr.msra.gmra.mxu0 %v6843_v40  ;;  %6378 = vmatprep.mubr.bf16.mxu1 %v6846_v53 }
 0x97c   : > { %6379 = vmatmul.mubr.bf16.vlgmr.msra.gmra.mxu1 %v6845_v57  ;;  %6401 = vmatpush1.bf16.xpose.msra.mxu0 %v6771_v19 }
 0x97d   : > { %6441 = vmatpush1.bf16.xpose.msra.mxu1 %v6773_v42 }
 0x98f   : > { %v7208_v13 = vpop.permute.xlu1 %7207 }
 0x990   : > { %v7210_v26 = vunpack.i.h.bf16 %v7208_v13  ;;  %v7209_v17 = vunpack.i.l.bf16 %v7208_v13 }
 0x992   : > { %v4963_v32 = vsel %vm507_vm2, %v7204_v34, %v7209_v17  ;;  %v4964_v15 = vsel %vm507_vm2, %v7209_v17, %v7210_v26 }
 0x993   : > { %v4979_v21 = vmax.f32 %v12341_v0, %v4963_v32  ;;  %v7213_v35 = vpop.permute.xlu0 %7212  ;;  %v4980_v47 = vmax.f32 %v12357_v49, %v4964_v15  ;;  %v12987_v49 = vld [vmem:[#allocation22_spill] sm:$0xff] }
 0x994   : > { %v7215_v30 = vunpack.i.h.bf16 %v7213_v35  ;;  %v7214_v52 = vunpack.i.l.bf16 %v7213_v35 }
 0x995   : > { %v6847_v14 = vpack.c.bf16 %v4979_v21, %v4979_v21  ;;  %v6848_v59 = vpack.c.bf16 %v4980_v47, %v4980_v47 }
 0x996   : > { %v4965_v22 = vsel %vm507_vm2, %v7210_v26, %v7214_v52  ;;  %v4966_v9 = vsel %vm507_vm2, %v7214_v52, %v7215_v30 }
 0x997   : > { %v4981_v19 = vmax.f32 %v12361_v2, %v4965_v22  ;;  %6418 = vmatprep.mubr.bf16.mxu0 %v6848_v59  ;;  %v4982_v60 = vmax.f32 %v12369_v43, %v4966_v9 }
 0x998   : > { %6419 = vmatmul.mubr.bf16.vlgmr.msra.gmra.mxu0 %v6847_v14 }
 0x999   : > { %v6849_v41 = vpack.c.bf16 %v4981_v19, %v4981_v19  ;;  %v6850_v51 = vpack.c.bf16 %v4982_v60, %v4982_v60 }
 0x99b   : > { %6458 = vmatprep.mubr.bf16.mxu1 %v6850_v51 }
 0x99c   : > { %6459 = vmatmul.mubr.bf16.vlgmr.msra.gmra.mxu1 %v6849_v41 }
 0x9e7   : > { %v6180_v0 = vpop.f32.mrf.mxu0 }
 0x9e8   : > { %v6181_v11 = vadd.f32 %v6180_v0, %v12987_v49  ;;  %v6220_v23 = vpop.f32.mrf.mxu1 }
 0x9e9   : > { %v6182_v46 = vpop.f32.mrf.mxu0 }
 0x9ea   : > { %v6221_v36 = vadd.f32 %v6220_v23, %v6181_v11  ;;  %v6222_v61 = vpop.f32.mrf.mxu1 }
 0x9eb   : > { %v6183_v31 = vpop.f32.mrf.mxu0 }
 0x9ec   : > { %v6223_v28 = vpop.f32.mrf.mxu1 }
 0x9ed   : > { %v6184_v6 = vpop.f32.mrf.mxu0 }
 0x9ee   : > { %v6224_v48 = vpop.f32.mrf.mxu1 }
 0x9ef   : > { %v6260_v2 = vpop.f32.mrf.mxu0 }
 0x9f0   : > { %v6261_v8 = vadd.f32 %v6260_v2, %v6221_v36 }
 0x9f1   : > { %v6262_v63 = vpop.f32.mrf.mxu0 }
 0x9f3   : > { %v6263_v43 = vpop.f32.mrf.mxu0 }
 0x9f5   : > { %v6264_v20 = vpop.f32.mrf.mxu0 }
 0xa34   : > { %v6300_v33 = vpop.f32.mrf.mxu1 }
 0xa35   : > { %v6301_v25 = vadd.f32 %v6300_v33, %v6261_v8 }
 0xa36   : > { %v6302_v58 = vpop.f32.mrf.mxu1 }
 0xa38   : > { %v6303_v18 = vpop.f32.mrf.mxu1 }
 0xa3a   : > { %v6304_v50 = vpop.f32.mrf.mxu1 }
 0xa3b   : > { %v6340_v10 = vpop.f32.mrf.mxu0 }
 0xa3c   : > { %v6380_v38 = vpop.f32.mrf.mxu1  ;;  %v6341_v1 = vadd.f32 %v6340_v10, %v6301_v25 }
 0xa3d   : > { %v6342_v4 = vpop.f32.mrf.mxu0 }
 0xa3e   : > { %v6382_v3 = vpop.f32.mrf.mxu1  ;;  %v6381_v29 = vadd.f32 %v6380_v38, %v6341_v1 }
 0xa3f   : > { %v6343_v27 = vpop.f32.mrf.mxu0 }
 0xa40   : > { %v6383_v44 = vpop.f32.mrf.mxu1 }
 0xa41   : > { %v6344_v37 = vpop.f32.mrf.mxu0 }
 0xa42   : > { %v6384_v62 = vpop.f32.mrf.mxu1 }
 0xa58   : > { %v6420_v12 = vpop.f32.mrf.mxu0 }
 0xa59   : > { %v6421_v56 = vadd.f32 %v6420_v12, %v6381_v29 }
 0xa5a   : > { %v6422_v55 = vpop.f32.mrf.mxu0 }
 0xa5c   : > { %v6423_v45 = vpop.f32.mrf.mxu0  ;;  %v6460_v34 = vpop.f32.mrf.mxu1 }
 0xa5d   : > { %v6461_v24 = vadd.f32 %v6460_v34, %v6421_v56 }
 0xa5e   : > { %v6424_v39 = vpop.f32.mrf.mxu0  ;;  %v6462_v7 = vpop.f32.mrf.mxu1 }
 0xa5f   : > { %6467 = vst.msk [vmem:[%s282_s9] sm:$0xff] %vm6466_vm8, %v6461_v24 }
 0xa60   : > { %v6463_v54 = vpop.f32.mrf.mxu1 }
 0xa61   : > { %7368 = shalt.err (!%p7365_p1)
}
 0xa62   : > { %s7369_s12 = scalar_lea.hbm %s12429_s11, 128  ;;  %s7373_s13 = scalar_lea.hbm %s12477_s5, 256 }
 0xa63   : > { %p7370_p9 = scmp.ne.s32.totalorder %s12429_s11, %s7369_s12  ;;  %p7374_p6 = scmp.lt.s32.totalorder %s12429_s11, %s12477_s5 }
 0xa64   : > { %p7375_p8 = scmp.lt.s32.totalorder %s7373_s13, %s7369_s12 }
 0xa65   : > { %p7371_p11 = pnand %p7370_p9, %p12988_p10 }
 0xa66   : > { %p7376_p13 = por %p7375_p8, %p7374_p6 }
 0xa67   : > { %p7372_p4 = pneg %p7371_p11 }
 0xa69   : > { %p7377_p7 = pnand %p7376_p13, %p7372_p4 }
 0xa6b   : > { %7380 = shalt.err (!%p7377_p7)
}
 0xa6c   : > { %6868 = dma.vmem_to_hbm [thread:$0]  (%p12988_p10), %s12431_s8, 128, %s12429_s11, %s6469_s22   ;;  %v6464_v5 = vpop.f32.mrf.mxu1 }
 0xa6d PF: > { %s6494_s17 = sand.u32 1, %s7419_s18   ;;  %p12989_p12 = scmp.ne.s32.totalorder %s12625_s25, 0 }
 0xa6e   : > { %p12990_p0 = scmp.ge.s32.totalorder %s7431_s21, 2  ;;  %s6495_s9 = scalar_lea.sflag [#allocation5], %s6494_s17 }
 0xa70   : > { %p6885_p3 = pnand %p12990_p0, %p12989_p12 }
 0xa72   : > { %p6886_p2 = pneg %p6885_p3 }
 0xa74   : > { %7414 = dma.done.wait (%p6886_p2), %s6495_s9, 128  }
 0xa75   : > { %7416 = vsyncadd (%p6886_p2), %s6495_s9, 4294967168  ;;  %p21_p5 = scmp.ge.s32.totalorder %s7565_s27, 4   ;;  %s12991_s18 = smov %s7423_s19 }
 0xa76   : > { %s12992_s19 = smov %s7427_s20  ;;  %s12993_s20 = smov %s7575_s6 }
 0xa77   : > { %s12994_s21 = smov %s7565_s27  ;;  %23 = sbr.rel (!%p21_p5) target bundleno = 8 (0x8), region = 98 }
 0xa7c   :  { %6500 = vsyncpa [#allocation4], 1 }
 0xa7d   :  { %6502 = vsyncpa [#allocation4 + $0x1], 1 }
 0xa7e   :  { %6503 = vsyncpa [#allocation11], 1 }
 0xa7f   :  { %6504 = vsyncpa [#allocation5], 1 }
 0xa80   :  { %6506 = vsyncpa [#allocation5 + $0x1], 1 }
 0xa81   :  { %6507 = vsyncpa [#allocation6], 1 }
 0xa82   :  { %6509 = vsyncpa [#allocation6 + $0x1], 1 }
 0xa83   :  { %6510 = vsyncpa [#allocation9], 1 }

</bundles_post_ra>
